<compile_context>
chip_gen: v5e
topology: v5e:2x2
jax: 0.10.0
libtpu: 0.0.40
codegen_flags: <defaults>
</compile_context>

<pallas_src>
import math

import jax
import jax.numpy as jnp
from jax.experimental import pallas as pl
from jax.experimental.pallas import tpu as pltpu

# ---- small hyperparameters consistent with the module structure ----
IMAGE_SIZE = 16
PATCH_SIZE = 4
IN_CHANNELS = 1
EMBED_DIM = 32
NUM_HEADS = 4
HEAD_DIM = EMBED_DIM // NUM_HEADS
NUM_LAYERS = 2          # 2 encoder blocks + 2 decoder blocks (module default is 6+6)
FF_DIM = 64
NUM_PATCHES = (IMAGE_SIZE // PATCH_SIZE) ** 2      # 16
PATCH_DIM = IN_CHANNELS * PATCH_SIZE * PATCH_SIZE  # 16
PATCH_DIM_PAD = 128                                # lane-dense padded patch width
NUM_DIGITS = 4
NUM_CLASSES = 10
LN_EPS = 1e-5

SMALL_W = 128            # lane width of the packed small-parameter buffers
CLS_PAD = 128            # lane-dense (padded) classifier output width per digit
MAX_BATCH_TILE = 256     # one grid step whenever B <= this (fits scoped VMEM easily)
COMPUTE_DTYPE = jnp.bfloat16   # matmul operand dtype; accumulation stays f32

KP_ORDER = ("patch_w_t", "glob",
            "enc_wqkv", "enc_wo", "enc_w1", "enc_w2", "enc_small",
            "dec_swqkv", "dec_swo", "dec_cwq", "dec_cwkv", "dec_cwo",
            "dec_w1", "dec_w2", "dec_small", "cls_wb")


# ----------------------------------------------------------------------------
# Shared LayerNorm (used by kernel helpers and the pure-JAX reference)
# ----------------------------------------------------------------------------
def _layernorm(x, w, b):
    mu = jnp.mean(x, axis=-1, keepdims=True)
    var = jnp.mean((x - mu) ** 2, axis=-1, keepdims=True)
    return (x - mu) * jax.lax.rsqrt(var + LN_EPS) * w + b


# ----------------------------------------------------------------------------
# In-kernel helpers (operate on VMEM-resident values; activations are 2-D slabs)
# ----------------------------------------------------------------------------
def _dense(x2, w, b):
    """(M, Din) @ (Din, Dout) + (1, Dout); operands cast to the weight dtype (bf16)."""
    return jnp.dot(x2.astype(w.dtype), w, preferred_element_type=jnp.float32) + b


def _ffn(x2, w1, b1, w2, b2):
    return _dense(jnp.maximum(_dense(x2, w1, b1), 0.0), w2, b2)


def _attn_core(q2, k2, v2, bt, lq, lk, wo, bo):
    """Multi-head attention: per-head score/ctx via lane slices, one fused out-proj."""
    scale = 1.0 / math.sqrt(HEAD_DIM)
    cd = wo.dtype
    q3 = q2.reshape(bt, lq, EMBED_DIM).astype(cd)
    k3 = k2.reshape(bt, lk, EMBED_DIM).astype(cd)
    v3 = v2.reshape(bt, lk, EMBED_DIM).astype(cd)
    ctx_heads = []
    for h in range(NUM_HEADS):
        sl = slice(h * HEAD_DIM, (h + 1) * HEAD_DIM)
        s = jnp.einsum("bqd,bkd->bqk", q3[..., sl], k3[..., sl],
                       preferred_element_type=jnp.float32) * scale
        s = s - jnp.max(s, axis=-1, keepdims=True)
        p = jnp.exp(s)
        p = p * pl.reciprocal(jnp.sum(p, axis=-1, keepdims=True), approx=True)
        ctx_heads.append(jnp.einsum("bqk,bkd->bqd", p.astype(cd), v3[..., sl],
                                    preferred_element_type=jnp.float32))
    # one lane-axis concat (XLU) + ONE (M, D) @ (D, D) output projection
    ctx = jnp.concatenate(ctx_heads, axis=-1).reshape(bt * lq, EMBED_DIM)
    return _dense(ctx, wo, bo)


def _self_attn(x2, bt, seq, wqkv, bqkv, wo, bo):
    D = EMBED_DIM
    qkv = _dense(x2, wqkv, bqkv)                      # one (M, D) @ (D, 3D) matmul
    return _attn_core(qkv[:, :D], qkv[:, D:2 * D], qkv[:, 2 * D:],
                      bt, seq, seq, wo, bo)


def _cross_attn(x2, bt, lq, enc2, lk, wq, bq, wkv, bkv, wo, bo):
    D = EMBED_DIM
    q = _dense(x2, wq, bq)
    kv = _dense(enc2, wkv, bkv)
    return _attn_core(q, kv[:, :D], kv[:, D:], bt, lq, lk, wo, bo)


# ----------------------------------------------------------------------------
# The fused forward-pass kernel (one batch tile per grid step)
# ----------------------------------------------------------------------------
def vit_fused_kernel(patches_ref, patch_w_ref, glob_ref,
                     enc_wqkv_ref, enc_wo_ref, enc_w1_ref, enc_w2_ref, enc_small_ref,
                     dec_swqkv_ref, dec_swo_ref, dec_cwq_ref, dec_cwkv_ref, dec_cwo_ref,
                     dec_w1_ref, dec_w2_ref, dec_small_ref,
                     cls_wb_ref, out_ref):
    D, F = EMBED_DIM, FF_DIM
    BT = patches_ref.shape[0]

    glob = glob_ref[...]
    posb = glob[:NUM_PATCHES]                               # pos + patch bias (16, D)
    norm_w = glob[NUM_PATCHES:NUM_PATCHES + 1]
    norm_b = glob[NUM_PATCHES + 1:NUM_PATCHES + 2]
    digit = glob[NUM_PATCHES + 2:NUM_PATCHES + 2 + NUM_DIGITS]

    # ---- patch embedding: lane-dense (BT*16, 128) @ (128, 32) ----
    pf = patches_ref[...].reshape(BT * NUM_PATCHES, PATCH_DIM_PAD)
    x = jnp.dot(pf, patch_w_ref[...], preferred_element_type=jnp.float32)
    x = (x.reshape(BT, NUM_PATCHES, D) + posb[None]).reshape(BT * NUM_PATCHES, D)

    # ---- encoder blocks (activations stay a 2-D VMEM-resident slab) ----
    for l in range(NUM_LAYERS):
        sm = enc_small_ref[l]
        bqkv, bo = sm[0:1, :3 * D], sm[1:2, :D]
        b1, b2 = sm[2:3, :F], sm[3:4, :D]
        ln1w, ln1b = sm[4:5, :D], sm[5:6, :D]
        ln2w, ln2b = sm[6:7, :D], sm[7:8, :D]

        attn = _self_attn(x, BT, NUM_PATCHES, enc_wqkv_ref[l], bqkv, enc_wo_ref[l], bo)
        x = _layernorm(x + attn, ln1w, ln1b)
        ff = _ffn(x, enc_w1_ref[l], b1, enc_w2_ref[l], b2)
        x = _layernorm(x + ff, ln2w, ln2b)

    enc2 = _layernorm(x, norm_w, norm_b)                    # (BT*16, D)

    # ---- decoder blocks ----
    y = jnp.broadcast_to(digit[None], (BT, NUM_DIGITS, D)).reshape(BT * NUM_DIGITS, D)
    for l in range(NUM_LAYERS):
        sm = dec_small_ref[l]
        s_bqkv, s_bo = sm[0:1, :3 * D], sm[1:2, :D]
        c_bq, c_bkv, c_bo = sm[2:3, :D], sm[3:4, :2 * D], sm[4:5, :D]
        b1, b2 = sm[5:6, :F], sm[6:7, :D]
        ln1w, ln1b = sm[7:8, :D], sm[8:9, :D]
        ln2w, ln2b = sm[9:10, :D], sm[10:11, :D]
        ln3w, ln3b = sm[11:12, :D], sm[12:13, :D]

        sa = _self_attn(y, BT, NUM_DIGITS, dec_swqkv_ref[l], s_bqkv, dec_swo_ref[l], s_bo)
        y = _layernorm(y + sa, ln1w, ln1b)
        ca = _cross_attn(y, BT, NUM_DIGITS, enc2, NUM_PATCHES,
                         dec_cwq_ref[l], c_bq, dec_cwkv_ref[l], c_bkv,
                         dec_cwo_ref[l], c_bo)
        y = _layernorm(y + ca, ln2w, ln2b)
        ff = _ffn(y, dec_w1_ref[l], b1, dec_w2_ref[l], b2)
        y = _layernorm(y + ff, ln3w, ln3b)

    # ---- classifier into one lane-dense (BT, NUM_DIGITS*128) store ----
    cls_wb = cls_wb_ref[...]
    logits = (jnp.dot(y.astype(COMPUTE_DTYPE), cls_wb[:D].astype(COMPUTE_DTYPE),
                      preferred_element_type=jnp.float32)
              + cls_wb[D:D + 1])
    out_ref[...] = logits.reshape(BT, NUM_DIGITS * CLS_PAD)


# ----------------------------------------------------------------------------
# Host-side parameter packing — run ONCE, cached by the caller.
# ----------------------------------------------------------------------------
def _row(v):
    v = jnp.asarray(v, jnp.float32).reshape(-1)
    return jnp.pad(v, (0, SMALL_W - v.shape[0]))


def pack_kernel_params(p):
    D = EMBED_DIM
    cd = COMPUTE_DTYPE

    glob = jnp.concatenate([
        p["pos"] + p["patch_b"],              # (16, D)  positional + patch-proj bias
        p["norm_w"].reshape(1, D),
        p["norm_b"].reshape(1, D),
        p["digit_positions"],                 # (4, D)
    ], axis=0).astype(jnp.float32)            # (22, D)

    def enc_small(lp):
        rows = [_row(lp["bqkv"]), _row(lp["bo"]), _row(lp["b1"]), _row(lp["b2"]),
                _row(lp["ln1w"]), _row(lp["ln1b"]), _row(lp["ln2w"]), _row(lp["ln2b"])]
        return jnp.stack(rows)                # (8, 128)

    def dec_small(lp):
        rows = [_row(lp["s_bqkv"]), _row(lp["s_bo"]),
                _row(lp["c_bqkv"][:, :D]), _row(lp["c_bqkv"][:, D:]), _row(lp["c_bo"]),
                _row(lp["b1"]), _row(lp["b2"]),
                _row(lp["ln1w"]), _row(lp["ln1b"]),
                _row(lp["ln2w"]), _row(lp["ln2b"]),
                _row(lp["ln3w"]), _row(lp["ln3b"])]
        rows += [jnp.zeros((SMALL_W,), jnp.float32)] * (16 - len(rows))
        return jnp.stack(rows)                # (16, 128)

    # lane-dense padded patch projection (128, D); extra rows are zeros
    patch_w_pad = jnp.zeros((PATCH_DIM_PAD, D), jnp.float32)
    patch_w_pad = patch_w_pad.at[:PATCH_DIM].set(p["patch_w"].T)

    cls_wb = jnp.zeros((D + 1, CLS_PAD), jnp.float32)
    cls_wb = cls_wb.at[:D, :NUM_CLASSES].set(p["cls_w"].T)
    cls_wb = cls_wb.at[D, :NUM_CLASSES].set(p["cls_b"].reshape(-1))

    return {
        "patch_w_t": patch_w_pad.astype(cd),                                  # (128, D)
        "glob": glob,                                                         # (22, D) f32
        "enc_wqkv": jnp.stack([lp["wqkv"].T for lp in p["enc_layers"]]).astype(cd),
        "enc_wo":   jnp.stack([lp["wo"].T for lp in p["enc_layers"]]).astype(cd),
        "enc_w1":   jnp.stack([lp["w1"].T for lp in p["enc_layers"]]).astype(cd),
        "enc_w2":   jnp.stack([lp["w2"].T for lp in p["enc_layers"]]).astype(cd),
        "enc_small": jnp.stack([enc_small(lp) for lp in p["enc_layers"]]),    # f32
        "dec_swqkv": jnp.stack([lp["s_wqkv"].T for lp in p["dec_layers"]]).astype(cd),
        "dec_swo":   jnp.stack([lp["s_wo"].T for lp in p["dec_layers"]]).astype(cd),
        "dec_cwq":   jnp.stack([lp["c_wqkv"][:D].T for lp in p["dec_layers"]]).astype(cd),
        "dec_cwkv":  jnp.stack([lp["c_wqkv"][D:].T for lp in p["dec_layers"]]).astype(cd),
        "dec_cwo":   jnp.stack([lp["c_wo"].T for lp in p["dec_layers"]]).astype(cd),
        "dec_w1":    jnp.stack([lp["w1"].T for lp in p["dec_layers"]]).astype(cd),
        "dec_w2":    jnp.stack([lp["w2"].T for lp in p["dec_layers"]]).astype(cd),
        "dec_small": jnp.stack([dec_small(lp) for lp in p["dec_layers"]]),    # f32
        "cls_wb": cls_wb,                                                     # (D+1, 128) f32
    }


# ----------------------------------------------------------------------------
# Glue / forward pass (jit-compiled; packed params passed in, not rebuilt)
# ----------------------------------------------------------------------------
def extract_patches(x):
    # NCHW -> (B, num_patches, C*p*p), matching Conv2d(kernel=stride=p) im2col order.
    B, C, H, W = x.shape
    p = PATCH_SIZE
    x = x.reshape(B, C, H // p, p, W // p, p)
    x = x.transpose(0, 2, 4, 1, 3, 5)
    return x.reshape(B, (H // p) * (W // p), C * p * p)


@jax.jit
def vit_forward(x, kp):
    B = x.shape[0]
    # One grid step whenever the whole batch fits the tile cap (v5e/v6e: 1 TC, so fewer
    # serial grid steps is strictly better).  Awkward batch sizes are zero-padded.
    bt = min(B, MAX_BATCH_TILE)
    b_pad = ((B + bt - 1) // bt) * bt

    patches = extract_patches(x)                                  # (B, 16, 16)
    patches = jnp.pad(patches, ((0, b_pad - B), (0, 0),
                                (0, PATCH_DIM_PAD - PATCH_DIM)))  # lane-dense pad
    patches = patches.astype(COMPUTE_DTYPE)

    param_list = [kp[k] for k in KP_ORDER]
    grid = (b_pad // bt,)

    in_specs = [pl.BlockSpec((bt, NUM_PATCHES, PATCH_DIM_PAD), lambda i: (i, 0, 0))]
    in_specs += [pl.BlockSpec(a.shape, lambda i, _n=a.ndim: (0,) * _n)
                 for a in param_list]
    out_specs = pl.BlockSpec((bt, NUM_DIGITS * CLS_PAD), lambda i: (i, 0))

    logits_pad = pl.pallas_call(
        vit_fused_kernel,
        out_shape=jax.ShapeDtypeStruct((b_pad, NUM_DIGITS * CLS_PAD), jnp.float32),
        grid=grid,
        in_specs=in_specs,
        out_specs=out_specs,
        compiler_params=pltpu.CompilerParams(
            dimension_semantics=("parallel",),
            vmem_limit_bytes=48 * 1024 * 1024),
    )(patches, *param_list)

    logits = logits_pad.reshape(b_pad, NUM_DIGITS, CLS_PAD)[:B, :, :NUM_CLASSES]
    # matches `digits = [classifier(decoded[:, i]) for i in range(4)]`
    return [logits[:, i] for i in range(NUM_DIGITS)]


# ----------------------------------------------------------------------------
# Pure-JAX reference (PyTorch semantics), used only for verification
# ----------------------------------------------------------------------------
def _ref_mha(q_in, kv_in, w_qkv, b_qkv, w_o, b_o):
    D = q_in.shape[-1]
    hd = D // NUM_HEADS
    scale = 1.0 / math.sqrt(hd)
    wq, wk, wv = w_qkv[:D], w_qkv[D:2 * D], w_qkv[2 * D:]
    bq, bk, bv = b_qkv[:, :D], b_qkv[:, D:2 * D], b_qkv[:, 2 * D:]
    q = q_in @ wq.T + bq
    k = kv_in @ wk.T + bk
    v = kv_in @ wv.T + bv
    Lq, Lk = q_in.shape[0], kv_in.shape[0]
    qh = q.reshape(Lq, NUM_HEADS, hd)
    kh = k.reshape(Lk, NUM_HEADS, hd)
    vh = v.reshape(Lk, NUM_HEADS, hd)
    s = jnp.einsum("qhd,khd->hqk", qh, kh) * scale
    s = s - jnp.max(s, axis=-1, keepdims=True)
    p = jnp.exp(s)
    p = p / jnp.sum(p, axis=-1, keepdims=True)
    ctx = jnp.einsum("hqk,khd->qhd", p, vh).reshape(Lq, D)
    return ctx @ w_o.T + b_o


def _ref_encoder(x, p):
    attn = _ref_mha(x, x, p["wqkv"], p["bqkv"], p["wo"], p["bo"])
    x = _layernorm(x + attn, p["ln1w"], p["ln1b"])
    h = jnp.maximum(x @ p["w1"].T + p["b1"], 0.0)
    ff = h @ p["w2"].T + p["b2"]
    return _layernorm(x + ff, p["ln2w"], p["ln2b"])


def _ref_decoder(x, enc, p):
    sa = _ref_mha(x, x, p["s_wqkv"], p["s_bqkv"], p["s_wo"], p["s_bo"])
    x = _layernorm(x + sa, p["ln1w"], p["ln1b"])
    ca = _ref_mha(x, enc, p["c_wqkv"], p["c_bqkv"], p["c_wo"], p["c_bo"])
    x = _layernorm(x + ca, p["ln2w"], p["ln2b"])
    h = jnp.maximum(x @ p["w1"].T + p["b1"], 0.0)
    ff = h @ p["w2"].T + p["b2"]
    return _layernorm(x + ff, p["ln3w"], p["ln3b"])


def ref_forward(x, params):
    B = x.shape[0]
    patches = extract_patches(x)
    outs = []
    for b in range(B):
        e = patches[b] @ params["patch_w"].T + params["patch_b"] + params["pos"]
        for lp in params["enc_layers"]:
            e = _ref_encoder(e, lp)
        e = _layernorm(e, params["norm_w"], params["norm_b"])
        d = params["digit_positions"]
        for lp in params["dec_layers"]:
            d = _ref_decoder(d, e, lp)
        outs.append(d @ params["cls_w"].T + params["cls_b"])
    logits = jnp.stack(outs)
    return [logits[:, i] for i in range(NUM_DIGITS)]


# ----------------------------------------------------------------------------
# Deterministic parameter init (synthetic weights, no checkpoint)
# ----------------------------------------------------------------------------
def init_params(key):
    keys = iter(jax.random.split(key, 256))

    def w(shape, scale=0.02):
        return jax.random.normal(next(keys), shape, jnp.float32) * scale

    def zeros(shape):
        return jnp.zeros(shape, jnp.float32)

    def ones(shape):
        return jnp.ones(shape, jnp.float32)

    D, F = EMBED_DIM, FF_DIM
    params = {
        "patch_w": w((D, PATCH_DIM)),
        "patch_b": zeros((1, D)),
        "pos": w((NUM_PATCHES, D)),
        "norm_w": ones((1, D)),
        "norm_b": zeros((1, D)),
        "digit_positions": w((NUM_DIGITS, D)),
        "cls_w": w((NUM_CLASSES, D)),
        "cls_b": zeros((1, NUM_CLASSES)),
        "enc_layers": [],
        "dec_layers": [],
    }
    for _ in range(NUM_LAYERS):
        params["enc_layers"].append(dict(
            wqkv=w((3 * D, D)), bqkv=zeros((1, 3 * D)),
            wo=w((D, D)), bo=zeros((1, D)),
            ln1w=ones((1, D)), ln1b=zeros((1, D)),
            ln2w=ones((1, D)), ln2b=zeros((1, D)),
            w1=w((F, D)), b1=zeros((1, F)),
            w2=w((D, F)), b2=zeros((1, D)),
        ))
    for _ in range(NUM_LAYERS):
        params["dec_layers"].append(dict(
            s_wqkv=w((3 * D, D)), s_bqkv=zeros((1, 3 * D)),
            s_wo=w((D, D)), s_bo=zeros((1, D)),
            c_wqkv=w((3 * D, D)), c_bqkv=zeros((1, 3 * D)),
            c_wo=w((D, D)), c_bo=zeros((1, D)),
            ln1w=ones((1, D)), ln1b=zeros((1, D)),
            ln2w=ones((1, D)), ln2b=zeros((1, D)),
            ln3w=ones((1, D)), ln3b=zeros((1, D)),
            w1=w((F, D)), b1=zeros((1, F)),
            w2=w((D, F)), b2=zeros((1, D)),
        ))
    return params


if __name__ == "__main__":
    key = jax.random.PRNGKey(0)
    pkey, xkey = jax.random.split(key)
    params = init_params(pkey)
    x = jax.random.normal(xkey, (2, IN_CHANNELS, IMAGE_SIZE, IMAGE_SIZE), jnp.float32)

    # Pack ONCE (hoisted out of the per-call path per the perf review) and reuse.
    kp = pack_kernel_params(params)
    kp = jax.tree_util.tree_map(jax.block_until_ready, kp)

    digits = vit_forward(x, kp)
    digits = [jax.block_until_ready(d) for d in digits]

    ref = ref_forward(x, params)
    for d, r in zip(digits, ref):
        assert d.shape == (2, NUM_CLASSES)
        err = float(jnp.max(jnp.abs(d - r)))
        assert jnp.allclose(d, r, atol=2e-2, rtol=2e-2), err

    print("KERNEL_OK")
</pallas_src>

<mosaic_0001>
module attributes {stable_mosaic.version = 11 : i64} {
  func.func @vit_fused_kernel(%arg0: i32, %arg1: memref<2x16x128xbf16, #tpu.memory_space<vmem>>, %arg2: memref<128x32xbf16, #tpu.memory_space<vmem>>, %arg3: memref<22x32xf32, #tpu.memory_space<vmem>>, %arg4: memref<2x32x96xbf16, #tpu.memory_space<vmem>>, %arg5: memref<2x32x32xbf16, #tpu.memory_space<vmem>>, %arg6: memref<2x32x64xbf16, #tpu.memory_space<vmem>>, %arg7: memref<2x64x32xbf16, #tpu.memory_space<vmem>>, %arg8: memref<2x8x128xf32, #tpu.memory_space<vmem>>, %arg9: memref<2x32x96xbf16, #tpu.memory_space<vmem>>, %arg10: memref<2x32x32xbf16, #tpu.memory_space<vmem>>, %arg11: memref<2x32x32xbf16, #tpu.memory_space<vmem>>, %arg12: memref<2x32x64xbf16, #tpu.memory_space<vmem>>, %arg13: memref<2x32x32xbf16, #tpu.memory_space<vmem>>, %arg14: memref<2x32x64xbf16, #tpu.memory_space<vmem>>, %arg15: memref<2x64x32xbf16, #tpu.memory_space<vmem>>, %arg16: memref<2x16x128xf32, #tpu.memory_space<vmem>>, %arg17: memref<33x128xf32, #tpu.memory_space<vmem>>, %arg18: memref<2x512xf32, #tpu.memory_space<vmem>>) attributes {dimension_semantics = [#tpu.dimension_semantics<parallel>], iteration_bounds = array<i64: 1>, scalar_prefetch = 0 : i64, scratch_operands = 0 : i64, tpu.core_type = #tpu.core_type<tc>, window_params = [{transform_indices = @transform_0, window_bounds = array<i64: 2, 16, 128>}, {pipeline_mode = #tpu.pipeline_mode<synchronous>, transform_indices = @transform_1, window_bounds = array<i64: 128, 32>}, {pipeline_mode = #tpu.pipeline_mode<synchronous>, transform_indices = @transform_2, window_bounds = array<i64: 22, 32>}, {pipeline_mode = #tpu.pipeline_mode<synchronous>, transform_indices = @transform_3, window_bounds = array<i64: 2, 32, 96>}, {pipeline_mode = #tpu.pipeline_mode<synchronous>, transform_indices = @transform_4, window_bounds = array<i64: 2, 32, 32>}, {pipeline_mode = #tpu.pipeline_mode<synchronous>, transform_indices = @transform_5, window_bounds = array<i64: 2, 32, 64>}, {pipeline_mode = #tpu.pipeline_mode<synchronous>, transform_indices = @transform_6, window_bounds = array<i64: 2, 64, 32>}, {pipeline_mode = #tpu.pipeline_mode<synchronous>, transform_indices = @transform_7, window_bounds = array<i64: 2, 8, 128>}, {pipeline_mode = #tpu.pipeline_mode<synchronous>, transform_indices = @transform_8, window_bounds = array<i64: 2, 32, 96>}, {pipeline_mode = #tpu.pipeline_mode<synchronous>, transform_indices = @transform_9, window_bounds = array<i64: 2, 32, 32>}, {pipeline_mode = #tpu.pipeline_mode<synchronous>, transform_indices = @transform_10, window_bounds = array<i64: 2, 32, 32>}, {pipeline_mode = #tpu.pipeline_mode<synchronous>, transform_indices = @transform_11, window_bounds = array<i64: 2, 32, 64>}, {pipeline_mode = #tpu.pipeline_mode<synchronous>, transform_indices = @transform_12, window_bounds = array<i64: 2, 32, 32>}, {pipeline_mode = #tpu.pipeline_mode<synchronous>, transform_indices = @transform_13, window_bounds = array<i64: 2, 32, 64>}, {pipeline_mode = #tpu.pipeline_mode<synchronous>, transform_indices = @transform_14, window_bounds = array<i64: 2, 64, 32>}, {pipeline_mode = #tpu.pipeline_mode<synchronous>, transform_indices = @transform_15, window_bounds = array<i64: 2, 16, 128>}, {pipeline_mode = #tpu.pipeline_mode<synchronous>, transform_indices = @transform_16, window_bounds = array<i64: 33, 128>}, {transform_indices = @transform_17, window_bounds = array<i64: 2, 512>}]} {
    %c0 = arith.constant 0 : index
    %c0_0 = arith.constant 0 : index
    %0 = vector.load %arg3[%c0, %c0_0] : memref<22x32xf32, #tpu.memory_space<vmem>>, vector<22x32xf32>
    %1 = vector.extract_strided_slice %0 {offsets = [0, 0], sizes = [16, 32], strides = [1, 1]} : vector<22x32xf32> to vector<16x32xf32>
    %2 = vector.extract_strided_slice %0 {offsets = [16, 0], sizes = [1, 32], strides = [1, 1]} : vector<22x32xf32> to vector<1x32xf32>
    %3 = vector.extract_strided_slice %0 {offsets = [17, 0], sizes = [1, 32], strides = [1, 1]} : vector<22x32xf32> to vector<1x32xf32>
    %4 = vector.extract_strided_slice %0 {offsets = [18, 0], sizes = [4, 32], strides = [1, 1]} : vector<22x32xf32> to vector<4x32xf32>
    %c0_1 = arith.constant 0 : index
    %c0_2 = arith.constant 0 : index
    %c0_3 = arith.constant 0 : index
    %5 = vector.load %arg1[%c0_1, %c0_2, %c0_3] : memref<2x16x128xbf16, #tpu.memory_space<vmem>>, vector<2x16x128xbf16>
    %6 = vector.shape_cast %5 : vector<2x16x128xbf16> to vector<32x128xbf16>
    %c0_4 = arith.constant 0 : index
    %c0_5 = arith.constant 0 : index
    %7 = vector.load %arg2[%c0_4, %c0_5] : memref<128x32xbf16, #tpu.memory_space<vmem>>, vector<128x32xbf16>
    %cst = arith.constant dense<0.000000e+00> : vector<32x32xf32>
    %8 = tpu.matmul %6, %7, %cst {dimension_numbers = #tpu.dot_dimension_numbers<[1], [0], [0], [1], [0, 0, 1, 1], [], []>} : vector<32x128xbf16>, vector<128x32xbf16>, vector<32x32xf32> -> vector<32x32xf32>
    %9 = vector.shape_cast %8 : vector<32x32xf32> to vector<2x16x32xf32>
    %10 = vector.shape_cast %1 : vector<16x32xf32> to vector<1x16x32xf32>
    %11 = vector.broadcast %10 : vector<1x16x32xf32> to vector<2x16x32xf32>
    %12 = arith.addf %9, %11 : vector<2x16x32xf32>
    %13 = vector.shape_cast %12 : vector<2x16x32xf32> to vector<32x32xf32>
    %c0_6 = arith.constant 0 : index
    %c0_7 = arith.constant 0 : index
    %c0_8 = arith.constant 0 : index
    %14 = vector.load %arg8[%c0_6, %c0_7, %c0_8] : memref<2x8x128xf32, #tpu.memory_space<vmem>>, vector<1x8x128xf32>
    %15 = vector.shape_cast %14 : vector<1x8x128xf32> to vector<8x128xf32>
    %16 = vector.extract_strided_slice %15 {offsets = [0, 0], sizes = [1, 96], strides = [1, 1]} : vector<8x128xf32> to vector<1x96xf32>
    %17 = vector.extract_strided_slice %15 {offsets = [1, 0], sizes = [1, 32], strides = [1, 1]} : vector<8x128xf32> to vector<1x32xf32>
    %18 = vector.extract_strided_slice %15 {offsets = [2, 0], sizes = [1, 64], strides = [1, 1]} : vector<8x128xf32> to vector<1x64xf32>
    %19 = vector.extract_strided_slice %15 {offsets = [3, 0], sizes = [1, 32], strides = [1, 1]} : vector<8x128xf32> to vector<1x32xf32>
    %20 = vector.extract_strided_slice %15 {offsets = [4, 0], sizes = [1, 32], strides = [1, 1]} : vector<8x128xf32> to vector<1x32xf32>
    %21 = vector.extract_strided_slice %15 {offsets = [5, 0], sizes = [1, 32], strides = [1, 1]} : vector<8x128xf32> to vector<1x32xf32>
    %22 = vector.extract_strided_slice %15 {offsets = [6, 0], sizes = [1, 32], strides = [1, 1]} : vector<8x128xf32> to vector<1x32xf32>
    %23 = vector.extract_strided_slice %15 {offsets = [7, 0], sizes = [1, 32], strides = [1, 1]} : vector<8x128xf32> to vector<1x32xf32>
    %c0_9 = arith.constant 0 : index
    %c0_10 = arith.constant 0 : index
    %c0_11 = arith.constant 0 : index
    %24 = vector.load %arg4[%c0_9, %c0_10, %c0_11] : memref<2x32x96xbf16, #tpu.memory_space<vmem>>, vector<1x32x96xbf16>
    %25 = vector.shape_cast %24 : vector<1x32x96xbf16> to vector<32x96xbf16>
    %c0_12 = arith.constant 0 : index
    %c0_13 = arith.constant 0 : index
    %c0_14 = arith.constant 0 : index
    %26 = vector.load %arg5[%c0_12, %c0_13, %c0_14] : memref<2x32x32xbf16, #tpu.memory_space<vmem>>, vector<1x32x32xbf16>
    %27 = vector.shape_cast %26 : vector<1x32x32xbf16> to vector<32x32xbf16>
    %28 = arith.truncf %13 : vector<32x32xf32> to vector<32x32xbf16>
    %cst_15 = arith.constant dense<0.000000e+00> : vector<32x96xf32>
    %29 = tpu.matmul %28, %25, %cst_15 {dimension_numbers = #tpu.dot_dimension_numbers<[1], [0], [0], [1], [0, 0, 1, 1], [], []>} : vector<32x32xbf16>, vector<32x96xbf16>, vector<32x96xf32> -> vector<32x96xf32>
    %30 = vector.broadcast %16 : vector<1x96xf32> to vector<32x96xf32>
    %31 = arith.addf %29, %30 : vector<32x96xf32>
    %32 = vector.extract_strided_slice %31 {offsets = [0, 0], sizes = [32, 32], strides = [1, 1]} : vector<32x96xf32> to vector<32x32xf32>
    %33 = vector.extract_strided_slice %31 {offsets = [0, 32], sizes = [32, 32], strides = [1, 1]} : vector<32x96xf32> to vector<32x32xf32>
    %34 = vector.extract_strided_slice %31 {offsets = [0, 64], sizes = [32, 32], strides = [1, 1]} : vector<32x96xf32> to vector<32x32xf32>
    %35 = vector.shape_cast %32 : vector<32x32xf32> to vector<2x16x32xf32>
    %36 = arith.truncf %35 : vector<2x16x32xf32> to vector<2x16x32xbf16>
    %37 = vector.shape_cast %33 : vector<32x32xf32> to vector<2x16x32xf32>
    %38 = arith.truncf %37 : vector<2x16x32xf32> to vector<2x16x32xbf16>
    %39 = vector.shape_cast %34 : vector<32x32xf32> to vector<2x16x32xf32>
    %40 = arith.truncf %39 : vector<2x16x32xf32> to vector<2x16x32xbf16>
    %41 = vector.extract_strided_slice %36 {offsets = [0, 0, 0], sizes = [2, 16, 8], strides = [1, 1, 1]} : vector<2x16x32xbf16> to vector<2x16x8xbf16>
    %42 = vector.extract_strided_slice %38 {offsets = [0, 0, 0], sizes = [2, 16, 8], strides = [1, 1, 1]} : vector<2x16x32xbf16> to vector<2x16x8xbf16>
    "tpu.trace_start"() <{level = 10 : i32, message = "bqd,bkd->bqk"}> : () -> ()
    %cst_16 = arith.constant dense<0.000000e+00> : vector<2x16x16xf32>
    %43 = tpu.matmul %41, %42, %cst_16 {dimension_numbers = #tpu.dot_dimension_numbers<[2], [2], [1], [1], [0, 0, 0, 1, 1, 1], [0], [0]>} : vector<2x16x8xbf16>, vector<2x16x8xbf16>, vector<2x16x16xf32> -> vector<2x16x16xf32>
    "tpu.trace_stop"() : () -> ()
    %cst_17 = arith.constant 0.353553385 : f32
    %44 = vector.broadcast %cst_17 : f32 to vector<2x16x16xf32>
    %45 = arith.mulf %43, %44 : vector<2x16x16xf32>
    %cst_18 = arith.constant dense<0xFF800000> : vector<2x16xf32>
    %46 = vector.multi_reduction <maximumf>, %45, %cst_18 [2] : vector<2x16x16xf32> to vector<2x16xf32>
    %47 = vector.shape_cast %46 : vector<2x16xf32> to vector<2x16x1xf32>
    %48 = vector.broadcast %47 : vector<2x16x1xf32> to vector<2x16x16xf32>
    %49 = arith.subf %45, %48 : vector<2x16x16xf32>
    %50 = math.exp %49 : vector<2x16x16xf32>
    %cst_19 = arith.constant dense<0.000000e+00> : vector<2x16xf32>
    %51 = vector.multi_reduction <add>, %50, %cst_19 [2] : vector<2x16x16xf32> to vector<2x16xf32>
    %52 = vector.shape_cast %51 : vector<2x16xf32> to vector<2x16x1xf32>
    %53 = tpu.reciprocal %52 {approx = true} : vector<2x16x1xf32> -> vector<2x16x1xf32>
    %54 = vector.broadcast %53 : vector<2x16x1xf32> to vector<2x16x16xf32>
    %55 = arith.mulf %50, %54 : vector<2x16x16xf32>
    %56 = arith.truncf %55 : vector<2x16x16xf32> to vector<2x16x16xbf16>
    %57 = vector.extract_strided_slice %40 {offsets = [0, 0, 0], sizes = [2, 16, 8], strides = [1, 1, 1]} : vector<2x16x32xbf16> to vector<2x16x8xbf16>
    "tpu.trace_start"() <{level = 10 : i32, message = "bqk,bkd->bqd"}> : () -> ()
    %cst_20 = arith.constant dense<0.000000e+00> : vector<2x16x8xf32>
    %58 = tpu.matmul %56, %57, %cst_20 {dimension_numbers = #tpu.dot_dimension_numbers<[2], [1], [1], [2], [0, 0, 0, 1, 1, 2], [0], [0]>} : vector<2x16x16xbf16>, vector<2x16x8xbf16>, vector<2x16x8xf32> -> vector<2x16x8xf32>
    "tpu.trace_stop"() : () -> ()
    %59 = vector.extract_strided_slice %36 {offsets = [0, 0, 8], sizes = [2, 16, 8], strides = [1, 1, 1]} : vector<2x16x32xbf16> to vector<2x16x8xbf16>
    %60 = vector.extract_strided_slice %38 {offsets = [0, 0, 8], sizes = [2, 16, 8], strides = [1, 1, 1]} : vector<2x16x32xbf16> to vector<2x16x8xbf16>
    "tpu.trace_start"() <{level = 10 : i32, message = "bqd,bkd->bqk"}> : () -> ()
    %cst_21 = arith.constant dense<0.000000e+00> : vector<2x16x16xf32>
    %61 = tpu.matmul %59, %60, %cst_21 {dimension_numbers = #tpu.dot_dimension_numbers<[2], [2], [1], [1], [0, 0, 0, 1, 1, 1], [0], [0]>} : vector<2x16x8xbf16>, vector<2x16x8xbf16>, vector<2x16x16xf32> -> vector<2x16x16xf32>
    "tpu.trace_stop"() : () -> ()
    %cst_22 = arith.constant 0.353553385 : f32
    %62 = vector.broadcast %cst_22 : f32 to vector<2x16x16xf32>
    %63 = arith.mulf %61, %62 : vector<2x16x16xf32>
    %cst_23 = arith.constant dense<0xFF800000> : vector<2x16xf32>
    %64 = vector.multi_reduction <maximumf>, %63, %cst_23 [2] : vector<2x16x16xf32> to vector<2x16xf32>
    %65 = vector.shape_cast %64 : vector<2x16xf32> to vector<2x16x1xf32>
    %66 = vector.broadcast %65 : vector<2x16x1xf32> to vector<2x16x16xf32>
    %67 = arith.subf %63, %66 : vector<2x16x16xf32>
    %68 = math.exp %67 : vector<2x16x16xf32>
    %cst_24 = arith.constant dense<0.000000e+00> : vector<2x16xf32>
    %69 = vector.multi_reduction <add>, %68, %cst_24 [2] : vector<2x16x16xf32> to vector<2x16xf32>
    %70 = vector.shape_cast %69 : vector<2x16xf32> to vector<2x16x1xf32>
    %71 = tpu.reciprocal %70 {approx = true} : vector<2x16x1xf32> -> vector<2x16x1xf32>
    %72 = vector.broadcast %71 : vector<2x16x1xf32> to vector<2x16x16xf32>
    %73 = arith.mulf %68, %72 : vector<2x16x16xf32>
    %74 = arith.truncf %73 : vector<2x16x16xf32> to vector<2x16x16xbf16>
    %75 = vector.extract_strided_slice %40 {offsets = [0, 0, 8], sizes = [2, 16, 8], strides = [1, 1, 1]} : vector<2x16x32xbf16> to vector<2x16x8xbf16>
    "tpu.trace_start"() <{level = 10 : i32, message = "bqk,bkd->bqd"}> : () -> ()
    %cst_25 = arith.constant dense<0.000000e+00> : vector<2x16x8xf32>
    %76 = tpu.matmul %74, %75, %cst_25 {dimension_numbers = #tpu.dot_dimension_numbers<[2], [1], [1], [2], [0, 0, 0, 1, 1, 2], [0], [0]>} : vector<2x16x16xbf16>, vector<2x16x8xbf16>, vector<2x16x8xf32> -> vector<2x16x8xf32>
    "tpu.trace_stop"() : () -> ()
    %77 = vector.extract_strided_slice %36 {offsets = [0, 0, 16], sizes = [2, 16, 8], strides = [1, 1, 1]} : vector<2x16x32xbf16> to vector<2x16x8xbf16>
    %78 = vector.extract_strided_slice %38 {offsets = [0, 0, 16], sizes = [2, 16, 8], strides = [1, 1, 1]} : vector<2x16x32xbf16> to vector<2x16x8xbf16>
    "tpu.trace_start"() <{level = 10 : i32, message = "bqd,bkd->bqk"}> : () -> ()
    %cst_26 = arith.constant dense<0.000000e+00> : vector<2x16x16xf32>
    %79 = tpu.matmul %77, %78, %cst_26 {dimension_numbers = #tpu.dot_dimension_numbers<[2], [2], [1], [1], [0, 0, 0, 1, 1, 1], [0], [0]>} : vector<2x16x8xbf16>, vector<2x16x8xbf16>, vector<2x16x16xf32> -> vector<2x16x16xf32>
    "tpu.trace_stop"() : () -> ()
    %cst_27 = arith.constant 0.353553385 : f32
    %80 = vector.broadcast %cst_27 : f32 to vector<2x16x16xf32>
    %81 = arith.mulf %79, %80 : vector<2x16x16xf32>
    %cst_28 = arith.constant dense<0xFF800000> : vector<2x16xf32>
    %82 = vector.multi_reduction <maximumf>, %81, %cst_28 [2] : vector<2x16x16xf32> to vector<2x16xf32>
    %83 = vector.shape_cast %82 : vector<2x16xf32> to vector<2x16x1xf32>
    %84 = vector.broadcast %83 : vector<2x16x1xf32> to vector<2x16x16xf32>
    %85 = arith.subf %81, %84 : vector<2x16x16xf32>
    %86 = math.exp %85 : vector<2x16x16xf32>
    %cst_29 = arith.constant dense<0.000000e+00> : vector<2x16xf32>
    %87 = vector.multi_reduction <add>, %86, %cst_29 [2] : vector<2x16x16xf32> to vector<2x16xf32>
    %88 = vector.shape_cast %87 : vector<2x16xf32> to vector<2x16x1xf32>
    %89 = tpu.reciprocal %88 {approx = true} : vector<2x16x1xf32> -> vector<2x16x1xf32>
    %90 = vector.broadcast %89 : vector<2x16x1xf32> to vector<2x16x16xf32>
    %91 = arith.mulf %86, %90 : vector<2x16x16xf32>
    %92 = arith.truncf %91 : vector<2x16x16xf32> to vector<2x16x16xbf16>
    %93 = vector.extract_strided_slice %40 {offsets = [0, 0, 16], sizes = [2, 16, 8], strides = [1, 1, 1]} : vector<2x16x32xbf16> to vector<2x16x8xbf16>
    "tpu.trace_start"() <{level = 10 : i32, message = "bqk,bkd->bqd"}> : () -> ()
    %cst_30 = arith.constant dense<0.000000e+00> : vector<2x16x8xf32>
    %94 = tpu.matmul %92, %93, %cst_30 {dimension_numbers = #tpu.dot_dimension_numbers<[2], [1], [1], [2], [0, 0, 0, 1, 1, 2], [0], [0]>} : vector<2x16x16xbf16>, vector<2x16x8xbf16>, vector<2x16x8xf32> -> vector<2x16x8xf32>
    "tpu.trace_stop"() : () -> ()
    %95 = vector.extract_strided_slice %36 {offsets = [0, 0, 24], sizes = [2, 16, 8], strides = [1, 1, 1]} : vector<2x16x32xbf16> to vector<2x16x8xbf16>
    %96 = vector.extract_strided_slice %38 {offsets = [0, 0, 24], sizes = [2, 16, 8], strides = [1, 1, 1]} : vector<2x16x32xbf16> to vector<2x16x8xbf16>
    "tpu.trace_start"() <{level = 10 : i32, message = "bqd,bkd->bqk"}> : () -> ()
    %cst_31 = arith.constant dense<0.000000e+00> : vector<2x16x16xf32>
    %97 = tpu.matmul %95, %96, %cst_31 {dimension_numbers = #tpu.dot_dimension_numbers<[2], [2], [1], [1], [0, 0, 0, 1, 1, 1], [0], [0]>} : vector<2x16x8xbf16>, vector<2x16x8xbf16>, vector<2x16x16xf32> -> vector<2x16x16xf32>
    "tpu.trace_stop"() : () -> ()
    %cst_32 = arith.constant 0.353553385 : f32
    %98 = vector.broadcast %cst_32 : f32 to vector<2x16x16xf32>
    %99 = arith.mulf %97, %98 : vector<2x16x16xf32>
    %cst_33 = arith.constant dense<0xFF800000> : vector<2x16xf32>
    %100 = vector.multi_reduction <maximumf>, %99, %cst_33 [2] : vector<2x16x16xf32> to vector<2x16xf32>
    %101 = vector.shape_cast %100 : vector<2x16xf32> to vector<2x16x1xf32>
    %102 = vector.broadcast %101 : vector<2x16x1xf32> to vector<2x16x16xf32>
    %103 = arith.subf %99, %102 : vector<2x16x16xf32>
    %104 = math.exp %103 : vector<2x16x16xf32>
    %cst_34 = arith.constant dense<0.000000e+00> : vector<2x16xf32>
    %105 = vector.multi_reduction <add>, %104, %cst_34 [2] : vector<2x16x16xf32> to vector<2x16xf32>
    %106 = vector.shape_cast %105 : vector<2x16xf32> to vector<2x16x1xf32>
    %107 = tpu.reciprocal %106 {approx = true} : vector<2x16x1xf32> -> vector<2x16x1xf32>
    %108 = vector.broadcast %107 : vector<2x16x1xf32> to vector<2x16x16xf32>
    %109 = arith.mulf %104, %108 : vector<2x16x16xf32>
    %110 = arith.truncf %109 : vector<2x16x16xf32> to vector<2x16x16xbf16>
    %111 = vector.extract_strided_slice %40 {offsets = [0, 0, 24], sizes = [2, 16, 8], strides = [1, 1, 1]} : vector<2x16x32xbf16> to vector<2x16x8xbf16>
    "tpu.trace_start"() <{level = 10 : i32, message = "bqk,bkd->bqd"}> : () -> ()
    %cst_35 = arith.constant dense<0.000000e+00> : vector<2x16x8xf32>
    %112 = tpu.matmul %110, %111, %cst_35 {dimension_numbers = #tpu.dot_dimension_numbers<[2], [1], [1], [2], [0, 0, 0, 1, 1, 2], [0], [0]>} : vector<2x16x16xbf16>, vector<2x16x8xbf16>, vector<2x16x8xf32> -> vector<2x16x8xf32>
    "tpu.trace_stop"() : () -> ()
    %113 = tpu.concatenate %58, %76, %94, %112 in 2 : vector<2x16x8xf32>, vector<2x16x8xf32>, vector<2x16x8xf32>, vector<2x16x8xf32> -> vector<2x16x32xf32>
    %114 = vector.shape_cast %113 : vector<2x16x32xf32> to vector<32x32xf32>
    %115 = arith.truncf %114 : vector<32x32xf32> to vector<32x32xbf16>
    %cst_36 = arith.constant dense<0.000000e+00> : vector<32x32xf32>
    %116 = tpu.matmul %115, %27, %cst_36 {dimension_numbers = #tpu.dot_dimension_numbers<[1], [0], [0], [1], [0, 0, 1, 1], [], []>} : vector<32x32xbf16>, vector<32x32xbf16>, vector<32x32xf32> -> vector<32x32xf32>
    %117 = vector.broadcast %17 : vector<1x32xf32> to vector<32x32xf32>
    %118 = arith.addf %116, %117 : vector<32x32xf32>
    %119 = arith.addf %13, %118 : vector<32x32xf32>
    %cst_37 = arith.constant dense<0.000000e+00> : vector<32xf32>
    %120 = vector.multi_reduction <add>, %119, %cst_37 [1] : vector<32x32xf32> to vector<32xf32>
    %121 = vector.shape_cast %120 : vector<32xf32> to vector<32x1xf32>
    %cst_38 = arith.constant 3.200000e+01 : f32
    %122 = vector.broadcast %cst_38 : f32 to vector<32x1xf32>
    %123 = arith.divf %121, %122 : vector<32x1xf32>
    %124 = vector.broadcast %123 : vector<32x1xf32> to vector<32x32xf32>
    %125 = arith.subf %119, %124 : vector<32x32xf32>
    %126 = arith.mulf %125, %125 : vector<32x32xf32>
    %cst_39 = arith.constant dense<0.000000e+00> : vector<32xf32>
    %127 = vector.multi_reduction <add>, %126, %cst_39 [1] : vector<32x32xf32> to vector<32xf32>
    %128 = vector.shape_cast %127 : vector<32xf32> to vector<32x1xf32>
    %cst_40 = arith.constant 3.200000e+01 : f32
    %129 = vector.broadcast %cst_40 : f32 to vector<32x1xf32>
    %130 = arith.divf %128, %129 : vector<32x1xf32>
    %131 = vector.broadcast %123 : vector<32x1xf32> to vector<32x32xf32>
    %132 = arith.subf %119, %131 : vector<32x32xf32>
    %cst_41 = arith.constant 9.99999974E-6 : f32
    %133 = vector.broadcast %cst_41 : f32 to vector<32x1xf32>
    %134 = arith.addf %130, %133 : vector<32x1xf32>
    %135 = math.rsqrt %134 : vector<32x1xf32>
    %136 = vector.broadcast %135 : vector<32x1xf32> to vector<32x32xf32>
    %137 = arith.mulf %132, %136 : vector<32x32xf32>
    %138 = vector.broadcast %20 : vector<1x32xf32> to vector<32x32xf32>
    %139 = arith.mulf %137, %138 : vector<32x32xf32>
    %140 = vector.broadcast %21 : vector<1x32xf32> to vector<32x32xf32>
    %141 = arith.addf %139, %140 : vector<32x32xf32>
    %c0_42 = arith.constant 0 : index
    %c0_43 = arith.constant 0 : index
    %c0_44 = arith.constant 0 : index
    %142 = vector.load %arg6[%c0_42, %c0_43, %c0_44] : memref<2x32x64xbf16, #tpu.memory_space<vmem>>, vector<1x32x64xbf16>
    %143 = vector.shape_cast %142 : vector<1x32x64xbf16> to vector<32x64xbf16>
    %c0_45 = arith.constant 0 : index
    %c0_46 = arith.constant 0 : index
    %c0_47 = arith.constant 0 : index
    %144 = vector.load %arg7[%c0_45, %c0_46, %c0_47] : memref<2x64x32xbf16, #tpu.memory_space<vmem>>, vector<1x64x32xbf16>
    %145 = vector.shape_cast %144 : vector<1x64x32xbf16> to vector<64x32xbf16>
    %146 = arith.truncf %141 : vector<32x32xf32> to vector<32x32xbf16>
    %cst_48 = arith.constant dense<0.000000e+00> : vector<32x64xf32>
    %147 = tpu.matmul %146, %143, %cst_48 {dimension_numbers = #tpu.dot_dimension_numbers<[1], [0], [0], [1], [0, 0, 1, 1], [], []>} : vector<32x32xbf16>, vector<32x64xbf16>, vector<32x64xf32> -> vector<32x64xf32>
    %148 = vector.broadcast %18 : vector<1x64xf32> to vector<32x64xf32>
    %149 = arith.addf %147, %148 : vector<32x64xf32>
    %cst_49 = arith.constant 0.000000e+00 : f32
    %150 = vector.broadcast %cst_49 : f32 to vector<32x64xf32>
    %151 = arith.maximumf %149, %150 : vector<32x64xf32>
    %152 = arith.truncf %151 : vector<32x64xf32> to vector<32x64xbf16>
    %cst_50 = arith.constant dense<0.000000e+00> : vector<32x32xf32>
    %153 = tpu.matmul %152, %145, %cst_50 {dimension_numbers = #tpu.dot_dimension_numbers<[1], [0], [0], [1], [0, 0, 1, 1], [], []>} : vector<32x64xbf16>, vector<64x32xbf16>, vector<32x32xf32> -> vector<32x32xf32>
    %154 = vector.broadcast %19 : vector<1x32xf32> to vector<32x32xf32>
    %155 = arith.addf %153, %154 : vector<32x32xf32>
    %156 = arith.addf %141, %155 : vector<32x32xf32>
    %cst_51 = arith.constant dense<0.000000e+00> : vector<32xf32>
    %157 = vector.multi_reduction <add>, %156, %cst_51 [1] : vector<32x32xf32> to vector<32xf32>
    %158 = vector.shape_cast %157 : vector<32xf32> to vector<32x1xf32>
    %cst_52 = arith.constant 3.200000e+01 : f32
    %159 = vector.broadcast %cst_52 : f32 to vector<32x1xf32>
    %160 = arith.divf %158, %159 : vector<32x1xf32>
    %161 = vector.broadcast %160 : vector<32x1xf32> to vector<32x32xf32>
    %162 = arith.subf %156, %161 : vector<32x32xf32>
    %163 = arith.mulf %162, %162 : vector<32x32xf32>
    %cst_53 = arith.constant dense<0.000000e+00> : vector<32xf32>
    %164 = vector.multi_reduction <add>, %163, %cst_53 [1] : vector<32x32xf32> to vector<32xf32>
    %165 = vector.shape_cast %164 : vector<32xf32> to vector<32x1xf32>
    %cst_54 = arith.constant 3.200000e+01 : f32
    %166 = vector.broadcast %cst_54 : f32 to vector<32x1xf32>
    %167 = arith.divf %165, %166 : vector<32x1xf32>
    %168 = vector.broadcast %160 : vector<32x1xf32> to vector<32x32xf32>
    %169 = arith.subf %156, %168 : vector<32x32xf32>
    %cst_55 = arith.constant 9.99999974E-6 : f32
    %170 = vector.broadcast %cst_55 : f32 to vector<32x1xf32>
    %171 = arith.addf %167, %170 : vector<32x1xf32>
    %172 = math.rsqrt %171 : vector<32x1xf32>
    %173 = vector.broadcast %172 : vector<32x1xf32> to vector<32x32xf32>
    %174 = arith.mulf %169, %173 : vector<32x32xf32>
    %175 = vector.broadcast %22 : vector<1x32xf32> to vector<32x32xf32>
    %176 = arith.mulf %174, %175 : vector<32x32xf32>
    %177 = vector.broadcast %23 : vector<1x32xf32> to vector<32x32xf32>
    %178 = arith.addf %176, %177 : vector<32x32xf32>
    %c1 = arith.constant 1 : index
    %c0_56 = arith.constant 0 : index
    %c0_57 = arith.constant 0 : index
    %179 = vector.load %arg8[%c1, %c0_56, %c0_57] : memref<2x8x128xf32, #tpu.memory_space<vmem>>, vector<1x8x128xf32>
    %180 = vector.shape_cast %179 : vector<1x8x128xf32> to vector<8x128xf32>
    %181 = vector.extract_strided_slice %180 {offsets = [0, 0], sizes = [1, 96], strides = [1, 1]} : vector<8x128xf32> to vector<1x96xf32>
    %182 = vector.extract_strided_slice %180 {offsets = [1, 0], sizes = [1, 32], strides = [1, 1]} : vector<8x128xf32> to vector<1x32xf32>
    %183 = vector.extract_strided_slice %180 {offsets = [2, 0], sizes = [1, 64], strides = [1, 1]} : vector<8x128xf32> to vector<1x64xf32>
    %184 = vector.extract_strided_slice %180 {offsets = [3, 0], sizes = [1, 32], strides = [1, 1]} : vector<8x128xf32> to vector<1x32xf32>
    %185 = vector.extract_strided_slice %180 {offsets = [4, 0], sizes = [1, 32], strides = [1, 1]} : vector<8x128xf32> to vector<1x32xf32>
    %186 = vector.extract_strided_slice %180 {offsets = [5, 0], sizes = [1, 32], strides = [1, 1]} : vector<8x128xf32> to vector<1x32xf32>
    %187 = vector.extract_strided_slice %180 {offsets = [6, 0], sizes = [1, 32], strides = [1, 1]} : vector<8x128xf32> to vector<1x32xf32>
    %188 = vector.extract_strided_slice %180 {offsets = [7, 0], sizes = [1, 32], strides = [1, 1]} : vector<8x128xf32> to vector<1x32xf32>
    %c1_58 = arith.constant 1 : index
    %c0_59 = arith.constant 0 : index
    %c0_60 = arith.constant 0 : index
    %189 = vector.load %arg4[%c1_58, %c0_59, %c0_60] : memref<2x32x96xbf16, #tpu.memory_space<vmem>>, vector<1x32x96xbf16>
    %190 = vector.shape_cast %189 : vector<1x32x96xbf16> to vector<32x96xbf16>
    %c1_61 = arith.constant 1 : index
    %c0_62 = arith.constant 0 : index
    %c0_63 = arith.constant 0 : index
    %191 = vector.load %arg5[%c1_61, %c0_62, %c0_63] : memref<2x32x32xbf16, #tpu.memory_space<vmem>>, vector<1x32x32xbf16>
    %192 = vector.shape_cast %191 : vector<1x32x32xbf16> to vector<32x32xbf16>
    %193 = arith.truncf %178 : vector<32x32xf32> to vector<32x32xbf16>
    %cst_64 = arith.constant dense<0.000000e+00> : vector<32x96xf32>
    %194 = tpu.matmul %193, %190, %cst_64 {dimension_numbers = #tpu.dot_dimension_numbers<[1], [0], [0], [1], [0, 0, 1, 1], [], []>} : vector<32x32xbf16>, vector<32x96xbf16>, vector<32x96xf32> -> vector<32x96xf32>
    %195 = vector.broadcast %181 : vector<1x96xf32> to vector<32x96xf32>
    %196 = arith.addf %194, %195 : vector<32x96xf32>
    %197 = vector.extract_strided_slice %196 {offsets = [0, 0], sizes = [32, 32], strides = [1, 1]} : vector<32x96xf32> to vector<32x32xf32>
    %198 = vector.extract_strided_slice %196 {offsets = [0, 32], sizes = [32, 32], strides = [1, 1]} : vector<32x96xf32> to vector<32x32xf32>
    %199 = vector.extract_strided_slice %196 {offsets = [0, 64], sizes = [32, 32], strides = [1, 1]} : vector<32x96xf32> to vector<32x32xf32>
    %200 = vector.shape_cast %197 : vector<32x32xf32> to vector<2x16x32xf32>
    %201 = arith.truncf %200 : vector<2x16x32xf32> to vector<2x16x32xbf16>
    %202 = vector.shape_cast %198 : vector<32x32xf32> to vector<2x16x32xf32>
    %203 = arith.truncf %202 : vector<2x16x32xf32> to vector<2x16x32xbf16>
    %204 = vector.shape_cast %199 : vector<32x32xf32> to vector<2x16x32xf32>
    %205 = arith.truncf %204 : vector<2x16x32xf32> to vector<2x16x32xbf16>
    %206 = vector.extract_strided_slice %201 {offsets = [0, 0, 0], sizes = [2, 16, 8], strides = [1, 1, 1]} : vector<2x16x32xbf16> to vector<2x16x8xbf16>
    %207 = vector.extract_strided_slice %203 {offsets = [0, 0, 0], sizes = [2, 16, 8], strides = [1, 1, 1]} : vector<2x16x32xbf16> to vector<2x16x8xbf16>
    "tpu.trace_start"() <{level = 10 : i32, message = "bqd,bkd->bqk"}> : () -> ()
    %cst_65 = arith.constant dense<0.000000e+00> : vector<2x16x16xf32>
    %208 = tpu.matmul %206, %207, %cst_65 {dimension_numbers = #tpu.dot_dimension_numbers<[2], [2], [1], [1], [0, 0, 0, 1, 1, 1], [0], [0]>} : vector<2x16x8xbf16>, vector<2x16x8xbf16>, vector<2x16x16xf32> -> vector<2x16x16xf32>
    "tpu.trace_stop"() : () -> ()
    %cst_66 = arith.constant 0.353553385 : f32
    %209 = vector.broadcast %cst_66 : f32 to vector<2x16x16xf32>
    %210 = arith.mulf %208, %209 : vector<2x16x16xf32>
    %cst_67 = arith.constant dense<0xFF800000> : vector<2x16xf32>
    %211 = vector.multi_reduction <maximumf>, %210, %cst_67 [2] : vector<2x16x16xf32> to vector<2x16xf32>
    %212 = vector.shape_cast %211 : vector<2x16xf32> to vector<2x16x1xf32>
    %213 = vector.broadcast %212 : vector<2x16x1xf32> to vector<2x16x16xf32>
    %214 = arith.subf %210, %213 : vector<2x16x16xf32>
    %215 = math.exp %214 : vector<2x16x16xf32>
    %cst_68 = arith.constant dense<0.000000e+00> : vector<2x16xf32>
    %216 = vector.multi_reduction <add>, %215, %cst_68 [2] : vector<2x16x16xf32> to vector<2x16xf32>
    %217 = vector.shape_cast %216 : vector<2x16xf32> to vector<2x16x1xf32>
    %218 = tpu.reciprocal %217 {approx = true} : vector<2x16x1xf32> -> vector<2x16x1xf32>
    %219 = vector.broadcast %218 : vector<2x16x1xf32> to vector<2x16x16xf32>
    %220 = arith.mulf %215, %219 : vector<2x16x16xf32>
    %221 = arith.truncf %220 : vector<2x16x16xf32> to vector<2x16x16xbf16>
    %222 = vector.extract_strided_slice %205 {offsets = [0, 0, 0], sizes = [2, 16, 8], strides = [1, 1, 1]} : vector<2x16x32xbf16> to vector<2x16x8xbf16>
    "tpu.trace_start"() <{level = 10 : i32, message = "bqk,bkd->bqd"}> : () -> ()
    %cst_69 = arith.constant dense<0.000000e+00> : vector<2x16x8xf32>
    %223 = tpu.matmul %221, %222, %cst_69 {dimension_numbers = #tpu.dot_dimension_numbers<[2], [1], [1], [2], [0, 0, 0, 1, 1, 2], [0], [0]>} : vector<2x16x16xbf16>, vector<2x16x8xbf16>, vector<2x16x8xf32> -> vector<2x16x8xf32>
    "tpu.trace_stop"() : () -> ()
    %224 = vector.extract_strided_slice %201 {offsets = [0, 0, 8], sizes = [2, 16, 8], strides = [1, 1, 1]} : vector<2x16x32xbf16> to vector<2x16x8xbf16>
    %225 = vector.extract_strided_slice %203 {offsets = [0, 0, 8], sizes = [2, 16, 8], strides = [1, 1, 1]} : vector<2x16x32xbf16> to vector<2x16x8xbf16>
    "tpu.trace_start"() <{level = 10 : i32, message = "bqd,bkd->bqk"}> : () -> ()
    %cst_70 = arith.constant dense<0.000000e+00> : vector<2x16x16xf32>
    %226 = tpu.matmul %224, %225, %cst_70 {dimension_numbers = #tpu.dot_dimension_numbers<[2], [2], [1], [1], [0, 0, 0, 1, 1, 1], [0], [0]>} : vector<2x16x8xbf16>, vector<2x16x8xbf16>, vector<2x16x16xf32> -> vector<2x16x16xf32>
    "tpu.trace_stop"() : () -> ()
    %cst_71 = arith.constant 0.353553385 : f32
    %227 = vector.broadcast %cst_71 : f32 to vector<2x16x16xf32>
    %228 = arith.mulf %226, %227 : vector<2x16x16xf32>
    %cst_72 = arith.constant dense<0xFF800000> : vector<2x16xf32>
    %229 = vector.multi_reduction <maximumf>, %228, %cst_72 [2] : vector<2x16x16xf32> to vector<2x16xf32>
    %230 = vector.shape_cast %229 : vector<2x16xf32> to vector<2x16x1xf32>
    %231 = vector.broadcast %230 : vector<2x16x1xf32> to vector<2x16x16xf32>
    %232 = arith.subf %228, %231 : vector<2x16x16xf32>
    %233 = math.exp %232 : vector<2x16x16xf32>
    %cst_73 = arith.constant dense<0.000000e+00> : vector<2x16xf32>
    %234 = vector.multi_reduction <add>, %233, %cst_73 [2] : vector<2x16x16xf32> to vector<2x16xf32>
    %235 = vector.shape_cast %234 : vector<2x16xf32> to vector<2x16x1xf32>
    %236 = tpu.reciprocal %235 {approx = true} : vector<2x16x1xf32> -> vector<2x16x1xf32>
    %237 = vector.broadcast %236 : vector<2x16x1xf32> to vector<2x16x16xf32>
    %238 = arith.mulf %233, %237 : vector<2x16x16xf32>
    %239 = arith.truncf %238 : vector<2x16x16xf32> to vector<2x16x16xbf16>
    %240 = vector.extract_strided_slice %205 {offsets = [0, 0, 8], sizes = [2, 16, 8], strides = [1, 1, 1]} : vector<2x16x32xbf16> to vector<2x16x8xbf16>
    "tpu.trace_start"() <{level = 10 : i32, message = "bqk,bkd->bqd"}> : () -> ()
    %cst_74 = arith.constant dense<0.000000e+00> : vector<2x16x8xf32>
    %241 = tpu.matmul %239, %240, %cst_74 {dimension_numbers = #tpu.dot_dimension_numbers<[2], [1], [1], [2], [0, 0, 0, 1, 1, 2], [0], [0]>} : vector<2x16x16xbf16>, vector<2x16x8xbf16>, vector<2x16x8xf32> -> vector<2x16x8xf32>
    "tpu.trace_stop"() : () -> ()
    %242 = vector.extract_strided_slice %201 {offsets = [0, 0, 16], sizes = [2, 16, 8], strides = [1, 1, 1]} : vector<2x16x32xbf16> to vector<2x16x8xbf16>
    %243 = vector.extract_strided_slice %203 {offsets = [0, 0, 16], sizes = [2, 16, 8], strides = [1, 1, 1]} : vector<2x16x32xbf16> to vector<2x16x8xbf16>
    "tpu.trace_start"() <{level = 10 : i32, message = "bqd,bkd->bqk"}> : () -> ()
    %cst_75 = arith.constant dense<0.000000e+00> : vector<2x16x16xf32>
    %244 = tpu.matmul %242, %243, %cst_75 {dimension_numbers = #tpu.dot_dimension_numbers<[2], [2], [1], [1], [0, 0, 0, 1, 1, 1], [0], [0]>} : vector<2x16x8xbf16>, vector<2x16x8xbf16>, vector<2x16x16xf32> -> vector<2x16x16xf32>
    "tpu.trace_stop"() : () -> ()
    %cst_76 = arith.constant 0.353553385 : f32
    %245 = vector.broadcast %cst_76 : f32 to vector<2x16x16xf32>
    %246 = arith.mulf %244, %245 : vector<2x16x16xf32>
    %cst_77 = arith.constant dense<0xFF800000> : vector<2x16xf32>
    %247 = vector.multi_reduction <maximumf>, %246, %cst_77 [2] : vector<2x16x16xf32> to vector<2x16xf32>
    %248 = vector.shape_cast %247 : vector<2x16xf32> to vector<2x16x1xf32>
    %249 = vector.broadcast %248 : vector<2x16x1xf32> to vector<2x16x16xf32>
    %250 = arith.subf %246, %249 : vector<2x16x16xf32>
    %251 = math.exp %250 : vector<2x16x16xf32>
    %cst_78 = arith.constant dense<0.000000e+00> : vector<2x16xf32>
    %252 = vector.multi_reduction <add>, %251, %cst_78 [2] : vector<2x16x16xf32> to vector<2x16xf32>
    %253 = vector.shape_cast %252 : vector<2x16xf32> to vector<2x16x1xf32>
    %254 = tpu.reciprocal %253 {approx = true} : vector<2x16x1xf32> -> vector<2x16x1xf32>
    %255 = vector.broadcast %254 : vector<2x16x1xf32> to vector<2x16x16xf32>
    %256 = arith.mulf %251, %255 : vector<2x16x16xf32>
    %257 = arith.truncf %256 : vector<2x16x16xf32> to vector<2x16x16xbf16>
    %258 = vector.extract_strided_slice %205 {offsets = [0, 0, 16], sizes = [2, 16, 8], strides = [1, 1, 1]} : vector<2x16x32xbf16> to vector<2x16x8xbf16>
    "tpu.trace_start"() <{level = 10 : i32, message = "bqk,bkd->bqd"}> : () -> ()
    %cst_79 = arith.constant dense<0.000000e+00> : vector<2x16x8xf32>
    %259 = tpu.matmul %257, %258, %cst_79 {dimension_numbers = #tpu.dot_dimension_numbers<[2], [1], [1], [2], [0, 0, 0, 1, 1, 2], [0], [0]>} : vector<2x16x16xbf16>, vector<2x16x8xbf16>, vector<2x16x8xf32> -> vector<2x16x8xf32>
    "tpu.trace_stop"() : () -> ()
    %260 = vector.extract_strided_slice %201 {offsets = [0, 0, 24], sizes = [2, 16, 8], strides = [1, 1, 1]} : vector<2x16x32xbf16> to vector<2x16x8xbf16>
    %261 = vector.extract_strided_slice %203 {offsets = [0, 0, 24], sizes = [2, 16, 8], strides = [1, 1, 1]} : vector<2x16x32xbf16> to vector<2x16x8xbf16>
    "tpu.trace_start"() <{level = 10 : i32, message = "bqd,bkd->bqk"}> : () -> ()
    %cst_80 = arith.constant dense<0.000000e+00> : vector<2x16x16xf32>
    %262 = tpu.matmul %260, %261, %cst_80 {dimension_numbers = #tpu.dot_dimension_numbers<[2], [2], [1], [1], [0, 0, 0, 1, 1, 1], [0], [0]>} : vector<2x16x8xbf16>, vector<2x16x8xbf16>, vector<2x16x16xf32> -> vector<2x16x16xf32>
    "tpu.trace_stop"() : () -> ()
    %cst_81 = arith.constant 0.353553385 : f32
    %263 = vector.broadcast %cst_81 : f32 to vector<2x16x16xf32>
    %264 = arith.mulf %262, %263 : vector<2x16x16xf32>
    %cst_82 = arith.constant dense<0xFF800000> : vector<2x16xf32>
    %265 = vector.multi_reduction <maximumf>, %264, %cst_82 [2] : vector<2x16x16xf32> to vector<2x16xf32>
    %266 = vector.shape_cast %265 : vector<2x16xf32> to vector<2x16x1xf32>
    %267 = vector.broadcast %266 : vector<2x16x1xf32> to vector<2x16x16xf32>
    %268 = arith.subf %264, %267 : vector<2x16x16xf32>
    %269 = math.exp %268 : vector<2x16x16xf32>
    %cst_83 = arith.constant dense<0.000000e+00> : vector<2x16xf32>
    %270 = vector.multi_reduction <add>, %269, %cst_83 [2] : vector<2x16x16xf32> to vector<2x16xf32>
    %271 = vector.shape_cast %270 : vector<2x16xf32> to vector<2x16x1xf32>
    %272 = tpu.reciprocal %271 {approx = true} : vector<2x16x1xf32> -> vector<2x16x1xf32>
    %273 = vector.broadcast %272 : vector<2x16x1xf32> to vector<2x16x16xf32>
    %274 = arith.mulf %269, %273 : vector<2x16x16xf32>
    %275 = arith.truncf %274 : vector<2x16x16xf32> to vector<2x16x16xbf16>
    %276 = vector.extract_strided_slice %205 {offsets = [0, 0, 24], sizes = [2, 16, 8], strides = [1, 1, 1]} : vector<2x16x32xbf16> to vector<2x16x8xbf16>
    "tpu.trace_start"() <{level = 10 : i32, message = "bqk,bkd->bqd"}> : () -> ()
    %cst_84 = arith.constant dense<0.000000e+00> : vector<2x16x8xf32>
    %277 = tpu.matmul %275, %276, %cst_84 {dimension_numbers = #tpu.dot_dimension_numbers<[2], [1], [1], [2], [0, 0, 0, 1, 1, 2], [0], [0]>} : vector<2x16x16xbf16>, vector<2x16x8xbf16>, vector<2x16x8xf32> -> vector<2x16x8xf32>
    "tpu.trace_stop"() : () -> ()
    %278 = tpu.concatenate %223, %241, %259, %277 in 2 : vector<2x16x8xf32>, vector<2x16x8xf32>, vector<2x16x8xf32>, vector<2x16x8xf32> -> vector<2x16x32xf32>
    %279 = vector.shape_cast %278 : vector<2x16x32xf32> to vector<32x32xf32>
    %280 = arith.truncf %279 : vector<32x32xf32> to vector<32x32xbf16>
    %cst_85 = arith.constant dense<0.000000e+00> : vector<32x32xf32>
    %281 = tpu.matmul %280, %192, %cst_85 {dimension_numbers = #tpu.dot_dimension_numbers<[1], [0], [0], [1], [0, 0, 1, 1], [], []>} : vector<32x32xbf16>, vector<32x32xbf16>, vector<32x32xf32> -> vector<32x32xf32>
    %282 = vector.broadcast %182 : vector<1x32xf32> to vector<32x32xf32>
    %283 = arith.addf %281, %282 : vector<32x32xf32>
    %284 = arith.addf %178, %283 : vector<32x32xf32>
    %cst_86 = arith.constant dense<0.000000e+00> : vector<32xf32>
    %285 = vector.multi_reduction <add>, %284, %cst_86 [1] : vector<32x32xf32> to vector<32xf32>
    %286 = vector.shape_cast %285 : vector<32xf32> to vector<32x1xf32>
    %cst_87 = arith.constant 3.200000e+01 : f32
    %287 = vector.broadcast %cst_87 : f32 to vector<32x1xf32>
    %288 = arith.divf %286, %287 : vector<32x1xf32>
    %289 = vector.broadcast %288 : vector<32x1xf32> to vector<32x32xf32>
    %290 = arith.subf %284, %289 : vector<32x32xf32>
    %291 = arith.mulf %290, %290 : vector<32x32xf32>
    %cst_88 = arith.constant dense<0.000000e+00> : vector<32xf32>
    %292 = vector.multi_reduction <add>, %291, %cst_88 [1] : vector<32x32xf32> to vector<32xf32>
    %293 = vector.shape_cast %292 : vector<32xf32> to vector<32x1xf32>
    %cst_89 = arith.constant 3.200000e+01 : f32
    %294 = vector.broadcast %cst_89 : f32 to vector<32x1xf32>
    %295 = arith.divf %293, %294 : vector<32x1xf32>
    %296 = vector.broadcast %288 : vector<32x1xf32> to vector<32x32xf32>
    %297 = arith.subf %284, %296 : vector<32x32xf32>
    %cst_90 = arith.constant 9.99999974E-6 : f32
    %298 = vector.broadcast %cst_90 : f32 to vector<32x1xf32>
    %299 = arith.addf %295, %298 : vector<32x1xf32>
    %300 = math.rsqrt %299 : vector<32x1xf32>
    %301 = vector.broadcast %300 : vector<32x1xf32> to vector<32x32xf32>
    %302 = arith.mulf %297, %301 : vector<32x32xf32>
    %303 = vector.broadcast %185 : vector<1x32xf32> to vector<32x32xf32>
    %304 = arith.mulf %302, %303 : vector<32x32xf32>
    %305 = vector.broadcast %186 : vector<1x32xf32> to vector<32x32xf32>
    %306 = arith.addf %304, %305 : vector<32x32xf32>
    %c1_91 = arith.constant 1 : index
    %c0_92 = arith.constant 0 : index
    %c0_93 = arith.constant 0 : index
    %307 = vector.load %arg6[%c1_91, %c0_92, %c0_93] : memref<2x32x64xbf16, #tpu.memory_space<vmem>>, vector<1x32x64xbf16>
    %308 = vector.shape_cast %307 : vector<1x32x64xbf16> to vector<32x64xbf16>
    %c1_94 = arith.constant 1 : index
    %c0_95 = arith.constant 0 : index
    %c0_96 = arith.constant 0 : index
    %309 = vector.load %arg7[%c1_94, %c0_95, %c0_96] : memref<2x64x32xbf16, #tpu.memory_space<vmem>>, vector<1x64x32xbf16>
    %310 = vector.shape_cast %309 : vector<1x64x32xbf16> to vector<64x32xbf16>
    %311 = arith.truncf %306 : vector<32x32xf32> to vector<32x32xbf16>
    %cst_97 = arith.constant dense<0.000000e+00> : vector<32x64xf32>
    %312 = tpu.matmul %311, %308, %cst_97 {dimension_numbers = #tpu.dot_dimension_numbers<[1], [0], [0], [1], [0, 0, 1, 1], [], []>} : vector<32x32xbf16>, vector<32x64xbf16>, vector<32x64xf32> -> vector<32x64xf32>
    %313 = vector.broadcast %183 : vector<1x64xf32> to vector<32x64xf32>
    %314 = arith.addf %312, %313 : vector<32x64xf32>
    %cst_98 = arith.constant 0.000000e+00 : f32
    %315 = vector.broadcast %cst_98 : f32 to vector<32x64xf32>
    %316 = arith.maximumf %314, %315 : vector<32x64xf32>
    %317 = arith.truncf %316 : vector<32x64xf32> to vector<32x64xbf16>
    %cst_99 = arith.constant dense<0.000000e+00> : vector<32x32xf32>
    %318 = tpu.matmul %317, %310, %cst_99 {dimension_numbers = #tpu.dot_dimension_numbers<[1], [0], [0], [1], [0, 0, 1, 1], [], []>} : vector<32x64xbf16>, vector<64x32xbf16>, vector<32x32xf32> -> vector<32x32xf32>
    %319 = vector.broadcast %184 : vector<1x32xf32> to vector<32x32xf32>
    %320 = arith.addf %318, %319 : vector<32x32xf32>
    %321 = arith.addf %306, %320 : vector<32x32xf32>
    %cst_100 = arith.constant dense<0.000000e+00> : vector<32xf32>
    %322 = vector.multi_reduction <add>, %321, %cst_100 [1] : vector<32x32xf32> to vector<32xf32>
    %323 = vector.shape_cast %322 : vector<32xf32> to vector<32x1xf32>
    %cst_101 = arith.constant 3.200000e+01 : f32
    %324 = vector.broadcast %cst_101 : f32 to vector<32x1xf32>
    %325 = arith.divf %323, %324 : vector<32x1xf32>
    %326 = vector.broadcast %325 : vector<32x1xf32> to vector<32x32xf32>
    %327 = arith.subf %321, %326 : vector<32x32xf32>
    %328 = arith.mulf %327, %327 : vector<32x32xf32>
    %cst_102 = arith.constant dense<0.000000e+00> : vector<32xf32>
    %329 = vector.multi_reduction <add>, %328, %cst_102 [1] : vector<32x32xf32> to vector<32xf32>
    %330 = vector.shape_cast %329 : vector<32xf32> to vector<32x1xf32>
    %cst_103 = arith.constant 3.200000e+01 : f32
    %331 = vector.broadcast %cst_103 : f32 to vector<32x1xf32>
    %332 = arith.divf %330, %331 : vector<32x1xf32>
    %333 = vector.broadcast %325 : vector<32x1xf32> to vector<32x32xf32>
    %334 = arith.subf %321, %333 : vector<32x32xf32>
    %cst_104 = arith.constant 9.99999974E-6 : f32
    %335 = vector.broadcast %cst_104 : f32 to vector<32x1xf32>
    %336 = arith.addf %332, %335 : vector<32x1xf32>
    %337 = math.rsqrt %336 : vector<32x1xf32>
    %338 = vector.broadcast %337 : vector<32x1xf32> to vector<32x32xf32>
    %339 = arith.mulf %334, %338 : vector<32x32xf32>
    %340 = vector.broadcast %187 : vector<1x32xf32> to vector<32x32xf32>
    %341 = arith.mulf %339, %340 : vector<32x32xf32>
    %342 = vector.broadcast %188 : vector<1x32xf32> to vector<32x32xf32>
    %343 = arith.addf %341, %342 : vector<32x32xf32>
    %cst_105 = arith.constant dense<0.000000e+00> : vector<32xf32>
    %344 = vector.multi_reduction <add>, %343, %cst_105 [1] : vector<32x32xf32> to vector<32xf32>
    %345 = vector.shape_cast %344 : vector<32xf32> to vector<32x1xf32>
    %cst_106 = arith.constant 3.200000e+01 : f32
    %346 = vector.broadcast %cst_106 : f32 to vector<32x1xf32>
    %347 = arith.divf %345, %346 : vector<32x1xf32>
    %348 = vector.broadcast %347 : vector<32x1xf32> to vector<32x32xf32>
    %349 = arith.subf %343, %348 : vector<32x32xf32>
    %350 = arith.mulf %349, %349 : vector<32x32xf32>
    %cst_107 = arith.constant dense<0.000000e+00> : vector<32xf32>
    %351 = vector.multi_reduction <add>, %350, %cst_107 [1] : vector<32x32xf32> to vector<32xf32>
    %352 = vector.shape_cast %351 : vector<32xf32> to vector<32x1xf32>
    %cst_108 = arith.constant 3.200000e+01 : f32
    %353 = vector.broadcast %cst_108 : f32 to vector<32x1xf32>
    %354 = arith.divf %352, %353 : vector<32x1xf32>
    %355 = vector.broadcast %347 : vector<32x1xf32> to vector<32x32xf32>
    %356 = arith.subf %343, %355 : vector<32x32xf32>
    %cst_109 = arith.constant 9.99999974E-6 : f32
    %357 = vector.broadcast %cst_109 : f32 to vector<32x1xf32>
    %358 = arith.addf %354, %357 : vector<32x1xf32>
    %359 = math.rsqrt %358 : vector<32x1xf32>
    %360 = vector.broadcast %359 : vector<32x1xf32> to vector<32x32xf32>
    %361 = arith.mulf %356, %360 : vector<32x32xf32>
    %362 = vector.broadcast %2 : vector<1x32xf32> to vector<32x32xf32>
    %363 = arith.mulf %361, %362 : vector<32x32xf32>
    %364 = vector.broadcast %3 : vector<1x32xf32> to vector<32x32xf32>
    %365 = arith.addf %363, %364 : vector<32x32xf32>
    %366 = vector.shape_cast %4 : vector<4x32xf32> to vector<1x4x32xf32>
    %367 = vector.shape_cast %366 : vector<1x4x32xf32> to vector<1x4x32xf32>
    %368 = vector.broadcast %367 : vector<1x4x32xf32> to vector<2x4x32xf32>
    %369 = vector.shape_cast %368 : vector<2x4x32xf32> to vector<8x32xf32>
    %c0_110 = arith.constant 0 : index
    %c0_111 = arith.constant 0 : index
    %c0_112 = arith.constant 0 : index
    %370 = vector.load %arg16[%c0_110, %c0_111, %c0_112] : memref<2x16x128xf32, #tpu.memory_space<vmem>>, vector<1x16x128xf32>
    %371 = vector.shape_cast %370 : vector<1x16x128xf32> to vector<16x128xf32>
    %372 = vector.extract_strided_slice %371 {offsets = [0, 0], sizes = [1, 96], strides = [1, 1]} : vector<16x128xf32> to vector<1x96xf32>
    %373 = vector.extract_strided_slice %371 {offsets = [1, 0], sizes = [1, 32], strides = [1, 1]} : vector<16x128xf32> to vector<1x32xf32>
    %374 = vector.extract_strided_slice %371 {offsets = [2, 0], sizes = [1, 32], strides = [1, 1]} : vector<16x128xf32> to vector<1x32xf32>
    %375 = vector.extract_strided_slice %371 {offsets = [3, 0], sizes = [1, 64], strides = [1, 1]} : vector<16x128xf32> to vector<1x64xf32>
    %376 = vector.extract_strided_slice %371 {offsets = [4, 0], sizes = [1, 32], strides = [1, 1]} : vector<16x128xf32> to vector<1x32xf32>
    %377 = vector.extract_strided_slice %371 {offsets = [5, 0], sizes = [1, 64], strides = [1, 1]} : vector<16x128xf32> to vector<1x64xf32>
    %378 = vector.extract_strided_slice %371 {offsets = [6, 0], sizes = [1, 32], strides = [1, 1]} : vector<16x128xf32> to vector<1x32xf32>
    %379 = vector.extract_strided_slice %371 {offsets = [7, 0], sizes = [1, 32], strides = [1, 1]} : vector<16x128xf32> to vector<1x32xf32>
    %380 = vector.extract_strided_slice %371 {offsets = [8, 0], sizes = [1, 32], strides = [1, 1]} : vector<16x128xf32> to vector<1x32xf32>
    %381 = vector.extract_strided_slice %371 {offsets = [9, 0], sizes = [1, 32], strides = [1, 1]} : vector<16x128xf32> to vector<1x32xf32>
    %382 = vector.extract_strided_slice %371 {offsets = [10, 0], sizes = [1, 32], strides = [1, 1]} : vector<16x128xf32> to vector<1x32xf32>
    %383 = vector.extract_strided_slice %371 {offsets = [11, 0], sizes = [1, 32], strides = [1, 1]} : vector<16x128xf32> to vector<1x32xf32>
    %384 = vector.extract_strided_slice %371 {offsets = [12, 0], sizes = [1, 32], strides = [1, 1]} : vector<16x128xf32> to vector<1x32xf32>
    %c0_113 = arith.constant 0 : index
    %c0_114 = arith.constant 0 : index
    %c0_115 = arith.constant 0 : index
    %385 = vector.load %arg9[%c0_113, %c0_114, %c0_115] : memref<2x32x96xbf16, #tpu.memory_space<vmem>>, vector<1x32x96xbf16>
    %386 = vector.shape_cast %385 : vector<1x32x96xbf16> to vector<32x96xbf16>
    %c0_116 = arith.constant 0 : index
    %c0_117 = arith.constant 0 : index
    %c0_118 = arith.constant 0 : index
    %387 = vector.load %arg10[%c0_116, %c0_117, %c0_118] : memref<2x32x32xbf16, #tpu.memory_space<vmem>>, vector<1x32x32xbf16>
    %388 = vector.shape_cast %387 : vector<1x32x32xbf16> to vector<32x32xbf16>
    %389 = arith.truncf %369 : vector<8x32xf32> to vector<8x32xbf16>
    %cst_119 = arith.constant dense<0.000000e+00> : vector<8x96xf32>
    %390 = tpu.matmul %389, %386, %cst_119 {dimension_numbers = #tpu.dot_dimension_numbers<[1], [0], [0], [1], [0, 0, 1, 1], [], []>} : vector<8x32xbf16>, vector<32x96xbf16>, vector<8x96xf32> -> vector<8x96xf32>
    %391 = vector.broadcast %372 : vector<1x96xf32> to vector<8x96xf32>
    %392 = arith.addf %390, %391 : vector<8x96xf32>
    %393 = vector.extract_strided_slice %392 {offsets = [0, 0], sizes = [8, 32], strides = [1, 1]} : vector<8x96xf32> to vector<8x32xf32>
    %394 = vector.extract_strided_slice %392 {offsets = [0, 32], sizes = [8, 32], strides = [1, 1]} : vector<8x96xf32> to vector<8x32xf32>
    %395 = vector.extract_strided_slice %392 {offsets = [0, 64], sizes = [8, 32], strides = [1, 1]} : vector<8x96xf32> to vector<8x32xf32>
    %396 = vector.shape_cast %393 : vector<8x32xf32> to vector<2x4x32xf32>
    %397 = arith.truncf %396 : vector<2x4x32xf32> to vector<2x4x32xbf16>
    %398 = vector.shape_cast %394 : vector<8x32xf32> to vector<2x4x32xf32>
    %399 = arith.truncf %398 : vector<2x4x32xf32> to vector<2x4x32xbf16>
    %400 = vector.shape_cast %395 : vector<8x32xf32> to vector<2x4x32xf32>
    %401 = arith.truncf %400 : vector<2x4x32xf32> to vector<2x4x32xbf16>
    %402 = vector.extract_strided_slice %397 {offsets = [0, 0, 0], sizes = [2, 4, 8], strides = [1, 1, 1]} : vector<2x4x32xbf16> to vector<2x4x8xbf16>
    %403 = vector.extract_strided_slice %399 {offsets = [0, 0, 0], sizes = [2, 4, 8], strides = [1, 1, 1]} : vector<2x4x32xbf16> to vector<2x4x8xbf16>
    "tpu.trace_start"() <{level = 10 : i32, message = "bqd,bkd->bqk"}> : () -> ()
    %cst_120 = arith.constant dense<0.000000e+00> : vector<2x4x4xf32>
    %404 = tpu.matmul %402, %403, %cst_120 {dimension_numbers = #tpu.dot_dimension_numbers<[2], [2], [1], [1], [0, 0, 0, 1, 1, 1], [0], [0]>} : vector<2x4x8xbf16>, vector<2x4x8xbf16>, vector<2x4x4xf32> -> vector<2x4x4xf32>
    "tpu.trace_stop"() : () -> ()
    %cst_121 = arith.constant 0.353553385 : f32
    %405 = vector.broadcast %cst_121 : f32 to vector<2x4x4xf32>
    %406 = arith.mulf %404, %405 : vector<2x4x4xf32>
    %cst_122 = arith.constant dense<0xFF800000> : vector<2x4xf32>
    %407 = vector.multi_reduction <maximumf>, %406, %cst_122 [2] : vector<2x4x4xf32> to vector<2x4xf32>
    %408 = vector.shape_cast %407 : vector<2x4xf32> to vector<2x4x1xf32>
    %409 = vector.broadcast %408 : vector<2x4x1xf32> to vector<2x4x4xf32>
    %410 = arith.subf %406, %409 : vector<2x4x4xf32>
    %411 = math.exp %410 : vector<2x4x4xf32>
    %cst_123 = arith.constant dense<0.000000e+00> : vector<2x4xf32>
    %412 = vector.multi_reduction <add>, %411, %cst_123 [2] : vector<2x4x4xf32> to vector<2x4xf32>
    %413 = vector.shape_cast %412 : vector<2x4xf32> to vector<2x4x1xf32>
    %414 = tpu.reciprocal %413 {approx = true} : vector<2x4x1xf32> -> vector<2x4x1xf32>
    %415 = vector.broadcast %414 : vector<2x4x1xf32> to vector<2x4x4xf32>
    %416 = arith.mulf %411, %415 : vector<2x4x4xf32>
    %417 = arith.truncf %416 : vector<2x4x4xf32> to vector<2x4x4xbf16>
    %418 = vector.extract_strided_slice %401 {offsets = [0, 0, 0], sizes = [2, 4, 8], strides = [1, 1, 1]} : vector<2x4x32xbf16> to vector<2x4x8xbf16>
    "tpu.trace_start"() <{level = 10 : i32, message = "bqk,bkd->bqd"}> : () -> ()
    %cst_124 = arith.constant dense<0.000000e+00> : vector<2x4x8xf32>
    %419 = tpu.matmul %417, %418, %cst_124 {dimension_numbers = #tpu.dot_dimension_numbers<[2], [1], [1], [2], [0, 0, 0, 1, 1, 2], [0], [0]>} : vector<2x4x4xbf16>, vector<2x4x8xbf16>, vector<2x4x8xf32> -> vector<2x4x8xf32>
    "tpu.trace_stop"() : () -> ()
    %420 = vector.extract_strided_slice %397 {offsets = [0, 0, 8], sizes = [2, 4, 8], strides = [1, 1, 1]} : vector<2x4x32xbf16> to vector<2x4x8xbf16>
    %421 = vector.extract_strided_slice %399 {offsets = [0, 0, 8], sizes = [2, 4, 8], strides = [1, 1, 1]} : vector<2x4x32xbf16> to vector<2x4x8xbf16>
    "tpu.trace_start"() <{level = 10 : i32, message = "bqd,bkd->bqk"}> : () -> ()
    %cst_125 = arith.constant dense<0.000000e+00> : vector<2x4x4xf32>
    %422 = tpu.matmul %420, %421, %cst_125 {dimension_numbers = #tpu.dot_dimension_numbers<[2], [2], [1], [1], [0, 0, 0, 1, 1, 1], [0], [0]>} : vector<2x4x8xbf16>, vector<2x4x8xbf16>, vector<2x4x4xf32> -> vector<2x4x4xf32>
    "tpu.trace_stop"() : () -> ()
    %cst_126 = arith.constant 0.353553385 : f32
    %423 = vector.broadcast %cst_126 : f32 to vector<2x4x4xf32>
    %424 = arith.mulf %422, %423 : vector<2x4x4xf32>
    %cst_127 = arith.constant dense<0xFF800000> : vector<2x4xf32>
    %425 = vector.multi_reduction <maximumf>, %424, %cst_127 [2] : vector<2x4x4xf32> to vector<2x4xf32>
    %426 = vector.shape_cast %425 : vector<2x4xf32> to vector<2x4x1xf32>
    %427 = vector.broadcast %426 : vector<2x4x1xf32> to vector<2x4x4xf32>
    %428 = arith.subf %424, %427 : vector<2x4x4xf32>
    %429 = math.exp %428 : vector<2x4x4xf32>
    %cst_128 = arith.constant dense<0.000000e+00> : vector<2x4xf32>
    %430 = vector.multi_reduction <add>, %429, %cst_128 [2] : vector<2x4x4xf32> to vector<2x4xf32>
    %431 = vector.shape_cast %430 : vector<2x4xf32> to vector<2x4x1xf32>
    %432 = tpu.reciprocal %431 {approx = true} : vector<2x4x1xf32> -> vector<2x4x1xf32>
    %433 = vector.broadcast %432 : vector<2x4x1xf32> to vector<2x4x4xf32>
    %434 = arith.mulf %429, %433 : vector<2x4x4xf32>
    %435 = arith.truncf %434 : vector<2x4x4xf32> to vector<2x4x4xbf16>
    %436 = vector.extract_strided_slice %401 {offsets = [0, 0, 8], sizes = [2, 4, 8], strides = [1, 1, 1]} : vector<2x4x32xbf16> to vector<2x4x8xbf16>
    "tpu.trace_start"() <{level = 10 : i32, message = "bqk,bkd->bqd"}> : () -> ()
    %cst_129 = arith.constant dense<0.000000e+00> : vector<2x4x8xf32>
    %437 = tpu.matmul %435, %436, %cst_129 {dimension_numbers = #tpu.dot_dimension_numbers<[2], [1], [1], [2], [0, 0, 0, 1, 1, 2], [0], [0]>} : vector<2x4x4xbf16>, vector<2x4x8xbf16>, vector<2x4x8xf32> -> vector<2x4x8xf32>
    "tpu.trace_stop"() : () -> ()
    %438 = vector.extract_strided_slice %397 {offsets = [0, 0, 16], sizes = [2, 4, 8], strides = [1, 1, 1]} : vector<2x4x32xbf16> to vector<2x4x8xbf16>
    %439 = vector.extract_strided_slice %399 {offsets = [0, 0, 16], sizes = [2, 4, 8], strides = [1, 1, 1]} : vector<2x4x32xbf16> to vector<2x4x8xbf16>
    "tpu.trace_start"() <{level = 10 : i32, message = "bqd,bkd->bqk"}> : () -> ()
    %cst_130 = arith.constant dense<0.000000e+00> : vector<2x4x4xf32>
    %440 = tpu.matmul %438, %439, %cst_130 {dimension_numbers = #tpu.dot_dimension_numbers<[2], [2], [1], [1], [0, 0, 0, 1, 1, 1], [0], [0]>} : vector<2x4x8xbf16>, vector<2x4x8xbf16>, vector<2x4x4xf32> -> vector<2x4x4xf32>
    "tpu.trace_stop"() : () -> ()
    %cst_131 = arith.constant 0.353553385 : f32
    %441 = vector.broadcast %cst_131 : f32 to vector<2x4x4xf32>
    %442 = arith.mulf %440, %441 : vector<2x4x4xf32>
    %cst_132 = arith.constant dense<0xFF800000> : vector<2x4xf32>
    %443 = vector.multi_reduction <maximumf>, %442, %cst_132 [2] : vector<2x4x4xf32> to vector<2x4xf32>
    %444 = vector.shape_cast %443 : vector<2x4xf32> to vector<2x4x1xf32>
    %445 = vector.broadcast %444 : vector<2x4x1xf32> to vector<2x4x4xf32>
    %446 = arith.subf %442, %445 : vector<2x4x4xf32>
    %447 = math.exp %446 : vector<2x4x4xf32>
    %cst_133 = arith.constant dense<0.000000e+00> : vector<2x4xf32>
    %448 = vector.multi_reduction <add>, %447, %cst_133 [2] : vector<2x4x4xf32> to vector<2x4xf32>
    %449 = vector.shape_cast %448 : vector<2x4xf32> to vector<2x4x1xf32>
    %450 = tpu.reciprocal %449 {approx = true} : vector<2x4x1xf32> -> vector<2x4x1xf32>
    %451 = vector.broadcast %450 : vector<2x4x1xf32> to vector<2x4x4xf32>
    %452 = arith.mulf %447, %451 : vector<2x4x4xf32>
    %453 = arith.truncf %452 : vector<2x4x4xf32> to vector<2x4x4xbf16>
    %454 = vector.extract_strided_slice %401 {offsets = [0, 0, 16], sizes = [2, 4, 8], strides = [1, 1, 1]} : vector<2x4x32xbf16> to vector<2x4x8xbf16>
    "tpu.trace_start"() <{level = 10 : i32, message = "bqk,bkd->bqd"}> : () -> ()
    %cst_134 = arith.constant dense<0.000000e+00> : vector<2x4x8xf32>
    %455 = tpu.matmul %453, %454, %cst_134 {dimension_numbers = #tpu.dot_dimension_numbers<[2], [1], [1], [2], [0, 0, 0, 1, 1, 2], [0], [0]>} : vector<2x4x4xbf16>, vector<2x4x8xbf16>, vector<2x4x8xf32> -> vector<2x4x8xf32>
    "tpu.trace_stop"() : () -> ()
    %456 = vector.extract_strided_slice %397 {offsets = [0, 0, 24], sizes = [2, 4, 8], strides = [1, 1, 1]} : vector<2x4x32xbf16> to vector<2x4x8xbf16>
    %457 = vector.extract_strided_slice %399 {offsets = [0, 0, 24], sizes = [2, 4, 8], strides = [1, 1, 1]} : vector<2x4x32xbf16> to vector<2x4x8xbf16>
    "tpu.trace_start"() <{level = 10 : i32, message = "bqd,bkd->bqk"}> : () -> ()
    %cst_135 = arith.constant dense<0.000000e+00> : vector<2x4x4xf32>
    %458 = tpu.matmul %456, %457, %cst_135 {dimension_numbers = #tpu.dot_dimension_numbers<[2], [2], [1], [1], [0, 0, 0, 1, 1, 1], [0], [0]>} : vector<2x4x8xbf16>, vector<2x4x8xbf16>, vector<2x4x4xf32> -> vector<2x4x4xf32>
    "tpu.trace_stop"() : () -> ()
    %cst_136 = arith.constant 0.353553385 : f32
    %459 = vector.broadcast %cst_136 : f32 to vector<2x4x4xf32>
    %460 = arith.mulf %458, %459 : vector<2x4x4xf32>
    %cst_137 = arith.constant dense<0xFF800000> : vector<2x4xf32>
    %461 = vector.multi_reduction <maximumf>, %460, %cst_137 [2] : vector<2x4x4xf32> to vector<2x4xf32>
    %462 = vector.shape_cast %461 : vector<2x4xf32> to vector<2x4x1xf32>
    %463 = vector.broadcast %462 : vector<2x4x1xf32> to vector<2x4x4xf32>
    %464 = arith.subf %460, %463 : vector<2x4x4xf32>
    %465 = math.exp %464 : vector<2x4x4xf32>
    %cst_138 = arith.constant dense<0.000000e+00> : vector<2x4xf32>
    %466 = vector.multi_reduction <add>, %465, %cst_138 [2] : vector<2x4x4xf32> to vector<2x4xf32>
    %467 = vector.shape_cast %466 : vector<2x4xf32> to vector<2x4x1xf32>
    %468 = tpu.reciprocal %467 {approx = true} : vector<2x4x1xf32> -> vector<2x4x1xf32>
    %469 = vector.broadcast %468 : vector<2x4x1xf32> to vector<2x4x4xf32>
    %470 = arith.mulf %465, %469 : vector<2x4x4xf32>
    %471 = arith.truncf %470 : vector<2x4x4xf32> to vector<2x4x4xbf16>
    %472 = vector.extract_strided_slice %401 {offsets = [0, 0, 24], sizes = [2, 4, 8], strides = [1, 1, 1]} : vector<2x4x32xbf16> to vector<2x4x8xbf16>
    "tpu.trace_start"() <{level = 10 : i32, message = "bqk,bkd->bqd"}> : () -> ()
    %cst_139 = arith.constant dense<0.000000e+00> : vector<2x4x8xf32>
    %473 = tpu.matmul %471, %472, %cst_139 {dimension_numbers = #tpu.dot_dimension_numbers<[2], [1], [1], [2], [0, 0, 0, 1, 1, 2], [0], [0]>} : vector<2x4x4xbf16>, vector<2x4x8xbf16>, vector<2x4x8xf32> -> vector<2x4x8xf32>
    "tpu.trace_stop"() : () -> ()
    %474 = tpu.concatenate %419, %437, %455, %473 in 2 : vector<2x4x8xf32>, vector<2x4x8xf32>, vector<2x4x8xf32>, vector<2x4x8xf32> -> vector<2x4x32xf32>
    %475 = vector.shape_cast %474 : vector<2x4x32xf32> to vector<8x32xf32>
    %476 = arith.truncf %475 : vector<8x32xf32> to vector<8x32xbf16>
    %cst_140 = arith.constant dense<0.000000e+00> : vector<8x32xf32>
    %477 = tpu.matmul %476, %388, %cst_140 {dimension_numbers = #tpu.dot_dimension_numbers<[1], [0], [0], [1], [0, 0, 1, 1], [], []>} : vector<8x32xbf16>, vector<32x32xbf16>, vector<8x32xf32> -> vector<8x32xf32>
    %478 = vector.broadcast %373 : vector<1x32xf32> to vector<8x32xf32>
    %479 = arith.addf %477, %478 : vector<8x32xf32>
    %480 = arith.addf %369, %479 : vector<8x32xf32>
    %cst_141 = arith.constant dense<0.000000e+00> : vector<8xf32>
    %481 = vector.multi_reduction <add>, %480, %cst_141 [1] : vector<8x32xf32> to vector<8xf32>
    %482 = vector.shape_cast %481 : vector<8xf32> to vector<8x1xf32>
    %cst_142 = arith.constant 3.200000e+01 : f32
    %483 = vector.broadcast %cst_142 : f32 to vector<8x1xf32>
    %484 = arith.divf %482, %483 : vector<8x1xf32>
    %485 = vector.broadcast %484 : vector<8x1xf32> to vector<8x32xf32>
    %486 = arith.subf %480, %485 : vector<8x32xf32>
    %487 = arith.mulf %486, %486 : vector<8x32xf32>
    %cst_143 = arith.constant dense<0.000000e+00> : vector<8xf32>
    %488 = vector.multi_reduction <add>, %487, %cst_143 [1] : vector<8x32xf32> to vector<8xf32>
    %489 = vector.shape_cast %488 : vector<8xf32> to vector<8x1xf32>
    %cst_144 = arith.constant 3.200000e+01 : f32
    %490 = vector.broadcast %cst_144 : f32 to vector<8x1xf32>
    %491 = arith.divf %489, %490 : vector<8x1xf32>
    %492 = vector.broadcast %484 : vector<8x1xf32> to vector<8x32xf32>
    %493 = arith.subf %480, %492 : vector<8x32xf32>
    %cst_145 = arith.constant 9.99999974E-6 : f32
    %494 = vector.broadcast %cst_145 : f32 to vector<8x1xf32>
    %495 = arith.addf %491, %494 : vector<8x1xf32>
    %496 = math.rsqrt %495 : vector<8x1xf32>
    %497 = vector.broadcast %496 : vector<8x1xf32> to vector<8x32xf32>
    %498 = arith.mulf %493, %497 : vector<8x32xf32>
    %499 = vector.broadcast %379 : vector<1x32xf32> to vector<8x32xf32>
    %500 = arith.mulf %498, %499 : vector<8x32xf32>
    %501 = vector.broadcast %380 : vector<1x32xf32> to vector<8x32xf32>
    %502 = arith.addf %500, %501 : vector<8x32xf32>
    %c0_146 = arith.constant 0 : index
    %c0_147 = arith.constant 0 : index
    %c0_148 = arith.constant 0 : index
    %503 = vector.load %arg11[%c0_146, %c0_147, %c0_148] : memref<2x32x32xbf16, #tpu.memory_space<vmem>>, vector<1x32x32xbf16>
    %504 = vector.shape_cast %503 : vector<1x32x32xbf16> to vector<32x32xbf16>
    %c0_149 = arith.constant 0 : index
    %c0_150 = arith.constant 0 : index
    %c0_151 = arith.constant 0 : index
    %505 = vector.load %arg12[%c0_149, %c0_150, %c0_151] : memref<2x32x64xbf16, #tpu.memory_space<vmem>>, vector<1x32x64xbf16>
    %506 = vector.shape_cast %505 : vector<1x32x64xbf16> to vector<32x64xbf16>
    %c0_152 = arith.constant 0 : index
    %c0_153 = arith.constant 0 : index
    %c0_154 = arith.constant 0 : index
    %507 = vector.load %arg13[%c0_152, %c0_153, %c0_154] : memref<2x32x32xbf16, #tpu.memory_space<vmem>>, vector<1x32x32xbf16>
    %508 = vector.shape_cast %507 : vector<1x32x32xbf16> to vector<32x32xbf16>
    %509 = arith.truncf %502 : vector<8x32xf32> to vector<8x32xbf16>
    %cst_155 = arith.constant dense<0.000000e+00> : vector<8x32xf32>
    %510 = tpu.matmul %509, %504, %cst_155 {dimension_numbers = #tpu.dot_dimension_numbers<[1], [0], [0], [1], [0, 0, 1, 1], [], []>} : vector<8x32xbf16>, vector<32x32xbf16>, vector<8x32xf32> -> vector<8x32xf32>
    %511 = vector.broadcast %374 : vector<1x32xf32> to vector<8x32xf32>
    %512 = arith.addf %510, %511 : vector<8x32xf32>
    %513 = arith.truncf %365 : vector<32x32xf32> to vector<32x32xbf16>
    %cst_156 = arith.constant dense<0.000000e+00> : vector<32x64xf32>
    %514 = tpu.matmul %513, %506, %cst_156 {dimension_numbers = #tpu.dot_dimension_numbers<[1], [0], [0], [1], [0, 0, 1, 1], [], []>} : vector<32x32xbf16>, vector<32x64xbf16>, vector<32x64xf32> -> vector<32x64xf32>
    %515 = vector.broadcast %375 : vector<1x64xf32> to vector<32x64xf32>
    %516 = arith.addf %514, %515 : vector<32x64xf32>
    %517 = vector.extract_strided_slice %516 {offsets = [0, 0], sizes = [32, 32], strides = [1, 1]} : vector<32x64xf32> to vector<32x32xf32>
    %518 = vector.extract_strided_slice %516 {offsets = [0, 32], sizes = [32, 32], strides = [1, 1]} : vector<32x64xf32> to vector<32x32xf32>
    %519 = vector.shape_cast %512 : vector<8x32xf32> to vector<2x4x32xf32>
    %520 = arith.truncf %519 : vector<2x4x32xf32> to vector<2x4x32xbf16>
    %521 = vector.shape_cast %517 : vector<32x32xf32> to vector<2x16x32xf32>
    %522 = arith.truncf %521 : vector<2x16x32xf32> to vector<2x16x32xbf16>
    %523 = vector.shape_cast %518 : vector<32x32xf32> to vector<2x16x32xf32>
    %524 = arith.truncf %523 : vector<2x16x32xf32> to vector<2x16x32xbf16>
    %525 = vector.extract_strided_slice %520 {offsets = [0, 0, 0], sizes = [2, 4, 8], strides = [1, 1, 1]} : vector<2x4x32xbf16> to vector<2x4x8xbf16>
    %526 = vector.extract_strided_slice %522 {offsets = [0, 0, 0], sizes = [2, 16, 8], strides = [1, 1, 1]} : vector<2x16x32xbf16> to vector<2x16x8xbf16>
    "tpu.trace_start"() <{level = 10 : i32, message = "bqd,bkd->bqk"}> : () -> ()
    %cst_157 = arith.constant dense<0.000000e+00> : vector<2x4x16xf32>
    %527 = tpu.matmul %525, %526, %cst_157 {dimension_numbers = #tpu.dot_dimension_numbers<[2], [2], [1], [1], [0, 0, 0, 1, 1, 1], [0], [0]>} : vector<2x4x8xbf16>, vector<2x16x8xbf16>, vector<2x4x16xf32> -> vector<2x4x16xf32>
    "tpu.trace_stop"() : () -> ()
    %cst_158 = arith.constant 0.353553385 : f32
    %528 = vector.broadcast %cst_158 : f32 to vector<2x4x16xf32>
    %529 = arith.mulf %527, %528 : vector<2x4x16xf32>
    %cst_159 = arith.constant dense<0xFF800000> : vector<2x4xf32>
    %530 = vector.multi_reduction <maximumf>, %529, %cst_159 [2] : vector<2x4x16xf32> to vector<2x4xf32>
    %531 = vector.shape_cast %530 : vector<2x4xf32> to vector<2x4x1xf32>
    %532 = vector.broadcast %531 : vector<2x4x1xf32> to vector<2x4x16xf32>
    %533 = arith.subf %529, %532 : vector<2x4x16xf32>
    %534 = math.exp %533 : vector<2x4x16xf32>
    %cst_160 = arith.constant dense<0.000000e+00> : vector<2x4xf32>
    %535 = vector.multi_reduction <add>, %534, %cst_160 [2] : vector<2x4x16xf32> to vector<2x4xf32>
    %536 = vector.shape_cast %535 : vector<2x4xf32> to vector<2x4x1xf32>
    %537 = tpu.reciprocal %536 {approx = true} : vector<2x4x1xf32> -> vector<2x4x1xf32>
    %538 = vector.broadcast %537 : vector<2x4x1xf32> to vector<2x4x16xf32>
    %539 = arith.mulf %534, %538 : vector<2x4x16xf32>
    %540 = arith.truncf %539 : vector<2x4x16xf32> to vector<2x4x16xbf16>
    %541 = vector.extract_strided_slice %524 {offsets = [0, 0, 0], sizes = [2, 16, 8], strides = [1, 1, 1]} : vector<2x16x32xbf16> to vector<2x16x8xbf16>
    "tpu.trace_start"() <{level = 10 : i32, message = "bqk,bkd->bqd"}> : () -> ()
    %cst_161 = arith.constant dense<0.000000e+00> : vector<2x4x8xf32>
    %542 = tpu.matmul %540, %541, %cst_161 {dimension_numbers = #tpu.dot_dimension_numbers<[2], [1], [1], [2], [0, 0, 0, 1, 1, 2], [0], [0]>} : vector<2x4x16xbf16>, vector<2x16x8xbf16>, vector<2x4x8xf32> -> vector<2x4x8xf32>
    "tpu.trace_stop"() : () -> ()
    %543 = vector.extract_strided_slice %520 {offsets = [0, 0, 8], sizes = [2, 4, 8], strides = [1, 1, 1]} : vector<2x4x32xbf16> to vector<2x4x8xbf16>
    %544 = vector.extract_strided_slice %522 {offsets = [0, 0, 8], sizes = [2, 16, 8], strides = [1, 1, 1]} : vector<2x16x32xbf16> to vector<2x16x8xbf16>
    "tpu.trace_start"() <{level = 10 : i32, message = "bqd,bkd->bqk"}> : () -> ()
    %cst_162 = arith.constant dense<0.000000e+00> : vector<2x4x16xf32>
    %545 = tpu.matmul %543, %544, %cst_162 {dimension_numbers = #tpu.dot_dimension_numbers<[2], [2], [1], [1], [0, 0, 0, 1, 1, 1], [0], [0]>} : vector<2x4x8xbf16>, vector<2x16x8xbf16>, vector<2x4x16xf32> -> vector<2x4x16xf32>
    "tpu.trace_stop"() : () -> ()
    %cst_163 = arith.constant 0.353553385 : f32
    %546 = vector.broadcast %cst_163 : f32 to vector<2x4x16xf32>
    %547 = arith.mulf %545, %546 : vector<2x4x16xf32>
    %cst_164 = arith.constant dense<0xFF800000> : vector<2x4xf32>
    %548 = vector.multi_reduction <maximumf>, %547, %cst_164 [2] : vector<2x4x16xf32> to vector<2x4xf32>
    %549 = vector.shape_cast %548 : vector<2x4xf32> to vector<2x4x1xf32>
    %550 = vector.broadcast %549 : vector<2x4x1xf32> to vector<2x4x16xf32>
    %551 = arith.subf %547, %550 : vector<2x4x16xf32>
    %552 = math.exp %551 : vector<2x4x16xf32>
    %cst_165 = arith.constant dense<0.000000e+00> : vector<2x4xf32>
    %553 = vector.multi_reduction <add>, %552, %cst_165 [2] : vector<2x4x16xf32> to vector<2x4xf32>
    %554 = vector.shape_cast %553 : vector<2x4xf32> to vector<2x4x1xf32>
    %555 = tpu.reciprocal %554 {approx = true} : vector<2x4x1xf32> -> vector<2x4x1xf32>
    %556 = vector.broadcast %555 : vector<2x4x1xf32> to vector<2x4x16xf32>
    %557 = arith.mulf %552, %556 : vector<2x4x16xf32>
    %558 = arith.truncf %557 : vector<2x4x16xf32> to vector<2x4x16xbf16>
    %559 = vector.extract_strided_slice %524 {offsets = [0, 0, 8], sizes = [2, 16, 8], strides = [1, 1, 1]} : vector<2x16x32xbf16> to vector<2x16x8xbf16>
    "tpu.trace_start"() <{level = 10 : i32, message = "bqk,bkd->bqd"}> : () -> ()
    %cst_166 = arith.constant dense<0.000000e+00> : vector<2x4x8xf32>
    %560 = tpu.matmul %558, %559, %cst_166 {dimension_numbers = #tpu.dot_dimension_numbers<[2], [1], [1], [2], [0, 0, 0, 1, 1, 2], [0], [0]>} : vector<2x4x16xbf16>, vector<2x16x8xbf16>, vector<2x4x8xf32> -> vector<2x4x8xf32>
    "tpu.trace_stop"() : () -> ()
    %561 = vector.extract_strided_slice %520 {offsets = [0, 0, 16], sizes = [2, 4, 8], strides = [1, 1, 1]} : vector<2x4x32xbf16> to vector<2x4x8xbf16>
    %562 = vector.extract_strided_slice %522 {offsets = [0, 0, 16], sizes = [2, 16, 8], strides = [1, 1, 1]} : vector<2x16x32xbf16> to vector<2x16x8xbf16>
    "tpu.trace_start"() <{level = 10 : i32, message = "bqd,bkd->bqk"}> : () -> ()
    %cst_167 = arith.constant dense<0.000000e+00> : vector<2x4x16xf32>
    %563 = tpu.matmul %561, %562, %cst_167 {dimension_numbers = #tpu.dot_dimension_numbers<[2], [2], [1], [1], [0, 0, 0, 1, 1, 1], [0], [0]>} : vector<2x4x8xbf16>, vector<2x16x8xbf16>, vector<2x4x16xf32> -> vector<2x4x16xf32>
    "tpu.trace_stop"() : () -> ()
    %cst_168 = arith.constant 0.353553385 : f32
    %564 = vector.broadcast %cst_168 : f32 to vector<2x4x16xf32>
    %565 = arith.mulf %563, %564 : vector<2x4x16xf32>
    %cst_169 = arith.constant dense<0xFF800000> : vector<2x4xf32>
    %566 = vector.multi_reduction <maximumf>, %565, %cst_169 [2] : vector<2x4x16xf32> to vector<2x4xf32>
    %567 = vector.shape_cast %566 : vector<2x4xf32> to vector<2x4x1xf32>
    %568 = vector.broadcast %567 : vector<2x4x1xf32> to vector<2x4x16xf32>
    %569 = arith.subf %565, %568 : vector<2x4x16xf32>
    %570 = math.exp %569 : vector<2x4x16xf32>
    %cst_170 = arith.constant dense<0.000000e+00> : vector<2x4xf32>
    %571 = vector.multi_reduction <add>, %570, %cst_170 [2] : vector<2x4x16xf32> to vector<2x4xf32>
    %572 = vector.shape_cast %571 : vector<2x4xf32> to vector<2x4x1xf32>
    %573 = tpu.reciprocal %572 {approx = true} : vector<2x4x1xf32> -> vector<2x4x1xf32>
    %574 = vector.broadcast %573 : vector<2x4x1xf32> to vector<2x4x16xf32>
    %575 = arith.mulf %570, %574 : vector<2x4x16xf32>
    %576 = arith.truncf %575 : vector<2x4x16xf32> to vector<2x4x16xbf16>
    %577 = vector.extract_strided_slice %524 {offsets = [0, 0, 16], sizes = [2, 16, 8], strides = [1, 1, 1]} : vector<2x16x32xbf16> to vector<2x16x8xbf16>
    "tpu.trace_start"() <{level = 10 : i32, message = "bqk,bkd->bqd"}> : () -> ()
    %cst_171 = arith.constant dense<0.000000e+00> : vector<2x4x8xf32>
    %578 = tpu.matmul %576, %577, %cst_171 {dimension_numbers = #tpu.dot_dimension_numbers<[2], [1], [1], [2], [0, 0, 0, 1, 1, 2], [0], [0]>} : vector<2x4x16xbf16>, vector<2x16x8xbf16>, vector<2x4x8xf32> -> vector<2x4x8xf32>
    "tpu.trace_stop"() : () -> ()
    %579 = vector.extract_strided_slice %520 {offsets = [0, 0, 24], sizes = [2, 4, 8], strides = [1, 1, 1]} : vector<2x4x32xbf16> to vector<2x4x8xbf16>
    %580 = vector.extract_strided_slice %522 {offsets = [0, 0, 24], sizes = [2, 16, 8], strides = [1, 1, 1]} : vector<2x16x32xbf16> to vector<2x16x8xbf16>
    "tpu.trace_start"() <{level = 10 : i32, message = "bqd,bkd->bqk"}> : () -> ()
    %cst_172 = arith.constant dense<0.000000e+00> : vector<2x4x16xf32>
    %581 = tpu.matmul %579, %580, %cst_172 {dimension_numbers = #tpu.dot_dimension_numbers<[2], [2], [1], [1], [0, 0, 0, 1, 1, 1], [0], [0]>} : vector<2x4x8xbf16>, vector<2x16x8xbf16>, vector<2x4x16xf32> -> vector<2x4x16xf32>
    "tpu.trace_stop"() : () -> ()
    %cst_173 = arith.constant 0.353553385 : f32
    %582 = vector.broadcast %cst_173 : f32 to vector<2x4x16xf32>
    %583 = arith.mulf %581, %582 : vector<2x4x16xf32>
    %cst_174 = arith.constant dense<0xFF800000> : vector<2x4xf32>
    %584 = vector.multi_reduction <maximumf>, %583, %cst_174 [2] : vector<2x4x16xf32> to vector<2x4xf32>
    %585 = vector.shape_cast %584 : vector<2x4xf32> to vector<2x4x1xf32>
    %586 = vector.broadcast %585 : vector<2x4x1xf32> to vector<2x4x16xf32>
    %587 = arith.subf %583, %586 : vector<2x4x16xf32>
    %588 = math.exp %587 : vector<2x4x16xf32>
    %cst_175 = arith.constant dense<0.000000e+00> : vector<2x4xf32>
    %589 = vector.multi_reduction <add>, %588, %cst_175 [2] : vector<2x4x16xf32> to vector<2x4xf32>
    %590 = vector.shape_cast %589 : vector<2x4xf32> to vector<2x4x1xf32>
    %591 = tpu.reciprocal %590 {approx = true} : vector<2x4x1xf32> -> vector<2x4x1xf32>
    %592 = vector.broadcast %591 : vector<2x4x1xf32> to vector<2x4x16xf32>
    %593 = arith.mulf %588, %592 : vector<2x4x16xf32>
    %594 = arith.truncf %593 : vector<2x4x16xf32> to vector<2x4x16xbf16>
    %595 = vector.extract_strided_slice %524 {offsets = [0, 0, 24], sizes = [2, 16, 8], strides = [1, 1, 1]} : vector<2x16x32xbf16> to vector<2x16x8xbf16>
    "tpu.trace_start"() <{level = 10 : i32, message = "bqk,bkd->bqd"}> : () -> ()
    %cst_176 = arith.constant dense<0.000000e+00> : vector<2x4x8xf32>
    %596 = tpu.matmul %594, %595, %cst_176 {dimension_numbers = #tpu.dot_dimension_numbers<[2], [1], [1], [2], [0, 0, 0, 1, 1, 2], [0], [0]>} : vector<2x4x16xbf16>, vector<2x16x8xbf16>, vector<2x4x8xf32> -> vector<2x4x8xf32>
    "tpu.trace_stop"() : () -> ()
    %597 = tpu.concatenate %542, %560, %578, %596 in 2 : vector<2x4x8xf32>, vector<2x4x8xf32>, vector<2x4x8xf32>, vector<2x4x8xf32> -> vector<2x4x32xf32>
    %598 = vector.shape_cast %597 : vector<2x4x32xf32> to vector<8x32xf32>
    %599 = arith.truncf %598 : vector<8x32xf32> to vector<8x32xbf16>
    %cst_177 = arith.constant dense<0.000000e+00> : vector<8x32xf32>
    %600 = tpu.matmul %599, %508, %cst_177 {dimension_numbers = #tpu.dot_dimension_numbers<[1], [0], [0], [1], [0, 0, 1, 1], [], []>} : vector<8x32xbf16>, vector<32x32xbf16>, vector<8x32xf32> -> vector<8x32xf32>
    %601 = vector.broadcast %376 : vector<1x32xf32> to vector<8x32xf32>
    %602 = arith.addf %600, %601 : vector<8x32xf32>
    %603 = arith.addf %502, %602 : vector<8x32xf32>
    %cst_178 = arith.constant dense<0.000000e+00> : vector<8xf32>
    %604 = vector.multi_reduction <add>, %603, %cst_178 [1] : vector<8x32xf32> to vector<8xf32>
    %605 = vector.shape_cast %604 : vector<8xf32> to vector<8x1xf32>
    %cst_179 = arith.constant 3.200000e+01 : f32
    %606 = vector.broadcast %cst_179 : f32 to vector<8x1xf32>
    %607 = arith.divf %605, %606 : vector<8x1xf32>
    %608 = vector.broadcast %607 : vector<8x1xf32> to vector<8x32xf32>
    %609 = arith.subf %603, %608 : vector<8x32xf32>
    %610 = arith.mulf %609, %609 : vector<8x32xf32>
    %cst_180 = arith.constant dense<0.000000e+00> : vector<8xf32>
    %611 = vector.multi_reduction <add>, %610, %cst_180 [1] : vector<8x32xf32> to vector<8xf32>
    %612 = vector.shape_cast %611 : vector<8xf32> to vector<8x1xf32>
    %cst_181 = arith.constant 3.200000e+01 : f32
    %613 = vector.broadcast %cst_181 : f32 to vector<8x1xf32>
    %614 = arith.divf %612, %613 : vector<8x1xf32>
    %615 = vector.broadcast %607 : vector<8x1xf32> to vector<8x32xf32>
    %616 = arith.subf %603, %615 : vector<8x32xf32>
    %cst_182 = arith.constant 9.99999974E-6 : f32
    %617 = vector.broadcast %cst_182 : f32 to vector<8x1xf32>
    %618 = arith.addf %614, %617 : vector<8x1xf32>
    %619 = math.rsqrt %618 : vector<8x1xf32>
    %620 = vector.broadcast %619 : vector<8x1xf32> to vector<8x32xf32>
    %621 = arith.mulf %616, %620 : vector<8x32xf32>
    %622 = vector.broadcast %381 : vector<1x32xf32> to vector<8x32xf32>
    %623 = arith.mulf %621, %622 : vector<8x32xf32>
    %624 = vector.broadcast %382 : vector<1x32xf32> to vector<8x32xf32>
    %625 = arith.addf %623, %624 : vector<8x32xf32>
    %c0_183 = arith.constant 0 : index
    %c0_184 = arith.constant 0 : index
    %c0_185 = arith.constant 0 : index
    %626 = vector.load %arg14[%c0_183, %c0_184, %c0_185] : memref<2x32x64xbf16, #tpu.memory_space<vmem>>, vector<1x32x64xbf16>
    %627 = vector.shape_cast %626 : vector<1x32x64xbf16> to vector<32x64xbf16>
    %c0_186 = arith.constant 0 : index
    %c0_187 = arith.constant 0 : index
    %c0_188 = arith.constant 0 : index
    %628 = vector.load %arg15[%c0_186, %c0_187, %c0_188] : memref<2x64x32xbf16, #tpu.memory_space<vmem>>, vector<1x64x32xbf16>
    %629 = vector.shape_cast %628 : vector<1x64x32xbf16> to vector<64x32xbf16>
    %630 = arith.truncf %625 : vector<8x32xf32> to vector<8x32xbf16>
    %cst_189 = arith.constant dense<0.000000e+00> : vector<8x64xf32>
    %631 = tpu.matmul %630, %627, %cst_189 {dimension_numbers = #tpu.dot_dimension_numbers<[1], [0], [0], [1], [0, 0, 1, 1], [], []>} : vector<8x32xbf16>, vector<32x64xbf16>, vector<8x64xf32> -> vector<8x64xf32>
    %632 = vector.broadcast %377 : vector<1x64xf32> to vector<8x64xf32>
    %633 = arith.addf %631, %632 : vector<8x64xf32>
    %cst_190 = arith.constant 0.000000e+00 : f32
    %634 = vector.broadcast %cst_190 : f32 to vector<8x64xf32>
    %635 = arith.maximumf %633, %634 : vector<8x64xf32>
    %636 = arith.truncf %635 : vector<8x64xf32> to vector<8x64xbf16>
    %cst_191 = arith.constant dense<0.000000e+00> : vector<8x32xf32>
    %637 = tpu.matmul %636, %629, %cst_191 {dimension_numbers = #tpu.dot_dimension_numbers<[1], [0], [0], [1], [0, 0, 1, 1], [], []>} : vector<8x64xbf16>, vector<64x32xbf16>, vector<8x32xf32> -> vector<8x32xf32>
    %638 = vector.broadcast %378 : vector<1x32xf32> to vector<8x32xf32>
    %639 = arith.addf %637, %638 : vector<8x32xf32>
    %640 = arith.addf %625, %639 : vector<8x32xf32>
    %cst_192 = arith.constant dense<0.000000e+00> : vector<8xf32>
    %641 = vector.multi_reduction <add>, %640, %cst_192 [1] : vector<8x32xf32> to vector<8xf32>
    %642 = vector.shape_cast %641 : vector<8xf32> to vector<8x1xf32>
    %cst_193 = arith.constant 3.200000e+01 : f32
    %643 = vector.broadcast %cst_193 : f32 to vector<8x1xf32>
    %644 = arith.divf %642, %643 : vector<8x1xf32>
    %645 = vector.broadcast %644 : vector<8x1xf32> to vector<8x32xf32>
    %646 = arith.subf %640, %645 : vector<8x32xf32>
    %647 = arith.mulf %646, %646 : vector<8x32xf32>
    %cst_194 = arith.constant dense<0.000000e+00> : vector<8xf32>
    %648 = vector.multi_reduction <add>, %647, %cst_194 [1] : vector<8x32xf32> to vector<8xf32>
    %649 = vector.shape_cast %648 : vector<8xf32> to vector<8x1xf32>
    %cst_195 = arith.constant 3.200000e+01 : f32
    %650 = vector.broadcast %cst_195 : f32 to vector<8x1xf32>
    %651 = arith.divf %649, %650 : vector<8x1xf32>
    %652 = vector.broadcast %644 : vector<8x1xf32> to vector<8x32xf32>
    %653 = arith.subf %640, %652 : vector<8x32xf32>
    %cst_196 = arith.constant 9.99999974E-6 : f32
    %654 = vector.broadcast %cst_196 : f32 to vector<8x1xf32>
    %655 = arith.addf %651, %654 : vector<8x1xf32>
    %656 = math.rsqrt %655 : vector<8x1xf32>
    %657 = vector.broadcast %656 : vector<8x1xf32> to vector<8x32xf32>
    %658 = arith.mulf %653, %657 : vector<8x32xf32>
    %659 = vector.broadcast %383 : vector<1x32xf32> to vector<8x32xf32>
    %660 = arith.mulf %658, %659 : vector<8x32xf32>
    %661 = vector.broadcast %384 : vector<1x32xf32> to vector<8x32xf32>
    %662 = arith.addf %660, %661 : vector<8x32xf32>
    %c1_197 = arith.constant 1 : index
    %c0_198 = arith.constant 0 : index
    %c0_199 = arith.constant 0 : index
    %663 = vector.load %arg16[%c1_197, %c0_198, %c0_199] : memref<2x16x128xf32, #tpu.memory_space<vmem>>, vector<1x16x128xf32>
    %664 = vector.shape_cast %663 : vector<1x16x128xf32> to vector<16x128xf32>
    %665 = vector.extract_strided_slice %664 {offsets = [0, 0], sizes = [1, 96], strides = [1, 1]} : vector<16x128xf32> to vector<1x96xf32>
    %666 = vector.extract_strided_slice %664 {offsets = [1, 0], sizes = [1, 32], strides = [1, 1]} : vector<16x128xf32> to vector<1x32xf32>
    %667 = vector.extract_strided_slice %664 {offsets = [2, 0], sizes = [1, 32], strides = [1, 1]} : vector<16x128xf32> to vector<1x32xf32>
    %668 = vector.extract_strided_slice %664 {offsets = [3, 0], sizes = [1, 64], strides = [1, 1]} : vector<16x128xf32> to vector<1x64xf32>
    %669 = vector.extract_strided_slice %664 {offsets = [4, 0], sizes = [1, 32], strides = [1, 1]} : vector<16x128xf32> to vector<1x32xf32>
    %670 = vector.extract_strided_slice %664 {offsets = [5, 0], sizes = [1, 64], strides = [1, 1]} : vector<16x128xf32> to vector<1x64xf32>
    %671 = vector.extract_strided_slice %664 {offsets = [6, 0], sizes = [1, 32], strides = [1, 1]} : vector<16x128xf32> to vector<1x32xf32>
    %672 = vector.extract_strided_slice %664 {offsets = [7, 0], sizes = [1, 32], strides = [1, 1]} : vector<16x128xf32> to vector<1x32xf32>
    %673 = vector.extract_strided_slice %664 {offsets = [8, 0], sizes = [1, 32], strides = [1, 1]} : vector<16x128xf32> to vector<1x32xf32>
    %674 = vector.extract_strided_slice %664 {offsets = [9, 0], sizes = [1, 32], strides = [1, 1]} : vector<16x128xf32> to vector<1x32xf32>
    %675 = vector.extract_strided_slice %664 {offsets = [10, 0], sizes = [1, 32], strides = [1, 1]} : vector<16x128xf32> to vector<1x32xf32>
    %676 = vector.extract_strided_slice %664 {offsets = [11, 0], sizes = [1, 32], strides = [1, 1]} : vector<16x128xf32> to vector<1x32xf32>
    %677 = vector.extract_strided_slice %664 {offsets = [12, 0], sizes = [1, 32], strides = [1, 1]} : vector<16x128xf32> to vector<1x32xf32>
    %c1_200 = arith.constant 1 : index
    %c0_201 = arith.constant 0 : index
    %c0_202 = arith.constant 0 : index
    %678 = vector.load %arg9[%c1_200, %c0_201, %c0_202] : memref<2x32x96xbf16, #tpu.memory_space<vmem>>, vector<1x32x96xbf16>
    %679 = vector.shape_cast %678 : vector<1x32x96xbf16> to vector<32x96xbf16>
    %c1_203 = arith.constant 1 : index
    %c0_204 = arith.constant 0 : index
    %c0_205 = arith.constant 0 : index
    %680 = vector.load %arg10[%c1_203, %c0_204, %c0_205] : memref<2x32x32xbf16, #tpu.memory_space<vmem>>, vector<1x32x32xbf16>
    %681 = vector.shape_cast %680 : vector<1x32x32xbf16> to vector<32x32xbf16>
    %682 = arith.truncf %662 : vector<8x32xf32> to vector<8x32xbf16>
    %cst_206 = arith.constant dense<0.000000e+00> : vector<8x96xf32>
    %683 = tpu.matmul %682, %679, %cst_206 {dimension_numbers = #tpu.dot_dimension_numbers<[1], [0], [0], [1], [0, 0, 1, 1], [], []>} : vector<8x32xbf16>, vector<32x96xbf16>, vector<8x96xf32> -> vector<8x96xf32>
    %684 = vector.broadcast %665 : vector<1x96xf32> to vector<8x96xf32>
    %685 = arith.addf %683, %684 : vector<8x96xf32>
    %686 = vector.extract_strided_slice %685 {offsets = [0, 0], sizes = [8, 32], strides = [1, 1]} : vector<8x96xf32> to vector<8x32xf32>
    %687 = vector.extract_strided_slice %685 {offsets = [0, 32], sizes = [8, 32], strides = [1, 1]} : vector<8x96xf32> to vector<8x32xf32>
    %688 = vector.extract_strided_slice %685 {offsets = [0, 64], sizes = [8, 32], strides = [1, 1]} : vector<8x96xf32> to vector<8x32xf32>
    %689 = vector.shape_cast %686 : vector<8x32xf32> to vector<2x4x32xf32>
    %690 = arith.truncf %689 : vector<2x4x32xf32> to vector<2x4x32xbf16>
    %691 = vector.shape_cast %687 : vector<8x32xf32> to vector<2x4x32xf32>
    %692 = arith.truncf %691 : vector<2x4x32xf32> to vector<2x4x32xbf16>
    %693 = vector.shape_cast %688 : vector<8x32xf32> to vector<2x4x32xf32>
    %694 = arith.truncf %693 : vector<2x4x32xf32> to vector<2x4x32xbf16>
    %695 = vector.extract_strided_slice %690 {offsets = [0, 0, 0], sizes = [2, 4, 8], strides = [1, 1, 1]} : vector<2x4x32xbf16> to vector<2x4x8xbf16>
    %696 = vector.extract_strided_slice %692 {offsets = [0, 0, 0], sizes = [2, 4, 8], strides = [1, 1, 1]} : vector<2x4x32xbf16> to vector<2x4x8xbf16>
    "tpu.trace_start"() <{level = 10 : i32, message = "bqd,bkd->bqk"}> : () -> ()
    %cst_207 = arith.constant dense<0.000000e+00> : vector<2x4x4xf32>
    %697 = tpu.matmul %695, %696, %cst_207 {dimension_numbers = #tpu.dot_dimension_numbers<[2], [2], [1], [1], [0, 0, 0, 1, 1, 1], [0], [0]>} : vector<2x4x8xbf16>, vector<2x4x8xbf16>, vector<2x4x4xf32> -> vector<2x4x4xf32>
    "tpu.trace_stop"() : () -> ()
    %cst_208 = arith.constant 0.353553385 : f32
    %698 = vector.broadcast %cst_208 : f32 to vector<2x4x4xf32>
    %699 = arith.mulf %697, %698 : vector<2x4x4xf32>
    %cst_209 = arith.constant dense<0xFF800000> : vector<2x4xf32>
    %700 = vector.multi_reduction <maximumf>, %699, %cst_209 [2] : vector<2x4x4xf32> to vector<2x4xf32>
    %701 = vector.shape_cast %700 : vector<2x4xf32> to vector<2x4x1xf32>
    %702 = vector.broadcast %701 : vector<2x4x1xf32> to vector<2x4x4xf32>
    %703 = arith.subf %699, %702 : vector<2x4x4xf32>
    %704 = math.exp %703 : vector<2x4x4xf32>
    %cst_210 = arith.constant dense<0.000000e+00> : vector<2x4xf32>
    %705 = vector.multi_reduction <add>, %704, %cst_210 [2] : vector<2x4x4xf32> to vector<2x4xf32>
    %706 = vector.shape_cast %705 : vector<2x4xf32> to vector<2x4x1xf32>
    %707 = tpu.reciprocal %706 {approx = true} : vector<2x4x1xf32> -> vector<2x4x1xf32>
    %708 = vector.broadcast %707 : vector<2x4x1xf32> to vector<2x4x4xf32>
    %709 = arith.mulf %704, %708 : vector<2x4x4xf32>
    %710 = arith.truncf %709 : vector<2x4x4xf32> to vector<2x4x4xbf16>
    %711 = vector.extract_strided_slice %694 {offsets = [0, 0, 0], sizes = [2, 4, 8], strides = [1, 1, 1]} : vector<2x4x32xbf16> to vector<2x4x8xbf16>
    "tpu.trace_start"() <{level = 10 : i32, message = "bqk,bkd->bqd"}> : () -> ()
    %cst_211 = arith.constant dense<0.000000e+00> : vector<2x4x8xf32>
    %712 = tpu.matmul %710, %711, %cst_211 {dimension_numbers = #tpu.dot_dimension_numbers<[2], [1], [1], [2], [0, 0, 0, 1, 1, 2], [0], [0]>} : vector<2x4x4xbf16>, vector<2x4x8xbf16>, vector<2x4x8xf32> -> vector<2x4x8xf32>
    "tpu.trace_stop"() : () -> ()
    %713 = vector.extract_strided_slice %690 {offsets = [0, 0, 8], sizes = [2, 4, 8], strides = [1, 1, 1]} : vector<2x4x32xbf16> to vector<2x4x8xbf16>
    %714 = vector.extract_strided_slice %692 {offsets = [0, 0, 8], sizes = [2, 4, 8], strides = [1, 1, 1]} : vector<2x4x32xbf16> to vector<2x4x8xbf16>
    "tpu.trace_start"() <{level = 10 : i32, message = "bqd,bkd->bqk"}> : () -> ()
    %cst_212 = arith.constant dense<0.000000e+00> : vector<2x4x4xf32>
    %715 = tpu.matmul %713, %714, %cst_212 {dimension_numbers = #tpu.dot_dimension_numbers<[2], [2], [1], [1], [0, 0, 0, 1, 1, 1], [0], [0]>} : vector<2x4x8xbf16>, vector<2x4x8xbf16>, vector<2x4x4xf32> -> vector<2x4x4xf32>
    "tpu.trace_stop"() : () -> ()
    %cst_213 = arith.constant 0.353553385 : f32
    %716 = vector.broadcast %cst_213 : f32 to vector<2x4x4xf32>
    %717 = arith.mulf %715, %716 : vector<2x4x4xf32>
    %cst_214 = arith.constant dense<0xFF800000> : vector<2x4xf32>
    %718 = vector.multi_reduction <maximumf>, %717, %cst_214 [2] : vector<2x4x4xf32> to vector<2x4xf32>
    %719 = vector.shape_cast %718 : vector<2x4xf32> to vector<2x4x1xf32>
    %720 = vector.broadcast %719 : vector<2x4x1xf32> to vector<2x4x4xf32>
    %721 = arith.subf %717, %720 : vector<2x4x4xf32>
    %722 = math.exp %721 : vector<2x4x4xf32>
    %cst_215 = arith.constant dense<0.000000e+00> : vector<2x4xf32>
    %723 = vector.multi_reduction <add>, %722, %cst_215 [2] : vector<2x4x4xf32> to vector<2x4xf32>
    %724 = vector.shape_cast %723 : vector<2x4xf32> to vector<2x4x1xf32>
    %725 = tpu.reciprocal %724 {approx = true} : vector<2x4x1xf32> -> vector<2x4x1xf32>
    %726 = vector.broadcast %725 : vector<2x4x1xf32> to vector<2x4x4xf32>
    %727 = arith.mulf %722, %726 : vector<2x4x4xf32>
    %728 = arith.truncf %727 : vector<2x4x4xf32> to vector<2x4x4xbf16>
    %729 = vector.extract_strided_slice %694 {offsets = [0, 0, 8], sizes = [2, 4, 8], strides = [1, 1, 1]} : vector<2x4x32xbf16> to vector<2x4x8xbf16>
    "tpu.trace_start"() <{level = 10 : i32, message = "bqk,bkd->bqd"}> : () -> ()
    %cst_216 = arith.constant dense<0.000000e+00> : vector<2x4x8xf32>
    %730 = tpu.matmul %728, %729, %cst_216 {dimension_numbers = #tpu.dot_dimension_numbers<[2], [1], [1], [2], [0, 0, 0, 1, 1, 2], [0], [0]>} : vector<2x4x4xbf16>, vector<2x4x8xbf16>, vector<2x4x8xf32> -> vector<2x4x8xf32>
    "tpu.trace_stop"() : () -> ()
    %731 = vector.extract_strided_slice %690 {offsets = [0, 0, 16], sizes = [2, 4, 8], strides = [1, 1, 1]} : vector<2x4x32xbf16> to vector<2x4x8xbf16>
    %732 = vector.extract_strided_slice %692 {offsets = [0, 0, 16], sizes = [2, 4, 8], strides = [1, 1, 1]} : vector<2x4x32xbf16> to vector<2x4x8xbf16>
    "tpu.trace_start"() <{level = 10 : i32, message = "bqd,bkd->bqk"}> : () -> ()
    %cst_217 = arith.constant dense<0.000000e+00> : vector<2x4x4xf32>
    %733 = tpu.matmul %731, %732, %cst_217 {dimension_numbers = #tpu.dot_dimension_numbers<[2], [2], [1], [1], [0, 0, 0, 1, 1, 1], [0], [0]>} : vector<2x4x8xbf16>, vector<2x4x8xbf16>, vector<2x4x4xf32> -> vector<2x4x4xf32>
    "tpu.trace_stop"() : () -> ()
    %cst_218 = arith.constant 0.353553385 : f32
    %734 = vector.broadcast %cst_218 : f32 to vector<2x4x4xf32>
    %735 = arith.mulf %733, %734 : vector<2x4x4xf32>
    %cst_219 = arith.constant dense<0xFF800000> : vector<2x4xf32>
    %736 = vector.multi_reduction <maximumf>, %735, %cst_219 [2] : vector<2x4x4xf32> to vector<2x4xf32>
    %737 = vector.shape_cast %736 : vector<2x4xf32> to vector<2x4x1xf32>
    %738 = vector.broadcast %737 : vector<2x4x1xf32> to vector<2x4x4xf32>
    %739 = arith.subf %735, %738 : vector<2x4x4xf32>
    %740 = math.exp %739 : vector<2x4x4xf32>
    %cst_220 = arith.constant dense<0.000000e+00> : vector<2x4xf32>
    %741 = vector.multi_reduction <add>, %740, %cst_220 [2] : vector<2x4x4xf32> to vector<2x4xf32>
    %742 = vector.shape_cast %741 : vector<2x4xf32> to vector<2x4x1xf32>
    %743 = tpu.reciprocal %742 {approx = true} : vector<2x4x1xf32> -> vector<2x4x1xf32>
    %744 = vector.broadcast %743 : vector<2x4x1xf32> to vector<2x4x4xf32>
    %745 = arith.mulf %740, %744 : vector<2x4x4xf32>
    %746 = arith.truncf %745 : vector<2x4x4xf32> to vector<2x4x4xbf16>
    %747 = vector.extract_strided_slice %694 {offsets = [0, 0, 16], sizes = [2, 4, 8], strides = [1, 1, 1]} : vector<2x4x32xbf16> to vector<2x4x8xbf16>
    "tpu.trace_start"() <{level = 10 : i32, message = "bqk,bkd->bqd"}> : () -> ()
    %cst_221 = arith.constant dense<0.000000e+00> : vector<2x4x8xf32>
    %748 = tpu.matmul %746, %747, %cst_221 {dimension_numbers = #tpu.dot_dimension_numbers<[2], [1], [1], [2], [0, 0, 0, 1, 1, 2], [0], [0]>} : vector<2x4x4xbf16>, vector<2x4x8xbf16>, vector<2x4x8xf32> -> vector<2x4x8xf32>
    "tpu.trace_stop"() : () -> ()
    %749 = vector.extract_strided_slice %690 {offsets = [0, 0, 24], sizes = [2, 4, 8], strides = [1, 1, 1]} : vector<2x4x32xbf16> to vector<2x4x8xbf16>
    %750 = vector.extract_strided_slice %692 {offsets = [0, 0, 24], sizes = [2, 4, 8], strides = [1, 1, 1]} : vector<2x4x32xbf16> to vector<2x4x8xbf16>
    "tpu.trace_start"() <{level = 10 : i32, message = "bqd,bkd->bqk"}> : () -> ()
    %cst_222 = arith.constant dense<0.000000e+00> : vector<2x4x4xf32>
    %751 = tpu.matmul %749, %750, %cst_222 {dimension_numbers = #tpu.dot_dimension_numbers<[2], [2], [1], [1], [0, 0, 0, 1, 1, 1], [0], [0]>} : vector<2x4x8xbf16>, vector<2x4x8xbf16>, vector<2x4x4xf32> -> vector<2x4x4xf32>
    "tpu.trace_stop"() : () -> ()
    %cst_223 = arith.constant 0.353553385 : f32
    %752 = vector.broadcast %cst_223 : f32 to vector<2x4x4xf32>
    %753 = arith.mulf %751, %752 : vector<2x4x4xf32>
    %cst_224 = arith.constant dense<0xFF800000> : vector<2x4xf32>
    %754 = vector.multi_reduction <maximumf>, %753, %cst_224 [2] : vector<2x4x4xf32> to vector<2x4xf32>
    %755 = vector.shape_cast %754 : vector<2x4xf32> to vector<2x4x1xf32>
    %756 = vector.broadcast %755 : vector<2x4x1xf32> to vector<2x4x4xf32>
    %757 = arith.subf %753, %756 : vector<2x4x4xf32>
    %758 = math.exp %757 : vector<2x4x4xf32>
    %cst_225 = arith.constant dense<0.000000e+00> : vector<2x4xf32>
    %759 = vector.multi_reduction <add>, %758, %cst_225 [2] : vector<2x4x4xf32> to vector<2x4xf32>
    %760 = vector.shape_cast %759 : vector<2x4xf32> to vector<2x4x1xf32>
    %761 = tpu.reciprocal %760 {approx = true} : vector<2x4x1xf32> -> vector<2x4x1xf32>
    %762 = vector.broadcast %761 : vector<2x4x1xf32> to vector<2x4x4xf32>
    %763 = arith.mulf %758, %762 : vector<2x4x4xf32>
    %764 = arith.truncf %763 : vector<2x4x4xf32> to vector<2x4x4xbf16>
    %765 = vector.extract_strided_slice %694 {offsets = [0, 0, 24], sizes = [2, 4, 8], strides = [1, 1, 1]} : vector<2x4x32xbf16> to vector<2x4x8xbf16>
    "tpu.trace_start"() <{level = 10 : i32, message = "bqk,bkd->bqd"}> : () -> ()
    %cst_226 = arith.constant dense<0.000000e+00> : vector<2x4x8xf32>
    %766 = tpu.matmul %764, %765, %cst_226 {dimension_numbers = #tpu.dot_dimension_numbers<[2], [1], [1], [2], [0, 0, 0, 1, 1, 2], [0], [0]>} : vector<2x4x4xbf16>, vector<2x4x8xbf16>, vector<2x4x8xf32> -> vector<2x4x8xf32>
    "tpu.trace_stop"() : () -> ()
    %767 = tpu.concatenate %712, %730, %748, %766 in 2 : vector<2x4x8xf32>, vector<2x4x8xf32>, vector<2x4x8xf32>, vector<2x4x8xf32> -> vector<2x4x32xf32>
    %768 = vector.shape_cast %767 : vector<2x4x32xf32> to vector<8x32xf32>
    %769 = arith.truncf %768 : vector<8x32xf32> to vector<8x32xbf16>
    %cst_227 = arith.constant dense<0.000000e+00> : vector<8x32xf32>
    %770 = tpu.matmul %769, %681, %cst_227 {dimension_numbers = #tpu.dot_dimension_numbers<[1], [0], [0], [1], [0, 0, 1, 1], [], []>} : vector<8x32xbf16>, vector<32x32xbf16>, vector<8x32xf32> -> vector<8x32xf32>
    %771 = vector.broadcast %666 : vector<1x32xf32> to vector<8x32xf32>
    %772 = arith.addf %770, %771 : vector<8x32xf32>
    %773 = arith.addf %662, %772 : vector<8x32xf32>
    %cst_228 = arith.constant dense<0.000000e+00> : vector<8xf32>
    %774 = vector.multi_reduction <add>, %773, %cst_228 [1] : vector<8x32xf32> to vector<8xf32>
    %775 = vector.shape_cast %774 : vector<8xf32> to vector<8x1xf32>
    %cst_229 = arith.constant 3.200000e+01 : f32
    %776 = vector.broadcast %cst_229 : f32 to vector<8x1xf32>
    %777 = arith.divf %775, %776 : vector<8x1xf32>
    %778 = vector.broadcast %777 : vector<8x1xf32> to vector<8x32xf32>
    %779 = arith.subf %773, %778 : vector<8x32xf32>
    %780 = arith.mulf %779, %779 : vector<8x32xf32>
    %cst_230 = arith.constant dense<0.000000e+00> : vector<8xf32>
    %781 = vector.multi_reduction <add>, %780, %cst_230 [1] : vector<8x32xf32> to vector<8xf32>
    %782 = vector.shape_cast %781 : vector<8xf32> to vector<8x1xf32>
    %cst_231 = arith.constant 3.200000e+01 : f32
    %783 = vector.broadcast %cst_231 : f32 to vector<8x1xf32>
    %784 = arith.divf %782, %783 : vector<8x1xf32>
    %785 = vector.broadcast %777 : vector<8x1xf32> to vector<8x32xf32>
    %786 = arith.subf %773, %785 : vector<8x32xf32>
    %cst_232 = arith.constant 9.99999974E-6 : f32
    %787 = vector.broadcast %cst_232 : f32 to vector<8x1xf32>
    %788 = arith.addf %784, %787 : vector<8x1xf32>
    %789 = math.rsqrt %788 : vector<8x1xf32>
    %790 = vector.broadcast %789 : vector<8x1xf32> to vector<8x32xf32>
    %791 = arith.mulf %786, %790 : vector<8x32xf32>
    %792 = vector.broadcast %672 : vector<1x32xf32> to vector<8x32xf32>
    %793 = arith.mulf %791, %792 : vector<8x32xf32>
    %794 = vector.broadcast %673 : vector<1x32xf32> to vector<8x32xf32>
    %795 = arith.addf %793, %794 : vector<8x32xf32>
    %c1_233 = arith.constant 1 : index
    %c0_234 = arith.constant 0 : index
    %c0_235 = arith.constant 0 : index
    %796 = vector.load %arg11[%c1_233, %c0_234, %c0_235] : memref<2x32x32xbf16, #tpu.memory_space<vmem>>, vector<1x32x32xbf16>
    %797 = vector.shape_cast %796 : vector<1x32x32xbf16> to vector<32x32xbf16>
    %c1_236 = arith.constant 1 : index
    %c0_237 = arith.constant 0 : index
    %c0_238 = arith.constant 0 : index
    %798 = vector.load %arg12[%c1_236, %c0_237, %c0_238] : memref<2x32x64xbf16, #tpu.memory_space<vmem>>, vector<1x32x64xbf16>
    %799 = vector.shape_cast %798 : vector<1x32x64xbf16> to vector<32x64xbf16>
    %c1_239 = arith.constant 1 : index
    %c0_240 = arith.constant 0 : index
    %c0_241 = arith.constant 0 : index
    %800 = vector.load %arg13[%c1_239, %c0_240, %c0_241] : memref<2x32x32xbf16, #tpu.memory_space<vmem>>, vector<1x32x32xbf16>
    %801 = vector.shape_cast %800 : vector<1x32x32xbf16> to vector<32x32xbf16>
    %802 = arith.truncf %795 : vector<8x32xf32> to vector<8x32xbf16>
    %cst_242 = arith.constant dense<0.000000e+00> : vector<8x32xf32>
    %803 = tpu.matmul %802, %797, %cst_242 {dimension_numbers = #tpu.dot_dimension_numbers<[1], [0], [0], [1], [0, 0, 1, 1], [], []>} : vector<8x32xbf16>, vector<32x32xbf16>, vector<8x32xf32> -> vector<8x32xf32>
    %804 = vector.broadcast %667 : vector<1x32xf32> to vector<8x32xf32>
    %805 = arith.addf %803, %804 : vector<8x32xf32>
    %806 = arith.truncf %365 : vector<32x32xf32> to vector<32x32xbf16>
    %cst_243 = arith.constant dense<0.000000e+00> : vector<32x64xf32>
    %807 = tpu.matmul %806, %799, %cst_243 {dimension_numbers = #tpu.dot_dimension_numbers<[1], [0], [0], [1], [0, 0, 1, 1], [], []>} : vector<32x32xbf16>, vector<32x64xbf16>, vector<32x64xf32> -> vector<32x64xf32>
    %808 = vector.broadcast %668 : vector<1x64xf32> to vector<32x64xf32>
    %809 = arith.addf %807, %808 : vector<32x64xf32>
    %810 = vector.extract_strided_slice %809 {offsets = [0, 0], sizes = [32, 32], strides = [1, 1]} : vector<32x64xf32> to vector<32x32xf32>
    %811 = vector.extract_strided_slice %809 {offsets = [0, 32], sizes = [32, 32], strides = [1, 1]} : vector<32x64xf32> to vector<32x32xf32>
    %812 = vector.shape_cast %805 : vector<8x32xf32> to vector<2x4x32xf32>
    %813 = arith.truncf %812 : vector<2x4x32xf32> to vector<2x4x32xbf16>
    %814 = vector.shape_cast %810 : vector<32x32xf32> to vector<2x16x32xf32>
    %815 = arith.truncf %814 : vector<2x16x32xf32> to vector<2x16x32xbf16>
    %816 = vector.shape_cast %811 : vector<32x32xf32> to vector<2x16x32xf32>
    %817 = arith.truncf %816 : vector<2x16x32xf32> to vector<2x16x32xbf16>
    %818 = vector.extract_strided_slice %813 {offsets = [0, 0, 0], sizes = [2, 4, 8], strides = [1, 1, 1]} : vector<2x4x32xbf16> to vector<2x4x8xbf16>
    %819 = vector.extract_strided_slice %815 {offsets = [0, 0, 0], sizes = [2, 16, 8], strides = [1, 1, 1]} : vector<2x16x32xbf16> to vector<2x16x8xbf16>
    "tpu.trace_start"() <{level = 10 : i32, message = "bqd,bkd->bqk"}> : () -> ()
    %cst_244 = arith.constant dense<0.000000e+00> : vector<2x4x16xf32>
    %820 = tpu.matmul %818, %819, %cst_244 {dimension_numbers = #tpu.dot_dimension_numbers<[2], [2], [1], [1], [0, 0, 0, 1, 1, 1], [0], [0]>} : vector<2x4x8xbf16>, vector<2x16x8xbf16>, vector<2x4x16xf32> -> vector<2x4x16xf32>
    "tpu.trace_stop"() : () -> ()
    %cst_245 = arith.constant 0.353553385 : f32
    %821 = vector.broadcast %cst_245 : f32 to vector<2x4x16xf32>
    %822 = arith.mulf %820, %821 : vector<2x4x16xf32>
    %cst_246 = arith.constant dense<0xFF800000> : vector<2x4xf32>
    %823 = vector.multi_reduction <maximumf>, %822, %cst_246 [2] : vector<2x4x16xf32> to vector<2x4xf32>
    %824 = vector.shape_cast %823 : vector<2x4xf32> to vector<2x4x1xf32>
    %825 = vector.broadcast %824 : vector<2x4x1xf32> to vector<2x4x16xf32>
    %826 = arith.subf %822, %825 : vector<2x4x16xf32>
    %827 = math.exp %826 : vector<2x4x16xf32>
    %cst_247 = arith.constant dense<0.000000e+00> : vector<2x4xf32>
    %828 = vector.multi_reduction <add>, %827, %cst_247 [2] : vector<2x4x16xf32> to vector<2x4xf32>
    %829 = vector.shape_cast %828 : vector<2x4xf32> to vector<2x4x1xf32>
    %830 = tpu.reciprocal %829 {approx = true} : vector<2x4x1xf32> -> vector<2x4x1xf32>
    %831 = vector.broadcast %830 : vector<2x4x1xf32> to vector<2x4x16xf32>
    %832 = arith.mulf %827, %831 : vector<2x4x16xf32>
    %833 = arith.truncf %832 : vector<2x4x16xf32> to vector<2x4x16xbf16>
    %834 = vector.extract_strided_slice %817 {offsets = [0, 0, 0], sizes = [2, 16, 8], strides = [1, 1, 1]} : vector<2x16x32xbf16> to vector<2x16x8xbf16>
    "tpu.trace_start"() <{level = 10 : i32, message = "bqk,bkd->bqd"}> : () -> ()
    %cst_248 = arith.constant dense<0.000000e+00> : vector<2x4x8xf32>
    %835 = tpu.matmul %833, %834, %cst_248 {dimension_numbers = #tpu.dot_dimension_numbers<[2], [1], [1], [2], [0, 0, 0, 1, 1, 2], [0], [0]>} : vector<2x4x16xbf16>, vector<2x16x8xbf16>, vector<2x4x8xf32> -> vector<2x4x8xf32>
    "tpu.trace_stop"() : () -> ()
    %836 = vector.extract_strided_slice %813 {offsets = [0, 0, 8], sizes = [2, 4, 8], strides = [1, 1, 1]} : vector<2x4x32xbf16> to vector<2x4x8xbf16>
    %837 = vector.extract_strided_slice %815 {offsets = [0, 0, 8], sizes = [2, 16, 8], strides = [1, 1, 1]} : vector<2x16x32xbf16> to vector<2x16x8xbf16>
    "tpu.trace_start"() <{level = 10 : i32, message = "bqd,bkd->bqk"}> : () -> ()
    %cst_249 = arith.constant dense<0.000000e+00> : vector<2x4x16xf32>
    %838 = tpu.matmul %836, %837, %cst_249 {dimension_numbers = #tpu.dot_dimension_numbers<[2], [2], [1], [1], [0, 0, 0, 1, 1, 1], [0], [0]>} : vector<2x4x8xbf16>, vector<2x16x8xbf16>, vector<2x4x16xf32> -> vector<2x4x16xf32>
    "tpu.trace_stop"() : () -> ()
    %cst_250 = arith.constant 0.353553385 : f32
    %839 = vector.broadcast %cst_250 : f32 to vector<2x4x16xf32>
    %840 = arith.mulf %838, %839 : vector<2x4x16xf32>
    %cst_251 = arith.constant dense<0xFF800000> : vector<2x4xf32>
    %841 = vector.multi_reduction <maximumf>, %840, %cst_251 [2] : vector<2x4x16xf32> to vector<2x4xf32>
    %842 = vector.shape_cast %841 : vector<2x4xf32> to vector<2x4x1xf32>
    %843 = vector.broadcast %842 : vector<2x4x1xf32> to vector<2x4x16xf32>
    %844 = arith.subf %840, %843 : vector<2x4x16xf32>
    %845 = math.exp %844 : vector<2x4x16xf32>
    %cst_252 = arith.constant dense<0.000000e+00> : vector<2x4xf32>
    %846 = vector.multi_reduction <add>, %845, %cst_252 [2] : vector<2x4x16xf32> to vector<2x4xf32>
    %847 = vector.shape_cast %846 : vector<2x4xf32> to vector<2x4x1xf32>
    %848 = tpu.reciprocal %847 {approx = true} : vector<2x4x1xf32> -> vector<2x4x1xf32>
    %849 = vector.broadcast %848 : vector<2x4x1xf32> to vector<2x4x16xf32>
    %850 = arith.mulf %845, %849 : vector<2x4x16xf32>
    %851 = arith.truncf %850 : vector<2x4x16xf32> to vector<2x4x16xbf16>
    %852 = vector.extract_strided_slice %817 {offsets = [0, 0, 8], sizes = [2, 16, 8], strides = [1, 1, 1]} : vector<2x16x32xbf16> to vector<2x16x8xbf16>
    "tpu.trace_start"() <{level = 10 : i32, message = "bqk,bkd->bqd"}> : () -> ()
    %cst_253 = arith.constant dense<0.000000e+00> : vector<2x4x8xf32>
    %853 = tpu.matmul %851, %852, %cst_253 {dimension_numbers = #tpu.dot_dimension_numbers<[2], [1], [1], [2], [0, 0, 0, 1, 1, 2], [0], [0]>} : vector<2x4x16xbf16>, vector<2x16x8xbf16>, vector<2x4x8xf32> -> vector<2x4x8xf32>
    "tpu.trace_stop"() : () -> ()
    %854 = vector.extract_strided_slice %813 {offsets = [0, 0, 16], sizes = [2, 4, 8], strides = [1, 1, 1]} : vector<2x4x32xbf16> to vector<2x4x8xbf16>
    %855 = vector.extract_strided_slice %815 {offsets = [0, 0, 16], sizes = [2, 16, 8], strides = [1, 1, 1]} : vector<2x16x32xbf16> to vector<2x16x8xbf16>
    "tpu.trace_start"() <{level = 10 : i32, message = "bqd,bkd->bqk"}> : () -> ()
    %cst_254 = arith.constant dense<0.000000e+00> : vector<2x4x16xf32>
    %856 = tpu.matmul %854, %855, %cst_254 {dimension_numbers = #tpu.dot_dimension_numbers<[2], [2], [1], [1], [0, 0, 0, 1, 1, 1], [0], [0]>} : vector<2x4x8xbf16>, vector<2x16x8xbf16>, vector<2x4x16xf32> -> vector<2x4x16xf32>
    "tpu.trace_stop"() : () -> ()
    %cst_255 = arith.constant 0.353553385 : f32
    %857 = vector.broadcast %cst_255 : f32 to vector<2x4x16xf32>
    %858 = arith.mulf %856, %857 : vector<2x4x16xf32>
    %cst_256 = arith.constant dense<0xFF800000> : vector<2x4xf32>
    %859 = vector.multi_reduction <maximumf>, %858, %cst_256 [2] : vector<2x4x16xf32> to vector<2x4xf32>
    %860 = vector.shape_cast %859 : vector<2x4xf32> to vector<2x4x1xf32>
    %861 = vector.broadcast %860 : vector<2x4x1xf32> to vector<2x4x16xf32>
    %862 = arith.subf %858, %861 : vector<2x4x16xf32>
    %863 = math.exp %862 : vector<2x4x16xf32>
    %cst_257 = arith.constant dense<0.000000e+00> : vector<2x4xf32>
    %864 = vector.multi_reduction <add>, %863, %cst_257 [2] : vector<2x4x16xf32> to vector<2x4xf32>
    %865 = vector.shape_cast %864 : vector<2x4xf32> to vector<2x4x1xf32>
    %866 = tpu.reciprocal %865 {approx = true} : vector<2x4x1xf32> -> vector<2x4x1xf32>
    %867 = vector.broadcast %866 : vector<2x4x1xf32> to vector<2x4x16xf32>
    %868 = arith.mulf %863, %867 : vector<2x4x16xf32>
    %869 = arith.truncf %868 : vector<2x4x16xf32> to vector<2x4x16xbf16>
    %870 = vector.extract_strided_slice %817 {offsets = [0, 0, 16], sizes = [2, 16, 8], strides = [1, 1, 1]} : vector<2x16x32xbf16> to vector<2x16x8xbf16>
    "tpu.trace_start"() <{level = 10 : i32, message = "bqk,bkd->bqd"}> : () -> ()
    %cst_258 = arith.constant dense<0.000000e+00> : vector<2x4x8xf32>
    %871 = tpu.matmul %869, %870, %cst_258 {dimension_numbers = #tpu.dot_dimension_numbers<[2], [1], [1], [2], [0, 0, 0, 1, 1, 2], [0], [0]>} : vector<2x4x16xbf16>, vector<2x16x8xbf16>, vector<2x4x8xf32> -> vector<2x4x8xf32>
    "tpu.trace_stop"() : () -> ()
    %872 = vector.extract_strided_slice %813 {offsets = [0, 0, 24], sizes = [2, 4, 8], strides = [1, 1, 1]} : vector<2x4x32xbf16> to vector<2x4x8xbf16>
    %873 = vector.extract_strided_slice %815 {offsets = [0, 0, 24], sizes = [2, 16, 8], strides = [1, 1, 1]} : vector<2x16x32xbf16> to vector<2x16x8xbf16>
    "tpu.trace_start"() <{level = 10 : i32, message = "bqd,bkd->bqk"}> : () -> ()
    %cst_259 = arith.constant dense<0.000000e+00> : vector<2x4x16xf32>
    %874 = tpu.matmul %872, %873, %cst_259 {dimension_numbers = #tpu.dot_dimension_numbers<[2], [2], [1], [1], [0, 0, 0, 1, 1, 1], [0], [0]>} : vector<2x4x8xbf16>, vector<2x16x8xbf16>, vector<2x4x16xf32> -> vector<2x4x16xf32>
    "tpu.trace_stop"() : () -> ()
    %cst_260 = arith.constant 0.353553385 : f32
    %875 = vector.broadcast %cst_260 : f32 to vector<2x4x16xf32>
    %876 = arith.mulf %874, %875 : vector<2x4x16xf32>
    %cst_261 = arith.constant dense<0xFF800000> : vector<2x4xf32>
    %877 = vector.multi_reduction <maximumf>, %876, %cst_261 [2] : vector<2x4x16xf32> to vector<2x4xf32>
    %878 = vector.shape_cast %877 : vector<2x4xf32> to vector<2x4x1xf32>
    %879 = vector.broadcast %878 : vector<2x4x1xf32> to vector<2x4x16xf32>
    %880 = arith.subf %876, %879 : vector<2x4x16xf32>
    %881 = math.exp %880 : vector<2x4x16xf32>
    %cst_262 = arith.constant dense<0.000000e+00> : vector<2x4xf32>
    %882 = vector.multi_reduction <add>, %881, %cst_262 [2] : vector<2x4x16xf32> to vector<2x4xf32>
    %883 = vector.shape_cast %882 : vector<2x4xf32> to vector<2x4x1xf32>
    %884 = tpu.reciprocal %883 {approx = true} : vector<2x4x1xf32> -> vector<2x4x1xf32>
    %885 = vector.broadcast %884 : vector<2x4x1xf32> to vector<2x4x16xf32>
    %886 = arith.mulf %881, %885 : vector<2x4x16xf32>
    %887 = arith.truncf %886 : vector<2x4x16xf32> to vector<2x4x16xbf16>
    %888 = vector.extract_strided_slice %817 {offsets = [0, 0, 24], sizes = [2, 16, 8], strides = [1, 1, 1]} : vector<2x16x32xbf16> to vector<2x16x8xbf16>
    "tpu.trace_start"() <{level = 10 : i32, message = "bqk,bkd->bqd"}> : () -> ()
    %cst_263 = arith.constant dense<0.000000e+00> : vector<2x4x8xf32>
    %889 = tpu.matmul %887, %888, %cst_263 {dimension_numbers = #tpu.dot_dimension_numbers<[2], [1], [1], [2], [0, 0, 0, 1, 1, 2], [0], [0]>} : vector<2x4x16xbf16>, vector<2x16x8xbf16>, vector<2x4x8xf32> -> vector<2x4x8xf32>
    "tpu.trace_stop"() : () -> ()
    %890 = tpu.concatenate %835, %853, %871, %889 in 2 : vector<2x4x8xf32>, vector<2x4x8xf32>, vector<2x4x8xf32>, vector<2x4x8xf32> -> vector<2x4x32xf32>
    %891 = vector.shape_cast %890 : vector<2x4x32xf32> to vector<8x32xf32>
    %892 = arith.truncf %891 : vector<8x32xf32> to vector<8x32xbf16>
    %cst_264 = arith.constant dense<0.000000e+00> : vector<8x32xf32>
    %893 = tpu.matmul %892, %801, %cst_264 {dimension_numbers = #tpu.dot_dimension_numbers<[1], [0], [0], [1], [0, 0, 1, 1], [], []>} : vector<8x32xbf16>, vector<32x32xbf16>, vector<8x32xf32> -> vector<8x32xf32>
    %894 = vector.broadcast %669 : vector<1x32xf32> to vector<8x32xf32>
    %895 = arith.addf %893, %894 : vector<8x32xf32>
    %896 = arith.addf %795, %895 : vector<8x32xf32>
    %cst_265 = arith.constant dense<0.000000e+00> : vector<8xf32>
    %897 = vector.multi_reduction <add>, %896, %cst_265 [1] : vector<8x32xf32> to vector<8xf32>
    %898 = vector.shape_cast %897 : vector<8xf32> to vector<8x1xf32>
    %cst_266 = arith.constant 3.200000e+01 : f32
    %899 = vector.broadcast %cst_266 : f32 to vector<8x1xf32>
    %900 = arith.divf %898, %899 : vector<8x1xf32>
    %901 = vector.broadcast %900 : vector<8x1xf32> to vector<8x32xf32>
    %902 = arith.subf %896, %901 : vector<8x32xf32>
    %903 = arith.mulf %902, %902 : vector<8x32xf32>
    %cst_267 = arith.constant dense<0.000000e+00> : vector<8xf32>
    %904 = vector.multi_reduction <add>, %903, %cst_267 [1] : vector<8x32xf32> to vector<8xf32>
    %905 = vector.shape_cast %904 : vector<8xf32> to vector<8x1xf32>
    %cst_268 = arith.constant 3.200000e+01 : f32
    %906 = vector.broadcast %cst_268 : f32 to vector<8x1xf32>
    %907 = arith.divf %905, %906 : vector<8x1xf32>
    %908 = vector.broadcast %900 : vector<8x1xf32> to vector<8x32xf32>
    %909 = arith.subf %896, %908 : vector<8x32xf32>
    %cst_269 = arith.constant 9.99999974E-6 : f32
    %910 = vector.broadcast %cst_269 : f32 to vector<8x1xf32>
    %911 = arith.addf %907, %910 : vector<8x1xf32>
    %912 = math.rsqrt %911 : vector<8x1xf32>
    %913 = vector.broadcast %912 : vector<8x1xf32> to vector<8x32xf32>
    %914 = arith.mulf %909, %913 : vector<8x32xf32>
    %915 = vector.broadcast %674 : vector<1x32xf32> to vector<8x32xf32>
    %916 = arith.mulf %914, %915 : vector<8x32xf32>
    %917 = vector.broadcast %675 : vector<1x32xf32> to vector<8x32xf32>
    %918 = arith.addf %916, %917 : vector<8x32xf32>
    %c1_270 = arith.constant 1 : index
    %c0_271 = arith.constant 0 : index
    %c0_272 = arith.constant 0 : index
    %919 = vector.load %arg14[%c1_270, %c0_271, %c0_272] : memref<2x32x64xbf16, #tpu.memory_space<vmem>>, vector<1x32x64xbf16>
    %920 = vector.shape_cast %919 : vector<1x32x64xbf16> to vector<32x64xbf16>
    %c1_273 = arith.constant 1 : index
    %c0_274 = arith.constant 0 : index
    %c0_275 = arith.constant 0 : index
    %921 = vector.load %arg15[%c1_273, %c0_274, %c0_275] : memref<2x64x32xbf16, #tpu.memory_space<vmem>>, vector<1x64x32xbf16>
    %922 = vector.shape_cast %921 : vector<1x64x32xbf16> to vector<64x32xbf16>
    %923 = arith.truncf %918 : vector<8x32xf32> to vector<8x32xbf16>
    %cst_276 = arith.constant dense<0.000000e+00> : vector<8x64xf32>
    %924 = tpu.matmul %923, %920, %cst_276 {dimension_numbers = #tpu.dot_dimension_numbers<[1], [0], [0], [1], [0, 0, 1, 1], [], []>} : vector<8x32xbf16>, vector<32x64xbf16>, vector<8x64xf32> -> vector<8x64xf32>
    %925 = vector.broadcast %670 : vector<1x64xf32> to vector<8x64xf32>
    %926 = arith.addf %924, %925 : vector<8x64xf32>
    %cst_277 = arith.constant 0.000000e+00 : f32
    %927 = vector.broadcast %cst_277 : f32 to vector<8x64xf32>
    %928 = arith.maximumf %926, %927 : vector<8x64xf32>
    %929 = arith.truncf %928 : vector<8x64xf32> to vector<8x64xbf16>
    %cst_278 = arith.constant dense<0.000000e+00> : vector<8x32xf32>
    %930 = tpu.matmul %929, %922, %cst_278 {dimension_numbers = #tpu.dot_dimension_numbers<[1], [0], [0], [1], [0, 0, 1, 1], [], []>} : vector<8x64xbf16>, vector<64x32xbf16>, vector<8x32xf32> -> vector<8x32xf32>
    %931 = vector.broadcast %671 : vector<1x32xf32> to vector<8x32xf32>
    %932 = arith.addf %930, %931 : vector<8x32xf32>
    %933 = arith.addf %918, %932 : vector<8x32xf32>
    %cst_279 = arith.constant dense<0.000000e+00> : vector<8xf32>
    %934 = vector.multi_reduction <add>, %933, %cst_279 [1] : vector<8x32xf32> to vector<8xf32>
    %935 = vector.shape_cast %934 : vector<8xf32> to vector<8x1xf32>
    %cst_280 = arith.constant 3.200000e+01 : f32
    %936 = vector.broadcast %cst_280 : f32 to vector<8x1xf32>
    %937 = arith.divf %935, %936 : vector<8x1xf32>
    %938 = vector.broadcast %937 : vector<8x1xf32> to vector<8x32xf32>
    %939 = arith.subf %933, %938 : vector<8x32xf32>
    %940 = arith.mulf %939, %939 : vector<8x32xf32>
    %cst_281 = arith.constant dense<0.000000e+00> : vector<8xf32>
    %941 = vector.multi_reduction <add>, %940, %cst_281 [1] : vector<8x32xf32> to vector<8xf32>
    %942 = vector.shape_cast %941 : vector<8xf32> to vector<8x1xf32>
    %cst_282 = arith.constant 3.200000e+01 : f32
    %943 = vector.broadcast %cst_282 : f32 to vector<8x1xf32>
    %944 = arith.divf %942, %943 : vector<8x1xf32>
    %945 = vector.broadcast %937 : vector<8x1xf32> to vector<8x32xf32>
    %946 = arith.subf %933, %945 : vector<8x32xf32>
    %cst_283 = arith.constant 9.99999974E-6 : f32
    %947 = vector.broadcast %cst_283 : f32 to vector<8x1xf32>
    %948 = arith.addf %944, %947 : vector<8x1xf32>
    %949 = math.rsqrt %948 : vector<8x1xf32>
    %950 = vector.broadcast %949 : vector<8x1xf32> to vector<8x32xf32>
    %951 = arith.mulf %946, %950 : vector<8x32xf32>
    %952 = vector.broadcast %676 : vector<1x32xf32> to vector<8x32xf32>
    %953 = arith.mulf %951, %952 : vector<8x32xf32>
    %954 = vector.broadcast %677 : vector<1x32xf32> to vector<8x32xf32>
    %955 = arith.addf %953, %954 : vector<8x32xf32>
    %c0_284 = arith.constant 0 : index
    %c0_285 = arith.constant 0 : index
    %956 = vector.load %arg17[%c0_284, %c0_285] : memref<33x128xf32, #tpu.memory_space<vmem>>, vector<33x128xf32>
    %957 = arith.truncf %955 : vector<8x32xf32> to vector<8x32xbf16>
    %958 = vector.extract_strided_slice %956 {offsets = [0, 0], sizes = [32, 128], strides = [1, 1]} : vector<33x128xf32> to vector<32x128xf32>
    %959 = arith.truncf %958 : vector<32x128xf32> to vector<32x128xbf16>
    %cst_286 = arith.constant dense<0.000000e+00> : vector<8x128xf32>
    %960 = tpu.matmul %957, %959, %cst_286 {dimension_numbers = #tpu.dot_dimension_numbers<[1], [0], [0], [1], [0, 0, 1, 1], [], []>} : vector<8x32xbf16>, vector<32x128xbf16>, vector<8x128xf32> -> vector<8x128xf32>
    %961 = vector.extract_strided_slice %956 {offsets = [32, 0], sizes = [1, 128], strides = [1, 1]} : vector<33x128xf32> to vector<1x128xf32>
    %962 = vector.broadcast %961 : vector<1x128xf32> to vector<8x128xf32>
    %963 = arith.addf %960, %962 : vector<8x128xf32>
    %964 = vector.shape_cast %963 : vector<8x128xf32> to vector<2x512xf32>
    %c0_287 = arith.constant 0 : index
    %c0_288 = arith.constant 0 : index
    %965 = vector.load %arg18[%c0_287, %c0_288] : memref<2x512xf32, #tpu.memory_space<vmem>>, vector<2x512xf32>
    tpu.vector_store %arg18[%c0_287, %c0_288], %964 {strides = array<i32>} : memref<2x512xf32, #tpu.memory_space<vmem>>, vector<2x512xf32>,
    return
  }
  func.func @transform_0(%arg0: i32) -> (i32, i32, i32) {
    %c0_i32 = arith.constant 0 : i32
    %c0_i32_0 = arith.constant 0 : i32
    %c0_i32_1 = arith.constant 0 : i32
    return %arg0, %c0_i32, %c0_i32_0 : i32, i32, i32
  }
  func.func @transform_1(%arg0: i32) -> (i32, i32) {
    %c0_i32 = arith.constant 0 : i32
    %c0_i32_0 = arith.constant 0 : i32
    %c0_i32_1 = arith.constant 0 : i32
    return %c0_i32, %c0_i32_0 : i32, i32
  }
  func.func @transform_2(%arg0: i32) -> (i32, i32) {
    %c0_i32 = arith.constant 0 : i32
    %c0_i32_0 = arith.constant 0 : i32
    %c0_i32_1 = arith.constant 0 : i32
    return %c0_i32, %c0_i32_0 : i32, i32
  }
  func.func @transform_3(%arg0: i32) -> (i32, i32, i32) {
    %c0_i32 = arith.constant 0 : i32
    %c0_i32_0 = arith.constant 0 : i32
    %c0_i32_1 = arith.constant 0 : i32
    %c0_i32_2 = arith.constant 0 : i32
    return %c0_i32, %c0_i32_0, %c0_i32_1 : i32, i32, i32
  }
  func.func @transform_4(%arg0: i32) -> (i32, i32, i32) {
    %c0_i32 = arith.constant 0 : i32
    %c0_i32_0 = arith.constant 0 : i32
    %c0_i32_1 = arith.constant 0 : i32
    %c0_i32_2 = arith.constant 0 : i32
    return %c0_i32, %c0_i32_0, %c0_i32_1 : i32, i32, i32
  }
  func.func @transform_5(%arg0: i32) -> (i32, i32, i32) {
    %c0_i32 = arith.constant 0 : i32
    %c0_i32_0 = arith.constant 0 : i32
    %c0_i32_1 = arith.constant 0 : i32
    %c0_i32_2 = arith.constant 0 : i32
    return %c0_i32, %c0_i32_0, %c0_i32_1 : i32, i32, i32
  }
  func.func @transform_6(%arg0: i32) -> (i32, i32, i32) {
    %c0_i32 = arith.constant 0 : i32
    %c0_i32_0 = arith.constant 0 : i32
    %c0_i32_1 = arith.constant 0 : i32
    %c0_i32_2 = arith.constant 0 : i32
    return %c0_i32, %c0_i32_0, %c0_i32_1 : i32, i32, i32
  }
  func.func @transform_7(%arg0: i32) -> (i32, i32, i32) {
    %c0_i32 = arith.constant 0 : i32
    %c0_i32_0 = arith.constant 0 : i32
    %c0_i32_1 = arith.constant 0 : i32
    %c0_i32_2 = arith.constant 0 : i32
    return %c0_i32, %c0_i32_0, %c0_i32_1 : i32, i32, i32
  }
  func.func @transform_8(%arg0: i32) -> (i32, i32, i32) {
    %c0_i32 = arith.constant 0 : i32
    %c0_i32_0 = arith.constant 0 : i32
    %c0_i32_1 = arith.constant 0 : i32
    %c0_i32_2 = arith.constant 0 : i32
    return %c0_i32, %c0_i32_0, %c0_i32_1 : i32, i32, i32
  }
  func.func @transform_9(%arg0: i32) -> (i32, i32, i32) {
    %c0_i32 = arith.constant 0 : i32
    %c0_i32_0 = arith.constant 0 : i32
    %c0_i32_1 = arith.constant 0 : i32
    %c0_i32_2 = arith.constant 0 : i32
    return %c0_i32, %c0_i32_0, %c0_i32_1 : i32, i32, i32
  }
  func.func @transform_10(%arg0: i32) -> (i32, i32, i32) {
    %c0_i32 = arith.constant 0 : i32
    %c0_i32_0 = arith.constant 0 : i32
    %c0_i32_1 = arith.constant 0 : i32
    %c0_i32_2 = arith.constant 0 : i32
    return %c0_i32, %c0_i32_0, %c0_i32_1 : i32, i32, i32
  }
  func.func @transform_11(%arg0: i32) -> (i32, i32, i32) {
    %c0_i32 = arith.constant 0 : i32
    %c0_i32_0 = arith.constant 0 : i32
    %c0_i32_1 = arith.constant 0 : i32
    %c0_i32_2 = arith.constant 0 : i32
    return %c0_i32, %c0_i32_0, %c0_i32_1 : i32, i32, i32
  }
  func.func @transform_12(%arg0: i32) -> (i32, i32, i32) {
    %c0_i32 = arith.constant 0 : i32
    %c0_i32_0 = arith.constant 0 : i32
    %c0_i32_1 = arith.constant 0 : i32
    %c0_i32_2 = arith.constant 0 : i32
    return %c0_i32, %c0_i32_0, %c0_i32_1 : i32, i32, i32
  }
  func.func @transform_13(%arg0: i32) -> (i32, i32, i32) {
    %c0_i32 = arith.constant 0 : i32
    %c0_i32_0 = arith.constant 0 : i32
    %c0_i32_1 = arith.constant 0 : i32
    %c0_i32_2 = arith.constant 0 : i32
    return %c0_i32, %c0_i32_0, %c0_i32_1 : i32, i32, i32
  }
  func.func @transform_14(%arg0: i32) -> (i32, i32, i32) {
    %c0_i32 = arith.constant 0 : i32
    %c0_i32_0 = arith.constant 0 : i32
    %c0_i32_1 = arith.constant 0 : i32
    %c0_i32_2 = arith.constant 0 : i32
    return %c0_i32, %c0_i32_0, %c0_i32_1 : i32, i32, i32
  }
  func.func @transform_15(%arg0: i32) -> (i32, i32, i32) {
    %c0_i32 = arith.constant 0 : i32
    %c0_i32_0 = arith.constant 0 : i32
    %c0_i32_1 = arith.constant 0 : i32
    %c0_i32_2 = arith.constant 0 : i32
    return %c0_i32, %c0_i32_0, %c0_i32_1 : i32, i32, i32
  }
  func.func @transform_16(%arg0: i32) -> (i32, i32) {
    %c0_i32 = arith.constant 0 : i32
    %c0_i32_0 = arith.constant 0 : i32
    %c0_i32_1 = arith.constant 0 : i32
    return %c0_i32, %c0_i32_0 : i32, i32
  }
  func.func @transform_17(%arg0: i32) -> (i32, i32) {
    %c0_i32 = arith.constant 0 : i32
    %c0_i32_0 = arith.constant 0 : i32
    return %arg0, %c0_i32 : i32, i32
  }
}

</mosaic_0001>

<bundles_post_ra>
// kernel: vit_forward.1
= control target key start
LH: loop header
LB: loop body
LE: loop exit
PB: predicated region body
PF: predicated region fallthrough
CT: control target
= control target key end

     0   :  { %vm187_vm0 = vcmask 261120   ;;  %s8227_s30 = smov 96   ;;  %s8221_s18 = smov 120   ;;  %vm224_vm1 = vcmask 64512   ;;  %vm276_vm2 = vcmask 130048   ;;  %vm881_vm3 = vcmask 195584   ;;  %s8181_s1 = inlined_call_operand.vmem [shape: bf16[128,32], index: 1, kind: input, shape index: {}]   ;;  %s8182_s0 = inlined_call_operand.vmem [shape: bf16[2,16,128], index: 0, kind: input, shape index: {}]   ;;  %s8183_s2 = inlined_call_operand.vmem [shape: f32[22,32], index: 2, kind: input, shape index: {}]   ;;  %s8184_s3 = inlined_call_operand.vmem [shape: bf16[2,32,96], index: 3, kind: input, shape index: {}]   ;;  %s8185_s7 = inlined_call_operand.vmem [shape: f32[2,8,128], index: 7, kind: input, shape index: {}]   ;;  %s8186_s4 = inlined_call_operand.vmem [shape: bf16[2,32,32], index: 4, kind: input, shape index: {}]   ;;  %s8187_s5 = inlined_call_operand.vmem [shape: bf16[2,32,64], index: 5, kind: input, shape index: {}]   ;;  %s8188_s6 = inlined_call_operand.vmem [shape: bf16[2,64,32], index: 6, kind: input, shape index: {}]   ;;  %s8189_s8 = inlined_call_operand.vmem [shape: bf16[2,32,96], index: 8, kind: input, shape index: {}]   ;;  %s8190_s15 = inlined_call_operand.vmem [shape: f32[2,16,128], index: 15, kind: input, shape index: {}]   ;;  %s8191_s9 = inlined_call_operand.vmem [shape: bf16[2,32,32], index: 9, kind: input, shape index: {}]   ;;  %s8192_s10 = inlined_call_operand.vmem [shape: bf16[2,32,32], index: 10, kind: input, shape index: {}]   ;;  %s8193_s11 = inlined_call_operand.vmem [shape: bf16[2,32,64], index: 11, kind: input, shape index: {}]   ;;  %s8194_s12 = inlined_call_operand.vmem [shape: bf16[2,32,32], index: 12, kind: input, shape index: {}]   ;;  %s8195_s13 = inlined_call_operand.vmem [shape: bf16[2,32,64], index: 13, kind: input, shape index: {}]   ;;  %s8196_s14 = inlined_call_operand.vmem [shape: bf16[2,64,32], index: 14, kind: input, shape index: {}]   ;;  %s8197_s16 = inlined_call_operand.vmem [shape: f32[33,128], index: 16, kind: input, shape index: {}]   ;;  %s8198_s17 = inlined_call_operand.vmem [shape: f32[2,512], index: 17, kind: output, shape index: {}]  }
   0x1   :  { %8229 = sst [smem:[#allocation2_spill]] %s8181_s1  ;;  %v59_v10 = vld [vmem:[%s8183_s2 + $0x10] sm:$0x3f]  ;;  %v5950_v12 = vld [vmem:[%s8184_s3 + $0x8] sm:$0xff]  ;;  %v5949_v13 = vld [vmem:[%s8184_s3] sm:$0xff]  ;;  %s8225_s1 = smov 88  }
   0x2   :  { %8230 = sst [smem:[#allocation3_spill]] %s8182_s0  ;;  %v6536_v11 = vrot.slane %v59_v10, 10  ;;  %200 = vmatpush.bf16.msra.mxu1 %v5950_v12  ;;  %v57_v15 = vld [vmem:[%s8183_s2] sm:$0xff]  ;;  %v58_v16 = vld [vmem:[%s8183_s2 + $0x8] sm:$0xff]  ;;  %s8223_s19 = smov 80  }
   0x3   :  { %8231 = sst [smem:[#allocation4_spill]] %s8198_s17  ;;  %v6569_v26 = vld [vmem:[%s8185_s7] sm:$0xff]  ;;  %s8215_s0 = smov 56  }
   0x4   :  { %s8232_s26 = sld [smem:[#allocation2_spill]]  ;;  %2440 = vst [vmem:[#allocation1] ss:$2 sm:$0xff] %v6536_v11  ;;  %v174_v28 = vperm.slane %v6569_v26, 0  ;;  %s8213_s20 = smov 112  }
   0x5   :  { %s8233_s29 = sld [smem:[#allocation3_spill]]  ;;  %2442 = vst [vmem:[#allocation1 + $0x1] ss:$2 sm:$0xff] %v6536_v11  ;;  %s8219_s21 = smov 72  }
   0x6   :  { %201 = vmatpush.bf16.msra.mxu1 %v5949_v13  ;;  %s8205_s22 = smov 48   ;;  %s8201_s23 = smov 40  }
   0x7   :  { %s8209_s24 = smov 8   ;;  %s8203_s25 = smov 16  }
   0x8   :  { %s8207_s27 = smov 24   ;;  %s8234_s28 = smov 112  }
   0xa   :  { %v5948_v0 = vld [vmem:[%s8232_s26 + $0x38] sm:$0xff]  ;;  %v5947_v1 = vld [vmem:[%s8232_s26 + $0x30] sm:$0xff]  ;;  %v5946_v2 = vld [vmem:[%s8232_s26 + $0x28] sm:$0xff] }
   0xb   :  { %140 = vmatpush.bf16.msra.mxu0 %v5948_v0  ;;  %v5945_v3 = vld [vmem:[%s8232_s26 + $0x20] sm:$0xff]  ;;  %v5944_v4 = vld [vmem:[%s8232_s26 + $0x18] sm:$0xff]  ;;  %v5943_v5 = vld [vmem:[%s8232_s26 + $0x10] sm:$0xff] }
   0xc   :  { %v5942_v6 = vld [vmem:[%s8232_s26 + $0x8] sm:$0xff]  ;;  %v5941_v7 = vld [vmem:[%s8232_s26] sm:$0xff]  ;;  %s8217_s26 = smov 104  }
   0xd   :  { %v5939_v8 = vld [vmem:[%s8233_s29] sm:$0xff]  ;;  %v5940_v9 = vld [vmem:[%s8233_s29 + $0x8] sm:$0xff]  ;;  %s8211_s29 = smov 64  }
   0xf   :  { %141 = vmatpush.bf16.msra.mxu0 %v5947_v1 }
  0x13   :  { %142 = vmatpush.bf16.msra.mxu0 %v5946_v2 }
  0x17   :  { %143 = vmatpush.bf16.msra.mxu0 %v5945_v3 }
  0x1b   :  { %144 = vmatpush.bf16.msra.mxu0 %v5944_v4 }
  0x1f   :  { %145 = vmatpush.bf16.msra.mxu0 %v5943_v5 }
  0x23   :  { %146 = vmatpush.bf16.msra.mxu0 %v5942_v6 }
  0x27   :  { %147 = vmatpush.bf16.msra.mxu0 %v5941_v7 }
  0x2a   :  { %148 = vmatmul.bf16.vlgmr.msra.gmra.mxu0 %v5939_v8 }
  0x3a   :  { %153 = vmatmul.bf16.gmra.mxu0 %v5940_v9 }
  0xa7   :  { %v149_v14 = vpop.f32.mrf.mxu0 }
  0xa8   :  { %v6552_v18 = vadd.f32 %v149_v14, %v57_v15 }
  0xaf   :  { %v151_v17 = vpop.f32.mrf.mxu0 }
  0xb0   :  { %v6554_v19 = vadd.f32 %v151_v17, %v58_v16 }
  0xb2   :  { %v172_v20 = vpack.c.bf16 %v6554_v19, %v6552_v18 }
  0xb4   :  { %5552 = vmatmul.msk.bf16.vlgmr.msra.gmra.mxu1 %vm187_vm0, %v172_v20 }
  0xb7   :  { %v154_v21 = vpop.f32.mrf.mxu0 }
  0xb8   :  { %v6559_v22 = vadd.f32 %v154_v21, %v57_v15 }
  0xbf   :  { %v156_v23 = vpop.f32.mrf.mxu0 }
  0xc0   :  { %v6561_v24 = vadd.f32 %v156_v23, %v58_v16 }
  0xc2   :  { %v173_v25 = vpack.c.bf16 %v6561_v24, %v6559_v22 }
  0xc4   :  { %5553 = vmatmul.msk.bf16.gmra.mxu1 %vm187_vm0, %v173_v25 }
 0x131   :  { %v203_v27 = vpop.f32.mrf.mxu1 }
 0x132   :  { %v204_v29 = vadd.f32 %v203_v27, %v174_v28 }
 0x134   :  { %v213_v31 = vpack.c.bf16 %v204_v29, %v204_v29 }
 0x136   :  { %v219_v34 = vunpack.c.l.b16 %v213_v31 }
 0x139   :  { %v205_v30 = vpop.f32.mrf.mxu1 }
 0x13a   :  { %v206_v32 = vadd.f32 %v205_v30, %v174_v28 }
 0x13c   :  { %v214_v33 = vpack.c.bf16 %v206_v32, %v206_v32 }
 0x13e   :  { %v220_v35 = vunpack.c.l.b16 %v214_v33 }
 0x140   :  { %v6572_v36 = vpack.c.b16 %v220_v35, %v219_v34 }
 0x141   :  { %v208_v37 = vpop.f32.mrf.mxu1 }
 0x142   :  { %330 = vrot.lane.b32.xlu2 %v6572_v36, %s8211_s29  ;;  %377 = vrot.lane.b32.xlu1 %v6572_v36, %s8225_s1  ;;  %v209_v38 = vadd.f32 %v208_v37, %v174_v28 }
 0x143   :  { %222 = vrot.lane.b32.xlu0 %v6572_v36, %s8227_s30 }
 0x144   :  { %v215_v39 = vpack.c.bf16 %v209_v38, %v209_v38 }
 0x146   :  { %v247_v42 = vunpack.c.l.b16 %v215_v39 }
 0x149   :  { %v210_v40 = vpop.f32.mrf.mxu1 }
 0x14a   :  { %v211_v41 = vadd.f32 %v210_v40, %v174_v28  ;;  %375 = vrot.lane.b32.xlu1 %v6572_v36, %s8221_s18 }
 0x14c   :  { %v216_v43 = vpack.c.bf16 %v211_v41, %v211_v41 }
 0x14e   :  { %v248_v44 = vunpack.c.l.b16 %v216_v43 }
 0x150   :  { %v6582_v45 = vpack.c.b16 %v248_v44, %v247_v42 }
 0x152   :  { %250 = vrot.lane.b32.xlu0 %v6582_v45, %s8227_s30  ;;  %355 = vrot.lane.b32.xlu1 %v6582_v45, %s8211_s29  ;;  %s8237_s29 = smov 40  }
 0x19c   :  { %v331_v50 = vpop.permute.xlu2 %330 }
 0x1b4   :  { %v378_v46 = vpop.permute.xlu1 %377 }
 0x1b5   :  { %v223_v47 = vpop.permute.xlu0 %222  ;;  %v383_v48 = vsel %vm224_vm1, %v378_v46, 0 }
 0x1b6   :  { %v229_v49 = vsel %vm224_vm1, %v223_v47, 0  ;;  %392 = vmatpush.bf16.xpose.msrb.mxu1 %v383_v48 }
 0x1b7   :  { %238 = vmatpush.bf16.xpose.msra.mxu2 %v229_v49 }
 0x1bc   :  { %v376_v51 = vpop.permute.xlu1 %375 }
 0x1bd   :  { %5558 = vmatmul.msk.bf16.vlgmr.msrb.gmra.mxu1 %vm224_vm1, %v376_v51 }
 0x1be   :  { %5554 = vmatmul.msk.bf16.vlgmr.msra.gmra.mxu2 %vm224_vm1, %v6572_v36 }
 0x1bf   :  { %343 = vmatpush.bf16.msrb.mxu2 %v331_v50 }
 0x1c4   :  { %v251_v52 = vpop.permute.xlu0 %250  ;;  %v356_v53 = vpop.permute.xlu1 %355 }
 0x1c5   :  { %v256_v54 = vsel %vm224_vm1, %v251_v52, 0 }
 0x1c6   :  { %265 = vmatpush.bf16.xpose.msra.mxu3 %v256_v54 }
 0x1cd   :  { %5555 = vmatmul.msk.bf16.vlgmr.msra.gmra.mxu3 %vm224_vm1, %v6582_v45 }
 0x1ce   :  { %368 = vmatpush.bf16.msrb.mxu3 %v356_v53 }
 0x23a   :  { %v394_v55 = vpop.f32.mrf.mxu1 }
 0x23b   :  { %v6596_v56 = vmul.f32 0.35355338, %v394_v55 }
 0x23d   :  { %v427_v57 = vsel %vm276_vm2, %v6596_v56, -inf }
 0x23e   :  { %428 = vmax.xlane.f32.xlu2 %v427_v57 }
 0x241   :  { %v240_v58 = vpop.f32.mrf.mxu2 }
 0x242   :  { %v272_v59 = vmul.f32 0.35355338, %v240_v58  ;;  %v396_v61 = vpop.f32.mrf.mxu1 }
 0x243   :  { %v424_v62 = vmul.f32 0.35355338, %v396_v61 }
 0x244   :  { %v277_v60 = vsel %vm276_vm2, %v272_v59, -inf }
 0x245   :  { %v430_v63 = vsel %vm276_vm2, %v424_v62, -inf }
 0x246   :  { %278 = vmax.xlane.f32.xlu2 %v277_v60 }
 0x249   :  { %v242_v0 = vpop.f32.mrf.mxu2 }
 0x24a   :  { %v273_v2 = vmul.f32 0.35355338, %v242_v0 }
 0x24c   :  { %v280_v5 = vsel %vm276_vm2, %v273_v2, -inf }
 0x24e   :  { %431 = vmax.xlane.f32.xlu2 %v430_v63 }
 0x250   :  { %v267_v1 = vpop.f32.mrf.mxu3 }
 0x251   :  { %v274_v3 = vmul.f32 0.35355338, %v267_v1 }
 0x253   :  { %v283_v4 = vsel %vm276_vm2, %v274_v3, -inf }
 0x254   :  { %284 = vmax.xlane.f32.xlu0 %v283_v4 }
 0x256   :  { %281 = vmax.xlane.f32.xlu2 %v280_v5 }
 0x258   :  { %v269_v6 = vpop.f32.mrf.mxu3 }
 0x259   :  { %v275_v7 = vmul.f32 0.35355338, %v269_v6 }
 0x25b   :  { %v286_v8 = vsel %vm276_vm2, %v275_v7, -inf }
 0x25c   :  { %287 = vmax.xlane.f32.xlu1 %v286_v8 }
 0x268   :  { %401 = vrot.lane.b32.xlu0 %v6582_v45, %s8225_s1 }
 0x275   :  { %527 = vrot.lane.b32.xlu1 %v6572_v36, %s8223_s19 }
 0x27d   :  { %480 = vrot.lane.b32.xlu1 %v6572_v36, %s8215_s0 }
 0x285   :  { %525 = vrot.lane.b32.xlu1 %v6572_v36, %s8213_s20 }
 0x2b1   :  { %v429_v9 = vpop.xlane.xlu2 %428 }
 0x2b2   :  { %v439_v47 = vsub.f32 %v6596_v56, %v429_v9 }
 0x2b4   :  { %v443_v48 = vmul.f32 1.442695, %v439_v47 }
 0x2b9   :  { %v279_v10 = vpop.xlane.xlu2 %278 }
 0x2ba   :  { %v289_v12 = vsub.f32 %v272_v59, %v279_v10 }
 0x2bc   :  { %v293_v13 = vmul.f32 1.442695, %v289_v12 }
 0x2be   :  { %6079 = vpow2.f32 %v293_v13 }
 0x2c1   :  { %v432_v14 = vpop.xlane.xlu2 %431 }
 0x2c2   :  { %v440_v23 = vsub.f32 %v424_v62, %v432_v14 }
 0x2c4   :  { %v6080_v15 = vpop.eup %6079  ;;  %v445_v29 = vmul.f32 1.442695, %v440_v23 }
 0x2c5   :  { %v301_v16 = vsel %vm276_vm2, %v6080_v15, 0.0 }
 0x2c6   :  { %302 = vadd.xlane.f32.xlu2 %v301_v16 }
 0x2c7   :  { %v285_v17 = vpop.xlane.xlu0 %284 }
 0x2c8   :  { %v291_v20 = vsub.f32 %v274_v3, %v285_v17 }
 0x2c9   :  { %v282_v21 = vpop.xlane.xlu2 %281 }
 0x2ca   :  { %v297_v25 = vmul.f32 1.442695, %v291_v20  ;;  %v290_v27 = vsub.f32 %v273_v2, %v282_v21 }
 0x2cc   :  { %6081 = vpow2.f32 %v297_v25  ;;  %v295_v28 = vmul.f32 1.442695, %v290_v27 }
 0x2ce   :  { %6083 = vpow2.f32 %v295_v28 }
 0x2cf   :  { %v288_v30 = vpop.xlane.xlu1 %287  ;;  %6085 = vpow2.f32 %v445_v29 }
 0x2d0   :  { %v292_v31 = vsub.f32 %v275_v7, %v288_v30 }
 0x2d2   :  { %v6082_v32 = vpop.eup %6081  ;;  %v299_v33 = vmul.f32 1.442695, %v292_v31 }
 0x2d3   :  { %v307_v34 = vsel %vm276_vm2, %v6082_v32, 0.0 }
 0x2d4   :  { %v6084_v35 = vpop.eup %6083  ;;  %6087 = vpow2.f32 %v299_v33  ;;  %308 = vadd.xlane.f32.xlu0 %v307_v34 }
 0x2d5   :  { %v304_v37 = vsel %vm276_vm2, %v6084_v35, 0.0  ;;  %v6616_v38 = vpop.eup %6085  ;;  %6089 = vpow2.f32 %v443_v48 }
 0x2d6   :  { %305 = vadd.xlane.f32.xlu2 %v304_v37  ;;  %v454_v42 = vsel %vm276_vm2, %v6616_v38, 0.0 }
 0x2da   :  { %v6088_v39 = vpop.eup %6087  ;;  %v402_v40 = vpop.permute.xlu0 %401 }
 0x2db   :  { %v407_v41 = vsel %vm224_vm1, %v402_v40, 0  ;;  %v310_v43 = vsel %vm276_vm2, %v6088_v39, 0.0  ;;  %v6090_v49 = vpop.eup %6089 }
 0x2dc   :  { %455 = vadd.xlane.f32.xlu0 %v454_v42  ;;  %416 = vmatpush.bf16.xpose.msra.mxu2 %v407_v41  ;;  %v451_v50 = vsel %vm276_vm2, %v6090_v49, 0.0 }
 0x2dd   :  { %311 = vadd.xlane.f32.xlu1 %v310_v43 }
 0x2e7   :  { %v528_v44 = vpop.permute.xlu1 %527 }
 0x2e8   :  { %v533_v6 = vsel %vm224_vm1, %v528_v44, 0 }
 0x2ee   :  { %399 = vrot.lane.b32.xlu2 %v6582_v45, %s8221_s18 }
 0x2ef   :  { %v481_v46 = vpop.permute.xlu1 %480 }
 0x2f0   :  { %675 = vrot.lane.b32.xlu0 %v6572_v36, %s8217_s26  ;;  %493 = vmatpush.bf16.msra.mxu3 %v481_v46 }
 0x2f6   :  { %551 = vrot.lane.b32.xlu1 %v6582_v45, %s8223_s19 }
 0x2f7   :  { %v526_v52 = vpop.permute.xlu1 %525 }
 0x2fe   :  { %549 = vrot.lane.b32.xlu1 %v6582_v45, %s8213_s20  ;;  %s8238_s20 = smov 8  }
 0x306   :  { %701 = vrot.lane.b32.xlu1 %v6582_v45, %s8219_s21 }
 0x30e   :  { %699 = vrot.lane.b32.xlu1 %v6582_v45, %s8217_s26 }
 0x317   :  { %452 = vadd.xlane.f32.xlu2 %v451_v50 }
 0x32f   :  { %677 = vrot.lane.b32.xlu2 %v6572_v36, %s8219_s21 }
 0x339   :  { %v303_v51 = vpop.xlane.xlu2 %302 }
 0x33a   :  { %6091 = vrcp.f32 %v303_v51 }
 0x340   :  { %v6092_v55 = vpop.eup %6091 }
 0x341   :  { %v317_v56 = vmul.f32 %v6092_v55, %v6080_v15 }
 0x343   :  { %v321_v60 = vpack.c.bf16 %v317_v56, %v317_v56 }
 0x345   :  { %v327_v0 = vunpack.c.l.b16 %v321_v60 }
 0x347   :  { %v309_v53 = vpop.xlane.xlu0 %308 }
 0x349   :  { %v306_v54 = vpop.xlane.xlu2 %305 }
 0x34a   :  { %6093 = vrcp.f32 %v306_v54 }
 0x34b   :  { %6095 = vrcp.f32 %v309_v53 }
 0x34f   :  { %v456_v15 = vpop.xlane.xlu0 %455 }
 0x350   :  { %v6094_v57 = vpop.eup %6093  ;;  %v312_v58 = vpop.xlane.xlu1 %311 }
 0x351   :  { %v6096_v59 = vpop.eup %6095  ;;  %v318_v61 = vmul.f32 %v6094_v57, %v6084_v35  ;;  %6097 = vrcp.f32 %v312_v58  ;;  %v400_v12 = vpop.permute.xlu2 %399 }
 0x352   :  { %v319_v63 = vmul.f32 %v6096_v59, %v6082_v32  ;;  %6099 = vrcp.f32 %v456_v15 }
 0x353   :  { %v322_v62 = vpack.c.bf16 %v318_v61, %v318_v61 }
 0x354   :  { %v323_v4 = vpack.c.bf16 %v319_v63, %v319_v63 }
 0x355   :  { %v328_v1 = vunpack.c.l.b16 %v322_v62 }
 0x356   :  { %v352_v8 = vunpack.c.l.b16 %v323_v4 }
 0x357   :  { %v6098_v2 = vpop.eup %6097  ;;  %v329_v3 = vpack.c.b16 %v328_v1, %v327_v0 }
 0x358   :  { %v320_v5 = vmul.f32 %v6098_v2, %v6088_v39  ;;  %v6100_v17 = vpop.eup %6099 }
 0x359   :  { %5556 = vmatmul.msk.bf16.vlgmr.msrb.gmra.mxu2 %vm276_vm2, %v329_v3  ;;  %v468_v21 = vmul.f32 %v6100_v17, %v6616_v38 }
 0x35a   :  { %v324_v7 = vpack.c.bf16 %v320_v5, %v320_v5  ;;  %542 = vmatpush.bf16.xpose.msrb.mxu2 %v533_v6 }
 0x35b   :  { %v472_v25 = vpack.c.bf16 %v468_v21, %v468_v21 }
 0x35c   :  { %v353_v9 = vunpack.c.l.b16 %v324_v7 }
 0x35d   :  { %v478_v31 = vunpack.c.l.b16 %v472_v25 }
 0x35e   :  { %v354_v10 = vpack.c.b16 %v353_v9, %v352_v8 }
 0x360   :  { %5557 = vmatmul.msk.bf16.vlgmr.msrb.gmra.mxu3 %vm276_vm2, %v354_v10 }
 0x362   :  { %v676_v35 = vpop.permute.xlu0 %675 }
 0x368   :  { %v552_v13 = vpop.permute.xlu1 %551 }
 0x369   :  { %v557_v14 = vsel %vm224_vm1, %v552_v13, 0  ;;  %5559 = vmatmul.msk.bf16.vlgmr.msra.gmra.mxu2 %vm224_vm1, %v400_v12 }
 0x36a   :  { %566 = vmatpush.bf16.xpose.msrb.mxu3 %v557_v14 }
 0x370   :  { %v550_v20 = vpop.permute.xlu1 %549 }
 0x378   :  { %v702_v33 = vpop.permute.xlu1 %701 }
 0x379   :  { %5562 = vmatmul.msk.bf16.vlgmr.msrb.gmra.mxu2 %vm224_vm1, %v526_v52  ;;  %v707_v37 = vsel %vm224_vm1, %v702_v33, 0 }
 0x380   :  { %v700_v38 = vpop.permute.xlu1 %699 }
 0x38a   :  { %v453_v16 = vpop.xlane.xlu2 %452 }
 0x38b   :  { %6101 = vrcp.f32 %v453_v16 }
 0x391   :  { %v6102_v23 = vpop.eup %6101 }
 0x392   :  { %v467_v27 = vmul.f32 %v6102_v23, %v6090_v49  ;;  %v678_v28 = vpop.permute.xlu2 %677 }
 0x393   :  { %v683_v29 = vsel %vm224_vm1, %v678_v28, 0 }
 0x394   :  { %v471_v30 = vpack.c.bf16 %v467_v27, %v467_v27  ;;  %692 = vmatpush.bf16.xpose.msra.mxu2 %v683_v29 }
 0x396   :  { %v477_v32 = vunpack.c.l.b16 %v471_v30 }
 0x398   :  { %v479_v34 = vpack.c.b16 %v478_v31, %v477_v32 }
 0x39a   :  { %5560 = vmatmul.msk.bf16.vlgmr.msra.gmra.mxu3 %vm276_vm2, %v479_v34 }
 0x39b   :  { %716 = vmatpush.bf16.xpose.msra.mxu3 %v707_v37  ;;  %5566 = vmatmul.msk.bf16.vlgmr.msra.gmra.mxu2 %vm224_vm1, %v676_v35 }
 0x3aa   :  { %5563 = vmatmul.msk.bf16.vlgmr.msrb.gmra.mxu3 %vm224_vm1, %v550_v20 }
 0x3ba   :  { %5567 = vmatmul.msk.bf16.vlgmr.msra.gmra.mxu3 %vm224_vm1, %v700_v38 }
 0x3dc   :  { %v6651_v39 = vpop.f32.mrf.mxu2 }
 0x3e3   :  { %v6659_v54 = vpop.f32.mrf.mxu3 }
 0x3e4   :  { %v6653_v40 = vpop.f32.mrf.mxu2 }
 0x3eb   :  { %v6661_v55 = vpop.f32.mrf.mxu3 }
 0x3ec   :  { %v418_v41 = vpop.f32.mrf.mxu2 }
 0x3ed   :  { %v425_v42 = vmul.f32 0.35355338, %v418_v41 }
 0x3ef   :  { %v433_v43 = vsel %vm276_vm2, %v425_v42, -inf }
 0x3f0   :  { %434 = vmax.xlane.f32.xlu2 %v433_v43 }
 0x3f4   :  { %v420_v44 = vpop.f32.mrf.mxu2 }
 0x3f5   :  { %v426_v46 = vmul.f32 0.35355338, %v420_v44 }
 0x3f7   :  { %v436_v47 = vsel %vm276_vm2, %v426_v46, -inf }
 0x3f8   :  { %437 = vmax.xlane.f32.xlu1 %v436_v47 }
 0x3fc   :  { %v544_v48 = vpop.f32.mrf.mxu2 }
 0x3fd   :  { %v573_v49 = vmul.f32 0.35355338, %v544_v48 }
 0x3ff   :  { %v577_v50 = vsel %vm276_vm2, %v573_v49, -inf }
 0x400   :  { %578 = vmax.xlane.f32.xlu0 %v577_v50 }
 0x404   :  { %v546_v51 = vpop.f32.mrf.mxu2 }
 0x405   :  { %v574_v52 = vmul.f32 0.35355338, %v546_v51 }
 0x407   :  { %v580_v53 = vsel %vm276_vm2, %v574_v52, -inf }
 0x408   :  { %581 = vmax.xlane.f32.xlu2 %v580_v53 }
 0x41d   :  { %v6663_v56 = vpop.f32.mrf.mxu3 }
 0x41e   :  { %v694_v57 = vpop.f32.mrf.mxu2 }
 0x41f   :  { %v723_v58 = vmul.f32 0.35355338, %v694_v57 }
 0x421   :  { %v727_v59 = vsel %vm276_vm2, %v723_v58, -inf }
 0x422   :  { %728 = vmax.xlane.f32.xlu2 %v727_v59 }
 0x425   :  { %v6666_v60 = vpop.f32.mrf.mxu3 }
 0x426   :  { %v696_v0 = vpop.f32.mrf.mxu2 }
 0x427   :  { %v6669_v1 = vmul.f32 0.35355338, %v696_v0 }
 0x429   :  { %v730_v4 = vsel %vm276_vm2, %v6669_v1, -inf }
 0x42d   :  { %v568_v61 = vpop.f32.mrf.mxu3 }
 0x42e   :  { %v575_v62 = vmul.f32 0.35355338, %v568_v61 }
 0x430   :  { %v583_v63 = vsel %vm276_vm2, %v575_v62, -inf }
 0x431   :  { %584 = vmax.xlane.f32.xlu1 %v583_v63 }
 0x435   :  { %v570_v2 = vpop.f32.mrf.mxu3 }
 0x436   :  { %v576_v3 = vmul.f32 0.35355338, %v570_v2 }
 0x438   :  { %v586_v5 = vsel %vm276_vm2, %v576_v3, -inf }
 0x439   :  { %731 = vmax.xlane.f32.xlu1 %v730_v4  ;;  %587 = vmax.xlane.f32.xlu0 %v586_v5 }
 0x43a   :  { %630 = vrot.lane.b32.xlu2 %v6572_v36, %s8205_s22 }
 0x43d   :  { %v718_v6 = vpop.f32.mrf.mxu3 }
 0x43e   :  { %v6676_v7 = vmul.f32 0.35355338, %v718_v6 }
 0x440   :  { %v733_v8 = vsel %vm276_vm2, %v6676_v7, -inf }
 0x441   :  { %734 = vmax.xlane.f32.xlu0 %v733_v8  ;;  %v6018_v8 = vpack.i.bf16 %v6666_v60, %v6663_v56 }
 0x445   :  { %v720_v9 = vpop.f32.mrf.mxu3 }
 0x446   :  { %v6682_v10 = vmul.f32 0.35355338, %v720_v9 }
 0x448   :  { %v736_v12 = vsel %vm276_vm2, %v6682_v10, -inf }
 0x455   :  { %505 = vrot.lane.b32.xlu0 %v6582_v45, %s8215_s0 }
 0x463   :  { %v435_v13 = vpop.xlane.xlu2 %434  ;;  %737 = vmax.xlane.f32.xlu2 %v736_v12 }
 0x464   :  { %v441_v14 = vsub.f32 %v425_v42, %v435_v13 }
 0x466   :  { %v447_v15 = vmul.f32 1.442695, %v441_v14 }
 0x468   :  { %6103 = vpow2.f32 %v447_v15 }
 0x46b   :  { %v438_v16 = vpop.xlane.xlu1 %437 }
 0x46c   :  { %v442_v17 = vsub.f32 %v426_v46, %v438_v16 }
 0x46e   :  { %v6686_v20 = vpop.eup %6103  ;;  %v449_v23 = vmul.f32 1.442695, %v442_v17 }
 0x46f   :  { %v457_v21 = vsel %vm276_vm2, %v6686_v20, 0.0 }
 0x470   :  { %458 = vadd.xlane.f32.xlu1 %v457_v21  ;;  %6105 = vpow2.f32 %v449_v23 }
 0x473   :  { %v579_v25 = vpop.xlane.xlu0 %578 }
 0x474   :  { %v589_v27 = vsub.f32 %v573_v49, %v579_v25 }
 0x476   :  { %v593_v28 = vmul.f32 1.442695, %v589_v27  ;;  %v6690_v29 = vpop.eup %6105 }
 0x477   :  { %v460_v34 = vsel %vm276_vm2, %v6690_v29, 0.0 }
 0x478   :  { %6107 = vpow2.f32 %v593_v28 }
 0x47b   :  { %v582_v30 = vpop.xlane.xlu2 %581 }
 0x47c   :  { %v590_v31 = vsub.f32 %v574_v52, %v582_v30 }
 0x47e   :  { %v6692_v32 = vpop.eup %6107  ;;  %v595_v33 = vmul.f32 1.442695, %v590_v31 }
 0x47f   :  { %461 = vadd.xlane.f32.xlu0 %v460_v34  ;;  %v601_v35 = vsel %vm276_vm2, %v6692_v32, 0.0 }
 0x480   :  { %6109 = vpow2.f32 %v595_v33  ;;  %602 = vadd.xlane.f32.xlu2 %v601_v35 }
 0x486   :  { %v6698_v37 = vpop.eup %6109 }
 0x487   :  { %v604_v38 = vsel %vm276_vm2, %v6698_v37, 0.0 }
 0x488   :  { %605 = vadd.xlane.f32.xlu1 %v604_v38 }
 0x495   :  { %v729_v41 = vpop.xlane.xlu2 %728 }
 0x496   :  { %v739_v42 = vsub.f32 %v723_v58, %v729_v41 }
 0x498   :  { %v743_v43 = vmul.f32 1.442695, %v739_v42  ;;  %655 = vrot.lane.b32.xlu2 %v6582_v45, %s8205_s22  ;;  %s8235_s22 = smov 64  }
 0x49a   :  { %6111 = vpow2.f32 %v743_v43 }
 0x49d   :  { %v631_v44 = vpop.permute.xlu2 %630 }
 0x49e   :  { %643 = vmatpush.bf16.msrb.mxu0 %v631_v44 }
 0x4a0   :  { %v6704_v46 = vpop.eup %6111 }
 0x4a1   :  { %v751_v47 = vsel %vm276_vm2, %v6704_v46, 0.0 }
 0x4a2   :  { %752 = vadd.xlane.f32.xlu0 %v751_v47 }
 0x4a4   :  { %v585_v48 = vpop.xlane.xlu1 %584 }
 0x4a5   :  { %v591_v49 = vsub.f32 %v575_v62, %v585_v48 }
 0x4a7   :  { %v597_v50 = vmul.f32 1.442695, %v591_v49 }
 0x4a9   :  { %6113 = vpow2.f32 %v597_v50 }
 0x4ac   :  { %v588_v51 = vpop.xlane.xlu0 %587  ;;  %v732_v52 = vpop.xlane.xlu1 %731 }
 0x4ad   :  { %v592_v53 = vsub.f32 %v576_v3, %v588_v51  ;;  %v740_v59 = vsub.f32 %v6669_v1, %v732_v52 }
 0x4af   :  { %v6708_v57 = vpop.eup %6113  ;;  %v599_v58 = vmul.f32 1.442695, %v592_v53  ;;  %v745_v63 = vmul.f32 1.442695, %v740_v59 }
 0x4b0   :  { %v607_v61 = vsel %vm276_vm2, %v6708_v57, 0.0 }
 0x4b1   :  { %6115 = vpow2.f32 %v599_v58  ;;  %608 = vadd.xlane.f32.xlu1 %v607_v61 }
 0x4b2   :  { %6117 = vpow2.f32 %v745_v63 }
 0x4b4   :  { %v735_v0 = vpop.xlane.xlu0 %734 }
 0x4b5   :  { %v741_v2 = vsub.f32 %v6676_v7, %v735_v0 }
 0x4b6   :  { %805 = vrot.lane.b32.xlu0 %v6582_v45, %s8201_s23 }
 0x4b7   :  { %v6716_v62 = vpop.eup %6115  ;;  %v747_v3 = vmul.f32 1.442695, %v741_v2 }
 0x4b8   :  { %v610_v1 = vsel %vm276_vm2, %v6716_v62, 0.0  ;;  %v6720_v4 = vpop.eup %6117 }
 0x4b9   :  { %6119 = vpow2.f32 %v747_v3  ;;  %611 = vadd.xlane.f32.xlu1 %v610_v1  ;;  %v754_v7 = vsel %vm276_vm2, %v6720_v4, 0.0 }
 0x4bf   :  { %v6722_v5 = vpop.eup %6119 }
 0x4c0   :  { %v757_v6 = vsel %vm276_vm2, %v6722_v5, 0.0 }
 0x4c1   :  { %758 = vadd.xlane.f32.xlu2 %v757_v6  ;;  %755 = vadd.xlane.f32.xlu1 %v754_v7 }
 0x4c7   :  { %v506_v45 = vpop.permute.xlu0 %505 }
 0x4c8   :  { %518 = vmatpush.bf16.msra.mxu1 %v506_v45 }
 0x4d6   :  { %v738_v12 = vpop.xlane.xlu2 %737 }
 0x4d7   :  { %v742_v13 = vsub.f32 %v6682_v10, %v738_v12 }
 0x4d9   :  { %6019 = vrot.lane.b32.xlu2 %v6018_v8, %s8209_s24  ;;  %v749_v17 = vmul.f32 1.442695, %v742_v13 }
 0x4da   :  { %780 = vrot.lane.b32.xlu1 %v6572_v36, %s8201_s23  ;;  %s8236_s23 = smov 48  }
 0x4e3   :  { %v459_v9 = vpop.xlane.xlu1 %458 }
 0x4e4   :  { %6121 = vrcp.f32 %v459_v9 }
 0x4ea   :  { %v6122_v15 = vpop.eup %6121 }
 0x4eb   :  { %v469_v21 = vmul.f32 %v6122_v15, %v6686_v20 }
 0x4ed   :  { %v473_v60 = vpack.c.bf16 %v469_v21, %v469_v21 }
 0x4ef   :  { %v502_v10 = vunpack.c.l.b16 %v473_v60 }
 0x4f2   :  { %v462_v14 = vpop.xlane.xlu0 %461 }
 0x4f3   :  { %6123 = vrcp.f32 %v462_v14  ;;  %v603_v16 = vpop.xlane.xlu2 %602 }
 0x4f4   :  { %6125 = vrcp.f32 %v603_v16 }
 0x4f5   :  { %6127 = vpow2.f32 %v749_v17 }
 0x4f9   :  { %v6124_v56 = vpop.eup %6123 }
 0x4fa   :  { %v470_v23 = vmul.f32 %v6124_v56, %v6690_v29  ;;  %v6126_v27 = vpop.eup %6125 }
 0x4fb   :  { %v656_v25 = vpop.permute.xlu2 %655  ;;  %v606_v36 = vpop.xlane.xlu1 %605  ;;  %v617_v31 = vmul.f32 %v6126_v27, %v6692_v32 }
 0x4fc   :  { %v474_v28 = vpack.c.bf16 %v470_v23, %v470_v23  ;;  %6129 = vrcp.f32 %v606_v36  ;;  %668 = vmatpush.bf16.msrb.mxu1 %v656_v25  ;;  %v6128_v33 = vpop.eup %6127 }
 0x4fd   :  { %v621_v20 = vpack.c.bf16 %v617_v31, %v617_v31  ;;  %v760_v29 = vsel %vm276_vm2, %v6128_v33, 0.0 }
 0x4fe   :  { %v503_v30 = vunpack.c.l.b16 %v474_v28 }
 0x4ff   :  { %v627_v42 = vunpack.c.l.b16 %v621_v20 }
 0x500   :  { %v504_v34 = vpack.c.b16 %v503_v30, %v502_v10 }
 0x502   :  { %v6130_v35 = vpop.eup %6129  ;;  %5561 = vmatmul.msk.bf16.vlgmr.msra.gmra.mxu1 %vm276_vm2, %v504_v34 }
 0x503   :  { %v618_v38 = vmul.f32 %v6130_v35, %v6698_v37 }
 0x504   :  { %761 = vadd.xlane.f32.xlu1 %v760_v29 }
 0x505   :  { %v622_v41 = vpack.c.bf16 %v618_v38, %v618_v38 }
 0x507   :  { %v628_v43 = vunpack.c.l.b16 %v622_v41  ;;  %v5952_v41 = vld [vmem:[%s8186_s4 + $0x8] sm:$0xff] }
 0x508   :  { %913 = vmatpush.bf16.msrb.mxu2 %v5952_v41 }
 0x509   :  { %v629_v44 = vpack.c.b16 %v628_v43, %v627_v42  ;;  %v5951_v42 = vld [vmem:[%s8186_s4] sm:$0xff] }
 0x50b   :  { %5564 = vmatmul.msk.bf16.vlgmr.msrb.gmra.mxu0 %vm276_vm2, %v629_v44 }
 0x50c   :  { %914 = vmatpush.bf16.msrb.mxu2 %v5951_v42 }
 0x515   :  { %v753_v47 = vpop.xlane.xlu0 %752 }
 0x524   :  { %v609_v48 = vpop.xlane.xlu1 %608 }
 0x525   :  { %6131 = vrcp.f32 %v609_v48 }
 0x528   :  { %v806_v32 = vpop.permute.xlu0 %805 }
 0x529   :  { %818 = vmatpush.bf16.msra.mxu1 %v806_v32 }
 0x52b   :  { %v6132_v50 = vpop.eup %6131 }
 0x52c   :  { %v612_v49 = vpop.xlane.xlu1 %611  ;;  %v619_v51 = vmul.f32 %v6132_v50, %v6708_v57 }
 0x52d   :  { %6133 = vrcp.f32 %v612_v49 }
 0x52e   :  { %v623_v52 = vpack.c.bf16 %v619_v51, %v619_v51 }
 0x530   :  { %v652_v61 = vunpack.c.l.b16 %v623_v52 }
 0x533   :  { %v6134_v37 = vpop.eup %6133 }
 0x534   :  { %v620_v53 = vmul.f32 %v6134_v37, %v6716_v62  ;;  %v756_v59 = vpop.xlane.xlu1 %755  ;;  %v759_v12 = vpop.xlane.xlu2 %758 }
 0x535   :  { %6135 = vrcp.f32 %v756_v59 }
 0x536   :  { %v624_v58 = vpack.c.bf16 %v620_v53, %v620_v53  ;;  %6137 = vrcp.f32 %v753_v47 }
 0x537   :  { %6139 = vrcp.f32 %v759_v12 }
 0x538   :  { %v653_v63 = vunpack.c.l.b16 %v624_v58 }
 0x53a   :  { %v654_v0 = vpack.c.b16 %v653_v63, %v652_v61 }
 0x53b   :  { %v6136_v2 = vpop.eup %6135 }
 0x53c   :  { %5565 = vmatmul.msk.bf16.vlgmr.msrb.gmra.mxu1 %vm276_vm2, %v654_v0  ;;  %v6138_v3 = vpop.eup %6137  ;;  %v768_v1 = vmul.f32 %v6136_v2, %v6720_v4  ;;  %v6020_v44 = vpop.permute.xlu2 %6019 }
 0x53d   :  { %v767_v6 = vmul.f32 %v6138_v3, %v6704_v46  ;;  %v6140_v14 = vpop.eup %6139  ;;  %v6022_v47 = vunpack.i.h.bf16 %v6020_v44  ;;  %v6021_v48 = vunpack.i.l.bf16 %v6020_v44 }
 0x53e   :  { %v772_v57 = vpack.c.bf16 %v768_v1, %v768_v1  ;;  %v769_v15 = vmul.f32 %v6140_v14, %v6722_v5 }
 0x53f   :  { %v771_v7 = vpack.c.bf16 %v767_v6, %v767_v6  ;;  %v874_v51 = vsel %vm224_vm1, %v6653_v40, %v6022_v47  ;;  %v873_v37 = vsel %vm224_vm1, %v6651_v39, %v6021_v48 }
 0x540   :  { %v778_v45 = vunpack.c.l.b16 %v772_v57  ;;  %v773_v4 = vpack.c.bf16 %v769_v15, %v769_v15 }
 0x541   :  { %v777_v8 = vunpack.c.l.b16 %v771_v7 }
 0x542   :  { %v802_v21 = vunpack.c.l.b16 %v773_v4 }
 0x543   :  { %v779_v9 = vpack.c.b16 %v778_v45, %v777_v8 }
 0x54c   :  { %v781_v62 = vpop.permute.xlu1 %780 }
 0x54d   :  { %793 = vmatpush.bf16.msra.mxu0 %v781_v62 }
 0x550   :  { %5568 = vmatmul.msk.bf16.vlgmr.msra.gmra.mxu0 %vm276_vm2, %v779_v9 }
 0x577   :  { %v762_v13 = vpop.xlane.xlu1 %761 }
 0x578   :  { %6141 = vrcp.f32 %v762_v13 }
 0x57e   :  { %v6142_v16 = vpop.eup %6141 }
 0x57f   :  { %v770_v17 = vmul.f32 %v6142_v16, %v6128_v33  ;;  %v520_v27 = vpop.f32.mrf.mxu1 }
 0x581   :  { %v774_v46 = vpack.c.bf16 %v770_v17, %v770_v17 }
 0x583   :  { %v803_v56 = vunpack.c.l.b16 %v774_v46 }
 0x585   :  { %v804_v60 = vpack.c.b16 %v803_v56, %v802_v21 }
 0x587   :  { %5569 = vmatmul.msk.bf16.vlgmr.msra.gmra.mxu1 %vm276_vm2, %v804_v60  ;;  %v522_v28 = vpop.f32.mrf.mxu1 }
 0x588   :  { %v645_v23 = vpop.f32.mrf.mxu0  ;;  %v6033_v35 = vpack.i.bf16 %v522_v28, %v520_v27 }
 0x590   :  { %v647_v25 = vpop.f32.mrf.mxu0 }
 0x591   :  { %v6023_v36 = vpack.i.bf16 %v647_v25, %v645_v23 }
 0x593   :  { %6024 = vrot.lane.b32.xlu0 %v6023_v36, %s8203_s25 }
 0x5b9   :  { %v670_v10 = vpop.f32.mrf.mxu1 }
 0x5c1   :  { %v672_v30 = vpop.f32.mrf.mxu1 }
 0x5c2   :  { %v6038_v5 = vpack.i.bf16 %v672_v30, %v670_v10  ;;  %v6410_v30 = vmov 32.0  }
 0x5c3   :  { %6143 = vrcp.f32 %v6410_v30 }
 0x5c4   :  { %6039 = vrot.lane.b32.xlu1 %v6038_v5, %s8203_s25 }
 0x5cd   :  { %v795_v31 = vpop.f32.mrf.mxu0 }
 0x5d5   :  { %v797_v33 = vpop.f32.mrf.mxu0 }
 0x5d6   :  { %v6028_v34 = vpack.i.bf16 %v797_v33, %v795_v31 }
 0x5d8   :  { %6029 = vrot.lane.b32.xlu0 %v6028_v34, %s8207_s27 }
 0x5e0   :  { %6034 = vrot.lane.b32.xlu0 %v6033_v35, %s8209_s24  ;;  %s8239_s24 = smov 16  }
 0x604   :  { %v820_v20 = vpop.f32.mrf.mxu1 }
 0x605   :  { %v6025_v43 = vpop.permute.xlu0 %6024 }
 0x606   :  { %v6027_v32 = vunpack.i.h.bf16 %v6025_v43  ;;  %v6026_v49 = vunpack.i.l.bf16 %v6025_v43 }
 0x608   :  { %v878_v58 = vsel %vm276_vm2, %v874_v51, %v6027_v32  ;;  %v877_v59 = vsel %vm276_vm2, %v873_v37, %v6026_v49 }
 0x60c   :  { %v822_v38 = vpop.f32.mrf.mxu1 }
 0x60d   :  { %v6043_v29 = vpack.i.bf16 %v822_v38, %v820_v20 }
 0x60f   :  { %6044 = vrot.lane.b32.xlu2 %v6043_v29, %s8207_s27 }
 0x636   :  { %v6040_v40 = vpop.permute.xlu1 %6039 }
 0x637   :  { %v6042_v57 = vunpack.i.h.bf16 %v6040_v40  ;;  %v6041_v7 = vunpack.i.l.bf16 %v6040_v40 }
 0x64a   :  { %v6030_v50 = vpop.permute.xlu0 %6029 }
 0x64b   :  { %v6032_v52 = vunpack.i.h.bf16 %v6030_v50  ;;  %v6031_v53 = vunpack.i.l.bf16 %v6030_v50 }
 0x64d   :  { %v883_v61 = vsel %vm881_vm3, %v878_v58, %v6032_v52  ;;  %v882_v63 = vsel %vm881_vm3, %v877_v59, %v6031_v53 }
 0x64e   :  { %v886_v0 = vpack.c.bf16 %v883_v61, %v882_v63  ;;  %v5954_v61 = vld [vmem:[%s8187_s5 + $0x8] sm:$0xff] }
 0x64f   :  { %1074 = vmatpush.bf16.msrb.mxu3 %v5954_v61  ;;  %v5955_v61 = vld [vmem:[%s8188_s6] sm:$0xff] }
 0x650   :  { %5578 = vmatmul.msk.bf16.vlgmr.msrb.gmra.mxu2 %vm187_vm0, %v886_v0 }
 0x652   :  { %v6035_v2 = vpop.permute.xlu0 %6034 }
 0x653   :  { %v6037_v3 = vunpack.i.h.bf16 %v6035_v2  ;;  %v6036_v1 = vunpack.i.l.bf16 %v6035_v2 }
 0x655   :  { %v876_v39 = vsel %vm224_vm1, %v6661_v55, %v6037_v3  ;;  %v875_v6 = vsel %vm224_vm1, %v6659_v54, %v6036_v1  ;;  %v888_v55 = vperm.slane %v6569_v26, 1  ;;  %v5953_v3 = vld [vmem:[%s8187_s5] sm:$0xff] }
 0x656   :  { %v879_v9 = vsel %vm276_vm2, %v875_v6, %v6041_v7  ;;  %v880_v12 = vsel %vm276_vm2, %v876_v39, %v6042_v57  ;;  %1075 = vmatpush.bf16.msrb.mxu3 %v5953_v3 }
 0x669   :  { %v6045_v45 = vpop.permute.xlu2 %6044 }
 0x66a   :  { %v6047_v8 = vunpack.i.h.bf16 %v6045_v45  ;;  %v6046_v62 = vunpack.i.l.bf16 %v6045_v45 }
 0x66c   :  { %v884_v13 = vsel %vm881_vm3, %v879_v9, %v6046_v62  ;;  %v885_v14 = vsel %vm881_vm3, %v880_v12, %v6047_v8 }
 0x66d   :  { %v887_v15 = vpack.c.bf16 %v885_v14, %v884_v13 }
 0x66f   :  { %5579 = vmatmul.msk.bf16.gmra.mxu2 %vm187_vm0, %v887_v15 }
 0x6d3   :  { %v916_v16 = vpop.f32.mrf.mxu2 }
 0x6d4   :  { %v917_v54 = vadd.f32 %v916_v16, %v888_v55  ;;  %v6816_v16 = vld [vmem:[%s8185_s7] sm:$0xff] }
 0x6d6   :  { %v926_v4 = vadd.f32 %v917_v54, %v6552_v18  ;;  %v1025_v54 = vperm.slane %v6816_v16, 4 }
 0x6d8   :  { %v930_v17 = vsel %vm187_vm0, %v926_v4, 0.0 }
 0x6d9   :  { %931 = vadd.xlane.f32.xlu0 %v930_v17 }
 0x6db   :  { %v918_v46 = vpop.f32.mrf.mxu2 }
 0x6dc   :  { %v919_v21 = vadd.f32 %v918_v46, %v888_v55 }
 0x6de   :  { %v927_v56 = vadd.f32 %v919_v21, %v6554_v19  ;;  %v6144_v19 = vpop.eup %6143 }
 0x6df   :  { %v943_v5 = vmul.f32 32.0, %v6144_v19  ;;  %vm947_vm4 = vweird.f32 %v6144_v19 }
 0x6e0   :  { %v933_v60 = vsel %vm187_vm0, %v927_v56, 0.0 }
 0x6e1   :  { %934 = vadd.xlane.f32.xlu2 %v933_v60  ;;  %v944_v31 = vsub.f32 1.0, %v943_v5 }
 0x6e3   :  { %v945_v33 = vmul.f32 %v6144_v19, %v944_v31 }
 0x6e5   :  { %v946_v34 = vadd.f32 %v6144_v19, %v945_v33 }
 0x6e7   :  { %v6787_v35 = vsel %vm947_vm4, %v6144_v19, %v946_v34 }
 0x6f2   :  { %v921_v23 = vpop.f32.mrf.mxu2 }
 0x6f3   :  { %v922_v25 = vadd.f32 %v921_v23, %v888_v55  ;;  %v1030_v23 = vperm.slane %v6816_v16, 5 }
 0x6f5   :  { %v928_v36 = vadd.f32 %v922_v25, %v6559_v22 }
 0x6f7   :  { %v936_v26 = vsel %vm187_vm0, %v928_v36, 0.0 }
 0x6f8   :  { %937 = vadd.xlane.f32.xlu1 %v936_v26 }
 0x6fa   :  { %v923_v27 = vpop.f32.mrf.mxu2 }
 0x6fb   :  { %v924_v28 = vadd.f32 %v923_v27, %v888_v55 }
 0x6fd   :  { %v929_v18 = vadd.f32 %v924_v28, %v6561_v24 }
 0x6ff   :  { %v939_v10 = vsel %vm187_vm0, %v929_v18, 0.0 }
 0x700   :  { %940 = vadd.xlane.f32.xlu0 %v939_v10 }
 0x74c   :  { %v932_v22 = vpop.xlane.xlu0 %931 }
 0x74d   :  { %v949_v20 = vmul.f32 %v6787_v35, %v932_v22 }
 0x74f   :  { %v953_v38 = vsub.f32 %v926_v4, %v949_v20 }
 0x751   :  { %v957_v29 = vmul.f32 %v953_v38, %v953_v38 }
 0x753   :  { %v961_v24 = vsel %vm187_vm0, %v957_v29, 0.0 }
 0x754   :  { %962 = vadd.xlane.f32.xlu2 %v961_v24  ;;  %v935_v41 = vpop.xlane.xlu2 %934 }
 0x755   :  { %v950_v42 = vmul.f32 %v6787_v35, %v935_v41 }
 0x757   :  { %v954_v43 = vsub.f32 %v927_v56, %v950_v42 }
 0x759   :  { %v958_v44 = vmul.f32 %v954_v43, %v954_v43 }
 0x75b   :  { %v964_v47 = vsel %vm187_vm0, %v958_v44, 0.0 }
 0x75c   :  { %965 = vadd.xlane.f32.xlu0 %v964_v47 }
 0x76b   :  { %v938_v48 = vpop.xlane.xlu1 %937 }
 0x76c   :  { %v951_v32 = vmul.f32 %v6787_v35, %v938_v48 }
 0x76e   :  { %v6794_v49 = vsub.f32 %v928_v36, %v951_v32 }
 0x770   :  { %v959_v50 = vmul.f32 %v6794_v49, %v6794_v49 }
 0x772   :  { %v967_v51 = vsel %vm187_vm0, %v959_v50, 0.0 }
 0x773   :  { %v941_v37 = vpop.xlane.xlu0 %940  ;;  %968 = vadd.xlane.f32.xlu2 %v967_v51 }
 0x774   :  { %v952_v52 = vmul.f32 %v6787_v35, %v941_v37 }
 0x776   :  { %v6800_v53 = vsub.f32 %v929_v18, %v952_v52 }
 0x778   :  { %v960_v58 = vmul.f32 %v6800_v53, %v6800_v53 }
 0x77a   :  { %v970_v59 = vsel %vm187_vm0, %v960_v58, 0.0 }
 0x77b   :  { %971 = vadd.xlane.f32.xlu0 %v970_v59  ;;  %v5958_v59 = vld [vmem:[%s8188_s6 + $0x18] sm:$0xff] }
 0x77c   :  { %1129 = vmatpush.bf16.msrb.mxu0 %v5958_v59 }
 0x7c7   :  { %v963_v63 = vpop.xlane.xlu2 %962 }
 0x7c8   :  { %v973_v0 = vmul.f32 %v963_v63, %v6787_v35 }
 0x7ca   :  { %v977_v2 = vadd.f32 1e-05, %v973_v0  ;;  %v1049_v0 = vperm.slane %v6816_v16, 2 }
 0x7cc   :  { %6145 = vrsqrt.f32 %v977_v2  ;;  %vm987_vm6 = vweird.f32 %v977_v2 }
 0x7cf   :  { %v966_v1 = vpop.xlane.xlu0 %965 }
 0x7d0   :  { %v974_v40 = vmul.f32 %v966_v1, %v6787_v35 }
 0x7d2   :  { %v6146_v39 = vpop.eup %6145  ;;  %v978_v6 = vadd.f32 1e-05, %v974_v40 }
 0x7d3   :  { %v982_v57 = vmul.f32 %v6146_v39, %v977_v2  ;;  %vm988_vm5 = vweird.f32 %v6146_v39 }
 0x7d4   :  { %6147 = vrsqrt.f32 %v978_v6  ;;  %vm989_vm7 = vmor %vm987_vm6, %vm988_vm5  ;;  %vm997_vm9 = vweird.f32 %v978_v6  ;;  %vm1118_vm5 = vcmask 523264  }
 0x7d5   :  { %v983_v7 = vmul.f32 %v6146_v39, %v982_v57 }
 0x7d7   :  { %v984_v45 = vmul.f32 0.5, %v983_v7 }
 0x7d9   :  { %v985_v8 = vsub.f32 1.5, %v984_v45 }
 0x7da   :  { %v6148_v62 = vpop.eup %6147 }
 0x7db   :  { %v986_v9 = vmul.f32 %v6146_v39, %v985_v8  ;;  %v992_v12 = vmul.f32 %v6148_v62, %v978_v6  ;;  %vm998_vm8 = vweird.f32 %v6148_v62 }
 0x7dc   :  { %vm999_vm10 = vmor %vm997_vm9, %vm998_vm8 }
 0x7dd   :  { %v993_v13 = vmul.f32 %v6148_v62, %v992_v12  ;;  %v990_v14 = vsel %vm989_vm7, %v6146_v39, %v986_v9 }
 0x7de   :  { %v1021_v4 = vmul.f32 %v990_v14, %v953_v38 }
 0x7df   :  { %v994_v15 = vmul.f32 0.5, %v993_v13  ;;  %v1093_v13 = vperm.slane %v6816_v16, 3 }
 0x7e0   :  { %v1026_v21 = vmul.f32 %v1025_v54, %v1021_v4 }
 0x7e1   :  { %v995_v55 = vsub.f32 1.5, %v994_v15 }
 0x7e2   :  { %v6821_v27 = vadd.f32 %v1030_v23, %v1026_v21 }
 0x7e3   :  { %v996_v17 = vmul.f32 %v6148_v62, %v995_v55 }
 0x7e5   :  { %v1000_v46 = vsel %vm999_vm10, %v6148_v62, %v996_v17 }
 0x7e6   :  { %v1022_v56 = vmul.f32 %v1000_v46, %v954_v43  ;;  %v969_v60 = vpop.xlane.xlu2 %968 }
 0x7e7   :  { %v975_v25 = vmul.f32 %v969_v60, %v6787_v35 }
 0x7e8   :  { %v1027_v36 = vmul.f32 %v1025_v54, %v1022_v56 }
 0x7e9   :  { %v979_v26 = vadd.f32 1e-05, %v975_v25 }
 0x7ea   :  { %v6823_v28 = vadd.f32 %v1030_v23, %v1027_v36 }
 0x7eb   :  { %6149 = vrsqrt.f32 %v979_v26  ;;  %vm1007_vm12 = vweird.f32 %v979_v26 }
 0x7ec   :  { %v1047_v18 = vpack.c.bf16 %v6823_v28, %v6821_v27 }
 0x7ee   :  { %5588 = vmatmul.msk.bf16.vlgmr.msrb.gmra.mxu3 %vm187_vm0, %v1047_v18  ;;  %v972_v10 = vpop.xlane.xlu0 %971 }
 0x7ef   :  { %v976_v30 = vmul.f32 %v972_v10, %v6787_v35 }
 0x7f1   :  { %v6150_v19 = vpop.eup %6149  ;;  %v980_v5 = vadd.f32 1e-05, %v976_v30 }
 0x7f2   :  { %v1002_v31 = vmul.f32 %v6150_v19, %v979_v26  ;;  %vm1008_vm11 = vweird.f32 %v6150_v19 }
 0x7f3   :  { %6151 = vrsqrt.f32 %v980_v5  ;;  %vm1009_vm13 = vmor %vm1007_vm12, %vm1008_vm11  ;;  %vm1017_vm15 = vweird.f32 %v980_v5 }
 0x7f4   :  { %v1003_v33 = vmul.f32 %v6150_v19, %v1002_v31 }
 0x7f6   :  { %v1004_v34 = vmul.f32 0.5, %v1003_v33 }
 0x7f8   :  { %v1005_v22 = vsub.f32 1.5, %v1004_v34 }
 0x7f9   :  { %v6152_v20 = vpop.eup %6151 }
 0x7fa   :  { %v1006_v38 = vmul.f32 %v6150_v19, %v1005_v22  ;;  %v1012_v29 = vmul.f32 %v6152_v20, %v980_v5  ;;  %vm1018_vm14 = vweird.f32 %v6152_v20 }
 0x7fb   :  { %vm1019_vm4 = vmor %vm1017_vm15, %vm1018_vm14 }
 0x7fc   :  { %v1013_v24 = vmul.f32 %v6152_v20, %v1012_v29  ;;  %v1010_v41 = vsel %vm1009_vm13, %v6150_v19, %v1006_v38 }
 0x7fd   :  { %v1023_v44 = vmul.f32 %v1010_v41, %v6794_v49  ;;  %v5957_v49 = vld [vmem:[%s8188_s6 + $0x10] sm:$0xff] }
 0x7fe   :  { %v1014_v42 = vmul.f32 0.5, %v1013_v24  ;;  %1130 = vmatpush.bf16.msrb.mxu0 %v5957_v49 }
 0x7ff   :  { %v1028_v50 = vmul.f32 %v1025_v54, %v1023_v44 }
 0x800   :  { %v1015_v43 = vsub.f32 1.5, %v1014_v42 }
 0x801   :  { %v1033_v37 = vadd.f32 %v1030_v23, %v1028_v50  ;;  %v5960_v50 = vld [vmem:[%s8184_s3 + $0x18] sm:$0xff] }
 0x802   :  { %v1016_v47 = vmul.f32 %v6152_v20, %v1015_v43  ;;  %1285 = vmatpush.bf16.msrb.mxu1 %v5960_v50 }
 0x804   :  { %v1020_v48 = vsel %vm1019_vm4, %v6152_v20, %v1016_v47 }
 0x805   :  { %v1024_v32 = vmul.f32 %v1020_v48, %v6800_v53  ;;  %v5956_v53 = vld [vmem:[%s8188_s6 + $0x8] sm:$0xff] }
 0x806   :  { %1131 = vmatpush.bf16.msrb.mxu0 %v5956_v53 }
 0x807   :  { %v1029_v51 = vmul.f32 %v1025_v54, %v1024_v32 }
 0x809   :  { %v1034_v52 = vadd.f32 %v1030_v23, %v1029_v51 }
 0x80a   :  { %1132 = vmatpush.bf16.msrb.mxu0 %v5955_v61 }
 0x80b   :  { %v1048_v58 = vpack.c.bf16 %v1034_v52, %v1033_v37 }
 0x80d   :  { %5589 = vmatmul.msk.bf16.gmra.mxu3 %vm187_vm0, %v1048_v58  ;;  %v5959_v58 = vld [vmem:[%s8184_s3 + $0x10] sm:$0xff] }
 0x80e   :  { %1286 = vmatpush.bf16.msrb.mxu1 %v5959_v58 }
 0x871   :  { %v1077_v63 = vpop.f32.mrf.mxu3 }
 0x872   :  { %v1078_v2 = vadd.f32 %v1077_v63, %v1049_v0 }
 0x874   :  { %v1087_v40 = vmax.f32 %v1078_v2, 0.0 }
 0x879   :  { %v1079_v3 = vpop.f32.mrf.mxu3 }
 0x87a   :  { %v1080_v1 = vadd.f32 %v1079_v3, %v1049_v0 }
 0x87c   :  { %v1088_v39 = vmax.f32 %v1080_v1, 0.0 }
 0x87e   :  { %v1091_v6 = vpack.c.bf16 %v1088_v39, %v1087_v40 }
 0x880   :  { %5606 = vmatmul.msk.bf16.vlgmr.msrb.gmra.mxu0 %vm1118_vm5, %v1091_v6 }
 0x890   :  { %v1082_v57 = vpop.f32.mrf.mxu3 }
 0x891   :  { %v1083_v7 = vadd.f32 %v1082_v57, %v1049_v0 }
 0x893   :  { %v1089_v62 = vmax.f32 %v1083_v7, 0.0 }
 0x898   :  { %v1084_v45 = vpop.f32.mrf.mxu3 }
 0x899   :  { %v1085_v8 = vadd.f32 %v1084_v45, %v1049_v0 }
 0x89b   :  { %v1090_v9 = vmax.f32 %v1085_v8, 0.0  ;;  %v1236_v8 = vperm.slane %v6816_v16, 6 }
 0x89d   :  { %v1092_v12 = vpack.c.bf16 %v1090_v9, %v1089_v62 }
 0x89f   :  { %5607 = vmatmul.msk.bf16.gmra.mxu0 %vm1118_vm5, %v1092_v12 }
 0x8fd   :  { %v1134_v14 = vpop.f32.mrf.mxu0 }
 0x8fe   :  { %v1135_v15 = vadd.f32 %v1134_v14, %v1093_v13 }
 0x900   :  { %v1144_v55 = vadd.f32 %v1135_v15, %v6821_v27 }
 0x902   :  { %v1148_v54 = vsel %vm187_vm0, %v1144_v55, 0.0 }
 0x903   :  { %1149 = vadd.xlane.f32.xlu1 %v1148_v54 }
 0x905   :  { %v1136_v4 = vpop.f32.mrf.mxu0 }
 0x906   :  { %v1137_v17 = vadd.f32 %v1136_v4, %v1093_v13 }
 0x908   :  { %v1145_v46 = vadd.f32 %v1137_v17, %v6823_v28 }
 0x90a   :  { %v1151_v21 = vsel %vm187_vm0, %v1145_v46, 0.0 }
 0x90b   :  { %1152 = vadd.xlane.f32.xlu2 %v1151_v21 }
 0x91c   :  { %v1139_v56 = vpop.f32.mrf.mxu0 }
 0x91d   :  { %v1140_v60 = vadd.f32 %v1139_v56, %v1093_v13 }
 0x91f   :  { %v1146_v23 = vadd.f32 %v1140_v60, %v1033_v37 }
 0x921   :  { %v1154_v25 = vsel %vm187_vm0, %v1146_v23, 0.0 }
 0x922   :  { %1155 = vadd.xlane.f32.xlu0 %v1154_v25 }
 0x924   :  { %v1141_v36 = vpop.f32.mrf.mxu0 }
 0x925   :  { %v1142_v26 = vadd.f32 %v1141_v36, %v1093_v13 }
 0x927   :  { %v1147_v18 = vadd.f32 %v1142_v26, %v1034_v52 }
 0x929   :  { %v1157_v27 = vsel %vm187_vm0, %v1147_v18, 0.0 }
 0x92a   :  { %1158 = vadd.xlane.f32.xlu1 %v1157_v27 }
 0x976   :  { %v1150_v10 = vpop.xlane.xlu1 %1149 }
 0x977   :  { %v1160_v30 = vmul.f32 %v1150_v10, %v6787_v35 }
 0x979   :  { %v1164_v19 = vsub.f32 %v1144_v55, %v1160_v30  ;;  %v1241_v55 = vperm.slane %v6816_v16, 7 }
 0x97b   :  { %v1168_v28 = vmul.f32 %v1164_v19, %v1164_v19 }
 0x97d   :  { %v1172_v5 = vsel %vm187_vm0, %v1168_v28, 0.0 }
 0x97e   :  { %v1153_v31 = vpop.xlane.xlu2 %1152  ;;  %1173 = vadd.xlane.f32.xlu2 %v1172_v5 }
 0x97f   :  { %v1161_v33 = vmul.f32 %v1153_v31, %v6787_v35 }
 0x981   :  { %v1165_v34 = vsub.f32 %v1145_v46, %v1161_v33 }
 0x983   :  { %v1169_v22 = vmul.f32 %v1165_v34, %v1165_v34 }
 0x985   :  { %v1175_v20 = vsel %vm187_vm0, %v1169_v22, 0.0 }
 0x986   :  { %1176 = vadd.xlane.f32.xlu0 %v1175_v20 }
 0x995   :  { %v1156_v38 = vpop.xlane.xlu0 %1155 }
 0x996   :  { %v1162_v29 = vmul.f32 %v1156_v38, %v6787_v35 }
 0x998   :  { %v6859_v24 = vsub.f32 %v1146_v23, %v1162_v29 }
 0x99a   :  { %v1170_v41 = vmul.f32 %v6859_v24, %v6859_v24 }
 0x99c   :  { %v1178_v42 = vsel %vm187_vm0, %v1170_v41, 0.0 }
 0x99d   :  { %1179 = vadd.xlane.f32.xlu1 %v1178_v42  ;;  %v1159_v43 = vpop.xlane.xlu1 %1158 }
 0x99e   :  { %v1163_v44 = vmul.f32 %v1159_v43, %v6787_v35 }
 0x9a0   :  { %v6865_v47 = vsub.f32 %v1147_v18, %v1163_v44 }
 0x9a2   :  { %v1171_v48 = vmul.f32 %v6865_v47, %v6865_v47 }
 0x9a4   :  { %v1181_v32 = vsel %vm187_vm0, %v1171_v48, 0.0 }
 0x9a5   :  { %1182 = vadd.xlane.f32.xlu2 %v1181_v32 }
 0x9f1   :  { %v1174_v51 = vpop.xlane.xlu2 %1173 }
 0x9f2   :  { %v1184_v37 = vmul.f32 %v1174_v51, %v6787_v35 }
 0x9f4   :  { %v1188_v52 = vadd.f32 1e-05, %v1184_v37 }
 0x9f6   :  { %6153 = vrsqrt.f32 %v1188_v52  ;;  %vm1198_vm7 = vweird.f32 %v1188_v52 }
 0x9f9   :  { %v1177_v59 = vpop.xlane.xlu0 %1176 }
 0x9fa   :  { %v1185_v49 = vmul.f32 %v1177_v59, %v6787_v35 }
 0x9fc   :  { %v6154_v53 = vpop.eup %6153  ;;  %v1189_v61 = vadd.f32 1e-05, %v1185_v49 }
 0x9fd   :  { %v1193_v63 = vmul.f32 %v6154_v53, %v1188_v52  ;;  %vm1199_vm6 = vweird.f32 %v6154_v53 }
 0x9fe   :  { %6155 = vrsqrt.f32 %v1189_v61  ;;  %vm1200_vm8 = vmor %vm1198_vm7, %vm1199_vm6  ;;  %vm1208_vm10 = vweird.f32 %v1189_v61  ;;  %vm2530_vm7 = vcmask 27648  }
 0x9ff   :  { %v1194_v0 = vmul.f32 %v6154_v53, %v1193_v63 }
 0xa01   :  { %v1195_v2 = vmul.f32 0.5, %v1194_v0 }
 0xa03   :  { %v1196_v3 = vsub.f32 1.5, %v1195_v2 }
 0xa04   :  { %v6156_v1 = vpop.eup %6155 }
 0xa05   :  { %v1197_v40 = vmul.f32 %v6154_v53, %v1196_v3  ;;  %v1203_v39 = vmul.f32 %v6156_v1, %v1189_v61  ;;  %vm1209_vm9 = vweird.f32 %v6156_v1 }
 0xa06   :  { %vm1210_vm11 = vmor %vm1208_vm10, %vm1209_vm9 }
 0xa07   :  { %v1204_v6 = vmul.f32 %v6156_v1, %v1203_v39  ;;  %v1201_v57 = vsel %vm1200_vm8, %v6154_v53, %v1197_v40 }
 0xa08   :  { %v1232_v62 = vmul.f32 %v1201_v57, %v1164_v19 }
 0xa09   :  { %v1205_v7 = vmul.f32 0.5, %v1204_v6 }
 0xa0a   :  { %v1237_v13 = vmul.f32 %v1236_v8, %v1232_v62 }
 0xa0b   :  { %v1206_v45 = vsub.f32 1.5, %v1205_v7 }
 0xa0c   :  { %v6881_v46 = vadd.f32 %v1241_v55, %v1237_v13 }
 0xa0d   :  { %v1207_v9 = vmul.f32 %v6156_v1, %v1206_v45 }
 0xa0f   :  { %v1211_v12 = vsel %vm1210_vm11, %v6156_v1, %v1207_v9 }
 0xa10   :  { %v1233_v14 = vmul.f32 %v1211_v12, %v1165_v34  ;;  %v1180_v15 = vpop.xlane.xlu1 %1179 }
 0xa11   :  { %v1186_v54 = vmul.f32 %v1180_v15, %v6787_v35 }
 0xa12   :  { %v1238_v4 = vmul.f32 %v1236_v8, %v1233_v14 }
 0xa13   :  { %v1190_v17 = vadd.f32 1e-05, %v1186_v54 }
 0xa14   :  { %v6883_v21 = vadd.f32 %v1241_v55, %v1238_v4 }
 0xa15   :  { %6157 = vrsqrt.f32 %v1190_v17  ;;  %vm1218_vm13 = vweird.f32 %v1190_v17 }
 0xa16   :  { %v1258_v56 = vpack.c.bf16 %v6883_v21, %v6881_v46 }
 0xa18   :  { %5625 = vmatmul.msk.bf16.vlgmr.msrb.gmra.mxu1 %vm187_vm0, %v1258_v56  ;;  %v1183_v60 = vpop.xlane.xlu2 %1182 }
 0xa19   :  { %v1187_v23 = vmul.f32 %v1183_v60, %v6787_v35 }
 0xa1b   :  { %v6158_v25 = vpop.eup %6157  ;;  %v1191_v36 = vadd.f32 1e-05, %v1187_v23 }
 0xa1c   :  { %v1213_v16 = vmul.f32 %v6158_v25, %v1190_v17  ;;  %vm1219_vm12 = vweird.f32 %v6158_v25 }
 0xa1d   :  { %6159 = vrsqrt.f32 %v1191_v36  ;;  %vm1220_vm14 = vmor %vm1218_vm13, %vm1219_vm12  ;;  %vm1228_vm4 = vweird.f32 %v1191_v36 }
 0xa1e   :  { %v1214_v26 = vmul.f32 %v6158_v25, %v1213_v16 }
 0xa20   :  { %v1215_v18 = vmul.f32 0.5, %v1214_v26 }
 0xa22   :  { %v1216_v27 = vsub.f32 1.5, %v1215_v18 }
 0xa23   :  { %v6160_v10 = vpop.eup %6159 }
 0xa24   :  { %v1217_v30 = vmul.f32 %v6158_v25, %v1216_v27  ;;  %v1223_v19 = vmul.f32 %v6160_v10, %v1191_v36  ;;  %vm1229_vm15 = vweird.f32 %v6160_v10 }
 0xa25   :  { %vm1230_vm6 = vmor %vm1228_vm4, %vm1229_vm15 }
 0xa26   :  { %v1224_v28 = vmul.f32 %v6160_v10, %v1223_v19  ;;  %v1221_v5 = vsel %vm1220_vm14, %v6158_v25, %v1217_v30 }
 0xa27   :  { %v1234_v34 = vmul.f32 %v1221_v5, %v6859_v24  ;;  %v6901_v24 = vld [vmem:[%s8185_s7 + $0x8] sm:$0xff] }
 0xa28   :  { %v1225_v31 = vmul.f32 0.5, %v1224_v28  ;;  %v1260_v32 = vperm.slane %v6901_v24, 0 }
 0xa29   :  { %v1239_v29 = vmul.f32 %v1236_v8, %v1234_v34 }
 0xa2a   :  { %v1226_v33 = vsub.f32 1.5, %v1225_v31 }
 0xa2b   :  { %v6891_v42 = vadd.f32 %v1241_v55, %v1239_v29 }
 0xa2c   :  { %v1227_v22 = vmul.f32 %v6160_v10, %v1226_v33 }
 0xa2e   :  { %v1231_v20 = vsel %vm1230_vm6, %v6160_v10, %v1227_v22 }
 0xa2f   :  { %v1235_v38 = vmul.f32 %v1231_v20, %v6865_v47 }
 0xa31   :  { %v1240_v41 = vmul.f32 %v1236_v8, %v1235_v38 }
 0xa33   :  { %v6893_v43 = vadd.f32 %v1241_v55, %v1240_v41 }
 0xa35   :  { %v1259_v44 = vpack.c.bf16 %v6893_v43, %v6891_v42 }
 0xa37   :  { %5626 = vmatmul.msk.bf16.gmra.mxu1 %vm187_vm0, %v1259_v44 }
 0xa95   :  { %v1288_v48 = vpop.f32.mrf.mxu1 }
 0xa96   :  { %v1289_v47 = vadd.f32 %v1288_v48, %v1260_v32 }
 0xa98   :  { %v1298_v51 = vpack.c.bf16 %v1289_v47, %v1289_v47 }
 0xa9a   :  { %v1304_v58 = vunpack.c.l.b16 %v1298_v51 }
 0xa9d   :  { %v1290_v50 = vpop.f32.mrf.mxu1 }
 0xa9e   :  { %v1291_v37 = vadd.f32 %v1290_v50, %v1260_v32 }
 0xaa0   :  { %v1299_v52 = vpack.c.bf16 %v1291_v37, %v1291_v37 }
 0xaa2   :  { %v1305_v59 = vunpack.c.l.b16 %v1299_v52 }
 0xaa4   :  { %v6904_v49 = vpack.c.b16 %v1305_v59, %v1304_v58 }
 0xaa6   :  { %1307 = vrot.lane.b32.xlu0 %v6904_v49, %s8227_s30  ;;  %1460 = vrot.lane.b32.xlu2 %v6904_v49, %s8225_s1 }
 0xaae   :  { %1458 = vrot.lane.b32.xlu0 %v6904_v49, %s8221_s18  ;;  %1610 = vrot.lane.b32.xlu2 %v6904_v49, %s8223_s19 }
 0xab4   :  { %v1293_v53 = vpop.f32.mrf.mxu1 }
 0xab5   :  { %v1294_v61 = vadd.f32 %v1293_v53, %v1260_v32 }
 0xab7   :  { %v1300_v0 = vpack.c.bf16 %v1294_v61, %v1294_v61 }
 0xab9   :  { %v1331_v1 = vunpack.c.l.b16 %v1300_v0 }
 0xabc   :  { %v1295_v63 = vpop.f32.mrf.mxu1 }
 0xabd   :  { %v1296_v2 = vadd.f32 %v1295_v63, %v1260_v32 }
 0xabf   :  { %v1301_v3 = vpack.c.bf16 %v1296_v2, %v1296_v2 }
 0xac1   :  { %v1332_v40 = vunpack.c.l.b16 %v1301_v3 }
 0xac3   :  { %v6914_v39 = vpack.c.b16 %v1332_v40, %v1331_v1 }
 0xac5   :  { %1634 = vrot.lane.b32.xlu2 %v6914_v39, %s8223_s19  ;;  %1482 = vrot.lane.b32.xlu0 %v6914_v39, %s8221_s18  ;;  %s8242_s18 = smov 72  }
 0xac6   :  { %1334 = vrot.lane.b32.xlu1 %v6914_v39, %s8227_s30 }
 0xacd   :  { %1758 = vrot.lane.b32.xlu2 %v6904_v49, %s8217_s26  ;;  %1760 = vrot.lane.b32.xlu0 %v6904_v49, %s8219_s21 }
 0xace   :  { %1484 = vrot.lane.b32.xlu1 %v6914_v39, %s8225_s1 }
 0xad5   :  { %1563 = vrot.lane.b32.xlu2 %v6904_v49, %s8215_s0  ;;  %1784 = vrot.lane.b32.xlu0 %v6914_v39, %s8219_s21  ;;  %s8243_s21 = smov 104  }
 0xad6   :  { %1608 = vrot.lane.b32.xlu1 %v6904_v49, %s8234_s28 }
 0xadd   :  { %1438 = vrot.lane.b32.xlu0 %v6914_v39, %s8235_s22 }
 0xade   :  { %1632 = vrot.lane.b32.xlu1 %v6914_v39, %s8234_s28 }
 0xae6   :  { %1782 = vrot.lane.b32.xlu1 %v6914_v39, %s8217_s26  ;;  %s8240_s26 = smov 24  }
 0xaee   :  { %1413 = vrot.lane.b32.xlu1 %v6904_v49, %s8235_s22 }
 0xb00   :  { %v1461_v6 = vpop.permute.xlu2 %1460 }
 0xb01   :  { %v1466_v45 = vsel %vm224_vm1, %v1461_v6, 0 }
 0xb08   :  { %v1611_v8 = vpop.permute.xlu2 %1610 }
 0xb09   :  { %v1616_v62 = vsel %vm224_vm1, %v1611_v8, 0 }
 0xb18   :  { %v1308_v57 = vpop.permute.xlu0 %1307 }
 0xb19   :  { %v1313_v7 = vsel %vm224_vm1, %v1308_v57, 0 }
 0xb1a   :  { %1322 = vmatpush.bf16.xpose.msra.mxu2 %v1313_v7 }
 0xb1f   :  { %v1635_v15 = vpop.permute.xlu2 %1634 }
 0xb20   :  { %v1459_v9 = vpop.permute.xlu0 %1458  ;;  %v1640_v56 = vsel %vm224_vm1, %v1635_v15, 0 }
 0xb21   :  { %5627 = vmatmul.msk.bf16.vlgmr.msra.gmra.mxu2 %vm224_vm1, %v6904_v49 }
 0xb22   :  { %1475 = vmatpush.bf16.xpose.msrb.mxu2 %v1466_v45 }
 0xb27   :  { %v1759_v26 = vpop.permute.xlu2 %1758 }
 0xb2a   :  { %1625 = vmatpush.bf16.xpose.msra.mxu2 %v1616_v62 }
 0xb2f   :  { %v1564_v10 = vpop.permute.xlu2 %1563 }
 0xb31   :  { %5631 = vmatmul.msk.bf16.vlgmr.msrb.gmra.mxu2 %vm224_vm1, %v1459_v9 }
 0xb37   :  { %v1483_v12 = vpop.permute.xlu0 %1482 }
 0xb38   :  { %v1335_v13 = vpop.permute.xlu1 %1334 }
 0xb39   :  { %v1340_v14 = vsel %vm224_vm1, %v1335_v13, 0 }
 0xb3a   :  { %1349 = vmatpush.bf16.xpose.msra.mxu3 %v1340_v14 }
 0xb3f   :  { %v1761_v55 = vpop.permute.xlu0 %1760 }
 0xb40   :  { %v1766_v54 = vsel %vm224_vm1, %v1761_v55, 0  ;;  %v1485_v4 = vpop.permute.xlu1 %1484 }
 0xb41   :  { %v1490_v17 = vsel %vm224_vm1, %v1485_v4, 0  ;;  %5628 = vmatmul.msk.bf16.vlgmr.msra.gmra.mxu3 %vm224_vm1, %v6914_v39  ;;  %1775 = vmatpush.bf16.xpose.msrb.mxu2 %v1766_v54 }
 0xb42   :  { %1499 = vmatpush.bf16.xpose.msrb.mxu3 %v1490_v17 }
 0xb47   :  { %v1785_v60 = vpop.permute.xlu0 %1784 }
 0xb48   :  { %v1609_v23 = vpop.permute.xlu1 %1608  ;;  %v1790_v16 = vsel %vm224_vm1, %v1785_v60, 0 }
 0xb49   :  { %5635 = vmatmul.msk.bf16.vlgmr.msra.gmra.mxu2 %vm224_vm1, %v1609_v23 }
 0xb4a   :  { %1649 = vmatpush.bf16.xpose.msra.mxu3 %v1640_v56 }
 0xb4f   :  { %v1439_v25 = vpop.permute.xlu0 %1438 }
 0xb50   :  { %v1633_v36 = vpop.permute.xlu1 %1632  ;;  %1451 = vmatpush.bf16.msra.mxu1 %v1439_v25 }
 0xb51   :  { %5632 = vmatmul.msk.bf16.vlgmr.msrb.gmra.mxu3 %vm224_vm1, %v1483_v12 }
 0xb52   :  { %1799 = vmatpush.bf16.xpose.msrb.mxu3 %v1790_v16 }
 0xb58   :  { %v1783_v18 = vpop.permute.xlu1 %1782 }
 0xb59   :  { %5639 = vmatmul.msk.bf16.vlgmr.msrb.gmra.mxu2 %vm224_vm1, %v1759_v26 }
 0xb60   :  { %v1414_v27 = vpop.permute.xlu1 %1413 }
 0xb61   :  { %1426 = vmatpush.bf16.msra.mxu0 %v1414_v27  ;;  %5636 = vmatmul.msk.bf16.vlgmr.msra.gmra.mxu3 %vm224_vm1, %v1633_v36 }
 0xb65   :  { %1576 = vmatpush.bf16.msrb.mxu0 %v1564_v10 }
 0xb71   :  { %5640 = vmatmul.msk.bf16.vlgmr.msrb.gmra.mxu3 %vm224_vm1, %v1783_v18 }
 0xba4   :  { %v1324_v30 = vpop.f32.mrf.mxu2 }
 0xba5   :  { %v6960_v19 = vmul.f32 0.35355338, %v1324_v30 }
 0xba7   :  { %v1360_v28 = vsel %vm276_vm2, %v6960_v19, -inf }
 0xba8   :  { %1361 = vmax.xlane.f32.xlu2 %v1360_v28 }
 0xbac   :  { %v1326_v5 = vpop.f32.mrf.mxu2 }
 0xbad   :  { %v6964_v31 = vmul.f32 0.35355338, %v1326_v5 }
 0xbaf   :  { %v1363_v33 = vsel %vm276_vm2, %v6964_v31, -inf }
 0xbb0   :  { %1364 = vmax.xlane.f32.xlu0 %v1363_v33 }
 0xbb4   :  { %v1477_v34 = vpop.f32.mrf.mxu2 }
 0xbb5   :  { %v6968_v22 = vmul.f32 0.35355338, %v1477_v34 }
 0xbb7   :  { %v1510_v20 = vsel %vm276_vm2, %v6968_v22, -inf }
 0xbb8   :  { %1511 = vmax.xlane.f32.xlu0 %v1510_v20 }
 0xbbc   :  { %v1479_v38 = vpop.f32.mrf.mxu2 }
 0xbbd   :  { %v6980_v51 = vmul.f32 0.35355338, %v1479_v38 }
 0xbbf   :  { %v1513_v59 = vsel %vm276_vm2, %v6980_v51, -inf }
 0xbc4   :  { %v1351_v29 = vpop.f32.mrf.mxu3 }
 0xbc5   :  { %v6972_v41 = vmul.f32 0.35355338, %v1351_v29 }
 0xbc7   :  { %v1366_v44 = vsel %vm276_vm2, %v6972_v41, -inf }
 0xbc8   :  { %1367 = vmax.xlane.f32.xlu1 %v1366_v44 }
 0xbcc   :  { %v1353_v48 = vpop.f32.mrf.mxu3  ;;  %v1627_v32 = vpop.f32.mrf.mxu2 }
 0xbcd   :  { %v6976_v47 = vmul.f32 0.35355338, %v1353_v48  ;;  %v6988_v61 = vmul.f32 0.35355338, %v1627_v32 }
 0xbcf   :  { %v1369_v50 = vsel %vm276_vm2, %v6976_v47, -inf  ;;  %v1660_v40 = vsel %vm276_vm2, %v6988_v61, -inf }
 0xbd0   :  { %1370 = vmax.xlane.f32.xlu2 %v1369_v50 }
 0xbd4   :  { %v1501_v37 = vpop.f32.mrf.mxu3  ;;  %v1629_v52 = vpop.f32.mrf.mxu2 }
 0xbd5   :  { %v6982_v58 = vmul.f32 0.35355338, %v1501_v37  ;;  %v6990_v63 = vmul.f32 0.35355338, %v1629_v52 }
 0xbd7   :  { %v1516_v53 = vsel %vm276_vm2, %v6982_v58, -inf  ;;  %v1663_v6 = vsel %vm276_vm2, %v6990_v63, -inf }
 0xbd8   :  { %1514 = vmax.xlane.f32.xlu2 %v1513_v59  ;;  %1517 = vmax.xlane.f32.xlu1 %v1516_v53 }
 0xbdc   :  { %v1503_v0 = vpop.f32.mrf.mxu3  ;;  %v1777_v3 = vpop.f32.mrf.mxu2 }
 0xbdd   :  { %v6992_v2 = vmul.f32 0.35355338, %v1503_v0  ;;  %v7000_v57 = vmul.f32 0.35355338, %v1777_v3 }
 0xbdf   :  { %v1519_v1 = vsel %vm276_vm2, %v6992_v2, -inf  ;;  %v1810_v9 = vsel %vm276_vm2, %v7000_v57, -inf }
 0xbe0   :  { %1520 = vmax.xlane.f32.xlu0 %v1519_v1  ;;  %1661 = vmax.xlane.f32.xlu2 %v1660_v40 }
 0xbe1   :  { %1664 = vmax.xlane.f32.xlu1 %v1663_v6 }
 0xbe4   :  { %v1651_v7 = vpop.f32.mrf.mxu3  ;;  %v1779_v62 = vpop.f32.mrf.mxu2 }
 0xbe5   :  { %v7002_v45 = vmul.f32 0.35355338, %v1651_v7  ;;  %v7008_v12 = vmul.f32 0.35355338, %v1779_v62 }
 0xbe7   :  { %v1666_v8 = vsel %vm276_vm2, %v7002_v45, -inf  ;;  %v1813_v15 = vsel %vm276_vm2, %v7008_v12, -inf }
 0xbe8   :  { %1667 = vmax.xlane.f32.xlu0 %v1666_v8 }
 0xbe9   :  { %1811 = vmax.xlane.f32.xlu1 %v1810_v9 }
 0xbec   :  { %v1653_v13 = vpop.f32.mrf.mxu3 }
 0xbed   :  { %v7010_v14 = vmul.f32 0.35355338, %v1653_v13 }
 0xbef   :  { %v1669_v55 = vsel %vm276_vm2, %v7010_v14, -inf }
 0xbf0   :  { %1814 = vmax.xlane.f32.xlu0 %v1813_v15  ;;  %1670 = vmax.xlane.f32.xlu2 %v1669_v55 }
 0xbf4   :  { %v1801_v54 = vpop.f32.mrf.mxu3 }
 0xbf5   :  { %v7016_v4 = vmul.f32 0.35355338, %v1801_v54 }
 0xbf7   :  { %v1816_v17 = vsel %vm276_vm2, %v7016_v4, -inf }
 0xbf8   :  { %1817 = vmax.xlane.f32.xlu0 %v1816_v17 }
 0xbfc   :  { %v1803_v56 = vpop.f32.mrf.mxu3 }
 0xbfd   :  { %v7020_v60 = vmul.f32 0.35355338, %v1803_v56 }
 0xbff   :  { %v1819_v23 = vsel %vm276_vm2, %v7020_v60, -inf }
 0xc00   :  { %1820 = vmax.xlane.f32.xlu2 %v1819_v23 }
 0xc1b   :  { %v1362_v25 = vpop.xlane.xlu2 %1361 }
 0xc1c   :  { %v1372_v36 = vsub.f32 %v6960_v19, %v1362_v25 }
 0xc1e   :  { %v1376_v16 = vmul.f32 1.442695, %v1372_v36 }
 0xc20   :  { %6161 = vpow2.f32 %v1376_v16 }
 0xc23   :  { %v1365_v26 = vpop.xlane.xlu0 %1364 }
 0xc24   :  { %v1373_v18 = vsub.f32 %v6964_v31, %v1365_v26 }
 0xc26   :  { %v7026_v27 = vpop.eup %6161  ;;  %v1378_v10 = vmul.f32 1.442695, %v1373_v18 }
 0xc27   :  { %v1384_v30 = vsel %vm276_vm2, %v7026_v27, 0.0 }
 0xc28   :  { %6163 = vpow2.f32 %v1378_v10  ;;  %1385 = vadd.xlane.f32.xlu2 %v1384_v30 }
 0xc2b   :  { %v1512_v19 = vpop.xlane.xlu0 %1511 }
 0xc2c   :  { %v1522_v31 = vsub.f32 %v6968_v22, %v1512_v19 }
 0xc2e   :  { %v7030_v28 = vpop.eup %6163  ;;  %v1526_v38 = vmul.f32 1.442695, %v1522_v31 }
 0xc2f   :  { %v1387_v5 = vsel %vm276_vm2, %v7030_v28, 0.0 }
 0xc30   :  { %1388 = vadd.xlane.f32.xlu1 %v1387_v5 }
 0xc3b   :  { %v1368_v33 = vpop.xlane.xlu1 %1367 }
 0xc3c   :  { %v1374_v34 = vsub.f32 %v6972_v41, %v1368_v33 }
 0xc3e   :  { %v1380_v20 = vmul.f32 1.442695, %v1374_v34 }
 0xc40   :  { %6165 = vpow2.f32 %v1380_v20 }
 0xc41   :  { %6167 = vpow2.f32 %v1526_v38 }
 0xc43   :  { %v1371_v29 = vpop.xlane.xlu2 %1370 }
 0xc44   :  { %v1375_v44 = vsub.f32 %v6976_v47, %v1371_v29 }
 0xc46   :  { %v7037_v48 = vpop.eup %6165  ;;  %v1382_v32 = vmul.f32 1.442695, %v1375_v44 }
 0xc47   :  { %v1390_v50 = vsel %vm276_vm2, %v7037_v48, 0.0  ;;  %v7043_v22 = vpop.eup %6167 }
 0xc48   :  { %6169 = vpow2.f32 %v1382_v32  ;;  %1391 = vadd.xlane.f32.xlu0 %v1390_v50  ;;  %v1534_v53 = vsel %vm276_vm2, %v7043_v22, 0.0 }
 0xc49   :  { %1588 = vrot.lane.b32.xlu1 %v6914_v39, %s8215_s0 }
 0xc4b   :  { %v1515_v41 = vpop.xlane.xlu2 %1514  ;;  %v1518_v9 = vpop.xlane.xlu1 %1517 }
 0xc4c   :  { %v1523_v37 = vsub.f32 %v6980_v51, %v1515_v41  ;;  %v1524_v17 = vsub.f32 %v6982_v58, %v1518_v9 }
 0xc4e   :  { %v7046_v52 = vpop.eup %6169  ;;  %v1528_v47 = vmul.f32 1.442695, %v1523_v37  ;;  %v1530_v56 = vmul.f32 1.442695, %v1524_v17 }
 0xc4f   :  { %v1393_v59 = vsel %vm276_vm2, %v7046_v52, 0.0 }
 0xc50   :  { %6171 = vpow2.f32 %v1528_v47  ;;  %1394 = vadd.xlane.f32.xlu2 %v1393_v59  ;;  %1535 = vadd.xlane.f32.xlu0 %v1534_v53 }
 0xc53   :  { %v1521_v0 = vpop.xlane.xlu0 %1520  ;;  %v1662_v3 = vpop.xlane.xlu2 %1661 }
 0xc54   :  { %v1525_v1 = vsub.f32 %v6992_v2, %v1521_v0  ;;  %v1672_v40 = vsub.f32 %v6988_v61, %v1662_v3 }
 0xc56   :  { %v7054_v6 = vpop.eup %6171  ;;  %v1532_v51 = vmul.f32 1.442695, %v1525_v1  ;;  %v1676_v7 = vmul.f32 1.442695, %v1672_v40 }
 0xc57   :  { %v1537_v8 = vsel %vm276_vm2, %v7054_v6, 0.0 }
 0xc58   :  { %6173 = vpow2.f32 %v1532_v51  ;;  %1538 = vadd.xlane.f32.xlu2 %v1537_v8 }
 0xc59   :  { %6175 = vpow2.f32 %v1676_v7 }
 0xc5b   :  { %v1668_v62 = vpop.xlane.xlu0 %1667 }
 0xc5c   :  { %v1674_v13 = vsub.f32 %v7002_v45, %v1668_v62  ;;  %v1665_v45 = vpop.xlane.xlu1 %1664 }
 0xc5d   :  { %v1673_v36 = vsub.f32 %v6990_v63, %v1665_v45 }
 0xc5e   :  { %v7059_v15 = vpop.eup %6173  ;;  %v1680_v55 = vmul.f32 1.442695, %v1674_v13 }
 0xc5f   :  { %v7061_v2 = vpop.eup %6175  ;;  %v1543_v61 = vsel %vm276_vm2, %v7059_v15, 0.0  ;;  %v1678_v16 = vmul.f32 1.442695, %v1673_v36 }
 0xc60   :  { %6177 = vpow2.f32 %v1680_v55  ;;  %v1684_v54 = vsel %vm276_vm2, %v7061_v2, 0.0  ;;  %1544 = vadd.xlane.f32.xlu0 %v1543_v61 }
 0xc61   :  { %1685 = vadd.xlane.f32.xlu2 %v1684_v54  ;;  %6179 = vpow2.f32 %v1530_v56 }
 0xc62   :  { %6181 = vpow2.f32 %v1678_v16 }
 0xc63   :  { %v1815_v26 = vpop.xlane.xlu0 %1814  ;;  %v1671_v34 = vpop.xlane.xlu2 %1670 }
 0xc64   :  { %v1823_v10 = vsub.f32 %v7008_v12, %v1815_v26  ;;  %v1812_v33 = vpop.xlane.xlu1 %1811  ;;  %v1675_v44 = vsub.f32 %v7010_v14, %v1671_v34 }
 0xc65   :  { %v1822_v31 = vsub.f32 %v7000_v57, %v1812_v33 }
 0xc66   :  { %v7068_v23 = vpop.eup %6177  ;;  %v1828_v30 = vmul.f32 1.442695, %v1823_v10  ;;  %v1682_v37 = vmul.f32 1.442695, %v1675_v44 }
 0xc67   :  { %v1690_v25 = vsel %vm276_vm2, %v7068_v23, 0.0  ;;  %v7073_v18 = vpop.eup %6179  ;;  %v1826_v20 = vmul.f32 1.442695, %v1822_v31 }
 0xc68   :  { %v1540_v58 = vsel %vm276_vm2, %v7073_v18, 0.0  ;;  %v7080_v5 = vpop.eup %6181  ;;  %6183 = vpow2.f32 %v1828_v30 }
 0xc69   :  { %1691 = vadd.xlane.f32.xlu2 %v1690_v25  ;;  %v1687_v63 = vsel %vm276_vm2, %v7080_v5, 0.0  ;;  %6185 = vpow2.f32 %v1826_v20 }
 0xc6b   :  { %v1818_v9 = vpop.xlane.xlu0 %1817 }
 0xc6e   :  { %v7084_v19 = vpop.eup %6183 }
 0xc6f   :  { %v1837_v12 = vsel %vm276_vm2, %v7084_v19, 0.0  ;;  %v7093_v50 = vpop.eup %6185 }
 0xc70   :  { %v1834_v47 = vsel %vm276_vm2, %v7093_v50, 0.0 }
 0xc73   :  { %1541 = vadd.xlane.f32.xlu1 %v1540_v58  ;;  %v1821_v38 = vpop.xlane.xlu2 %1820 }
 0xc74   :  { %1713 = vrot.lane.b32.xlu0 %v6904_v49, %s8236_s23  ;;  %v1825_v29 = vsub.f32 %v7020_v60, %v1821_v38 }
 0xc76   :  { %v1832_v32 = vmul.f32 1.442695, %v1825_v29 }
 0xc78   :  { %6187 = vpow2.f32 %v1832_v32 }
 0xc7b   :  { %1688 = vadd.xlane.f32.xlu1 %v1687_v63 }
 0xc7e   :  { %v7099_v57 = vpop.eup %6187 }
 0xc7f   :  { %v1843_v14 = vsel %vm276_vm2, %v7099_v57, 0.0 }
 0xc81   :  { %1738 = vrot.lane.b32.xlu2 %v6914_v39, %s8236_s23 }
 0xc83   :  { %1838 = vadd.xlane.f32.xlu1 %v1837_v12 }
 0xc9b   :  { %v1386_v41 = vpop.xlane.xlu2 %1385 }
 0xc9c   :  { %1888 = vrot.lane.b32.xlu1 %v6914_v39, %s8237_s29  ;;  %6189 = vrcp.f32 %v1386_v41 }
 0xc9d   :  { %6191 = vpow2.f32 %v1682_v37 }
 0xc9e   :  { %1835 = vadd.xlane.f32.xlu0 %v1834_v47 }
 0xca2   :  { %v6190_v59 = vpop.eup %6189 }
 0xca3   :  { %v1389_v60 = vpop.xlane.xlu1 %1388  ;;  %v7103_v53 = vpop.eup %6191  ;;  %v1400_v0 = vmul.f32 %v6190_v59, %v7026_v27 }
 0xca4   :  { %6193 = vrcp.f32 %v1389_v60  ;;  %v1693_v39 = vsel %vm276_vm2, %v7103_v53, 0.0 }
 0xca5   :  { %v1404_v1 = vpack.c.bf16 %v1400_v0, %v1400_v0 }
 0xca6   :  { %1844 = vadd.xlane.f32.xlu0 %v1843_v14 }
 0xca7   :  { %v1410_v7 = vunpack.c.l.b16 %v1404_v1 }
 0xcaa   :  { %v6194_v3 = vpop.eup %6193  ;;  %1694 = vadd.xlane.f32.xlu2 %v1693_v39 }
 0xcab   :  { %v1401_v40 = vmul.f32 %v6194_v3, %v7030_v28 }
 0xcad   :  { %v1405_v51 = vpack.c.bf16 %v1401_v40, %v1401_v40 }
 0xcaf   :  { %v1411_v8 = vunpack.c.l.b16 %v1405_v51 }
 0xcb1   :  { %v1412_v62 = vpack.c.b16 %v1411_v8, %v1410_v7 }
 0xcb3   :  { %5629 = vmatmul.msk.bf16.vlgmr.msra.gmra.mxu0 %vm276_vm2, %v1412_v62 }
 0xcbb   :  { %v1392_v13 = vpop.xlane.xlu0 %1391  ;;  %v1589_v55 = vpop.permute.xlu1 %1588 }
 0xcbc   :  { %1601 = vmatpush.bf16.msrb.mxu1 %v1589_v55  ;;  %6195 = vrcp.f32 %v1392_v13 }
 0xcc2   :  { %1863 = vrot.lane.b32.xlu2 %v6904_v49, %s8237_s29  ;;  %v6196_v54 = vpop.eup %6195 }
 0xcc3   :  { %v1395_v27 = vpop.xlane.xlu2 %1394  ;;  %v1536_v61 = vpop.xlane.xlu0 %1535  ;;  %v1402_v28 = vmul.f32 %v6196_v54, %v7037_v48 }
 0xcc4   :  { %6197 = vrcp.f32 %v1395_v27 }
 0xcc5   :  { %6199 = vrcp.f32 %v1536_v61  ;;  %v1406_v56 = vpack.c.bf16 %v1402_v28, %v1402_v28 }
 0xcc7   :  { %v1435_v26 = vunpack.c.l.b16 %v1406_v56 }
 0xcca   :  { %v6198_v17 = vpop.eup %6197 }
 0xccb   :  { %v1403_v45 = vmul.f32 %v6198_v17, %v7046_v52  ;;  %v1539_v25 = vpop.xlane.xlu2 %1538  ;;  %v6200_v36 = vpop.eup %6199  ;;  %v1824_v52 = vsub.f32 %v7016_v4, %v1818_v9 }
 0xccc   :  { %6201 = vrcp.f32 %v1539_v25  ;;  %v1550_v58 = vmul.f32 %v6200_v36, %v7043_v22 }
 0xccd   :  { %v1407_v16 = vpack.c.bf16 %v1403_v45, %v1403_v45  ;;  %v1830_v38 = vmul.f32 1.442695, %v1824_v52 }
 0xcce   :  { %v1554_v63 = vpack.c.bf16 %v1550_v58, %v1550_v58 }
 0xccf   :  { %v1436_v10 = vunpack.c.l.b16 %v1407_v16  ;;  %6203 = vpow2.f32 %v1830_v38 }
 0xcd0   :  { %v1560_v34 = vunpack.c.l.b16 %v1554_v63 }
 0xcd1   :  { %v1437_v49 = vpack.c.b16 %v1436_v10, %v1435_v26 }
 0xcd2   :  { %v6202_v30 = vpop.eup %6201 }
 0xcd3   :  { %v1551_v12 = vmul.f32 %v6202_v30, %v7054_v6  ;;  %5630 = vmatmul.msk.bf16.vlgmr.msra.gmra.mxu1 %vm276_vm2, %v1437_v49  ;;  %v1545_v44 = vpop.xlane.xlu0 %1544 }
 0xcd4   :  { %v1686_v48 = vpop.xlane.xlu2 %1685  ;;  %6205 = vrcp.f32 %v1545_v44 }
 0xcd5   :  { %v1555_v33 = vpack.c.bf16 %v1551_v12, %v1551_v12  ;;  %v7119_v32 = vpop.eup %6203 }
 0xcd6   :  { %v1840_v47 = vsel %vm276_vm2, %v7119_v32, 0.0 }
 0xcd7   :  { %v1561_v31 = vunpack.c.l.b16 %v1555_v33 }
 0xcd9   :  { %v1562_v20 = vpack.c.b16 %v1561_v31, %v1560_v34 }
 0xcda   :  { %v6206_v37 = vpop.eup %6205 }
 0xcdb   :  { %5633 = vmatmul.msk.bf16.vlgmr.msrb.gmra.mxu0 %vm276_vm2, %v1562_v20  ;;  %v1553_v4 = vmul.f32 %v6206_v37, %v7059_v15 }
 0xcdc   :  { %v1692_v29 = vpop.xlane.xlu2 %1691 }
 0xcdd   :  { %v1557_v59 = vpack.c.bf16 %v1553_v4, %v1553_v4 }
 0xcdf   :  { %v1586_v40 = vunpack.c.l.b16 %v1557_v59 }
 0xce4   :  { %v1739_v22 = vpop.permute.xlu2 %1738 }
 0xce5   :  { %1751 = vmatpush.bf16.msra.mxu1 %v1739_v22 }
 0xce6   :  { %v1714_v6 = vpop.permute.xlu0 %1713  ;;  %v1542_v41 = vpop.xlane.xlu1 %1541 }
 0xce7   :  { %1726 = vmatpush.bf16.msra.mxu0 %v1714_v6  ;;  %6207 = vrcp.f32 %v1542_v41 }
 0xce8   :  { %6209 = vrcp.f32 %v1686_v48 }
 0xceb   :  { %1841 = vadd.xlane.f32.xlu2 %v1840_v47 }
 0xced   :  { %v6208_v60 = vpop.eup %6207 }
 0xcee   :  { %v1552_v14 = vmul.f32 %v6208_v60, %v7073_v18  ;;  %v1689_v0 = vpop.xlane.xlu1 %1688  ;;  %v6210_v39 = vpop.eup %6209 }
 0xcef   :  { %6211 = vrcp.f32 %v1689_v0  ;;  %v1700_v1 = vmul.f32 %v6210_v39, %v7061_v2 }
 0xcf0   :  { %v1556_v3 = vpack.c.bf16 %v1552_v14, %v1552_v14 }
 0xcf1   :  { %v1704_v62 = vpack.c.bf16 %v1700_v1, %v1700_v1 }
 0xcf2   :  { %v1585_v51 = vunpack.c.l.b16 %v1556_v3 }
 0xcf3   :  { %v1710_v13 = vunpack.c.l.b16 %v1704_v62 }
 0xcf4   :  { %v1587_v7 = vpack.c.b16 %v1586_v40, %v1585_v51  ;;  %v2443_v51 = vld.sshfl [vmem:[#allocation1] sm:$0xff pattern:$0x75316420] }
 0xcf5   :  { %v6212_v8 = vpop.eup %6211 }
 0xcf6   :  { %v1701_v15 = vmul.f32 %v6212_v8, %v7080_v5  ;;  %5634 = vmatmul.msk.bf16.vlgmr.msrb.gmra.mxu1 %vm276_vm2, %v1587_v7  ;;  %v1839_v18 = vpop.xlane.xlu1 %1838  ;;  %v5969_v7 = vld [vmem:[%s8189_s8] sm:$0xff]  ;;  %v2445_v8 = vpack.c.bf16 %v2443_v51, %v2443_v51 }
 0xcf8   :  { %v1705_v9 = vpack.c.bf16 %v1701_v15, %v1701_v15 }
 0xcfa   :  { %v1711_v55 = vunpack.c.l.b16 %v1705_v9 }
 0xcfc   :  { %v1712_v27 = vpack.c.b16 %v1711_v55, %v1710_v13 }
 0xcfe   :  { %5637 = vmatmul.msk.bf16.vlgmr.msra.gmra.mxu0 %vm276_vm2, %v1712_v27 }
 0xd0e   :  { %v1889_v61 = vpop.permute.xlu1 %1888 }
 0xd0f   :  { %1901 = vmatpush.bf16.msrb.mxu1 %v1889_v61  ;;  %v5962_v61 = vld [vmem:[%s8186_s4 + $0x18] sm:$0xff] }
 0xd10   :  { %1995 = vmatpush.bf16.msra.mxu2 %v5962_v61 }
 0xd11   :  { %v1836_v54 = vpop.xlane.xlu0 %1835 }
 0xd12   :  { %6213 = vrcp.f32 %v1836_v54 }
 0xd13   :  { %6215 = vrcp.f32 %v1839_v18 }
 0xd14   :  { %6217 = vrcp.f32 %v1692_v29 }
 0xd18   :  { %v6214_v2 = vpop.eup %6213 }
 0xd19   :  { %v6216_v28 = vpop.eup %6215  ;;  %v1850_v17 = vmul.f32 %v6214_v2, %v7093_v50  ;;  %v1845_v31 = vpop.xlane.xlu0 %1844 }
 0xd1a   :  { %v1851_v5 = vmul.f32 %v6216_v28, %v7084_v19  ;;  %v6218_v45 = vpop.eup %6217  ;;  %v5961_v28 = vld [vmem:[%s8186_s4 + $0x10] sm:$0xff]  ;;  %s8241_s4 = smov 120  }
 0xd1b   :  { %v1854_v25 = vpack.c.bf16 %v1850_v17, %v1850_v17  ;;  %v1702_v36 = vmul.f32 %v6218_v45, %v7068_v23  ;;  %1996 = vmatpush.bf16.msra.mxu2 %v5961_v28  ;;  %v2430_v17 = vld [vmem:[%s8190_s15] sm:$0xff] }
 0xd1c   :  { %v1855_v16 = vpack.c.bf16 %v1851_v5, %v1851_v5  ;;  %v2446_v5 = vperm.slane %v2430_v17, 0 }
 0xd1d   :  { %v1695_v56 = vpop.xlane.xlu2 %1694  ;;  %v1860_v26 = vunpack.c.l.b16 %v1854_v25  ;;  %v1706_v58 = vpack.c.bf16 %v1702_v36, %v1702_v36 }
 0xd1e   :  { %6219 = vrcp.f32 %v1695_v56  ;;  %v1861_v49 = vunpack.c.l.b16 %v1855_v16 }
 0xd1f   :  { %v1735_v50 = vunpack.c.l.b16 %v1706_v58  ;;  %6221 = vrcp.f32 %v1845_v31 }
 0xd20   :  { %v1862_v12 = vpack.c.b16 %v1861_v49, %v1860_v26 }
 0xd24   :  { %v6220_v10 = vpop.eup %6219 }
 0xd25   :  { %v1703_v30 = vmul.f32 %v6220_v10, %v7103_v53  ;;  %v1864_v63 = vpop.permute.xlu2 %1863  ;;  %v6222_v53 = vpop.eup %6221 }
 0xd26   :  { %1876 = vmatpush.bf16.msrb.mxu0 %v1864_v63  ;;  %v1853_v44 = vmul.f32 %v6222_v53, %v7099_v57 }
 0xd27   :  { %v1707_v48 = vpack.c.bf16 %v1703_v30, %v1703_v30 }
 0xd28   :  { %v1857_v6 = vpack.c.bf16 %v1853_v44, %v1853_v44 }
 0xd29   :  { %v1736_v33 = vunpack.c.l.b16 %v1707_v48  ;;  %5641 = vmatmul.msk.bf16.vlgmr.msrb.gmra.mxu0 %vm276_vm2, %v1862_v12 }
 0xd2a   :  { %v1886_v4 = vunpack.c.l.b16 %v1857_v6 }
 0xd2b   :  { %v1737_v19 = vpack.c.b16 %v1736_v33, %v1735_v50 }
 0xd2d   :  { %5638 = vmatmul.msk.bf16.vlgmr.msra.gmra.mxu1 %vm276_vm2, %v1737_v19 }
 0xd30   :  { %v7135_v34 = vpop.f32.mrf.mxu0 }
 0xd38   :  { %v7137_v23 = vpop.f32.mrf.mxu0 }
 0xd50   :  { %v7142_v59 = vpop.f32.mrf.mxu1 }
 0xd58   :  { %v1578_v52 = vpop.f32.mrf.mxu0  ;;  %v7145_v14 = vpop.f32.mrf.mxu1 }
 0xd5e   :  { %v1842_v20 = vpop.xlane.xlu2 %1841 }
 0xd5f   :  { %6223 = vrcp.f32 %v1842_v20 }
 0xd60   :  { %v1580_v38 = vpop.f32.mrf.mxu0 }
 0xd61   :  { %v6048_v29 = vpack.i.bf16 %v1580_v38, %v1578_v52 }
 0xd63   :  { %6049 = vrot.lane.b32.xlu0 %v6048_v29, %s8238_s20 }
 0xd65   :  { %v6224_v22 = vpop.eup %6223 }
 0xd66   :  { %v1852_v41 = vmul.f32 %v6224_v22, %v7119_v32  ;;  %v5970_v32 = vld [vmem:[%s8189_s8 + $0x8] sm:$0xff] }
 0xd67   :  { %2468 = vmatpush.bf16.msra.mxu1 %v5970_v32 }
 0xd68   :  { %v1856_v37 = vpack.c.bf16 %v1852_v41, %v1852_v41 }
 0xd6a   :  { %v1885_v47 = vunpack.c.l.b16 %v1856_v37 }
 0xd6b   :  { %2469 = vmatpush.bf16.msra.mxu1 %v5969_v7 }
 0xd6c   :  { %v1887_v60 = vpack.c.b16 %v1886_v4, %v1885_v47 }
 0xd6e   :  { %5642 = vmatmul.msk.bf16.vlgmr.msrb.gmra.mxu1 %vm276_vm2, %v1887_v60 }
 0xd73   :  { %v1603_v39 = vpop.f32.mrf.mxu1 }
 0xd7b   :  { %v1728_v0 = vpop.f32.mrf.mxu0  ;;  %v1605_v1 = vpop.f32.mrf.mxu1 }
 0xd7c   :  { %v6063_v40 = vpack.i.bf16 %v1605_v1, %v1603_v39 }
 0xd7e   :  { %5703 = vmatmul.msk.bf16.vlgmr.msra.gmra.mxu1 %vm187_vm0, %v2445_v8 }
 0xd83   :  { %v1730_v3 = vpop.f32.mrf.mxu0 }
 0xd84   :  { %v6053_v57 = vpack.i.bf16 %v1730_v3, %v1728_v0 }
 0xd86   :  { %6054 = vrot.lane.b32.xlu1 %v6053_v57, %s8239_s24 }
 0xd8e   :  { %6064 = vrot.lane.b32.xlu1 %v6063_v40, %s8238_s20 }
 0xda6   :  { %v1878_v62 = vpop.f32.mrf.mxu0 }
 0xdaa   :  { %v1753_v15 = vpop.f32.mrf.mxu1 }
 0xdae   :  { %v1880_v9 = vpop.f32.mrf.mxu0 }
 0xdaf   :  { %v6058_v13 = vpack.i.bf16 %v1880_v9, %v1878_v62 }
 0xdb1   :  { %6059 = vrot.lane.b32.xlu0 %v6058_v13, %s8240_s26  ;;  %v1970_v13 = vperm.slane %v6901_v24, 1 }
 0xdb2   :  { %v1755_v55 = vpop.f32.mrf.mxu1 }
 0xdb3   :  { %v6068_v27 = vpack.i.bf16 %v1755_v55, %v1753_v15 }
 0xdb5   :  { %6069 = vrot.lane.b32.xlu2 %v6068_v27, %s8239_s24 }
 0xdd5   :  { %v6050_v25 = vpop.permute.xlu0 %6049 }
 0xdd6   :  { %v6052_v58 = vunpack.i.h.bf16 %v6050_v25  ;;  %v6051_v30 = vunpack.i.l.bf16 %v6050_v25 }
 0xdd8   :  { %v1957_v33 = vsel %vm224_vm1, %v7137_v23, %v6052_v58  ;;  %v1956_v31 = vsel %vm224_vm1, %v7135_v34, %v6051_v30 }
 0xdeb   :  { %v1903_v18 = vpop.f32.mrf.mxu1 }
 0xdf3   :  { %v1905_v54 = vpop.f32.mrf.mxu1 }
 0xdf4   :  { %v6073_v2 = vpack.i.bf16 %v1905_v54, %v1903_v18 }
 0xdf6   :  { %6074 = vrot.lane.b32.xlu0 %v6073_v2, %s8240_s26 }
 0xdf8   :  { %v6055_v10 = vpop.permute.xlu1 %6054 }
 0xdf9   :  { %v6057_v48 = vunpack.i.h.bf16 %v6055_v10  ;;  %v6056_v50 = vunpack.i.l.bf16 %v6055_v10 }
 0xdfb   :  { %v2471_v56 = vpop.f32.mrf.mxu1  ;;  %v1961_v38 = vsel %vm276_vm2, %v1957_v33, %v6057_v48  ;;  %v1960_v29 = vsel %vm276_vm2, %v1956_v31, %v6056_v50 }
 0xdfc   :  { %v2472_v45 = vadd.f32 %v2471_v56, %v2446_v5 }
 0xdfe   :  { %v2478_v36 = vpack.c.bf16 %v2472_v45, %v2472_v45  ;;  %v2476_v16 = vrot.slane %v2472_v45, 4 }
 0xe00   :  { %v2481_v26 = vunpack.c.l.b16 %v2478_v36  ;;  %v2479_v63 = vpack.c.bf16 %v2476_v16, %v2476_v16  ;;  %v6065_v34 = vpop.permute.xlu1 %6064 }
 0xe01   :  { %v6067_v37 = vunpack.i.h.bf16 %v6065_v34  ;;  %v6066_v4 = vunpack.i.l.bf16 %v6065_v34 }
 0xe02   :  { %v7168_v49 = vpack.c.b16 %v2481_v26, %v2481_v26  ;;  %v2505_v53 = vunpack.c.l.b16 %v2479_v63 }
 0xe03   :  { %v2473_v12 = vpop.f32.mrf.mxu1  ;;  %v1959_v39 = vsel %vm224_vm1, %v7145_v14, %v6067_v37  ;;  %v1958_v3 = vsel %vm224_vm1, %v7142_v59, %v6066_v4 }
 0xe04   :  { %2483 = vrot.lane.b32.xlu2 %v7168_v49, %s8227_s30  ;;  %2714 = vrot.lane.b32.xlu1 %v7168_v49, %s8223_s19  ;;  %v7184_v41 = vpack.c.b16 %v2505_v53, %v2505_v53 }
 0xe05   :  { %2600 = vrot.lane.b32.xlu0 %v7168_v49, %s8225_s1 }
 0xe0c   :  { %2712 = vrot.lane.b32.xlu2 %v7168_v49, %s8234_s28  ;;  %2623 = vrot.lane.b32.xlu1 %v7184_v41, %s8225_s1  ;;  %s8247_s1 = smov 80  }
 0xe0d   :  { %2598 = vrot.lane.b32.xlu0 %v7168_v49, %s8241_s4 }
 0xe0f   :  { %v6070_v23 = vpop.permute.xlu2 %6069 }
 0xe10   :  { %v6072_v47 = vunpack.i.h.bf16 %v6070_v23  ;;  %v6071_v60 = vunpack.i.l.bf16 %v6070_v23 }
 0xe12   :  { %v1962_v40 = vsel %vm276_vm2, %v1958_v3, %v6071_v60  ;;  %v1963_v32 = vsel %vm276_vm2, %v1959_v39, %v6072_v47 }
 0xe14   :  { %2507 = vrot.lane.b32.xlu2 %v7184_v41, %s8227_s30 }
 0xe15   :  { %2621 = vrot.lane.b32.xlu0 %v7184_v41, %s8241_s4 }
 0xe1c   :  { %2737 = vrot.lane.b32.xlu2 %v7184_v41, %s8223_s19 }
 0xe23   :  { %v6060_v19 = vpop.permute.xlu0 %6059 }
 0xe24   :  { %v6062_v52 = vunpack.i.h.bf16 %v6060_v19  ;;  %v6061_v20 = vunpack.i.l.bf16 %v6060_v19  ;;  %2735 = vrot.lane.b32.xlu2 %v7184_v41, %s8234_s28 }
 0xe26   :  { %v1964_v44 = vsel %vm881_vm3, %v1960_v29, %v6061_v20  ;;  %v1965_v22 = vsel %vm881_vm3, %v1961_v38, %v6062_v52 }
 0xe27   :  { %v1968_v6 = vpack.c.bf16 %v1965_v22, %v1964_v44 }
 0xe29   :  { %5651 = vmatmul.msk.bf16.vlgmr.msra.gmra.mxu2 %vm187_vm0, %v1968_v6 }
 0xe5e   :  { %v2484_v62 = vpop.permute.xlu2 %2483 }
 0xe5f   :  { %v2489_v15 = vsel %vm224_vm1, %v2484_v62, 0 }
 0xe60   :  { %2498 = vmatpush.bf16.xpose.msrb.mxu1 %v2489_v15 }
 0xe66   :  { %v2713_v14 = vpop.permute.xlu2 %2712 }
 0xe67   :  { %5704 = vmatmul.msk.bf16.vlgmr.msrb.gmra.mxu1 %vm224_vm1, %v2478_v36 }
 0xe68   :  { %v6075_v0 = vpop.permute.xlu0 %6074 }
 0xe69   :  { %v6077_v57 = vunpack.i.h.bf16 %v6075_v0  ;;  %v6076_v1 = vunpack.i.l.bf16 %v6075_v0 }
 0xe6b   :  { %v1966_v51 = vsel %vm881_vm3, %v1962_v40, %v6076_v1  ;;  %v1967_v7 = vsel %vm881_vm3, %v1963_v32, %v6077_v57 }
 0xe6c   :  { %v1969_v8 = vpack.c.bf16 %v1967_v7, %v1966_v51 }
 0xe6e   :  { %5652 = vmatmul.msk.bf16.gmra.mxu2 %vm187_vm0, %v1969_v8  ;;  %v2508_v59 = vpop.permute.xlu2 %2507 }
 0xe6f   :  { %v2513_v9 = vsel %vm224_vm1, %v2508_v59, 0 }
 0xe70   :  { %2522 = vmatpush.bf16.xpose.msrb.mxu2 %v2513_v9 }
 0xe76   :  { %v2715_v61 = vpop.permute.xlu1 %2714  ;;  %v2738_v26 = vpop.permute.xlu2 %2737 }
 0xe77   :  { %v2601_v18 = vpop.permute.xlu0 %2600  ;;  %v2720_v28 = vsel %vm224_vm1, %v2715_v61, 0  ;;  %v2743_v10 = vsel %vm224_vm1, %v2738_v26, 0  ;;  %v5963_v26 = vld [vmem:[%s8187_s5 + $0x10] sm:$0xff] }
 0xe78   :  { %v2606_v2 = vsel %vm224_vm1, %v2601_v18, 0 }
 0xe79   :  { %2615 = vmatpush.bf16.xpose.msra.mxu1 %v2606_v2 }
 0xe7e   :  { %5705 = vmatmul.msk.bf16.vlgmr.msrb.gmra.mxu2 %vm224_vm1, %v2479_v63  ;;  %v2624_v25 = vpop.permute.xlu1 %2623 }
 0xe7f   :  { %v2629_v36 = vsel %vm224_vm1, %v2624_v25, 0  ;;  %v5964_v25 = vld [vmem:[%s8187_s5 + $0x18] sm:$0xff] }
 0xe80   :  { %2638 = vmatpush.bf16.xpose.msra.mxu2 %v2629_v36  ;;  %2151 = vmatpush.bf16.msra.mxu3 %v5964_v25 }
 0xe81   :  { %2729 = vmatpush.bf16.xpose.msrb.mxu1 %v2720_v28 }
 0xe84   :  { %2152 = vmatpush.bf16.msra.mxu3 %v5963_v26 }
 0xe88   :  { %2752 = vmatpush.bf16.xpose.msrb.mxu2 %v2743_v10 }
 0xeac   :  { %v1998_v55 = vpop.f32.mrf.mxu2 }
 0xead   :  { %v1999_v27 = vadd.f32 %v1998_v55, %v1970_v13 }
 0xeaf   :  { %v2008_v54 = vadd.f32 %v1999_v27, %v6881_v46  ;;  %v2599_v46 = vpop.permute.xlu0 %2598 }
 0xeb0   :  { %5708 = vmatmul.msk.bf16.vlgmr.msra.gmra.mxu1 %vm224_vm1, %v2599_v46 }
 0xeb1   :  { %v2012_v17 = vsel %vm187_vm0, %v2008_v54, 0.0 }
 0xeb2   :  { %2013 = vadd.xlane.f32.xlu1 %v2012_v17 }
 0xeb4   :  { %v2000_v5 = vpop.f32.mrf.mxu2 }
 0xeb5   :  { %v2001_v56 = vadd.f32 %v2000_v5, %v1970_v13 }
 0xeb7   :  { %v2009_v45 = vadd.f32 %v2001_v56, %v6883_v21  ;;  %v2622_v16 = vpop.permute.xlu0 %2621  ;;  %v2736_v21 = vpop.permute.xlu2 %2735 }
 0xeb8   :  { %5709 = vmatmul.msk.bf16.vlgmr.msra.gmra.mxu2 %vm224_vm1, %v2622_v16 }
 0xeb9   :  { %v2015_v24 = vsel %vm187_vm0, %v2009_v45, 0.0 }
 0xeba   :  { %2016 = vadd.xlane.f32.xlu0 %v2015_v24 }
 0xec0   :  { %5712 = vmatmul.msk.bf16.vlgmr.msrb.gmra.mxu1 %vm224_vm1, %v2713_v14 }
 0xec8   :  { %5713 = vmatmul.msk.bf16.vlgmr.msrb.gmra.mxu2 %vm224_vm1, %v2736_v21 }
 0xece   :  { %2851 = vrot.lane.b32.xlu0 %v7184_v41, %s8242_s18 }
 0xee4   :  { %v2500_v31 = vpop.f32.mrf.mxu1 }
 0xee5   :  { %v7252_v57 = vmul.f32 0.35355338, %v2500_v31 }
 0xee7   :  { %v2531_v32 = vsel %vm2530_vm7, %v7252_v57, -inf }
 0xeec   :  { %v2502_v52 = vpop.f32.mrf.mxu1 }
 0xef1   :  { %v2003_v58 = vpop.f32.mrf.mxu2 }
 0xef2   :  { %v2004_v30 = vadd.f32 %v2003_v58, %v1970_v13 }
 0xef4   :  { %v2010_v63 = vadd.f32 %v2004_v30, %v6891_v42 }
 0xef6   :  { %v2018_v12 = vsel %vm187_vm0, %v2010_v63, 0.0 }
 0xef7   :  { %2019 = vadd.xlane.f32.xlu2 %v2018_v12 }
 0xef9   :  { %v2005_v48 = vpop.f32.mrf.mxu2 }
 0xefa   :  { %v2006_v50 = vadd.f32 %v2005_v48, %v1970_v13 }
 0xefc   :  { %v2011_v33 = vadd.f32 %v2006_v50, %v6893_v43 }
 0xefe   :  { %v2021_v19 = vsel %vm187_vm0, %v2011_v33, 0.0 }
 0xeff   :  { %2022 = vadd.xlane.f32.xlu1 %v2021_v19 }
 0xf01   :  { %v7235_v20 = vpop.f32.mrf.mxu2 }
 0xf09   :  { %v2526_v53 = vpop.f32.mrf.mxu2 }
 0xf0f   :  { %2828 = vrot.lane.b32.xlu2 %v7168_v49, %s8242_s18 }
 0xf25   :  { %v2014_v38 = vpop.xlane.xlu1 %2013 }
 0xf26   :  { %v2024_v42 = vmul.f32 %v2014_v38, %v6787_v35 }
 0xf28   :  { %v7238_v29 = vsub.f32 %v2008_v54, %v2024_v42  ;;  %v7299_v42 = vmul.f32 0.35355338, %v7235_v20 }
 0xf2a   :  { %v2032_v44 = vmul.f32 %v7238_v29, %v7238_v29 }
 0xf2c   :  { %v2036_v43 = vsel %vm187_vm0, %v2032_v44, 0.0 }
 0xf2d   :  { %v2017_v22 = vpop.xlane.xlu0 %2016  ;;  %2037 = vadd.xlane.f32.xlu0 %v2036_v43  ;;  %v2617_v60 = vpop.f32.mrf.mxu1 }
 0xf2e   :  { %v2025_v6 = vmul.f32 %v2017_v22, %v6787_v35  ;;  %v7264_v27 = vmul.f32 0.35355338, %v2617_v60 }
 0xf30   :  { %v7244_v34 = vsub.f32 %v2009_v45, %v2025_v6  ;;  %v2646_v61 = vsel %vm2530_vm7, %v7264_v27, -inf  ;;  %v7304_v6 = vld [vmem:[%s8185_s7 + $0x8] sm:$0xff]  ;;  %s8244_s7 = smov 56  }
 0xf32   :  { %v2033_v23 = vmul.f32 %v7244_v34, %v7244_v34 }
 0xf34   :  { %v2039_v37 = vsel %vm187_vm0, %v2033_v23, 0.0  ;;  %v2100_v23 = vperm.slane %v7304_v6, 4 }
 0xf35   :  { %2040 = vadd.xlane.f32.xlu1 %v2039_v37  ;;  %v2619_v0 = vpop.f32.mrf.mxu1 }
 0xf3b   :  { %v2640_v39 = vpop.f32.mrf.mxu2 }
 0xf3c   :  { %v7273_v17 = vmul.f32 0.35355338, %v2640_v39  ;;  %v2105_v39 = vperm.slane %v7304_v6, 5 }
 0xf3d   :  { %v2731_v3 = vpop.f32.mrf.mxu1 }
 0xf3e   :  { %v2649_v5 = vsel %vm2530_vm7, %v7273_v17, -inf  ;;  %v7277_v56 = vmul.f32 0.35355338, %v2731_v3 }
 0xf40   :  { %v2852_v4 = vpop.permute.xlu0 %2851  ;;  %v2760_v45 = vsel %vm2530_vm7, %v7277_v56, -inf }
 0xf41   :  { %v2857_v47 = vsel %vm224_vm1, %v2852_v4, 0  ;;  %2849 = vrot.lane.b32.xlu0 %v7184_v41, %s8243_s21 }
 0xf42   :  { %2866 = vmatpush.bf16.xpose.msra.mxu2 %v2857_v47  ;;  %v2534_v47 = vsel %vm2530_vm7, %v7299_v42, -inf }
 0xf43   :  { %v2642_v1 = vpop.f32.mrf.mxu2 }
 0xf45   :  { %v2733_v8 = vpop.f32.mrf.mxu1 }
 0xf4b   :  { %v2754_v15 = vpop.f32.mrf.mxu2 }
 0xf4c   :  { %v7281_v24 = vmul.f32 0.35355338, %v2754_v15 }
 0xf4e   :  { %v2763_v46 = vsel %vm2530_vm7, %v7281_v24, -inf }
 0xf53   :  { %v2756_v2 = vpop.f32.mrf.mxu2 }
 0xf6a   :  { %v2020_v40 = vpop.xlane.xlu2 %2019 }
 0xf6b   :  { %v2026_v51 = vmul.f32 %v2020_v40, %v6787_v35  ;;  %2532 = vmax.xlane.f32.xlu0 %v2531_v32 }
 0xf6d   :  { %v7257_v7 = vsub.f32 %v2010_v63, %v2026_v51 }
 0xf6f   :  { %v2034_v62 = vmul.f32 %v7257_v7, %v7257_v7 }
 0xf71   :  { %v2042_v14 = vsel %vm187_vm0, %v2034_v62, 0.0 }
 0xf72   :  { %2043 = vadd.xlane.f32.xlu2 %v2042_v14  ;;  %v2829_v59 = vpop.permute.xlu2 %2828  ;;  %v2023_v9 = vpop.xlane.xlu1 %2022 }
 0xf73   :  { %v2834_v13 = vsel %vm224_vm1, %v2829_v59, 0  ;;  %v2027_v55 = vmul.f32 %v2023_v9, %v6787_v35 }
 0xf74   :  { %2843 = vmatpush.bf16.xpose.msra.mxu1 %v2834_v13 }
 0xf75   :  { %v7266_v18 = vsub.f32 %v2011_v33, %v2027_v55 }
 0xf77   :  { %v2035_v54 = vmul.f32 %v7266_v18, %v7266_v18 }
 0xf79   :  { %v2045_v28 = vsel %vm187_vm0, %v2035_v54, 0.0 }
 0xf7a   :  { %2647 = vmax.xlane.f32.xlu2 %v2646_v61  ;;  %2046 = vadd.xlane.f32.xlu1 %v2045_v28 }
 0xf82   :  { %2650 = vmax.xlane.f32.xlu2 %v2649_v5 }
 0xf8a   :  { %2761 = vmax.xlane.f32.xlu2 %v2760_v45 }
 0xf92   :  { %2764 = vmax.xlane.f32.xlu2 %v2763_v46 }
 0xf93   :  { %2826 = vrot.lane.b32.xlu1 %v7168_v49, %s8243_s21 }
 0xfa0   :  { %v2038_v36 = vpop.xlane.xlu0 %2037 }
 0xfa1   :  { %v2048_v16 = vmul.f32 %v2038_v36, %v6787_v35 }
 0xfa3   :  { %v2052_v10 = vadd.f32 1e-05, %v2048_v16 }
 0xfa5   :  { %6225 = vrsqrt.f32 %v2052_v10  ;;  %vm2062_vm9 = vweird.f32 %v2052_v10 }
 0xfa8   :  { %v2041_v21 = vpop.xlane.xlu1 %2040 }
 0xfa9   :  { %v2049_v58 = vmul.f32 %v2041_v21, %v6787_v35 }
 0xfaa   :  { %2555 = vrot.lane.b32.xlu2 %v7168_v49, %s8235_s22 }
 0xfab   :  { %v6226_v30 = vpop.eup %6225  ;;  %v2053_v63 = vadd.f32 1e-05, %v2049_v58 }
 0xfac   :  { %v2057_v12 = vmul.f32 %v6226_v30, %v2052_v10  ;;  %vm2063_vm8 = vweird.f32 %v6226_v30 }
 0xfad   :  { %6227 = vrsqrt.f32 %v2053_v63  ;;  %vm2064_vm10 = vmor %vm2062_vm9, %vm2063_vm8  ;;  %vm2072_vm12 = vweird.f32 %v2053_v63 }
 0xfae   :  { %v2058_v48 = vmul.f32 %v6226_v30, %v2057_v12 }
 0xfb0   :  { %v2059_v50 = vmul.f32 0.5, %v2058_v48 }
 0xfb2   :  { %v2060_v33 = vsub.f32 1.5, %v2059_v50 }
 0xfb3   :  { %v6228_v19 = vpop.eup %6227  ;;  %v2850_v31 = vpop.permute.xlu0 %2849 }
 0xfb4   :  { %v2061_v52 = vmul.f32 %v6226_v30, %v2060_v33  ;;  %v2067_v53 = vmul.f32 %v6228_v19, %v2053_v63  ;;  %5717 = vmatmul.msk.bf16.vlgmr.msra.gmra.mxu2 %vm224_vm1, %v2850_v31  ;;  %vm2073_vm11 = vweird.f32 %v6228_v19 }
 0xfb5   :  { %vm2074_vm13 = vmor %vm2072_vm12, %vm2073_vm11  ;;  %vm2557_vm11 = vcmask 31744  }
 0xfb6   :  { %v2068_v38 = vmul.f32 %v6228_v19, %v2067_v53  ;;  %v2065_v44 = vsel %vm2064_vm10, %v6226_v30, %v2061_v52  ;;  %vm2422_vm10 = vcmask 1041408  }
 0xfb7   :  { %v2096_v37 = vmul.f32 %v2065_v44, %v7238_v29 }
 0xfb8   :  { %v2069_v43 = vmul.f32 0.5, %v2068_v38 }
 0xfb9   :  { %v2101_v60 = vmul.f32 %v2100_v23, %v2096_v37 }
 0xfba   :  { %v2070_v22 = vsub.f32 1.5, %v2069_v43 }
 0xfbb   :  { %v7312_v1 = vadd.f32 %v2105_v39, %v2101_v60 }
 0xfbc   :  { %v2071_v4 = vmul.f32 %v6228_v19, %v2070_v22 }
 0xfbd   :  { %2535 = vmax.xlane.f32.xlu1 %v2534_v47  ;;  %v5965_v47 = vld [vmem:[%s8188_s6 + $0x20] sm:$0xff] }
 0xfbe   :  { %v2075_v20 = vsel %vm2074_vm13, %v6228_v19, %v2071_v4  ;;  %v5967_v4 = vld [vmem:[%s8188_s6 + $0x30] sm:$0xff] }
 0xfbf   :  { %v2097_v0 = vmul.f32 %v2075_v20, %v7244_v34 }
 0xfc1   :  { %v2102_v3 = vmul.f32 %v2100_v23, %v2097_v0 }
 0xfc3   :  { %v7314_v40 = vadd.f32 %v2105_v39, %v2102_v3 }
 0xfc5   :  { %v2124_v29 = vpack.c.bf16 %v7314_v40, %v7312_v1 }
 0xfc7   :  { %5673 = vmatmul.msk.bf16.vlgmr.msra.gmra.mxu3 %vm187_vm0, %v2124_v29  ;;  %v2126_v29 = vperm.slane %v7304_v6, 2 }
 0xfde   :  { %v2533_v32 = vpop.xlane.xlu0 %2532 }
 0xfdf   :  { %v2537_v51 = vsub.f32 %v7252_v57, %v2533_v32 }
 0xfe1   :  { %v2539_v8 = vmul.f32 1.442695, %v2537_v51 }
 0xfe3   :  { %6229 = vpow2.f32 %v2539_v8 }
 0xfe5   :  { %v2044_v62 = vpop.xlane.xlu2 %2043 }
 0xfe6   :  { %v2050_v34 = vmul.f32 %v2044_v62, %v6787_v35 }
 0xfe8   :  { %v2054_v15 = vadd.f32 1e-05, %v2050_v34 }
 0xfe9   :  { %v7321_v14 = vpop.eup %6229 }
 0xfea   :  { %6231 = vrsqrt.f32 %v2054_v15  ;;  %v2543_v59 = vsel %vm2530_vm7, %v7321_v14, 0.0  ;;  %vm2082_vm15 = vweird.f32 %v2054_v15 }
 0xfeb   :  { %2544 = vadd.xlane.f32.xlu2 %v2543_v59 }
 0xfed   :  { %v7325_v9 = vpop.xlane.xlu2 %2647  ;;  %v2047_v13 = vpop.xlane.xlu1 %2046 }
 0xfee   :  { %v2051_v55 = vmul.f32 %v2047_v13, %v6787_v35 }
 0xff0   :  { %v6232_v61 = vpop.eup %6231  ;;  %v2055_v57 = vadd.f32 1e-05, %v2051_v55 }
 0xff1   :  { %v2077_v54 = vmul.f32 %v6232_v61, %v2054_v15  ;;  %vm2083_vm14 = vweird.f32 %v6232_v61 }
 0xff2   :  { %6233 = vrsqrt.f32 %v2055_v57  ;;  %vm2084_vm4 = vmor %vm2082_vm15, %vm2083_vm14  ;;  %vm2092_vm8 = vweird.f32 %v2055_v57 }
 0xff3   :  { %v2078_v2 = vmul.f32 %v6232_v61, %v2077_v54 }
 0xff5   :  { %v2079_v28 = vmul.f32 0.5, %v2078_v2  ;;  %v7328_v5 = vpop.xlane.xlu2 %2650 }
 0xff7   :  { %v2080_v45 = vsub.f32 1.5, %v2079_v28 }
 0xff8   :  { %v6234_v46 = vpop.eup %6233 }
 0xff9   :  { %v2081_v25 = vmul.f32 %v6232_v61, %v2080_v45  ;;  %v2087_v36 = vmul.f32 %v6234_v46, %v2055_v57  ;;  %vm2093_vm6 = vweird.f32 %v6234_v46 }
 0xffa   :  { %vm2094_vm9 = vmor %vm2092_vm8, %vm2093_vm6 }
 0xffb   :  { %v2088_v16 = vmul.f32 %v6234_v46, %v2087_v36  ;;  %v2085_v10 = vsel %vm2084_vm4, %v6232_v61, %v2081_v25 }
 0xffc   :  { %v2098_v30 = vmul.f32 %v2085_v10, %v7257_v7 }
 0xffd   :  { %v7330_v26 = vpop.xlane.xlu2 %2761  ;;  %v2089_v21 = vmul.f32 0.5, %v2088_v16 }
 0xffe   :  { %v2103_v19 = vmul.f32 %v2100_v23, %v2098_v30  ;;  %v2766_v57 = vsub.f32 %v7277_v56, %v7330_v26 }
 0xfff   :  { %v2090_v58 = vsub.f32 1.5, %v2089_v21 }
0x1000   :  { %v7337_v52 = vadd.f32 %v2105_v39, %v2103_v19  ;;  %v2768_v54 = vmul.f32 1.442695, %v2766_v57 }
0x1001   :  { %v2091_v63 = vmul.f32 %v6234_v46, %v2090_v58 }
0x1003   :  { %2691 = vrot.lane.b32.xlu2 %v7184_v41, %s8244_s7  ;;  %v2095_v12 = vsel %vm2094_vm9, %v6234_v46, %v2091_v63 }
0x1004   :  { %v2099_v48 = vmul.f32 %v2095_v12, %v7266_v18 }
0x1005   :  { %v2765_v50 = vpop.xlane.xlu2 %2764  ;;  %v2827_v33 = vpop.permute.xlu1 %2826 }
0x1006   :  { %5716 = vmatmul.msk.bf16.vlgmr.msra.gmra.mxu1 %vm224_vm1, %v2827_v33  ;;  %v2104_v31 = vmul.f32 %v2100_v23, %v2099_v48  ;;  %v2767_v18 = vsub.f32 %v7281_v24, %v2765_v50  ;;  %v5968_v23 = vld [vmem:[%s8188_s6 + $0x38] sm:$0xff]  ;;  %v5966_v24 = vld [vmem:[%s8188_s6 + $0x28] sm:$0xff]  ;;  %s8246_s6 = smov 88  }
0x1007   :  { %2205 = vmatpush.bf16.msra.mxu0 %v5968_v23 }
0x1008   :  { %v7339_v53 = vadd.f32 %v2105_v39, %v2104_v31  ;;  %v2770_v43 = vmul.f32 1.442695, %v2767_v18 }
0x100a   :  { %v2125_v7 = vpack.c.bf16 %v7339_v53, %v7337_v52  ;;  %6235 = vpow2.f32 %v2770_v43 }
0x100b   :  { %2206 = vmatpush.bf16.msra.mxu0 %v5967_v4 }
0x100c   :  { %5674 = vmatmul.msk.bf16.gmra.mxu3 %vm187_vm0, %v2125_v7  ;;  %v2652_v7 = vsub.f32 %v7264_v27, %v7325_v9 }
0x100d   :  { %v2556_v38 = vpop.permute.xlu2 %2555 }
0x100e   :  { %v2562_v44 = vsel %vm2422_vm10, %v2556_v38, 0 }
0x100f   :  { %2571 = vmatpush.bf16.msrb.mxu3 %v2562_v44  ;;  %2207 = vmatpush.bf16.msra.mxu0 %v5966_v24  ;;  %v2654_v44 = vmul.f32 1.442695, %v2652_v7 }
0x1010   :  { %v7346_v22 = vpop.eup %6235 }
0x1011   :  { %v2775_v37 = vsel %vm2530_vm7, %v7346_v22, 0.0 }
0x1013   :  { %2208 = vmatpush.bf16.msra.mxu0 %v5965_v47 }
0x102c   :  { %2776 = vadd.xlane.f32.xlu2 %v2775_v37 }
0x1030   :  { %v2536_v30 = vpop.xlane.xlu1 %2535 }
0x1031   :  { %v2538_v19 = vsub.f32 %v7299_v42, %v2536_v30  ;;  %v2653_v42 = vsub.f32 %v7273_v17, %v7328_v5 }
0x1033   :  { %v2541_v31 = vmul.f32 1.442695, %v2538_v19  ;;  %v2656_v4 = vmul.f32 1.442695, %v2653_v42 }
0x1037   :  { %v2868_v20 = vpop.f32.mrf.mxu2 }
0x1038   :  { %v2873_v60 = vmul.f32 0.35355338, %v2868_v20 }
0x103a   :  { %v2877_v0 = vsel %vm2530_vm7, %v2873_v60, -inf }
0x103b   :  { %2878 = vmax.xlane.f32.xlu1 %v2877_v0 }
0x103f   :  { %v2870_v39 = vpop.f32.mrf.mxu2 }
0x1044   :  { %2898 = vrot.lane.b32.xlu2 %v7168_v49, %s8237_s29 }
0x104a   :  { %v2154_v3 = vpop.f32.mrf.mxu3 }
0x104b   :  { %v2155_v32 = vadd.f32 %v2154_v3, %v2126_v29 }
0x104d   :  { %v2164_v62 = vmax.f32 %v2155_v32, 0.0 }
0x1052   :  { %v2156_v51 = vpop.f32.mrf.mxu3 }
0x1053   :  { %v2157_v8 = vadd.f32 %v2156_v51, %v2126_v29 }
0x1054   :  { %2577 = vrot.lane.b32.xlu1 %v7184_v41, %s8235_s22 }
0x1055   :  { %v2165_v34 = vmax.f32 %v2157_v8, 0.0 }
0x1057   :  { %v2168_v15 = vpack.c.bf16 %v2165_v34, %v2164_v62 }
0x1059   :  { %5691 = vmatmul.msk.bf16.vlgmr.msra.gmra.mxu0 %vm1118_vm5, %v2168_v15 }
0x105e   :  { %v2545_v59 = vpop.xlane.xlu2 %2544 }
0x105f   :  { %6237 = vrcp.f32 %v2545_v59 }
0x1060   :  { %6239 = vpow2.f32 %v2768_v54 }
0x1065   :  { %v6238_v13 = vpop.eup %6237 }
0x1066   :  { %v2551_v55 = vmul.f32 %v6238_v13, %v7321_v14  ;;  %v7373_v2 = vpop.eup %6239  ;;  %v2692_v38 = vpop.permute.xlu2 %2691 }
0x1067   :  { %v2772_v28 = vsel %vm2530_vm7, %v7373_v2, 0.0  ;;  %v2697_v43 = vsel %vm2422_vm10, %v2692_v38, 0 }
0x1068   :  { %v2553_v61 = vpack.c.bf16 %v2551_v55, %v2551_v55 }
0x106a   :  { %5706 = vmatmul.msk.bf16.vlgmr.msrb.gmra.mxu3 %vm2557_vm11, %v2553_v61 }
0x107e   :  { %2773 = vadd.xlane.f32.xlu1 %v2772_v28 }
0x1083   :  { %v2845_v45 = vpop.f32.mrf.mxu1 }
0x1084   :  { %v2872_v46 = vmul.f32 0.35355338, %v2845_v45 }
0x1086   :  { %v2874_v25 = vsel %vm2530_vm7, %v2872_v46, -inf }
0x1087   :  { %2875 = vmax.xlane.f32.xlu0 %v2874_v25 }
0x108b   :  { %v2847_v14 = vpop.f32.mrf.mxu1 }
0x108f   :  { %v2159_v36 = vpop.f32.mrf.mxu3 }
0x1090   :  { %v2160_v16 = vadd.f32 %v2159_v36, %v2126_v29 }
0x1092   :  { %v2166_v58 = vmax.f32 %v2160_v16, 0.0 }
0x1097   :  { %v2161_v10 = vpop.f32.mrf.mxu3 }
0x1098   :  { %v2162_v21 = vadd.f32 %v2161_v10, %v2126_v29 }
0x109a   :  { %v2167_v56 = vmax.f32 %v2162_v21, 0.0 }
0x109b   :  { %2670 = vrot.lane.b32.xlu0 %v7168_v49, %s8244_s7 }
0x109c   :  { %v2169_v26 = vpack.c.bf16 %v2167_v56, %v2166_v58 }
0x109e   :  { %5692 = vmatmul.msk.bf16.gmra.mxu0 %vm1118_vm5, %v2169_v26 }
0x109f   :  { %v2777_v34 = vpop.xlane.xlu2 %2776 }
0x10a3   :  { %2784 = vrot.lane.b32.xlu0 %v7168_v49, %s8236_s23 }
0x10a7   :  { %v2899_v54 = vpop.permute.xlu2 %2898 }
0x10ae   :  { %v2879_v63 = vpop.xlane.xlu1 %2878 }
0x10af   :  { %v2881_v12 = vsub.f32 %v2873_v60, %v2879_v63 }
0x10b1   :  { %v2884_v48 = vmul.f32 1.442695, %v2881_v12 }
0x10b3   :  { %6241 = vpow2.f32 %v2884_v48 }
0x10b4   :  { %6243 = vpow2.f32 %v2541_v31 }
0x10b5   :  { %6245 = vpow2.f32 %v2654_v44 }
0x10b6   :  { %6247 = vpow2.f32 %v2656_v4 }
0x10b9   :  { %v7383_v50 = vpop.eup %6241 }
0x10ba   :  { %v2889_v33 = vsel %vm2530_vm7, %v7383_v50, 0.0  ;;  %v6244_v23 = vpop.eup %6243 }
0x10bb   :  { %2890 = vadd.xlane.f32.xlu1 %v2889_v33  ;;  %v2546_v37 = vsel %vm2530_vm7, %v6244_v23, 0.0  ;;  %v6246_v27 = vpop.eup %6245 }
0x10bc   :  { %v2658_v9 = vsel %vm2530_vm7, %v6246_v27, 0.0  ;;  %v6248_v24 = vpop.eup %6247 }
0x10bd   :  { %v2661_v47 = vsel %vm2530_vm7, %v6248_v24, 0.0 }
0x10c6   :  { %v2578_v49 = vpop.permute.xlu1 %2577 }
0x10c7   :  { %v2583_v18 = vsel %vm2422_vm10, %v2578_v49, 0 }
0x10c8   :  { %2592 = vmatpush.bf16.msrb.mxu0 %v2583_v18 }
0x10cc   :  { %2706 = vmatpush.bf16.msra.mxu0 %v2697_v43 }
0x10cd   :  { %2547 = vadd.xlane.f32.xlu0 %v2546_v37 }
0x10d4   :  { %2919 = vrot.lane.b32.xlu1 %v7184_v41, %s8237_s29 }
0x10d5   :  { %2659 = vadd.xlane.f32.xlu0 %v2658_v9 }
0x10d6   :  { %v2210_v18 = vpop.f32.mrf.mxu0 }
0x10dd   :  { %2662 = vadd.xlane.f32.xlu0 %v2661_v47 }
0x10ed   :  { %v7399_v20 = vpop.f32.mrf.mxu3 }
0x10f1   :  { %2805 = vrot.lane.b32.xlu0 %v7184_v41, %s8236_s23  ;;  %v2774_v28 = vpop.xlane.xlu1 %2773 }
0x10f5   :  { %v2575_v17 = vpop.f32.mrf.mxu3 }
0x10fa   :  { %v2876_v5 = vpop.xlane.xlu0 %2875 }
0x10fb   :  { %v2880_v60 = vsub.f32 %v2872_v46, %v2876_v5  ;;  %v2904_v46 = vsel %vm2422_vm10, %v2899_v54, 0  ;;  %v5972_v54 = vld [vmem:[%s8191_s9 + $0x8] sm:$0xff] }
0x10fc   :  { %3000 = vmatpush.bf16.msrb.mxu1 %v5972_v54 }
0x10fd   :  { %v2882_v0 = vmul.f32 1.442695, %v2880_v60  ;;  %v7428_v60 = vperm.slane %v7304_v6, 3 }
0x10ff   :  { %6249 = vpow2.f32 %v2882_v0 }
0x1105   :  { %v6250_v51 = vpop.eup %6249 }
0x1106   :  { %v2886_v8 = vsel %vm2530_vm7, %v6250_v51, 0.0 }
0x110d   :  { %v2671_v39 = vpop.permute.xlu0 %2670 }
0x110e   :  { %v2676_v3 = vsel %vm2422_vm10, %v2671_v39, 0  ;;  %v2211_v39 = vadd.f32 %v2210_v18, %v7428_v60 }
0x110f   :  { %2685 = vmatpush.bf16.msra.mxu3 %v2676_v3 }
0x1110   :  { %v2220_v3 = vadd.f32 %v2211_v39, %v7312_v1 }
0x1115   :  { %v2785_v29 = vpop.permute.xlu0 %2784 }
0x1116   :  { %v2790_v32 = vsel %vm2422_vm10, %v2785_v29, 0 }
0x1117   :  { %2799 = vmatpush.bf16.msrb.mxu3 %v2790_v32  ;;  %v2224_v32 = vsel %vm187_vm0, %v2220_v3, 0.0 }
0x111b   :  { %2887 = vadd.xlane.f32.xlu0 %v2886_v8 }
0x112e   :  { %v2891_v36 = vpop.xlane.xlu1 %2890 }
0x1140   :  { %v2548_v62 = vpop.xlane.xlu0 %2547 }
0x1141   :  { %6251 = vrcp.f32 %v2548_v62 }
0x1146   :  { %v2920_v56 = vpop.permute.xlu1 %2919 }
0x1147   :  { %v6252_v41 = vpop.eup %6251  ;;  %v2925_v12 = vsel %vm2422_vm10, %v2920_v56, 0 }
0x1148   :  { %v2552_v15 = vmul.f32 %v6252_v41, %v6244_v23  ;;  %v2660_v59 = vpop.xlane.xlu0 %2659 }
0x1149   :  { %6253 = vrcp.f32 %v2660_v59 }
0x114a   :  { %v2554_v13 = vpack.c.bf16 %v2552_v15, %v2552_v15 }
0x114c   :  { %5707 = vmatmul.msk.bf16.vlgmr.msrb.gmra.mxu0 %vm2557_vm11, %v2554_v13 }
0x114f   :  { %v6254_v55 = vpop.eup %6253 }
0x1150   :  { %v2666_v61 = vmul.f32 %v6254_v55, %v6246_v27  ;;  %v2663_v57 = vpop.xlane.xlu0 %2662 }
0x1151   :  { %6255 = vrcp.f32 %v2663_v57 }
0x1152   :  { %v2668_v45 = vpack.c.bf16 %v2666_v61, %v2666_v61  ;;  %6257 = vrcp.f32 %v2774_v28 }
0x1153   :  { %6259 = vrcp.f32 %v2777_v34 }
0x1154   :  { %5710 = vmatmul.msk.bf16.vlgmr.msra.gmra.mxu3 %vm2557_vm11, %v2668_v45  ;;  %6261 = vrcp.f32 %v2891_v36  ;;  %v5971_v45 = vld [vmem:[%s8191_s9] sm:$0xff] }
0x1155   :  { %2913 = vmatpush.bf16.msra.mxu3 %v2904_v46  ;;  %3001 = vmatpush.bf16.msrb.mxu1 %v5971_v45 }
0x1157   :  { %v6256_v25 = vpop.eup %6255 }
0x1158   :  { %v2667_v14 = vmul.f32 %v6256_v25, %v6248_v24  ;;  %v6258_v10 = vpop.eup %6257 }
0x1159   :  { %v2780_v21 = vmul.f32 %v6258_v10, %v7373_v2  ;;  %v6260_v26 = vpop.eup %6259 }
0x115a   :  { %v2669_v16 = vpack.c.bf16 %v2667_v14, %v2667_v14  ;;  %v2781_v48 = vmul.f32 %v6260_v26, %v7346_v22  ;;  %v6262_v19 = vpop.eup %6261  ;;  %v2212_v22 = vpop.f32.mrf.mxu0 }
0x115b   :  { %v2782_v58 = vpack.c.bf16 %v2780_v21, %v2780_v21  ;;  %v2895_v2 = vmul.f32 %v6262_v19, %v7383_v50  ;;  %v2213_v62 = vadd.f32 %v2212_v22, %v7428_v60  ;;  %v7458_v22 = vperm.slane %v7304_v6, 6 }
0x115c   :  { %5711 = vmatmul.msk.bf16.vlgmr.msra.gmra.mxu0 %vm2557_vm11, %v2669_v16  ;;  %v2783_v33 = vpack.c.bf16 %v2781_v48, %v2781_v48 }
0x115d   :  { %v2897_v31 = vpack.c.bf16 %v2895_v2, %v2895_v2  ;;  %v2221_v41 = vadd.f32 %v2213_v62, %v7314_v40 }
0x115f   :  { %v2227_v15 = vsel %vm187_vm0, %v2221_v41, 0.0 }
0x1162   :  { %v7419_v43 = vpop.f32.mrf.mxu0 }
0x1163   :  { %v2806_v30 = vpop.permute.xlu0 %2805 }
0x1164   :  { %v2811_v63 = vsel %vm2422_vm10, %v2806_v30, 0  ;;  %5714 = vmatmul.msk.bf16.vlgmr.msrb.gmra.mxu3 %vm2557_vm11, %v2782_v58 }
0x1165   :  { %2820 = vmatpush.bf16.msrb.mxu0 %v2811_v63 }
0x1169   :  { %2934 = vmatpush.bf16.msra.mxu0 %v2925_v12 }
0x116a   :  { %v7421_v23 = vpop.f32.mrf.mxu0 }
0x116c   :  { %5715 = vmatmul.msk.bf16.vlgmr.msrb.gmra.mxu0 %vm2557_vm11, %v2783_v33 }
0x117c   :  { %5719 = vmatmul.msk.bf16.vlgmr.msra.gmra.mxu0 %vm2557_vm11, %v2897_v31 }
0x118e   :  { %v2888_v7 = vpop.xlane.xlu0 %2887 }
0x118f   :  { %6263 = vrcp.f32 %v2888_v7 }
0x1195   :  { %v6264_v38 = vpop.eup %6263 }
0x1196   :  { %v2894_v49 = vmul.f32 %v6264_v38, %v6250_v51 }
0x1198   :  { %v2896_v44 = vpack.c.bf16 %v2894_v49, %v2894_v49 }
0x119a   :  { %5718 = vmatmul.msk.bf16.vlgmr.msra.gmra.mxu3 %vm2557_vm11, %v2896_v44 }
0x11c9   :  { %v2594_v42 = vpop.f32.mrf.mxu0 }
0x11d1   :  { %v2596_v37 = vpop.f32.mrf.mxu0 }
0x11d7   :  { %v2687_v4 = vpop.f32.mrf.mxu3 }
0x11d8   :  { %2942 = vrot.lane.b32.xlu2 %v2687_v4, %s8238_s20  ;;  %v7461_v4 = vperm.slane %v7304_v6, 7 }
0x11d9   :  { %v2708_v50 = vpop.f32.mrf.mxu0 }
0x11da   :  { %2944 = vrot.lane.b32.xlu0 %v2708_v50, %s8238_s20 }
0x11df   :  { %v2689_v27 = vpop.f32.mrf.mxu3 }
0x11e1   :  { %v2710_v9 = vpop.f32.mrf.mxu0 }
0x11e7   :  { %v2801_v24 = vpop.f32.mrf.mxu3 }
0x11e8   :  { %2950 = vrot.lane.b32.xlu1 %v2801_v24, %s8239_s24  ;;  %v7469_v24 = vld [vmem:[%s8190_s15] sm:$0xff] }
0x11e9   :  { %v2822_v47 = vpop.f32.mrf.mxu0 }
0x11ea   :  { %2952 = vrot.lane.b32.xlu2 %v2822_v47, %s8239_s24  ;;  %v2978_v47 = vperm.slane %v7469_v24, 1 }
0x11ef   :  { %v2803_v17 = vpop.f32.mrf.mxu3 }
0x11f1   :  { %v2824_v5 = vpop.f32.mrf.mxu0 }
0x11f9   :  { %v2936_v0 = vpop.f32.mrf.mxu0 }
0x11fa   :  { %2960 = vrot.lane.b32.xlu2 %v2936_v0, %s8240_s26 }
0x1201   :  { %v2938_v29 = vpop.f32.mrf.mxu0 }
0x1204   :  { %2225 = vadd.xlane.f32.xlu0 %v2224_v32 }
0x121d   :  { %v2915_v51 = vpop.f32.mrf.mxu3 }
0x121e   :  { %2958 = vrot.lane.b32.xlu1 %v2915_v51, %s8240_s26 }
0x1225   :  { %v2917_v8 = vpop.f32.mrf.mxu3 }
0x1232   :  { %v2943_v34 = vpop.permute.xlu2 %2942 }
0x1233   :  { %v2964_v16 = vsel %vm224_vm1, %v7399_v20, %v2943_v34 }
0x1244   :  { %v2953_v59 = vpop.permute.xlu2 %2952 }
0x1248   :  { %2228 = vadd.xlane.f32.xlu1 %v2227_v15 }
0x124c   :  { %v2945_v13 = vpop.permute.xlu0 %2944 }
0x124d   :  { %v2965_v1 = vsel %vm224_vm1, %v2594_v42, %v2945_v13 }
0x124e   :  { %v2967_v55 = vsel %vm276_vm2, %v2965_v1, %v2953_v59 }
0x1254   :  { %v2961_v61 = vpop.permute.xlu2 %2960 }
0x1255   :  { %v2969_v57 = vsel %vm881_vm3, %v2967_v55, %v2961_v61 }
0x1256   :  { %2974 = vst [vmem:[#allocation1 + $0x1] ss:$2 sm:$0xff] %v2969_v57 }
0x125a   :  { %v2951_v36 = vpop.permute.xlu1 %2950 }
0x125b   :  { %v2966_v10 = vsel %vm276_vm2, %v2964_v16, %v2951_v36 }
0x1277   :  { %v2226_v40 = vpop.xlane.xlu0 %2225 }
0x1278   :  { %v2236_v28 = vmul.f32 %v2226_v40, %v6787_v35 }
0x127a   :  { %v2240_v46 = vsub.f32 %v2220_v3, %v2236_v28 }
0x127c   :  { %v2244_v25 = vmul.f32 %v2240_v46, %v2240_v46 }
0x127e   :  { %v2248_v14 = vsel %vm187_vm0, %v2244_v25, 0.0  ;;  %v2216_v25 = vadd.f32 %v7419_v43, %v7428_v60 }
0x127f   :  { %2249 = vadd.xlane.f32.xlu2 %v2248_v14 }
0x1280   :  { %v2222_v36 = vadd.f32 %v2216_v25, %v7337_v52 }
0x1282   :  { %v2230_v16 = vsel %vm187_vm0, %v2222_v36, 0.0 }
0x1290   :  { %v2959_v21 = vpop.permute.xlu1 %2958 }
0x1291   :  { %v2968_v58 = vsel %vm881_vm3, %v2966_v10, %v2959_v21  ;;  %v6411_v10 = vmov 839922192  }
0x1292   :  { %2972 = vst [vmem:[#allocation1] ss:$2 sm:$0xff] %v2968_v58  ;;  %v3025_v21 = vunpack.c.l.s4 %v6411_v10  ;;  %v6412_v58 = vmov 1985246804  }
0x1299   :  { %v2975_v56 = vld.sshfl [vmem:[#allocation1] sm:$0xff pattern:$0x75316420] }
0x129a   :  { %v2977_v26 = vpack.c.bf16 %v2975_v56, %v2975_v56  ;;  %v3029_v56 = vunpack.c.l.s4 %v6412_v58 }
0x129c   :  { %5728 = vmatmul.msk.bf16.vlgmr.msrb.gmra.mxu1 %vm187_vm0, %v2977_v26  ;;  %v7489_v26 = vunpack.c.0.s8 %v3025_v21 }
0x12bb   :  { %v2229_v30 = vpop.xlane.xlu1 %2228 }
0x12bc   :  { %v2237_v63 = vmul.f32 %v2229_v30, %v6787_v35  ;;  %v7491_v30 = vunpack.c.0.s8 %v3029_v56 }
0x12be   :  { %v2241_v12 = vsub.f32 %v2221_v41, %v2237_v63 }
0x12c0   :  { %v2245_v48 = vmul.f32 %v2241_v12, %v2241_v12 }
0x12c2   :  { %v2251_v33 = vsel %vm187_vm0, %v2245_v48, 0.0 }
0x12c3   :  { %2252 = vadd.xlane.f32.xlu0 %v2251_v33 }
0x12f2   :  { %v2250_v19 = vpop.xlane.xlu2 %2249 }
0x12f3   :  { %v2260_v20 = vmul.f32 %v2250_v19, %v6787_v35 }
0x12f5   :  { %v2264_v2 = vadd.f32 1e-05, %v2260_v20 }
0x12f7   :  { %6265 = vrsqrt.f32 %v2264_v2  ;;  %vm2274_vm13 = vweird.f32 %v2264_v2 }
0x12fd   :  { %v6266_v31 = vpop.eup %6265 }
0x12fe   :  { %v2269_v7 = vmul.f32 %v6266_v31, %v2264_v2  ;;  %vm2275_vm12 = vweird.f32 %v6266_v31 }
0x12ff   :  { %vm2276_vm14 = vmor %vm2274_vm13, %vm2275_vm12 }
0x1300   :  { %v2270_v38 = vmul.f32 %v6266_v31, %v2269_v7 }
0x1302   :  { %v2271_v49 = vmul.f32 0.5, %v2270_v38 }
0x1304   :  { %v2272_v44 = vsub.f32 1.5, %v2271_v49 }
0x1306   :  { %v2273_v18 = vmul.f32 %v6266_v31, %v2272_v44 }
0x1308   :  { %v2277_v42 = vsel %vm2276_vm14, %v6266_v31, %v2273_v18  ;;  %v2218_v18 = vadd.f32 %v7421_v23, %v7428_v60 }
0x1309   :  { %v2308_v37 = vmul.f32 %v2277_v42, %v2240_v46 }
0x130b   :  { %v2313_v50 = vmul.f32 %v7458_v22, %v2308_v37  ;;  %v7506_v37 = vadd.f32 %v2218_v18, %v7339_v53 }
0x130d   :  { %v2318_v27 = vadd.f32 %v7461_v4, %v2313_v50  ;;  %v2233_v50 = vsel %vm187_vm0, %v7506_v37, 0.0 }
0x130f   :  { %v2322_v9 = vsel %vm187_vm0, %v2318_v27, 0.0 }
0x1310   :  { %2323 = vadd.xlane.f32.xlu1 %v2322_v9 }
0x1319   :  { %v3003_v17 = vpop.f32.mrf.mxu1 }
0x131a   :  { %v3004_v5 = vadd.f32 %v3003_v17, %v2978_v47 }
0x131c   :  { %v3008_v0 = vrot.slane %v3004_v5, 4  ;;  %v3010_v6 = vadd.f32 %v6536_v11, %v3004_v5 }
0x131e   :  { %v3011_v39 = vadd.f32 %v6536_v11, %v3008_v0  ;;  %3014 = vst [vmem:[#allocation1] ss:$2 sm:$0xff] %v3010_v6  ;;  %v5974_v0 = vld [vmem:[%s8192_s10 + $0x8] sm:$0xff] }
0x131f   :  { %3127 = vmatpush.bf16.msrb.mxu2 %v5974_v0 }
0x1320   :  { %3016 = vst [vmem:[#allocation1 + $0x1] ss:$2 sm:$0xff] %v3011_v39 }
0x1321   :  { %v3005_v3 = vpop.f32.mrf.mxu1 }
0x1327   :  { %v3017_v29 = vld.sshfl [vmem:[#allocation1] sm:$0xff pattern:$0x75316420] }
0x1328   :  { %v3019_v32 = vsel %vm187_vm0, %v3017_v29, 0.0 }
0x1329   :  { %3020 = vadd.xlane.f32.xlu0 %v3019_v32 }
0x1336   :  { %v2253_v51 = vpop.xlane.xlu0 %2252 }
0x1337   :  { %v2261_v8 = vmul.f32 %v2253_v51, %v6787_v35 }
0x1339   :  { %v2265_v62 = vadd.f32 1e-05, %v2261_v8 }
0x133b   :  { %6267 = vrsqrt.f32 %v2265_v62  ;;  %vm2284_vm4 = vweird.f32 %v2265_v62 }
0x1341   :  { %v6268_v41 = vpop.eup %6267 }
0x1342   :  { %v2279_v34 = vmul.f32 %v6268_v41, %v2265_v62  ;;  %vm2285_vm15 = vweird.f32 %v6268_v41 }
0x1343   :  { %vm2286_vm6 = vmor %vm2284_vm4, %vm2285_vm15 }
0x1344   :  { %v2280_v15 = vmul.f32 %v6268_v41, %v2279_v34 }
0x1346   :  { %v2281_v59 = vmul.f32 0.5, %v2280_v15  ;;  %v3073_v15 = vperm.slane %v7469_v24, 7 }
0x1348   :  { %v2282_v13 = vsub.f32 1.5, %v2281_v59 }
0x134a   :  { %v2283_v1 = vmul.f32 %v6268_v41, %v2282_v13 }
0x134c   :  { %v2287_v11 = vsel %vm2286_vm6, %v6268_v41, %v2283_v1  ;;  %v7527_v41 = vld [vmem:[%s8190_s15 + $0x8] sm:$0xff] }
0x134d   :  { %v2309_v55 = vmul.f32 %v2287_v11, %v2241_v12  ;;  %v3079_v13 = vperm.slane %v7527_v41, 0  ;;  %v3075_v11 = vrot.slane %v3073_v15, 4 }
0x134f   :  { %v2314_v61 = vmul.f32 %v7458_v22, %v2309_v55 }
0x1351   :  { %v2319_v57 = vadd.f32 %v7461_v4, %v2314_v61 }
0x1353   :  { %v2325_v54 = vsel %vm187_vm0, %v2319_v57, 0.0 }
0x1354   :  { %2326 = vadd.xlane.f32.xlu2 %v2325_v54 }
0x1383   :  { %v2324_v40 = vpop.xlane.xlu1 %2323 }
0x1384   :  { %v2334_v28 = vmul.f32 %v2324_v40, %v6787_v35  ;;  %v3081_v40 = vrot.slane %v3079_v13, 4 }
0x1386   :  { %v7480_v45 = vsub.f32 %v2318_v27, %v2334_v28 }
0x1388   :  { %v2342_v46 = vmul.f32 %v7480_v45, %v7480_v45 }
0x138a   :  { %v2346_v14 = vsel %vm187_vm0, %v2342_v46, 0.0 }
0x138b   :  { %2347 = vadd.xlane.f32.xlu1 %v2346_v14 }
0x1393   :  { %2231 = vadd.xlane.f32.xlu1 %v2230_v16  ;;  %v5975_v16 = vld [vmem:[%s8193_s11] sm:$0xff] }
0x139c   :  { %v3021_v63 = vpop.xlane.xlu0 %3020 }
0x139d   :  { %v3022_v12 = vmul.f32 %v3021_v63, %v6787_v35 }
0x139f   :  { %v3027_v43 = vperm.slane %v3022_v12, %v7489_v26  ;;  %v3031_v48 = vperm.slane %v3022_v12, %v7491_v30 }
0x13a1   :  { %v3034_v33 = vsub.f32 %v3010_v6, %v3027_v43  ;;  %v3035_v52 = vsub.f32 %v3011_v39, %v3031_v48  ;;  %v5973_v39 = vld [vmem:[%s8192_s10] sm:$0xff] }
0x13a2   :  { %3128 = vmatpush.bf16.msrb.mxu2 %v5973_v39 }
0x13a3   :  { %v3036_v19 = vmul.f32 %v3034_v33, %v3034_v33  ;;  %v3037_v20 = vmul.f32 %v3035_v52, %v3035_v52 }
0x13a5   :  { %3040 = vst [vmem:[#allocation1] ss:$2 sm:$0xff] %v3036_v19 }
0x13a6   :  { %3042 = vst [vmem:[#allocation1 + $0x1] ss:$2 sm:$0xff] %v3037_v20 }
0x13ad   :  { %v3043_v2 = vld.sshfl [vmem:[#allocation1] sm:$0xff pattern:$0x75316420] }
0x13ae   :  { %v3045_v31 = vsel %vm187_vm0, %v3043_v2, 0.0 }
0x13af   :  { %3046 = vadd.xlane.f32.xlu0 %v3045_v31 }
0x13c7   :  { %v2327_v7 = vpop.xlane.xlu2 %2326 }
0x13c8   :  { %v2335_v38 = vmul.f32 %v2327_v7, %v6787_v35 }
0x13ca   :  { %v7498_v49 = vsub.f32 %v2319_v57, %v2335_v38  ;;  %v5976_v57 = vld [vmem:[%s8193_s11 + $0x8] sm:$0xff] }
0x13cb   :  { %3161 = vmatpush.bf16.msrb.mxu3 %v5976_v57 }
0x13cc   :  { %v2343_v44 = vmul.f32 %v7498_v49, %v7498_v49 }
0x13ce   :  { %v2349_v42 = vsel %vm187_vm0, %v2343_v44, 0.0 }
0x13cf   :  { %2350 = vadd.xlane.f32.xlu2 %v2349_v42  ;;  %3162 = vmatpush.bf16.msrb.mxu3 %v5975_v16 }
0x13d7   :  { %2234 = vadd.xlane.f32.xlu2 %v2233_v50 }
0x13fe   :  { %v2348_v27 = vpop.xlane.xlu1 %2347 }
0x13ff   :  { %v2358_v29 = vmul.f32 %v2348_v27, %v6787_v35 }
0x1401   :  { %v2362_v8 = vadd.f32 1e-05, %v2358_v29 }
0x1403   :  { %vm2372_vm14 = vweird.f32 %v2362_v8 }
0x1406   :  { %v2232_v9 = vpop.xlane.xlu1 %2231 }
0x1407   :  { %v2238_v47 = vmul.f32 %v2232_v9, %v6787_v35 }
0x1409   :  { %v7511_v17 = vsub.f32 %v2222_v36, %v2238_v47 }
0x140b   :  { %v2246_v5 = vmul.f32 %v7511_v17, %v7511_v17 }
0x140d   :  { %v2254_v23 = vsel %vm187_vm0, %v2246_v5, 0.0 }
0x140e   :  { %2255 = vadd.xlane.f32.xlu0 %v2254_v23 }
0x1422   :  { %v3047_v60 = vpop.xlane.xlu0 %3046 }
0x1423   :  { %v3048_v53 = vmul.f32 %v3047_v60, %v6787_v35 }
0x1425   :  { %v3049_v6 = vadd.f32 1e-05, %v3048_v53 }
0x1427   :  { %6269 = vrsqrt.f32 %v3049_v6  ;;  %vm3056_vm9 = vweird.f32 %v3049_v6 }
0x1428   :  { %6271 = vrsqrt.f32 %v2362_v8 }
0x142d   :  { %v6270_v3 = vpop.eup %6269 }
0x142e   :  { %v3051_v32 = vmul.f32 %v6270_v3, %v3049_v6  ;;  %vm3057_vm8 = vweird.f32 %v6270_v3  ;;  %v6272_v54 = vpop.eup %6271 }
0x142f   :  { %vm3058_vm12 = vmor %vm3056_vm9, %vm3057_vm8  ;;  %v2367_v36 = vmul.f32 %v6272_v54, %v2362_v8  ;;  %vm2373_vm13 = vweird.f32 %v6272_v54 }
0x1430   :  { %v3052_v51 = vmul.f32 %v6270_v3, %v3051_v32  ;;  %vm2374_vm15 = vmor %vm2372_vm14, %vm2373_vm13 }
0x1431   :  { %v2368_v58 = vmul.f32 %v6272_v54, %v2367_v36 }
0x1432   :  { %v3053_v62 = vmul.f32 0.5, %v3052_v51 }
0x1433   :  { %v2369_v43 = vmul.f32 0.5, %v2368_v58 }
0x1434   :  { %v3054_v34 = vsub.f32 1.5, %v3053_v62 }
0x1436   :  { %v3055_v59 = vmul.f32 %v6270_v3, %v3054_v34 }
0x1438   :  { %v3059_v1 = vsel %vm3058_vm12, %v6270_v3, %v3055_v59 }
0x1439   :  { %v3064_v55 = vperm.slane %v3059_v1, %v7489_v26  ;;  %v3068_v61 = vperm.slane %v3059_v1, %v7491_v30 }
0x143b   :  { %v3071_v28 = vmul.f32 %v3064_v55, %v3034_v33  ;;  %v3072_v46 = vmul.f32 %v3068_v61, %v3035_v52  ;;  %v2370_v33 = vsub.f32 1.5, %v2369_v43 }
0x143d   :  { %v3077_v25 = vmul.f32 %v3073_v15, %v3071_v28  ;;  %v3078_v14 = vmul.f32 %v3075_v11, %v3072_v46  ;;  %v2371_v7 = vmul.f32 %v6272_v54, %v2370_v33 }
0x143f   :  { %v7539_v10 = vadd.f32 %v3079_v13, %v3077_v25  ;;  %v7541_v21 = vadd.f32 %v3081_v40, %v3078_v14  ;;  %v2375_v50 = vsel %vm2374_vm15, %v6272_v54, %v2371_v7 }
0x1440   :  { %v2406_v5 = vmul.f32 %v2375_v50, %v7480_v45 }
0x1441   :  { %3099 = vst [vmem:[#allocation1] ss:$2 sm:$0xff] %v7539_v10 }
0x1442   :  { %3101 = vst [vmem:[#allocation1 + $0x1] ss:$2 sm:$0xff] %v7541_v21  ;;  %v2351_v56 = vpop.xlane.xlu2 %2350 }
0x1443   :  { %v2359_v63 = vmul.f32 %v2351_v56, %v6787_v35 }
0x1445   :  { %v2363_v12 = vadd.f32 1e-05, %v2359_v63 }
0x1447   :  { %6273 = vrsqrt.f32 %v2363_v12  ;;  %vm2382_vm6 = vweird.f32 %v2363_v12 }
0x1449   :  { %v3102_v48 = vld.sshfl [vmem:[#allocation1] sm:$0xff pattern:$0x75316420] }
0x144a   :  { %v2235_v52 = vpop.xlane.xlu2 %2234  ;;  %v3104_v19 = vpack.c.bf16 %v3102_v48, %v3102_v48 }
0x144b   :  { %v2239_v20 = vmul.f32 %v2235_v52, %v6787_v35 }
0x144c   :  { %5737 = vmatmul.msk.bf16.vlgmr.msrb.gmra.mxu2 %vm187_vm0, %v3104_v19  ;;  %v7582_v19 = vperm.slane %v7469_v24, 3 }
0x144d   :  { %v6274_v2 = vpop.eup %6273  ;;  %v7549_v31 = vsub.f32 %v7506_v37, %v2239_v20  ;;  %v6392_v37 = vld [vmem:[%s8183_s2 + $0x10] sm:$0x3f]  ;;  %s8245_s2 = smov 96  }
0x144e   :  { %v2377_v38 = vmul.f32 %v6274_v2, %v2363_v12  ;;  %vm2383_vm4 = vweird.f32 %v6274_v2  ;;  %v7557_v47 = vperm.slane %v6392_v37, 0  ;;  %v7560_v53 = vperm.slane %v6392_v37, 1 }
0x144f   :  { %v2247_v44 = vmul.f32 %v7549_v31, %v7549_v31  ;;  %vm2384_vm8 = vmor %vm2382_vm6, %vm2383_vm4  ;;  %vm3233_vm6 = vcmask 125952  }
0x1450   :  { %v2378_v18 = vmul.f32 %v6274_v2, %v2377_v38  ;;  %v2411_v0 = vmul.f32 %v7557_v47, %v2406_v5 }
0x1451   :  { %v2257_v42 = vsel %vm187_vm0, %v2247_v44, 0.0 }
0x1452   :  { %v2379_v27 = vmul.f32 0.5, %v2378_v18  ;;  %2258 = vadd.xlane.f32.xlu1 %v2257_v42  ;;  %v2416_v3 = vadd.f32 %v7560_v53, %v2411_v0 }
0x1454   :  { %v2380_v9 = vsub.f32 1.5, %v2379_v27 }
0x1456   :  { %v2381_v23 = vmul.f32 %v6274_v2, %v2380_v9 }
0x1458   :  { %v2385_v60 = vsel %vm2384_vm8, %v6274_v2, %v2381_v23 }
0x1459   :  { %v2407_v6 = vmul.f32 %v2385_v60, %v7498_v49 }
0x145b   :  { %v2412_v39 = vmul.f32 %v7557_v47, %v2407_v6 }
0x145d   :  { %v2417_v29 = vadd.f32 %v7560_v53, %v2412_v39 }
0x145f   :  { %v7567_v32 = vpack.c.bf16 %v2417_v29, %v2416_v3 }
0x1461   :  { %5746 = vmatmul.msk.bf16.vlgmr.msrb.gmra.mxu3 %vm187_vm0, %v7567_v32 }
0x1481   :  { %v2256_v45 = vpop.xlane.xlu0 %2255 }
0x1482   :  { %v2262_v51 = vmul.f32 %v2256_v45, %v6787_v35 }
0x1484   :  { %v2266_v8 = vadd.f32 1e-05, %v2262_v51 }
0x1486   :  { %6275 = vrsqrt.f32 %v2266_v8  ;;  %vm2294_vm12 = vweird.f32 %v2266_v8 }
0x148c   :  { %v6276_v62 = vpop.eup %6275 }
0x148d   :  { %v2289_v34 = vmul.f32 %v6276_v62, %v2266_v8  ;;  %vm2295_vm9 = vweird.f32 %v6276_v62 }
0x148e   :  { %vm2296_vm13 = vmor %vm2294_vm12, %vm2295_vm9 }
0x148f   :  { %v2290_v15 = vmul.f32 %v6276_v62, %v2289_v34 }
0x1491   :  { %v2291_v49 = vmul.f32 0.5, %v2290_v15 }
0x1493   :  { %v2292_v59 = vsub.f32 1.5, %v2291_v49 }
0x1495   :  { %v2293_v13 = vmul.f32 %v6276_v62, %v2292_v59 }
0x1497   :  { %v2297_v1 = vsel %vm2296_vm13, %v6276_v62, %v2293_v13 }
0x1498   :  { %v2310_v11 = vmul.f32 %v2297_v1, %v7511_v17 }
0x149a   :  { %v2315_v55 = vmul.f32 %v7458_v22, %v2310_v11 }
0x149c   :  { %v2320_v61 = vadd.f32 %v7461_v4, %v2315_v55 }
0x149e   :  { %v2328_v57 = vsel %vm187_vm0, %v2320_v61, 0.0 }
0x149f   :  { %2329 = vadd.xlane.f32.xlu2 %v2328_v57 }
0x14c5   :  { %v2259_v54 = vpop.xlane.xlu1 %2258 }
0x14c6   :  { %v2263_v40 = vmul.f32 %v2259_v54, %v6787_v35 }
0x14c8   :  { %v2267_v28 = vadd.f32 1e-05, %v2263_v40 }
0x14ca   :  { %6277 = vrsqrt.f32 %v2267_v28  ;;  %vm2304_vm15 = vweird.f32 %v2267_v28 }
0x14cf   :  { %v3130_v46 = vpop.f32.mrf.mxu2 }
0x14d0   :  { %v6278_v25 = vpop.eup %6277 }
0x14d1   :  { %v2299_v14 = vmul.f32 %v6278_v25, %v2267_v28  ;;  %vm2305_vm14 = vweird.f32 %v6278_v25 }
0x14d2   :  { %vm2306_vm4 = vmor %vm2304_vm15, %vm2305_vm14 }
0x14d3   :  { %v2300_v36 = vmul.f32 %v6278_v25, %v2299_v14 }
0x14d5   :  { %v2301_v16 = vmul.f32 0.5, %v2300_v36 }
0x14d7   :  { %v2302_v58 = vsub.f32 1.5, %v2301_v16  ;;  %v3132_v17 = vpop.f32.mrf.mxu2 }
0x14d9   :  { %v2303_v56 = vmul.f32 %v6278_v25, %v2302_v58 }
0x14db   :  { %v2307_v63 = vsel %vm2306_vm4, %v6278_v25, %v2303_v56 }
0x14dc   :  { %v2311_v12 = vmul.f32 %v2307_v63, %v7549_v31 }
0x14de   :  { %v2316_v43 = vmul.f32 %v7458_v22, %v2311_v12  ;;  %v3105_v22 = vperm.slane %v7469_v24, 2 }
0x14e0   :  { %v2321_v48 = vadd.f32 %v7461_v4, %v2316_v43  ;;  %v3131_v50 = vadd.f32 %v3130_v46, %v3105_v22 }
0x14e2   :  { %v2331_v33 = vsel %vm187_vm0, %v2321_v48, 0.0  ;;  %v3177_v27 = vpack.c.bf16 %v3131_v50, %v3131_v50  ;;  %v3175_v34 = vrot.slane %v3131_v50, 4 }
0x14e3   :  { %2332 = vadd.xlane.f32.xlu0 %v2331_v33 }
0x14e4   :  { %v3164_v52 = vpop.f32.mrf.mxu3  ;;  %v3297_v29 = vunpack.c.l.b16 %v3177_v27  ;;  %v7603_v49 = vpack.c.bf16 %v3175_v34, %v3175_v34 }
0x14e5   :  { %v3165_v20 = vadd.f32 %v3164_v52, %v7582_v19 }
0x14e6   :  { %v3298_v8 = vpack.c.b16 %v3297_v29, %v3297_v29  ;;  %v3323_v59 = vunpack.c.l.b16 %v7603_v49 }
0x14e7   :  { %v3179_v7 = vpack.c.bf16 %v3165_v20, %v3165_v20 }
0x14e8   :  { %v7608_v13 = vpack.c.b16 %v3323_v59, %v3323_v59 }
0x14e9   :  { %v3185_v18 = vunpack.c.l.b16 %v3179_v7 }
0x14ec   :  { %v3166_v2 = vpop.f32.mrf.mxu3 }
0x14ed   :  { %v3167_v38 = vadd.f32 %v3166_v2, %v7582_v19 }
0x14ef   :  { %v3180_v44 = vpack.c.bf16 %v3167_v38, %v3167_v38 }
0x14f1   :  { %v3186_v31 = vunpack.c.l.b16 %v3180_v44 }
0x14f3   :  { %v7587_v42 = vpack.c.b16 %v3186_v31, %v3185_v18 }
0x14f5   :  { %v3192_v4 = vsel %vm224_vm1, %v7587_v42, 0 }
0x14f6   :  { %3201 = vmatpush.bf16.xpose.msrb.mxu0 %v3192_v4 }
0x14fd   :  { %5748 = vmatmul.msk.bf16.vlgmr.msrb.gmra.mxu0 %vm224_vm1, %v3177_v27 }
0x1512   :  { %v2330_v9 = vpop.xlane.xlu2 %2329 }
0x1513   :  { %v2336_v37 = vmul.f32 %v2330_v9, %v6787_v35 }
0x1515   :  { %v2340_v5 = vsub.f32 %v2320_v61, %v2336_v37 }
0x1517   :  { %v2344_v23 = vmul.f32 %v2340_v5, %v2340_v5 }
0x1519   :  { %v2352_v60 = vsel %vm187_vm0, %v2344_v23, 0.0 }
0x151a   :  { %2353 = vadd.xlane.f32.xlu1 %v2352_v60 }
0x1556   :  { %v2333_v0 = vpop.xlane.xlu0 %2332 }
0x1557   :  { %v2337_v24 = vmul.f32 %v2333_v0, %v6787_v35 }
0x1559   :  { %v2341_v6 = vsub.f32 %v2321_v48, %v2337_v24 }
0x155b   :  { %v2345_v39 = vmul.f32 %v2341_v6, %v2341_v6 }
0x155d   :  { %v2355_v3 = vsel %vm187_vm0, %v2345_v39, 0.0 }
0x155e   :  { %2356 = vadd.xlane.f32.xlu2 %v2355_v3 }
0x1576   :  { %3258 = vrot.lane.b32.xlu2 %v7587_v42, %s8245_s2 }
0x157a   :  { %v3203_v45 = vpop.f32.mrf.mxu0 }
0x157b   :  { %v7598_v51 = vmul.f32 0.35355338, %v3203_v45 }
0x157d   :  { %v3234_v62 = vsel %vm3233_vm6, %v7598_v51, -inf }
0x157e   :  { %3235 = vmax.xlane.f32.xlu0 %v3234_v62  ;;  %3299 = vrot.lane.b32.xlu2 %v3298_v8, %s8241_s4 }
0x1582   :  { %v3205_v15 = vpop.f32.mrf.mxu0 }
0x1586   :  { %3414 = vrot.lane.b32.xlu2 %v7587_v42, %s8234_s28 }
0x158d   :  { %v2354_v1 = vpop.xlane.xlu1 %2353 }
0x158e   :  { %3435 = vrot.lane.b32.xlu2 %v7608_v13, %s8234_s28  ;;  %v2360_v11 = vmul.f32 %v2354_v1, %v6787_v35 }
0x1590   :  { %v2364_v55 = vadd.f32 1e-05, %v2360_v11 }
0x1592   :  { %3301 = vrot.lane.b32.xlu0 %v7587_v42, %s8241_s4  ;;  %6279 = vrsqrt.f32 %v2364_v55  ;;  %vm2392_vm9 = vweird.f32 %v2364_v55 }
0x1596   :  { %3522 = vrot.lane.b32.xlu2 %v3298_v8, %s8243_s21 }
0x1598   :  { %v6280_v61 = vpop.eup %6279 }
0x1599   :  { %v2387_v57 = vmul.f32 %v6280_v61, %v2364_v55  ;;  %vm2393_vm8 = vweird.f32 %v6280_v61 }
0x159a   :  { %3325 = vrot.lane.b32.xlu0 %v7608_v13, %s8241_s4  ;;  %vm2394_vm12 = vmor %vm2392_vm9, %vm2393_vm8 }
0x159b   :  { %v2388_v54 = vmul.f32 %v6280_v61, %v2387_v57 }
0x159d   :  { %v2389_v25 = vmul.f32 0.5, %v2388_v54 }
0x159f   :  { %v2390_v14 = vsub.f32 1.5, %v2389_v25 }
0x15a1   :  { %v2391_v58 = vmul.f32 %v6280_v61, %v2390_v14 }
0x15a2   :  { %3412 = vrot.lane.b32.xlu0 %v3298_v8, %s8234_s28 }
0x15a3   :  { %v2395_v63 = vsel %vm2394_vm12, %v6280_v61, %v2391_v58 }
0x15a4   :  { %v2408_v48 = vmul.f32 %v2395_v63, %v2340_v5 }
0x15a6   :  { %v2413_v2 = vmul.f32 %v7557_v47, %v2408_v48 }
0x15a8   :  { %v2418_v38 = vadd.f32 %v7560_v53, %v2413_v2 }
0x15d1   :  { %v2357_v40 = vpop.xlane.xlu2 %2356 }
0x15d2   :  { %v2361_v28 = vmul.f32 %v2357_v40, %v6787_v35 }
0x15d4   :  { %v2365_v46 = vadd.f32 1e-05, %v2361_v28 }
0x15d6   :  { %6281 = vrsqrt.f32 %v2365_v46  ;;  %vm2402_vm14 = vweird.f32 %v2365_v46 }
0x15d9   :  { %v3259_v36 = vpop.permute.xlu2 %3258 }
0x15da   :  { %3271 = vmatpush.bf16.msra.mxu2 %v3259_v36 }
0x15dc   :  { %v6282_v16 = vpop.eup %6281 }
0x15dd   :  { %v2397_v17 = vmul.f32 %v6282_v16, %v2365_v46  ;;  %vm2403_vm13 = vweird.f32 %v6282_v16 }
0x15de   :  { %vm2404_vm15 = vmor %vm2402_vm14, %vm2403_vm13 }
0x15df   :  { %v2398_v56 = vmul.f32 %v6282_v16, %v2397_v17 }
0x15e1   :  { %v2399_v12 = vmul.f32 0.5, %v2398_v56  ;;  %v3300_v5 = vpop.permute.xlu2 %3299 }
0x15e3   :  { %v2400_v43 = vsub.f32 1.5, %v2399_v12 }
0x15e5   :  { %v2401_v33 = vmul.f32 %v6282_v16, %v2400_v43 }
0x15e7   :  { %v2405_v52 = vsel %vm2404_vm15, %v6282_v16, %v2401_v33 }
0x15e8   :  { %v2409_v20 = vmul.f32 %v2405_v52, %v2341_v6 }
0x15ea   :  { %v2414_v7 = vmul.f32 %v7557_v47, %v2409_v20 }
0x15ec   :  { %v2419_v44 = vadd.f32 %v7560_v53, %v2414_v7 }
0x15ee   :  { %v7624_v18 = vpack.c.bf16 %v2419_v44, %v2418_v38 }
0x15f0   :  { %5747 = vmatmul.msk.bf16.gmra.mxu3 %vm187_vm0, %v7624_v18 }
0x15f1   :  { %v3236_v4 = vpop.xlane.xlu0 %3235 }
0x15f2   :  { %v3240_v39 = vsub.f32 %v7598_v51, %v3236_v4 }
0x15f4   :  { %v3242_v3 = vmul.f32 1.442695, %v3240_v39 }
0x15f6   :  { %6283 = vpow2.f32 %v3242_v3 }
0x15fc   :  { %v6284_v45 = vpop.eup %6283 }
0x15fd   :  { %v3246_v62 = vsel %vm3233_vm6, %v6284_v45, 0.0 }
0x1604   :  { %v3302_v60 = vpop.permute.xlu0 %3301 }
0x1605   :  { %v3307_v24 = vsel %vm224_vm1, %v3302_v60, 0 }
0x160c   :  { %v3326_v29 = vpop.permute.xlu0 %3325 }
0x1614   :  { %v3413_v8 = vpop.permute.xlu0 %3412 }
0x1673   :  { %v3169_v31 = vpop.f32.mrf.mxu3 }
0x1674   :  { %v3170_v22 = vadd.f32 %v3169_v31, %v7582_v19 }
0x1676   :  { %v3181_v27 = vpack.c.bf16 %v3170_v22, %v3170_v22 }
0x1678   :  { %v3209_v47 = vunpack.c.l.b16 %v3181_v27 }
0x167b   :  { %v3171_v50 = vpop.f32.mrf.mxu3 }
0x167c   :  { %v3172_v9 = vadd.f32 %v3171_v50, %v7582_v19  ;;  %v3415_v19 = vpop.permute.xlu2 %3414 }
0x167d   :  { %v3420_v6 = vsel %vm224_vm1, %v3415_v19, 0 }
0x167e   :  { %v3182_v37 = vpack.c.bf16 %v3172_v9, %v3172_v9 }
0x1680   :  { %v3210_v23 = vunpack.c.l.b16 %v3182_v37 }
0x1682   :  { %v7630_v0 = vpack.c.b16 %v3210_v23, %v3209_v47 }
0x1684   :  { %3547 = vrot.lane.b32.xlu0 %v7630_v0, %s8243_s21  ;;  %3327 = vrot.lane.b32.xlu1 %v7630_v0, %s8241_s4  ;;  %v3216_v53 = vsel %vm224_vm1, %v7630_v0, 0  ;;  %v3436_v63 = vpop.permute.xlu2 %3435 }
0x1685   :  { %3225 = vmatpush.bf16.xpose.msra.mxu1 %v3216_v53 }
0x168c   :  { %5749 = vmatmul.msk.bf16.vlgmr.msra.gmra.mxu1 %vm224_vm1, %v7603_v49  ;;  %v3523_v48 = vpop.permute.xlu2 %3522 }
0x168d   :  { %3316 = vmatpush.bf16.xpose.msrb.mxu1 %v3307_v24 }
0x1695   :  { %3429 = vmatpush.bf16.xpose.msra.mxu1 %v3420_v6 }
0x169c   :  { %5752 = vmatmul.msk.bf16.vlgmr.msrb.gmra.mxu1 %vm224_vm1, %v3300_v5 }
0x16ac   :  { %5756 = vmatmul.msk.bf16.vlgmr.msra.gmra.mxu1 %vm224_vm1, %v3413_v8 }
0x16ae   :  { %3247 = vadd.xlane.f32.xlu1 %v3246_v62 }
0x16c7   :  { %3437 = vrot.lane.b32.xlu1 %v7630_v0, %s8234_s28 }
0x16cf   :  { %3524 = vrot.lane.b32.xlu1 %v7587_v42, %s8243_s21 }
0x16d7   :  { %3545 = vrot.lane.b32.xlu1 %v7608_v13, %s8243_s21 }
0x16f6   :  { %v3328_v51 = vpop.permute.xlu1 %3327  ;;  %v3548_v58 = vpop.permute.xlu0 %3547 }
0x16f7   :  { %v3333_v34 = vsel %vm224_vm1, %v3328_v51, 0  ;;  %v3553_v56 = vsel %vm224_vm1, %v3548_v58, 0 }
0x16f8   :  { %3342 = vmatpush.bf16.xpose.msrb.mxu2 %v3333_v34 }
0x1709   :  { %v3227_v15 = vpop.f32.mrf.mxu1 }
0x170a   :  { %v3232_v49 = vmul.f32 0.35355338, %v3227_v15 }
0x170c   :  { %v3237_v59 = vsel %vm3233_vm6, %v3232_v49, -inf }
0x170d   :  { %3238 = vmax.xlane.f32.xlu0 %v3237_v59 }
0x1711   :  { %v3229_v1 = vpop.f32.mrf.mxu1 }
0x1719   :  { %v3318_v11 = vpop.f32.mrf.mxu1 }
0x171a   :  { %v3348_v55 = vmul.f32 0.35355338, %v3318_v11 }
0x171c   :  { %v3350_v61 = vsel %vm3233_vm6, %v3348_v55, -inf }
0x171d   :  { %3351 = vmax.xlane.f32.xlu2 %v3350_v61 }
0x1721   :  { %v3248_v57 = vpop.xlane.xlu1 %3247  ;;  %v3320_v54 = vpop.f32.mrf.mxu1 }
0x1722   :  { %6285 = vrcp.f32 %v3248_v57 }
0x1728   :  { %v6286_v40 = vpop.eup %6285 }
0x1729   :  { %v3254_v13 = vmul.f32 %v6286_v40, %v6284_v45  ;;  %v3431_v28 = vpop.f32.mrf.mxu1 }
0x172a   :  { %v7655_v46 = vmul.f32 0.35355338, %v3431_v28 }
0x172b   :  { %v3256_v25 = vpack.c.bf16 %v3254_v13, %v3254_v13 }
0x172c   :  { %v3460_v14 = vsel %vm3233_vm6, %v7655_v46, -inf }
0x172d   :  { %5750 = vmatmul.msk.bf16.vlgmr.msra.gmra.mxu2 %vm276_vm2, %v3256_v25  ;;  %3461 = vmax.xlane.f32.xlu0 %v3460_v14 }
0x1731   :  { %v3433_v36 = vpop.f32.mrf.mxu1 }
0x1739   :  { %v3438_v16 = vpop.permute.xlu1 %3437 }
0x173a   :  { %v3443_v17 = vsel %vm224_vm1, %v3438_v16, 0 }
0x173b   :  { %3452 = vmatpush.bf16.xpose.msra.mxu2 %v3443_v17 }
0x173d   :  { %5753 = vmatmul.msk.bf16.vlgmr.msrb.gmra.mxu2 %vm224_vm1, %v3326_v29 }
0x1741   :  { %v3525_v12 = vpop.permute.xlu1 %3524 }
0x1742   :  { %v3530_v43 = vsel %vm224_vm1, %v3525_v12, 0 }
0x1743   :  { %3562 = vmatpush.bf16.xpose.msrb.mxu2 %v3553_v56  ;;  %3539 = vmatpush.bf16.xpose.msrb.mxu1 %v3530_v43 }
0x1749   :  { %v3546_v33 = vpop.permute.xlu1 %3545 }
0x174a   :  { %5760 = vmatmul.msk.bf16.vlgmr.msrb.gmra.mxu1 %vm224_vm1, %v3523_v48 }
0x174d   :  { %5757 = vmatmul.msk.bf16.vlgmr.msra.gmra.mxu2 %vm224_vm1, %v3436_v63 }
0x175d   :  { %5761 = vmatmul.msk.bf16.vlgmr.msrb.gmra.mxu2 %vm224_vm1, %v3546_v33 }
0x1780   :  { %v3239_v52 = vpop.xlane.xlu0 %3238 }
0x1781   :  { %v3241_v20 = vsub.f32 %v3232_v49, %v3239_v52 }
0x1783   :  { %v3244_v2 = vmul.f32 1.442695, %v3241_v20 }
0x1785   :  { %6287 = vpow2.f32 %v3244_v2 }
0x178b   :  { %v7667_v7 = vpop.eup %6287 }
0x178c   :  { %v3249_v38 = vsel %vm3233_vm6, %v7667_v7, 0.0 }
0x178d   :  { %3250 = vadd.xlane.f32.xlu2 %v3249_v38 }
0x1790   :  { %v3352_v44 = vpop.xlane.xlu2 %3351 }
0x1791   :  { %v3356_v31 = vsub.f32 %v3348_v55, %v3352_v44 }
0x1793   :  { %v3358_v22 = vmul.f32 1.442695, %v3356_v31 }
0x1795   :  { %6289 = vpow2.f32 %v3358_v22 }
0x179b   :  { %v7671_v4 = vpop.eup %6289 }
0x179c   :  { %v3362_v50 = vsel %vm3233_vm6, %v7671_v4, 0.0 }
0x179d   :  { %3363 = vadd.xlane.f32.xlu0 %v3362_v50 }
0x17a0   :  { %v3462_v34 = vpop.xlane.xlu0 %3461 }
0x17a1   :  { %v3466_v15 = vsub.f32 %v7655_v46, %v3462_v34 }
0x17a3   :  { %v3468_v49 = vmul.f32 1.442695, %v3466_v15 }
0x17a5   :  { %6291 = vpow2.f32 %v3468_v49 }
0x17ab   :  { %v6292_v59 = vpop.eup %6291 }
0x17ac   :  { %v3472_v1 = vsel %vm3233_vm6, %v6292_v59, 0.0 }
0x17b0   :  { %v7675_v27 = vpop.f32.mrf.mxu2 }
0x17b8   :  { %v3275_v9 = vpop.f32.mrf.mxu2 }
0x17c0   :  { %v3344_v37 = vpop.f32.mrf.mxu2 }
0x17c1   :  { %v3349_v53 = vmul.f32 0.35355338, %v3344_v37 }
0x17c3   :  { %v3353_v39 = vsel %vm3233_vm6, %v3349_v53, -inf }
0x17c7   :  { %v3541_v5 = vpop.f32.mrf.mxu1 }
0x17c8   :  { %v7677_v47 = vmul.f32 0.35355338, %v3541_v5  ;;  %v3346_v23 = vpop.f32.mrf.mxu2 }
0x17ca   :  { %v3570_v60 = vsel %vm3233_vm6, %v7677_v47, -inf }
0x17cb   :  { %3571 = vmax.xlane.f32.xlu1 %v3570_v60 }
0x17cf   :  { %v3543_v24 = vpop.f32.mrf.mxu1 }
0x17d0   :  { %v3454_v19 = vpop.f32.mrf.mxu2 }
0x17d1   :  { %v3459_v6 = vmul.f32 0.35355338, %v3454_v19 }
0x17d3   :  { %3354 = vmax.xlane.f32.xlu1 %v3353_v39  ;;  %v3463_v3 = vsel %vm3233_vm6, %v3459_v6, -inf }
0x17d4   :  { %3464 = vmax.xlane.f32.xlu2 %v3463_v3 }
0x17d8   :  { %v3456_v29 = vpop.f32.mrf.mxu2 }
0x17e0   :  { %v3564_v45 = vpop.f32.mrf.mxu2 }
0x17e1   :  { %v3569_v8 = vmul.f32 0.35355338, %v3564_v45 }
0x17e3   :  { %v3573_v62 = vsel %vm3233_vm6, %v3569_v8, -inf }
0x17e4   :  { %3574 = vmax.xlane.f32.xlu0 %v3573_v62 }
0x17e8   :  { %v3566_v51 = vpop.f32.mrf.mxu2 }
0x17ec   :  { %3393 = vrot.lane.b32.xlu2 %v7630_v0, %s8246_s6  ;;  %3277 = vrot.lane.b32.xlu1 %v7630_v0, %s8245_s2 }
0x17f4   :  { %3484 = vrot.lane.b32.xlu2 %v7587_v42, %s8247_s1 }
0x17f8   :  { %3374 = vrot.lane.b32.xlu0 %v7587_v42, %s8246_s6 }
0x1800   :  { %v3251_v55 = vpop.xlane.xlu2 %3250 }
0x1810   :  { %v3364_v25 = vpop.xlane.xlu0 %3363 }
0x1816   :  { %3473 = vadd.xlane.f32.xlu1 %v3472_v1 }
0x183e   :  { %v3572_v11 = vpop.xlane.xlu1 %3571 }
0x183f   :  { %v3576_v22 = vsub.f32 %v7677_v47, %v3572_v11 }
0x1841   :  { %v3578_v50 = vmul.f32 1.442695, %v3576_v22 }
0x1846   :  { %v3355_v61 = vpop.xlane.xlu1 %3354 }
0x1847   :  { %v3357_v57 = vsub.f32 %v3349_v53, %v3355_v61  ;;  %v3465_v54 = vpop.xlane.xlu2 %3464 }
0x1848   :  { %v3467_v40 = vsub.f32 %v3459_v6, %v3465_v54 }
0x1849   :  { %v3360_v13 = vmul.f32 1.442695, %v3357_v57 }
0x184a   :  { %v3470_v28 = vmul.f32 1.442695, %v3467_v40 }
0x184b   :  { %6293 = vpow2.f32 %v3360_v13 }
0x184c   :  { %6295 = vpow2.f32 %v3470_v28 }
0x184d   :  { %6297 = vrcp.f32 %v3251_v55 }
0x184f   :  { %v3394_v48 = vpop.permute.xlu2 %3393 }
0x1851   :  { %v6294_v14 = vpop.eup %6293 }
0x1852   :  { %v6296_v36 = vpop.eup %6295  ;;  %v3365_v46 = vsel %vm3233_vm6, %v6294_v14, 0.0 }
0x1853   :  { %3366 = vadd.xlane.f32.xlu2 %v3365_v46  ;;  %v3475_v16 = vsel %vm3233_vm6, %v6296_v36, 0.0  ;;  %v6298_v56 = vpop.eup %6297 }
0x1854   :  { %3476 = vadd.xlane.f32.xlu0 %v3475_v16  ;;  %v3255_v12 = vmul.f32 %v6298_v56, %v7667_v7 }
0x1856   :  { %v3257_v33 = vpack.c.bf16 %v3255_v12, %v3255_v12 }
0x1857   :  { %v3575_v58 = vpop.xlane.xlu0 %3574  ;;  %v3485_v44 = vpop.permute.xlu2 %3484 }
0x1858   :  { %v3577_v17 = vsub.f32 %v3569_v8, %v3575_v58 }
0x185a   :  { %v3580_v63 = vmul.f32 1.442695, %v3577_v17 }
0x185c   :  { %6299 = vpow2.f32 %v3580_v63 }
0x185d   :  { %6301 = vrcp.f32 %v3364_v25 }
0x185e   :  { %v3278_v43 = vpop.permute.xlu1 %3277  ;;  %6303 = vpow2.f32 %v3578_v50 }
0x185f   :  { %3290 = vmatpush.bf16.msra.mxu0 %v3278_v43 }
0x1862   :  { %v6300_v52 = vpop.eup %6299  ;;  %5751 = vmatmul.msk.bf16.vlgmr.msra.gmra.mxu0 %vm276_vm2, %v3257_v33  ;;  %v5978_v33 = vld [vmem:[%s8194_s12 + $0x8] sm:$0xff] }
0x1863   :  { %3406 = vmatpush.bf16.msrb.mxu0 %v3394_v48  ;;  %v3585_v20 = vsel %vm3233_vm6, %v6300_v52, 0.0  ;;  %v6302_v2 = vpop.eup %6301  ;;  %3692 = vmatpush.bf16.msra.mxu1 %v5978_v33  ;;  %v5981_v33 = vld [vmem:[%s8196_s14] sm:$0xff] }
0x1864   :  { %3586 = vadd.xlane.f32.xlu1 %v3585_v20  ;;  %v3370_v38 = vmul.f32 %v6302_v2, %v7671_v4 }
0x1866   :  { %v3372_v31 = vpack.c.bf16 %v3370_v38, %v3370_v38 }
0x1868   :  { %3594 = vrot.lane.b32.xlu0 %v7587_v42, %s8242_s18  ;;  %v6304_v42 = vpop.eup %6303 }
0x1869   :  { %v3582_v23 = vsel %vm3233_vm6, %v6304_v42, 0.0 }
0x186a   :  { %v3375_v7 = vpop.permute.xlu0 %3374 }
0x186b   :  { %3387 = vmatpush.bf16.msra.mxu3 %v3375_v7  ;;  %3503 = vrot.lane.b32.xlu2 %v7630_v0, %s8247_s1 }
0x186e   :  { %5754 = vmatmul.msk.bf16.vlgmr.msra.gmra.mxu3 %vm276_vm2, %v3372_v31 }
0x186f   :  { %3497 = vmatpush.bf16.msrb.mxu3 %v3485_v44 }
0x187d   :  { %3613 = vrot.lane.b32.xlu1 %v7630_v0, %s8242_s18 }
0x1889   :  { %v3474_v4 = vpop.xlane.xlu1 %3473 }
0x188a   :  { %6305 = vrcp.f32 %v3474_v4  ;;  %v7737_v4 = vld [vmem:[%s8190_s15] sm:$0xff] }
0x1890   :  { %v6306_v9 = vpop.eup %6305 }
0x1891   :  { %v3480_v37 = vmul.f32 %v6306_v9, %v6292_v59 }
0x1893   :  { %v3482_v5 = vpack.c.bf16 %v3480_v37, %v3480_v37 }
0x1894   :  { %3583 = vadd.xlane.f32.xlu2 %v3582_v23 }
0x1895   :  { %5758 = vmatmul.msk.bf16.vlgmr.msrb.gmra.mxu3 %vm276_vm2, %v3482_v5 }
0x18c6   :  { %v3367_v60 = vpop.xlane.xlu2 %3366 }
0x18c7   :  { %6307 = vrcp.f32 %v3367_v60  ;;  %v3477_v19 = vpop.xlane.xlu0 %3476 }
0x18c8   :  { %6309 = vrcp.f32 %v3477_v19 }
0x18cd   :  { %v6308_v53 = vpop.eup %6307 }
0x18ce   :  { %v3371_v24 = vmul.f32 %v6308_v53, %v6294_v14  ;;  %v3504_v0 = vpop.permute.xlu2 %3503  ;;  %v6310_v6 = vpop.eup %6309 }
0x18cf   :  { %3516 = vmatpush.bf16.msra.mxu0 %v3504_v0  ;;  %v3481_v3 = vmul.f32 %v6310_v6, %v6296_v36 }
0x18d0   :  { %v3373_v47 = vpack.c.bf16 %v3371_v24, %v3371_v24 }
0x18d1   :  { %v3483_v45 = vpack.c.bf16 %v3481_v3, %v3481_v3 }
0x18d2   :  { %5755 = vmatmul.msk.bf16.vlgmr.msrb.gmra.mxu0 %vm276_vm2, %v3373_v47 }
0x18d7   :  { %v3587_v8 = vpop.xlane.xlu1 %3586 }
0x18d8   :  { %6311 = vrcp.f32 %v3587_v8 }
0x18da   :  { %v3595_v39 = vpop.permute.xlu0 %3594 }
0x18db   :  { %3607 = vmatpush.bf16.msra.mxu3 %v3595_v39 }
0x18de   :  { %v6312_v51 = vpop.eup %6311 }
0x18df   :  { %v3292_v29 = vpop.f32.mrf.mxu0  ;;  %v3591_v34 = vmul.f32 %v6312_v51, %v6300_v52  ;;  %v5977_v52 = vld [vmem:[%s8194_s12] sm:$0xff]  ;;  %v5980_v51 = vld [vmem:[%s8195_s13 + $0x8] sm:$0xff] }
0x18e0   :  { %3693 = vmatpush.bf16.msra.mxu1 %v5977_v52  ;;  %3819 = vmatpush.bf16.msra.mxu2 %v5980_v51  ;;  %v3797_v52 = vperm.slane %v7737_v4, 5 }
0x18e1   :  { %v3593_v49 = vpack.c.bf16 %v3591_v34, %v3591_v34 }
0x18e2   :  { %5759 = vmatmul.msk.bf16.vlgmr.msra.gmra.mxu0 %vm276_vm2, %v3483_v45 }
0x18e7   :  { %v3294_v62 = vpop.f32.mrf.mxu0 }
0x18ef   :  { %v3614_v15 = vpop.permute.xlu1 %3613 }
0x18f0   :  { %3626 = vmatpush.bf16.msrb.mxu0 %v3614_v15  ;;  %v5979_v15 = vld [vmem:[%s8195_s13] sm:$0xff] }
0x18f1   :  { %v3389_v59 = vpop.f32.mrf.mxu3  ;;  %3820 = vmatpush.bf16.msra.mxu2 %v5979_v15 }
0x18f2   :  { %3634 = vrot.lane.b32.xlu0 %v3389_v59, %s8238_s20 }
0x18f3   :  { %5763 = vmatmul.msk.bf16.vlgmr.msrb.gmra.mxu0 %vm276_vm2, %v3593_v49  ;;  %v5984_v49 = vld [vmem:[%s8196_s14 + $0x18] sm:$0xff] }
0x18f4   :  { %3860 = vmatpush.bf16.msrb.mxu3 %v5984_v49 }
0x18f9   :  { %v3391_v1 = vpop.f32.mrf.mxu3 }
0x1907   :  { %v3584_v11 = vpop.xlane.xlu2 %3583 }
0x1908   :  { %6313 = vrcp.f32 %v3584_v11  ;;  %v5983_v11 = vld [vmem:[%s8196_s14 + $0x10] sm:$0xff] }
0x1909   :  { %3861 = vmatpush.bf16.msrb.mxu3 %v5983_v11 }
0x190e   :  { %v6314_v55 = vpop.eup %6313 }
0x190f   :  { %v3590_v61 = vmul.f32 %v6314_v55, %v6304_v42  ;;  %v3670_v42 = vperm.slane %v7737_v4, 4 }
0x1911   :  { %v3592_v57 = vpack.c.bf16 %v3590_v61, %v3590_v61 }
0x1913   :  { %5762 = vmatmul.msk.bf16.vlgmr.msra.gmra.mxu3 %vm276_vm2, %v3592_v57 }
0x1918   :  { %v3499_v54 = vpop.f32.mrf.mxu3 }
0x1919   :  { %3642 = vrot.lane.b32.xlu0 %v3499_v54, %s8239_s24  ;;  %v3765_v54 = vperm.slane %v7527_v41, 1 }
0x1920   :  { %v3501_v40 = vpop.f32.mrf.mxu3 }
0x194f   :  { %v3408_v13 = vpop.f32.mrf.mxu0 }
0x1950   :  { %3636 = vrot.lane.b32.xlu2 %v3408_v13, %s8238_s20  ;;  %v3771_v13 = vperm.slane %v7527_v41, 2  ;;  %v5982_v41 = vld [vmem:[%s8196_s14 + $0x8] sm:$0xff] }
0x1951   :  { %3862 = vmatpush.bf16.msrb.mxu3 %v5982_v41 }
0x1955   :  { %3863 = vmatpush.bf16.msrb.mxu3 %v5981_v33 }
0x1957   :  { %v3410_v28 = vpop.f32.mrf.mxu0 }
0x195f   :  { %v3518_v25 = vpop.f32.mrf.mxu0 }
0x1960   :  { %3644 = vrot.lane.b32.xlu1 %v3518_v25, %s8239_s24  ;;  %v3767_v25 = vrot.slane %v3765_v54, 4 }
0x1964   :  { %v3635_v20 = vpop.permute.xlu0 %3634 }
0x1965   :  { %v3656_v38 = vsel %vm224_vm1, %v7675_v27, %v3635_v20 }
0x1967   :  { %v3520_v14 = vpop.f32.mrf.mxu0 }
0x1970   :  { %v3628_v36 = vpop.f32.mrf.mxu0 }
0x1971   :  { %3652 = vrot.lane.b32.xlu1 %v3628_v36, %s8240_s26 }
0x1978   :  { %v3630_v46 = vpop.f32.mrf.mxu0 }
0x1979   :  { %v3773_v46 = vrot.slane %v3771_v13, 4 }
0x198b   :  { %v3643_v2 = vpop.permute.xlu0 %3642 }
0x198c   :  { %v3658_v7 = vsel %vm276_vm2, %v3656_v38, %v3643_v2 }
0x1996   :  { %v3609_v16 = vpop.f32.mrf.mxu3 }
0x1997   :  { %3650 = vrot.lane.b32.xlu0 %v3609_v16, %s8240_s26 }
0x199e   :  { %v3611_v58 = vpop.f32.mrf.mxu3 }
0x19aa   :  { %v3637_v56 = vpop.permute.xlu2 %3636 }
0x19ab   :  { %v3657_v63 = vsel %vm224_vm1, %v3292_v29, %v3637_v56 }
0x19d2   :  { %v3645_v17 = vpop.permute.xlu1 %3644 }
0x19d3   :  { %v3659_v12 = vsel %vm276_vm2, %v3657_v63, %v3645_v17 }
0x19e3   :  { %v3653_v43 = vpop.permute.xlu1 %3652 }
0x19e4   :  { %v3661_v48 = vsel %vm881_vm3, %v3659_v12, %v3653_v43 }
0x19e5   :  { %3666 = vst [vmem:[#allocation1 + $0x1] ss:$2 sm:$0xff] %v3661_v48 }
0x1a09   :  { %v3651_v44 = vpop.permute.xlu0 %3650 }
0x1a0a   :  { %v3660_v31 = vsel %vm881_vm3, %v3658_v7, %v3651_v44 }
0x1a0b   :  { %3664 = vst [vmem:[#allocation1] ss:$2 sm:$0xff] %v3660_v31  ;;  %v3828_v31 = vperm.slane %v7737_v4, 6 }
0x1a12   :  { %v3667_v22 = vld.sshfl [vmem:[#allocation1] sm:$0xff pattern:$0x75316420] }
0x1a13   :  { %v3669_v50 = vpack.c.bf16 %v3667_v22, %v3667_v22 }
0x1a15   :  { %5772 = vmatmul.msk.bf16.vlgmr.msra.gmra.mxu1 %vm187_vm0, %v3669_v50 }
0x1a92   :  { %v3695_v9 = vpop.f32.mrf.mxu1 }
0x1a93   :  { %v3696_v37 = vadd.f32 %v3695_v9, %v3670_v42 }
0x1a95   :  { %v3700_v27 = vrot.slane %v3696_v37, 4  ;;  %v3702_v5 = vadd.f32 %v3696_v37, %v7539_v10 }
0x1a97   :  { %v3703_v23 = vadd.f32 %v3700_v27, %v7541_v21  ;;  %3706 = vst [vmem:[#allocation1] ss:$2 sm:$0xff] %v3702_v5 }
0x1a99   :  { %3708 = vst [vmem:[#allocation1 + $0x1] ss:$2 sm:$0xff] %v3703_v23 }
0x1a9a   :  { %v3697_v60 = vpop.f32.mrf.mxu1 }
0x1aa0   :  { %v3709_v53 = vld.sshfl [vmem:[#allocation1] sm:$0xff pattern:$0x75316420] }
0x1aa1   :  { %v3711_v24 = vsel %vm187_vm0, %v3709_v53, 0.0 }
0x1aa2   :  { %3712 = vadd.xlane.f32.xlu0 %v3711_v24 }
0x1b15   :  { %v3713_v0 = vpop.xlane.xlu0 %3712 }
0x1b16   :  { %v3714_v47 = vmul.f32 %v3713_v0, %v6787_v35 }
0x1b18   :  { %v3719_v19 = vperm.slane %v3714_v47, %v7489_v26  ;;  %v3723_v6 = vperm.slane %v3714_v47, %v7491_v30 }
0x1b1a   :  { %v3726_v39 = vsub.f32 %v3702_v5, %v3719_v19  ;;  %v3727_v3 = vsub.f32 %v3703_v23, %v3723_v6 }
0x1b1c   :  { %v3728_v29 = vmul.f32 %v3726_v39, %v3726_v39  ;;  %v3729_v10 = vmul.f32 %v3727_v3, %v3727_v3 }
0x1b1e   :  { %3732 = vst [vmem:[#allocation1] ss:$2 sm:$0xff] %v3728_v29 }
0x1b1f   :  { %3734 = vst [vmem:[#allocation1 + $0x1] ss:$2 sm:$0xff] %v3729_v10 }
0x1b26   :  { %v3735_v21 = vld.sshfl [vmem:[#allocation1] sm:$0xff pattern:$0x75316420] }
0x1b27   :  { %v3737_v45 = vsel %vm187_vm0, %v3735_v21, 0.0  ;;  %v5986_v21 = vld [vmem:[%s8189_s8 + $0x18] sm:$0xff] }
0x1b28   :  { %3738 = vadd.xlane.f32.xlu1 %v3737_v45  ;;  %3990 = vmatpush.bf16.msra.mxu0 %v5986_v21 }
0x1b9b   :  { %v3739_v8 = vpop.xlane.xlu1 %3738 }
0x1b9c   :  { %v3740_v62 = vmul.f32 %v3739_v8, %v6787_v35  ;;  %v5985_v8 = vld [vmem:[%s8189_s8 + $0x10] sm:$0xff] }
0x1b9d   :  { %3991 = vmatpush.bf16.msra.mxu0 %v5985_v8 }
0x1b9e   :  { %v3741_v34 = vadd.f32 1e-05, %v3740_v62 }
0x1ba0   :  { %6315 = vrsqrt.f32 %v3741_v34  ;;  %vm3748_vm8 = vweird.f32 %v3741_v34 }
0x1ba6   :  { %v6316_v59 = vpop.eup %6315 }
0x1ba7   :  { %v3743_v1 = vmul.f32 %v6316_v59, %v3741_v34  ;;  %vm3749_vm4 = vweird.f32 %v6316_v59 }
0x1ba8   :  { %vm3750_vm9 = vmor %vm3748_vm8, %vm3749_vm4 }
0x1ba9   :  { %v3744_v55 = vmul.f32 %v6316_v59, %v3743_v1 }
0x1bab   :  { %v3745_v61 = vmul.f32 0.5, %v3744_v55 }
0x1bad   :  { %v3746_v57 = vsub.f32 1.5, %v3745_v61 }
0x1baf   :  { %v3747_v40 = vmul.f32 %v6316_v59, %v3746_v57 }
0x1bb1   :  { %v3751_v28 = vsel %vm3750_vm9, %v6316_v59, %v3747_v40  ;;  %v6394_v59 = vld [vmem:[%s8190_s15 + $0x8] sm:$0xff] }
0x1bb2   :  { %v3756_v14 = vperm.slane %v3751_v28, %v7489_v26  ;;  %v3760_v36 = vperm.slane %v3751_v28, %v7491_v30  ;;  %v3935_v1 = vperm.slane %v6394_v59, 3  ;;  %v3941_v55 = vperm.slane %v6394_v59, 4 }
0x1bb4   :  { %v3763_v16 = vmul.f32 %v3756_v14, %v3726_v39  ;;  %v3764_v58 = vmul.f32 %v3760_v36, %v3727_v3  ;;  %v3937_v57 = vrot.slane %v3935_v1, 4 }
0x1bb6   :  { %v3769_v17 = vmul.f32 %v3765_v54, %v3763_v16  ;;  %v3770_v56 = vmul.f32 %v3767_v25, %v3764_v58 }
0x1bb8   :  { %v3775_v63 = vadd.f32 %v3771_v13, %v3769_v17  ;;  %v3776_v12 = vadd.f32 %v3773_v46, %v3770_v56  ;;  %v3943_v13 = vrot.slane %v3941_v55, 4  ;;  %v7801_v56 = vld [vmem:[%s8190_s15 + $0x10] sm:$0xff] }
0x1bba   :  { %3791 = vst [vmem:[#allocation1] ss:$2 sm:$0xff] %v3775_v63 }
0x1bbb   :  { %3793 = vst [vmem:[#allocation1 + $0x1] ss:$2 sm:$0xff] %v3776_v12 }
0x1bc2   :  { %v3794_v43 = vld.sshfl [vmem:[#allocation1] sm:$0xff pattern:$0x75316420] }
0x1bc3   :  { %v3796_v48 = vpack.c.bf16 %v3794_v43, %v3794_v43 }
0x1bc5   :  { %5781 = vmatmul.msk.bf16.vlgmr.msra.gmra.mxu2 %vm187_vm0, %v3796_v48 }
0x1c48   :  { %v3822_v20 = vpop.f32.mrf.mxu2 }
0x1c49   :  { %v3823_v2 = vadd.f32 %v3822_v20, %v3797_v52 }
0x1c4b   :  { %v3826_v38 = vmax.f32 %v3823_v2, 0.0 }
0x1c4d   :  { %v3827_v7 = vpack.c.bf16 %v3826_v38, %v3826_v38 }
0x1c4f   :  { %5798 = vmatmul.msk.bf16.vlgmr.msrb.gmra.mxu3 %vm1118_vm5, %v3827_v7 }
0x1c50   :  { %v3824_v44 = vpop.f32.mrf.mxu2 }
0x1cd2   :  { %v3865_v22 = vpop.f32.mrf.mxu3 }
0x1cd3   :  { %v3866_v50 = vadd.f32 %v3865_v22, %v3828_v31 }
0x1cd5   :  { %v3870_v42 = vrot.slane %v3866_v50, 4  ;;  %v3872_v9 = vadd.f32 %v3866_v50, %v3775_v63  ;;  %v3968_v63 = vperm.slane %v7801_v56, 0 }
0x1cd7   :  { %v3873_v37 = vadd.f32 %v3870_v42, %v3776_v12  ;;  %3876 = vst [vmem:[#allocation1] ss:$2 sm:$0xff] %v3872_v9 }
0x1cd9   :  { %3878 = vst [vmem:[#allocation1 + $0x1] ss:$2 sm:$0xff] %v3873_v37 }
0x1cda   :  { %v3867_v27 = vpop.f32.mrf.mxu3 }
0x1ce0   :  { %v3879_v5 = vld.sshfl [vmem:[#allocation1] sm:$0xff pattern:$0x75316420] }
0x1ce1   :  { %v3881_v23 = vsel %vm187_vm0, %v3879_v5, 0.0 }
0x1ce2   :  { %3882 = vadd.xlane.f32.xlu2 %v3881_v23 }
0x1d55   :  { %v3883_v60 = vpop.xlane.xlu2 %3882 }
0x1d56   :  { %v3884_v53 = vmul.f32 %v3883_v60, %v6787_v35 }
0x1d58   :  { %v3889_v24 = vperm.slane %v3884_v53, %v7489_v26  ;;  %v3893_v0 = vperm.slane %v3884_v53, %v7491_v30 }
0x1d5a   :  { %v3896_v4 = vsub.f32 %v3872_v9, %v3889_v24  ;;  %v3897_v47 = vsub.f32 %v3873_v37, %v3893_v0 }
0x1d5c   :  { %v3898_v19 = vmul.f32 %v3896_v4, %v3896_v4  ;;  %v3899_v6 = vmul.f32 %v3897_v47, %v3897_v47 }
0x1d5e   :  { %3902 = vst [vmem:[#allocation1] ss:$2 sm:$0xff] %v3898_v19 }
0x1d5f   :  { %3904 = vst [vmem:[#allocation1 + $0x1] ss:$2 sm:$0xff] %v3899_v6 }
0x1d66   :  { %v3905_v39 = vld.sshfl [vmem:[#allocation1] sm:$0xff pattern:$0x75316420] }
0x1d67   :  { %v3907_v3 = vsel %vm187_vm0, %v3905_v39, 0.0 }
0x1d68   :  { %3908 = vadd.xlane.f32.xlu0 %v3907_v3 }
0x1ddb   :  { %v3909_v29 = vpop.xlane.xlu0 %3908 }
0x1ddc   :  { %v3910_v10 = vmul.f32 %v3909_v29, %v6787_v35 }
0x1dde   :  { %v3911_v45 = vadd.f32 1e-05, %v3910_v10 }
0x1de0   :  { %6317 = vrsqrt.f32 %v3911_v45  ;;  %vm3918_vm13 = vweird.f32 %v3911_v45 }
0x1de6   :  { %v6318_v62 = vpop.eup %6317 }
0x1de7   :  { %v3913_v51 = vmul.f32 %v6318_v62, %v3911_v45  ;;  %vm3919_vm12 = vweird.f32 %v6318_v62 }
0x1de8   :  { %vm3920_vm14 = vmor %vm3918_vm13, %vm3919_vm12 }
0x1de9   :  { %v3914_v34 = vmul.f32 %v6318_v62, %v3913_v51 }
0x1deb   :  { %v3915_v15 = vmul.f32 0.5, %v3914_v34 }
0x1ded   :  { %v3916_v49 = vsub.f32 1.5, %v3915_v15 }
0x1def   :  { %v3917_v11 = vmul.f32 %v6318_v62, %v3916_v49 }
0x1df1   :  { %v3921_v61 = vsel %vm3920_vm14, %v6318_v62, %v3917_v11 }
0x1df2   :  { %v3926_v54 = vperm.slane %v3921_v61, %v7489_v26  ;;  %v3930_v40 = vperm.slane %v3921_v61, %v7491_v30 }
0x1df4   :  { %v3933_v28 = vmul.f32 %v3926_v54, %v3896_v4  ;;  %v3934_v25 = vmul.f32 %v3930_v40, %v3897_v47 }
0x1df6   :  { %v3939_v14 = vmul.f32 %v3935_v1, %v3933_v28  ;;  %v3940_v36 = vmul.f32 %v3937_v57, %v3934_v25 }
0x1df8   :  { %v7791_v46 = vadd.f32 %v3941_v55, %v3939_v14  ;;  %v7793_v16 = vadd.f32 %v3943_v13, %v3940_v36 }
0x1dfa   :  { %3962 = vst [vmem:[#allocation1] ss:$2 sm:$0xff] %v7791_v46 }
0x1dfb   :  { %3964 = vst [vmem:[#allocation1 + $0x1] ss:$2 sm:$0xff] %v7793_v16 }
0x1e02   :  { %v3965_v58 = vld.sshfl [vmem:[#allocation1] sm:$0xff pattern:$0x75316420] }
0x1e03   :  { %v3967_v17 = vpack.c.bf16 %v3965_v58, %v3965_v58 }
0x1e05   :  { %5817 = vmatmul.msk.bf16.vlgmr.msra.gmra.mxu0 %vm187_vm0, %v3967_v17 }
0x1e82   :  { %v3993_v12 = vpop.f32.mrf.mxu0 }
0x1e83   :  { %v3994_v43 = vadd.f32 %v3993_v12, %v3968_v63 }
0x1e85   :  { %v3998_v48 = vrot.slane %v3994_v43, 4  ;;  %v4000_v41 = vpack.c.bf16 %v3994_v43, %v3994_v43 }
0x1e87   :  { %v4001_v33 = vpack.c.bf16 %v3998_v48, %v3998_v48  ;;  %v4003_v52 = vunpack.c.l.b16 %v4000_v41 }
0x1e89   :  { %v7804_v20 = vpack.c.b16 %v4003_v52, %v4003_v52  ;;  %v4027_v2 = vunpack.c.l.b16 %v4001_v33 }
0x1e8a   :  { %v3995_v38 = vpop.f32.mrf.mxu0 }
0x1e8b   :  { %v7806_v7 = vpack.c.b16 %v4027_v2, %v4027_v2  ;;  %4120 = vrot.lane.b32.xlu0 %v7804_v20, %s8246_s6  ;;  %4005 = vrot.lane.b32.xlu1 %v7804_v20, %s8245_s2 }
0x1e8d   :  { %4029 = vrot.lane.b32.xlu2 %v7806_v7, %s8245_s2 }
0x1e93   :  { %4141 = vrot.lane.b32.xlu0 %v7806_v7, %s8241_s4  ;;  %4143 = vrot.lane.b32.xlu1 %v7806_v7, %s8246_s6 }
0x1e95   :  { %4118 = vrot.lane.b32.xlu2 %v7804_v20, %s8241_s4 }
0x1e9b   :  { %4232 = vrot.lane.b32.xlu0 %v7804_v20, %s8234_s28  ;;  %4234 = vrot.lane.b32.xlu1 %v7804_v20, %s8247_s1 }
0x1e9d   :  { %4257 = vrot.lane.b32.xlu2 %v7806_v7, %s8247_s1 }
0x1ea3   :  { %4371 = vrot.lane.b32.xlu0 %v7806_v7, %s8242_s18  ;;  %4255 = vrot.lane.b32.xlu1 %v7806_v7, %s8234_s28 }
0x1ea5   :  { %4348 = vrot.lane.b32.xlu2 %v7804_v20, %s8242_s18 }
0x1eab   :  { %4346 = vrot.lane.b32.xlu1 %v7804_v20, %s8243_s21 }
0x1ead   :  { %4369 = vrot.lane.b32.xlu2 %v7806_v7, %s8243_s21 }
0x1ee7   :  { %v4030_v44 = vpop.permute.xlu2 %4029 }
0x1ee8   :  { %v4035_v31 = vsel %vm224_vm1, %v4030_v44, 0 }
0x1ee9   :  { %4044 = vmatpush.bf16.xpose.msrb.mxu2 %v4035_v31 }
0x1eef   :  { %v4119_v22 = vpop.permute.xlu2 %4118 }
0x1ef0   :  { %5819 = vmatmul.msk.bf16.vlgmr.msrb.gmra.mxu2 %vm224_vm1, %v4001_v33 }
0x1ef7   :  { %v4258_v27 = vpop.permute.xlu2 %4257 }
0x1ef8   :  { %v4263_v53 = vsel %vm224_vm1, %v4258_v27, 0 }
0x1efd   :  { %v4121_v50 = vpop.permute.xlu0 %4120  ;;  %v4006_v42 = vpop.permute.xlu1 %4005 }
0x1efe   :  { %v4126_v9 = vsel %vm224_vm1, %v4121_v50, 0  ;;  %v4011_v37 = vsel %vm224_vm1, %v4006_v42, 0 }
0x1eff   :  { %4020 = vmatpush.bf16.xpose.msrb.mxu1 %v4011_v37  ;;  %v4349_v47 = vpop.permute.xlu2 %4348 }
0x1f00   :  { %v4354_v6 = vsel %vm224_vm1, %v4349_v47, 0 }
0x1f05   :  { %v4142_v5 = vpop.permute.xlu0 %4141  ;;  %v4144_v23 = vpop.permute.xlu1 %4143 }
0x1f06   :  { %v4149_v60 = vsel %vm224_vm1, %v4144_v23, 0  ;;  %5818 = vmatmul.msk.bf16.vlgmr.msrb.gmra.mxu1 %vm224_vm1, %v4000_v41 }
0x1f07   :  { %4135 = vmatpush.bf16.xpose.msra.mxu1 %v4126_v9  ;;  %4158 = vmatpush.bf16.xpose.msra.mxu2 %v4149_v60  ;;  %v4370_v29 = vpop.permute.xlu2 %4369 }
0x1f0d   :  { %v4233_v24 = vpop.permute.xlu0 %4232  ;;  %v4235_v0 = vpop.permute.xlu1 %4234 }
0x1f0e   :  { %v4240_v4 = vsel %vm224_vm1, %v4235_v0, 0  ;;  %5823 = vmatmul.msk.bf16.vlgmr.msra.gmra.mxu2 %vm224_vm1, %v4142_v5 }
0x1f0f   :  { %4272 = vmatpush.bf16.xpose.msrb.mxu2 %v4263_v53  ;;  %4249 = vmatpush.bf16.xpose.msrb.mxu1 %v4240_v4 }
0x1f15   :  { %v4372_v19 = vpop.permute.xlu0 %4371  ;;  %v4256_v3 = vpop.permute.xlu1 %4255 }
0x1f16   :  { %v4377_v39 = vsel %vm224_vm1, %v4372_v19, 0  ;;  %5822 = vmatmul.msk.bf16.vlgmr.msra.gmra.mxu1 %vm224_vm1, %v4119_v22 }
0x1f17   :  { %4363 = vmatpush.bf16.xpose.msra.mxu1 %v4354_v6  ;;  %4386 = vmatpush.bf16.xpose.msra.mxu2 %v4377_v39 }
0x1f1d   :  { %v4347_v10 = vpop.permute.xlu1 %4346 }
0x1f1e   :  { %5827 = vmatmul.msk.bf16.vlgmr.msrb.gmra.mxu2 %vm224_vm1, %v4256_v3 }
0x1f26   :  { %5826 = vmatmul.msk.bf16.vlgmr.msrb.gmra.mxu1 %vm224_vm1, %v4233_v24 }
0x1f2e   :  { %5831 = vmatmul.msk.bf16.vlgmr.msra.gmra.mxu2 %vm224_vm1, %v4370_v29 }
0x1f36   :  { %5830 = vmatmul.msk.bf16.vlgmr.msra.gmra.mxu1 %vm224_vm1, %v4347_v10 }
0x1f73   :  { %v4046_v21 = vpop.f32.mrf.mxu2 }
0x1f74   :  { %v4051_v45 = vmul.f32 0.35355338, %v4046_v21 }
0x1f76   :  { %v4055_v8 = vsel %vm2530_vm7, %v4051_v45, -inf }
0x1f77   :  { %4056 = vmax.xlane.f32.xlu1 %v4055_v8 }
0x1f7b   :  { %v4048_v62 = vpop.f32.mrf.mxu2 }
0x1f83   :  { %v4022_v51 = vpop.f32.mrf.mxu1 }
0x1f84   :  { %v4050_v34 = vmul.f32 0.35355338, %v4022_v51 }
0x1f86   :  { %v4052_v15 = vsel %vm2530_vm7, %v4050_v34, -inf }
0x1f87   :  { %4053 = vmax.xlane.f32.xlu0 %v4052_v15 }
0x1f8b   :  { %v4024_v49 = vpop.f32.mrf.mxu1 }
0x1f91   :  { %v4160_v59 = vpop.f32.mrf.mxu2 }
0x1f92   :  { %v4165_v1 = vmul.f32 0.35355338, %v4160_v59 }
0x1f93   :  { %v4137_v11 = vpop.f32.mrf.mxu1 }
0x1f94   :  { %v4164_v55 = vmul.f32 0.35355338, %v4137_v11  ;;  %v4169_v61 = vsel %vm2530_vm7, %v4165_v1, -inf }
0x1f95   :  { %4170 = vmax.xlane.f32.xlu0 %v4169_v61 }
0x1f96   :  { %v4166_v57 = vsel %vm2530_vm7, %v4164_v55, -inf }
0x1f97   :  { %4167 = vmax.xlane.f32.xlu2 %v4166_v57 }
0x1f99   :  { %v4162_v54 = vpop.f32.mrf.mxu2 }
0x1f9b   :  { %v4139_v40 = vpop.f32.mrf.mxu1 }
0x1fa1   :  { %v4274_v13 = vpop.f32.mrf.mxu2 }
0x1fa2   :  { %v4279_v28 = vmul.f32 0.35355338, %v4274_v13 }
0x1fa3   :  { %v4251_v25 = vpop.f32.mrf.mxu1 }
0x1fa4   :  { %v7856_v14 = vmul.f32 0.35355338, %v4251_v25  ;;  %v4283_v36 = vsel %vm2530_vm7, %v4279_v28, -inf }
0x1fa5   :  { %4284 = vmax.xlane.f32.xlu2 %v4283_v36 }
0x1fa6   :  { %v4280_v58 = vsel %vm2530_vm7, %v7856_v14, -inf }
0x1fa7   :  { %4281 = vmax.xlane.f32.xlu1 %v4280_v58 }
0x1fa9   :  { %v4276_v17 = vpop.f32.mrf.mxu2 }
0x1fab   :  { %v4253_v63 = vpop.f32.mrf.mxu1 }
0x1fb1   :  { %v4388_v12 = vpop.f32.mrf.mxu2 }
0x1fb2   :  { %v7861_v43 = vmul.f32 0.35355338, %v4388_v12 }
0x1fb3   :  { %v4365_v48 = vpop.f32.mrf.mxu1 }
0x1fb4   :  { %v7863_v41 = vmul.f32 0.35355338, %v4365_v48  ;;  %v4397_v33 = vsel %vm2530_vm7, %v7861_v43, -inf }
0x1fb5   :  { %4398 = vmax.xlane.f32.xlu2 %v4397_v33 }
0x1fb6   :  { %v4394_v52 = vsel %vm2530_vm7, %v7863_v41, -inf }
0x1fb7   :  { %4395 = vmax.xlane.f32.xlu0 %v4394_v52 }
0x1fb9   :  { %v4390_v2 = vpop.f32.mrf.mxu2 }
0x1fbb   :  { %v4367_v38 = vpop.f32.mrf.mxu1 }
0x1fcb   :  { %4190 = vrot.lane.b32.xlu0 %v7804_v20, %s8244_s7 }
0x1fcd   :  { %4097 = vrot.lane.b32.xlu2 %v7806_v7, %s8235_s22 }
0x1fd3   :  { %4304 = vrot.lane.b32.xlu0 %v7804_v20, %s8236_s23 }
0x1fd5   :  { %4211 = vrot.lane.b32.xlu2 %v7806_v7, %s8244_s7 }
0x1fea   :  { %v4057_v44 = vpop.xlane.xlu1 %4056 }
0x1feb   :  { %v4059_v31 = vsub.f32 %v4051_v45, %v4057_v44 }
0x1fed   :  { %v4062_v22 = vmul.f32 1.442695, %v4059_v31 }
0x1fef   :  { %6319 = vpow2.f32 %v4062_v22 }
0x1ff5   :  { %v7877_v50 = vpop.eup %6319 }
0x1ff6   :  { %v4067_v37 = vsel %vm2530_vm7, %v7877_v50, 0.0 }
0x1ffa   :  { %v4054_v42 = vpop.xlane.xlu0 %4053 }
0x1ffb   :  { %v4058_v9 = vsub.f32 %v4050_v34, %v4054_v42 }
0x1ffd   :  { %v4060_v27 = vmul.f32 1.442695, %v4058_v9  ;;  %4068 = vadd.xlane.f32.xlu0 %v4067_v37 }
0x1fff   :  { %6321 = vpow2.f32 %v4060_v27 }
0x2005   :  { %v7881_v5 = vpop.eup %6321 }
0x2006   :  { %v4064_v23 = vsel %vm2530_vm7, %v7881_v5, 0.0 }
0x2007   :  { %4065 = vadd.xlane.f32.xlu1 %v4064_v23 }
0x2008   :  { %v4171_v60 = vpop.xlane.xlu0 %4170 }
0x2009   :  { %v4173_v0 = vsub.f32 %v4165_v1, %v4171_v60 }
0x200a   :  { %v4168_v53 = vpop.xlane.xlu2 %4167 }
0x200b   :  { %v4172_v24 = vsub.f32 %v4164_v55, %v4168_v53  ;;  %v4176_v47 = vmul.f32 1.442695, %v4173_v0 }
0x200d   :  { %v4174_v4 = vmul.f32 1.442695, %v4172_v24 }
0x200f   :  { %6323 = vpow2.f32 %v4174_v4 }
0x2010   :  { %6325 = vpow2.f32 %v4176_v47 }
0x2015   :  { %v7885_v19 = vpop.eup %6323 }
0x2016   :  { %v4178_v6 = vsel %vm2530_vm7, %v7885_v19, 0.0  ;;  %v7889_v29 = vpop.eup %6325 }
0x2017   :  { %4179 = vadd.xlane.f32.xlu0 %v4178_v6  ;;  %v4181_v21 = vsel %vm2530_vm7, %v7889_v29, 0.0 }
0x2018   :  { %v4285_v39 = vpop.xlane.xlu2 %4284 }
0x2019   :  { %v4287_v3 = vsub.f32 %v4279_v28, %v4285_v39 }
0x201a   :  { %v4282_v15 = vpop.xlane.xlu1 %4281 }
0x201b   :  { %v4290_v10 = vmul.f32 1.442695, %v4287_v3  ;;  %v4286_v49 = vsub.f32 %v7856_v14, %v4282_v15 }
0x201d   :  { %6327 = vpow2.f32 %v4290_v10  ;;  %v4288_v11 = vmul.f32 1.442695, %v4286_v49  ;;  %v5992_v10 = vld [vmem:[%s8193_s11 + $0x18] sm:$0xff] }
0x201f   :  { %4182 = vadd.xlane.f32.xlu0 %v4181_v21  ;;  %6329 = vpow2.f32 %v4288_v11 }
0x2020   :  { %4076 = vrot.lane.b32.xlu1 %v7804_v20, %s8235_s22 }
0x2023   :  { %v7895_v45 = vpop.eup %6327 }
0x2024   :  { %v4295_v8 = vsel %vm2530_vm7, %v7895_v45, 0.0 }
0x2025   :  { %4296 = vadd.xlane.f32.xlu2 %v4295_v8  ;;  %v7907_v57 = vpop.eup %6329 }
0x2026   :  { %v4292_v40 = vsel %vm2530_vm7, %v7907_v57, 0.0 }
0x2028   :  { %v4399_v62 = vpop.xlane.xlu2 %4398 }
0x2029   :  { %v4401_v55 = vsub.f32 %v7861_v43, %v4399_v62 }
0x202a   :  { %v4396_v54 = vpop.xlane.xlu0 %4395 }
0x202b   :  { %v4404_v61 = vmul.f32 1.442695, %v4401_v55  ;;  %v4400_v13 = vsub.f32 %v7863_v41, %v4396_v54 }
0x202d   :  { %6331 = vpow2.f32 %v4404_v61  ;;  %v4402_v25 = vmul.f32 1.442695, %v4400_v13 }
0x202f   :  { %6333 = vpow2.f32 %v4402_v25 }
0x2030   :  { %v4098_v51 = vpop.permute.xlu2 %4097 }
0x2031   :  { %v4103_v34 = vsel %vm2422_vm10, %v4098_v51, 0 }
0x2032   :  { %4112 = vmatpush.bf16.msrb.mxu0 %v4103_v34 }
0x2033   :  { %4325 = vrot.lane.b32.xlu0 %v7806_v7, %s8236_s23  ;;  %v7912_v28 = vpop.eup %6331 }
0x2035   :  { %v7916_v14 = vpop.eup %6333 }
0x2036   :  { %v4406_v36 = vsel %vm2530_vm7, %v7916_v14, 0.0 }
0x2038   :  { %v4212_v59 = vpop.permute.xlu2 %4211 }
0x2039   :  { %v4217_v1 = vsel %vm2422_vm10, %v4212_v59, 0 }
0x203a   :  { %4226 = vmatpush.bf16.msra.mxu0 %v4217_v1 }
0x203d   :  { %4418 = vrot.lane.b32.xlu2 %v7804_v20, %s8237_s29  ;;  %v4409_v20 = vsel %vm2530_vm7, %v7912_v28, 0.0  ;;  %v4191_v58 = vpop.permute.xlu0 %4190 }
0x2045   :  { %v4305_v17 = vpop.permute.xlu0 %4304 }
0x204a   :  { %4293 = vadd.xlane.f32.xlu1 %v4292_v40 }
0x2052   :  { %4410 = vadd.xlane.f32.xlu1 %v4409_v20 }
0x205d   :  { %4407 = vadd.xlane.f32.xlu0 %v4406_v36 }
0x206b   :  { %4439 = vrot.lane.b32.xlu1 %v7806_v7, %s8237_s29  ;;  %v4196_v7 = vsel %vm2422_vm10, %v4191_v58, 0 }
0x2070   :  { %v4069_v63 = vpop.xlane.xlu0 %4068 }
0x2071   :  { %6335 = vrcp.f32 %v4069_v63 }
0x2077   :  { %v6336_v12 = vpop.eup %6335 }
0x2078   :  { %v4073_v43 = vmul.f32 %v6336_v12, %v7877_v50  ;;  %v4310_v50 = vsel %vm2422_vm10, %v4305_v17, 0 }
0x207a   :  { %v4075_v48 = vpack.c.bf16 %v4073_v43, %v4073_v43  ;;  %v4066_v41 = vpop.xlane.xlu1 %4065  ;;  %v5988_v43 = vld [vmem:[%s8191_s9 + $0x18] sm:$0xff] }
0x207b   :  { %6337 = vrcp.f32 %v4066_v41  ;;  %4520 = vmatpush.bf16.msrb.mxu1 %v5988_v43 }
0x207c   :  { %5821 = vmatmul.msk.bf16.vlgmr.msrb.gmra.mxu0 %vm2557_vm11, %v4075_v48  ;;  %v5987_v48 = vld [vmem:[%s8191_s9 + $0x10] sm:$0xff] }
0x207f   :  { %4521 = vmatpush.bf16.msrb.mxu1 %v5987_v48 }
0x2081   :  { %v6338_v52 = vpop.eup %6337 }
0x2082   :  { %v4072_v2 = vmul.f32 %v6338_v52, %v7881_v5 }
0x2084   :  { %v4074_v22 = vpack.c.bf16 %v4072_v2, %v4072_v2 }
0x208a   :  { %v4180_v33 = vpop.xlane.xlu0 %4179 }
0x2092   :  { %v4077_v38 = vpop.permute.xlu1 %4076  ;;  %v4183_v44 = vpop.xlane.xlu0 %4182 }
0x2093   :  { %v4082_v31 = vsel %vm2422_vm10, %v4077_v38, 0  ;;  %6339 = vrcp.f32 %v4183_v44 }
0x2094   :  { %4091 = vmatpush.bf16.msra.mxu3 %v4082_v31  ;;  %6341 = vrcp.f32 %v4180_v33  ;;  %v4657_v33 = vperm.slane %v7801_v56, 3 }
0x2097   :  { %5820 = vmatmul.msk.bf16.vlgmr.msra.gmra.mxu3 %vm2557_vm11, %v4074_v22 }
0x2098   :  { %4205 = vmatpush.bf16.msrb.mxu3 %v4196_v7  ;;  %v4297_v37 = vpop.xlane.xlu2 %4296 }
0x2099   :  { %v6340_v42 = vpop.eup %6339  ;;  %6343 = vrcp.f32 %v4297_v37 }
0x209a   :  { %v4187_v9 = vmul.f32 %v6340_v42, %v7889_v29  ;;  %v6342_v5 = vpop.eup %6341 }
0x209b   :  { %v4186_v23 = vmul.f32 %v6342_v5, %v7885_v19 }
0x209c   :  { %4319 = vmatpush.bf16.msra.mxu3 %v4310_v50  ;;  %v4189_v27 = vpack.c.bf16 %v4187_v9, %v4187_v9 }
0x209d   :  { %v4188_v24 = vpack.c.bf16 %v4186_v23, %v4186_v23 }
0x209e   :  { %5825 = vmatmul.msk.bf16.vlgmr.msra.gmra.mxu0 %vm2557_vm11, %v4189_v27 }
0x209f   :  { %v6344_v53 = vpop.eup %6343 }
0x20a0   :  { %v4419_v60 = vpop.permute.xlu2 %4418  ;;  %v4301_v6 = vmul.f32 %v6344_v53, %v7895_v45  ;;  %v5991_v45 = vld [vmem:[%s8193_s11 + $0x10] sm:$0xff] }
0x20a1   :  { %v4424_v47 = vsel %vm2422_vm10, %v4419_v60, 0 }
0x20a2   :  { %v4303_v39 = vpack.c.bf16 %v4301_v6, %v4301_v6 }
0x20a5   :  { %v4326_v0 = vpop.permute.xlu0 %4325 }
0x20a6   :  { %v4331_v4 = vsel %vm2422_vm10, %v4326_v0, 0 }
0x20a7   :  { %5824 = vmatmul.msk.bf16.vlgmr.msrb.gmra.mxu3 %vm2557_vm11, %v4188_v24  ;;  %4340 = vmatpush.bf16.msrb.mxu0 %v4331_v4 }
0x20a8   :  { %4433 = vmatpush.bf16.msrb.mxu3 %v4424_v47 }
0x20ae   :  { %5829 = vmatmul.msk.bf16.vlgmr.msrb.gmra.mxu0 %vm2557_vm11, %v4303_v39 }
0x20bd   :  { %v4294_v3 = vpop.xlane.xlu1 %4293 }
0x20be   :  { %6345 = vrcp.f32 %v4294_v3 }
0x20c4   :  { %v6346_v19 = vpop.eup %6345 }
0x20c5   :  { %v4300_v29 = vmul.f32 %v6346_v19, %v7907_v57  ;;  %v4411_v8 = vpop.xlane.xlu1 %4410 }
0x20c7   :  { %v4302_v21 = vpack.c.bf16 %v4300_v29, %v4300_v29 }
0x20c9   :  { %5828 = vmatmul.msk.bf16.vlgmr.msra.gmra.mxu3 %vm2557_vm11, %v4302_v21 }
0x20ca   :  { %4676 = vmatpush.bf16.msra.mxu3 %v5992_v10 }
0x20ce   :  { %4677 = vmatpush.bf16.msra.mxu3 %v5991_v45 }
0x20d0   :  { %v4408_v62 = vpop.xlane.xlu0 %4407 }
0x20d1   :  { %6347 = vrcp.f32 %v4408_v62 }
0x20d2   :  { %6349 = vrcp.f32 %v4411_v8 }
0x20d7   :  { %v6348_v51 = vpop.eup %6347 }
0x20d8   :  { %v4414_v34 = vmul.f32 %v6348_v51, %v7916_v14  ;;  %v6350_v15 = vpop.eup %6349 }
0x20d9   :  { %v4415_v59 = vmul.f32 %v6350_v15, %v7912_v28 }
0x20da   :  { %v4416_v49 = vpack.c.bf16 %v4414_v34, %v4414_v34 }
0x20db   :  { %v4417_v55 = vpack.c.bf16 %v4415_v59, %v4415_v59 }
0x20dc   :  { %5832 = vmatmul.msk.bf16.vlgmr.msrb.gmra.mxu3 %vm2557_vm11, %v4416_v49  ;;  %v4498_v49 = vperm.slane %v7801_v56, 1 }
0x20dd   :  { %v4440_v1 = vpop.permute.xlu1 %4439 }
0x20de   :  { %v4445_v11 = vsel %vm2422_vm10, %v4440_v1, 0 }
0x20df   :  { %4454 = vmatpush.bf16.msra.mxu0 %v4445_v11 }
0x20e2   :  { %5833 = vmatmul.msk.bf16.vlgmr.msra.gmra.mxu0 %vm2557_vm11, %v4417_v55 }
0x20ec   :  { %5872 = vmatmul.msk.bf16.vlgmr.msra.gmra.mxu3 %vm187_vm0, %v7567_v32 }
0x20f9   :  { %v4114_v61 = vpop.f32.mrf.mxu0 }
0x20fc   :  { %5873 = vmatmul.msk.bf16.gmra.mxu3 %vm187_vm0, %v7624_v18 }
0x2101   :  { %v4116_v57 = vpop.f32.mrf.mxu0 }
0x211a   :  { %v4093_v54 = vpop.f32.mrf.mxu3 }
0x211b   :  { %v4228_v40 = vpop.f32.mrf.mxu0 }
0x211c   :  { %4464 = vrot.lane.b32.xlu2 %v4228_v40, %s8238_s20 }
0x2122   :  { %v4095_v13 = vpop.f32.mrf.mxu3 }
0x2123   :  { %v4230_v28 = vpop.f32.mrf.mxu0 }
0x212a   :  { %v4207_v25 = vpop.f32.mrf.mxu3 }
0x212b   :  { %4462 = vrot.lane.b32.xlu0 %v4207_v25, %s8238_s20  ;;  %v4342_v20 = vpop.f32.mrf.mxu0 }
0x212c   :  { %4472 = vrot.lane.b32.xlu2 %v4342_v20, %s8239_s24 }
0x2132   :  { %v4209_v14 = vpop.f32.mrf.mxu3 }
0x2133   :  { %v4344_v36 = vpop.f32.mrf.mxu0 }
0x214c   :  { %v4321_v32 = vpop.f32.mrf.mxu3 }
0x214d   :  { %4470 = vrot.lane.b32.xlu1 %v4321_v32, %s8239_s24 }
0x2154   :  { %v4323_v58 = vpop.f32.mrf.mxu3 }
0x215f   :  { %v4435_v18 = vpop.f32.mrf.mxu3  ;;  %v4456_v17 = vpop.f32.mrf.mxu0 }
0x2160   :  { %4480 = vrot.lane.b32.xlu2 %v4456_v17, %s8240_s26  ;;  %4478 = vrot.lane.b32.xlu1 %v4435_v18, %s8240_s26  ;;  %v5990_v18 = vld [vmem:[%s8192_s10 + $0x18] sm:$0xff]  ;;  %v5989_v17 = vld [vmem:[%s8192_s10 + $0x10] sm:$0xff]  ;;  %s8248_s10 = sld [smem:[#allocation4_spill]] }
0x2161   :  { %4650 = vmatpush.bf16.msrb.mxu2 %v5990_v18 }
0x2165   :  { %4651 = vmatpush.bf16.msrb.mxu2 %v5989_v17 }
0x2167   :  { %v4437_v63 = vpop.f32.mrf.mxu3  ;;  %v4458_v12 = vpop.f32.mrf.mxu0 }
0x216f   :  { %v4679_v41 = vpop.f32.mrf.mxu3 }
0x2170   :  { %v4680_v52 = vadd.f32 %v4679_v41, %v4657_v33 }
0x2172   :  { %v4694_v38 = vpack.c.bf16 %v4680_v52, %v4680_v52 }
0x2174   :  { %v4700_v7 = vunpack.c.l.b16 %v4694_v38 }
0x2176   :  { %v4465_v47 = vpop.permute.xlu2 %4464 }
0x2177   :  { %v4681_v2 = vpop.f32.mrf.mxu3  ;;  %v4485_v39 = vsel %vm224_vm1, %v4114_v61, %v4465_v47 }
0x2178   :  { %v4682_v44 = vadd.f32 %v4681_v2, %v4657_v33  ;;  %v8004_v2 = vld [vmem:[%s8190_s15 + $0x18] sm:$0xff] }
0x217a   :  { %v4695_v31 = vpack.c.bf16 %v4682_v44, %v4682_v44  ;;  %v4593_v44 = vperm.slane %v7801_v56, 7 }
0x217c   :  { %v4701_v22 = vunpack.c.l.b16 %v4695_v31 }
0x217e   :  { %v7967_v50 = vpack.c.b16 %v4701_v22, %v4700_v7  ;;  %v4599_v22 = vperm.slane %v8004_v2, 0 }
0x217f   :  { %v4684_v42 = vpop.f32.mrf.mxu3 }
0x2180   :  { %v4707_v9 = vsel %vm224_vm1, %v7967_v50, 0  ;;  %v4685_v37 = vadd.f32 %v4684_v42, %v4657_v33 }
0x2181   :  { %4716 = vmatpush.bf16.xpose.msrb.mxu0 %v4707_v9  ;;  %v4595_v9 = vrot.slane %v4593_v44, 4 }
0x2182   :  { %v4696_v5 = vpack.c.bf16 %v4685_v37, %v4685_v37 }
0x2184   :  { %v4724_v53 = vunpack.c.l.b16 %v4696_v5  ;;  %v4601_v5 = vrot.slane %v4599_v22, 4 }
0x2186   :  { %v4473_v6 = vpop.permute.xlu2 %4472 }
0x2187   :  { %v4686_v27 = vpop.f32.mrf.mxu3  ;;  %v4487_v3 = vsel %vm276_vm2, %v4485_v39, %v4473_v6 }
0x2188   :  { %v4687_v23 = vadd.f32 %v4686_v27, %v4657_v33 }
0x218a   :  { %v4697_v60 = vpack.c.bf16 %v4687_v23, %v4687_v23 }
0x218c   :  { %v4725_v24 = vunpack.c.l.b16 %v4697_v60 }
0x218e   :  { %v7971_v0 = vpack.c.b16 %v4725_v24, %v4724_v53 }
0x2190   :  { %v4731_v4 = vsel %vm224_vm1, %v7971_v0, 0 }
0x2191   :  { %4740 = vmatpush.bf16.xpose.msra.mxu1 %v4731_v4 }
0x219d   :  { %v4463_v21 = vpop.permute.xlu0 %4462 }
0x219e   :  { %v4484_v45 = vsel %vm224_vm1, %v4093_v54, %v4463_v21 }
0x21ba   :  { %v4481_v19 = vpop.permute.xlu2 %4480 }
0x21bb   :  { %v4489_v29 = vsel %vm881_vm3, %v4487_v3, %v4481_v19 }
0x21bc   :  { %4494 = vst [vmem:[#allocation1 + $0x1] ss:$2 sm:$0xff] %v4489_v29  ;;  %v4628_v29 = vperm.slane %v7801_v56, 2 }
0x21bf   :  { %v4471_v10 = vpop.permute.xlu1 %4470 }
0x21c0   :  { %v4486_v8 = vsel %vm276_vm2, %v4484_v45, %v4471_v10 }
0x21d2   :  { %v4479_v62 = vpop.permute.xlu1 %4478 }
0x21d3   :  { %v4488_v51 = vsel %vm881_vm3, %v4486_v8, %v4479_v62 }
0x21d4   :  { %4492 = vst [vmem:[#allocation1] ss:$2 sm:$0xff] %v4488_v51 }
0x21db   :  { %v4495_v34 = vld.sshfl [vmem:[#allocation1] sm:$0xff pattern:$0x75316420] }
0x21dc   :  { %v4497_v15 = vpack.c.bf16 %v4495_v34, %v4495_v34 }
0x21de   :  { %5842 = vmatmul.msk.bf16.vlgmr.msrb.gmra.mxu1 %vm187_vm0, %v4497_v15 }
0x225b   :  { %v4523_v59 = vpop.f32.mrf.mxu1 }
0x225c   :  { %v4524_v1 = vadd.f32 %v4523_v59, %v4498_v49 }
0x225e   :  { %v4528_v11 = vrot.slane %v4524_v1, 4  ;;  %v4530_v55 = vadd.f32 %v4524_v1, %v7791_v46 }
0x2260   :  { %v4531_v61 = vadd.f32 %v4528_v11, %v7793_v16  ;;  %4534 = vst [vmem:[#allocation1] ss:$2 sm:$0xff] %v4530_v55 }
0x2262   :  { %4536 = vst [vmem:[#allocation1 + $0x1] ss:$2 sm:$0xff] %v4531_v61 }
0x2263   :  { %v4525_v57 = vpop.f32.mrf.mxu1 }
0x2269   :  { %v4537_v54 = vld.sshfl [vmem:[#allocation1] sm:$0xff pattern:$0x75316420] }
0x226a   :  { %v4539_v40 = vsel %vm187_vm0, %v4537_v54, 0.0 }
0x226b   :  { %4540 = vadd.xlane.f32.xlu1 %v4539_v40 }
0x2284   :  { %4841 = vrot.lane.b32.xlu1 %v7971_v0, %s8241_s4 }
0x22de   :  { %v4541_v13 = vpop.xlane.xlu1 %4540 }
0x22df   :  { %v4542_v28 = vmul.f32 %v4541_v13, %v6787_v35 }
0x22e1   :  { %v4547_v25 = vperm.slane %v4542_v28, %v7489_v26  ;;  %v4551_v20 = vperm.slane %v4542_v28, %v7491_v30 }
0x22e3   :  { %v4554_v46 = vsub.f32 %v4530_v55, %v4547_v25  ;;  %v4555_v14 = vsub.f32 %v4531_v61, %v4551_v20 }
0x22e5   :  { %v4556_v16 = vmul.f32 %v4554_v46, %v4554_v46  ;;  %v4557_v36 = vmul.f32 %v4555_v14, %v4555_v14 }
0x22e7   :  { %4560 = vst [vmem:[#allocation1] ss:$2 sm:$0xff] %v4556_v16 }
0x22e8   :  { %4562 = vst [vmem:[#allocation1 + $0x1] ss:$2 sm:$0xff] %v4557_v36 }
0x22ef   :  { %v4563_v32 = vld.sshfl [vmem:[#allocation1] sm:$0xff pattern:$0x75316420] }
0x22f0   :  { %v4565_v58 = vsel %vm187_vm0, %v4563_v32, 0.0 }
0x22f1   :  { %4566 = vadd.xlane.f32.xlu0 %v4565_v58 }
0x22f6   :  { %v4842_v6 = vpop.permute.xlu1 %4841 }
0x22f7   :  { %v4847_v19 = vsel %vm224_vm1, %v4842_v6, 0 }
0x2305   :  { %4772 = vrot.lane.b32.xlu0 %v7967_v50, %s8245_s2 }
0x2364   :  { %v4567_v63 = vpop.xlane.xlu0 %4566 }
0x2365   :  { %v4568_v12 = vmul.f32 %v4567_v63, %v6787_v35 }
0x2367   :  { %v4569_v43 = vadd.f32 1e-05, %v4568_v12 }
0x2369   :  { %6351 = vrsqrt.f32 %v4569_v43  ;;  %vm4576_vm10 = vweird.f32 %v4569_v43 }
0x236f   :  { %v6352_v48 = vpop.eup %6351 }
0x2370   :  { %v4571_v41 = vmul.f32 %v6352_v48, %v4569_v43  ;;  %vm4577_vm7 = vweird.f32 %v6352_v48 }
0x2371   :  { %vm4578_vm11 = vmor %vm4576_vm10, %vm4577_vm7 }
0x2372   :  { %v4572_v33 = vmul.f32 %v6352_v48, %v4571_v41 }
0x2374   :  { %v4573_v52 = vmul.f32 0.5, %v4572_v33 }
0x2376   :  { %v4574_v38 = vsub.f32 1.5, %v4573_v52 }
0x2377   :  { %v4773_v31 = vpop.permute.xlu0 %4772 }
0x2378   :  { %v4575_v7 = vmul.f32 %v6352_v48, %v4574_v38  ;;  %4785 = vmatpush.bf16.msra.mxu2 %v4773_v31 }
0x237a   :  { %v4579_v42 = vsel %vm4578_vm11, %v6352_v48, %v4575_v7 }
0x237b   :  { %v4584_v37 = vperm.slane %v4579_v42, %v7489_v26  ;;  %v4588_v27 = vperm.slane %v4579_v42, %v7491_v30 }
0x237d   :  { %v4591_v23 = vmul.f32 %v4584_v37, %v4554_v46  ;;  %v4592_v60 = vmul.f32 %v4588_v27, %v4555_v14 }
0x237f   :  { %v4597_v53 = vmul.f32 %v4593_v44, %v4591_v23  ;;  %v4598_v24 = vmul.f32 %v4595_v9, %v4592_v60 }
0x2381   :  { %v8010_v4 = vadd.f32 %v4599_v22, %v4597_v53  ;;  %v8012_v47 = vadd.f32 %v4601_v5, %v4598_v24 }
0x2383   :  { %4622 = vst [vmem:[#allocation1] ss:$2 sm:$0xff] %v8010_v4 }
0x2384   :  { %4624 = vst [vmem:[#allocation1 + $0x1] ss:$2 sm:$0xff] %v8012_v47 }
0x238b   :  { %v4625_v39 = vld.sshfl [vmem:[#allocation1] sm:$0xff pattern:$0x75316420] }
0x238c   :  { %v4627_v3 = vpack.c.bf16 %v4625_v39, %v4625_v39 }
0x238e   :  { %5863 = vmatmul.msk.bf16.vlgmr.msrb.gmra.mxu2 %vm187_vm0, %v4627_v3 }
0x238f   :  { %4856 = vmatpush.bf16.xpose.msrb.mxu2 %v4847_v19 }
0x2411   :  { %v4653_v10 = vpop.f32.mrf.mxu2 }
0x2412   :  { %v4654_v21 = vadd.f32 %v4653_v10, %v4628_v29 }
0x2414   :  { %v4690_v45 = vrot.slane %v4654_v21, 4  ;;  %v4692_v8 = vpack.c.bf16 %v4654_v21, %v4654_v21 }
0x2416   :  { %v4693_v62 = vpack.c.bf16 %v4690_v45, %v4690_v45  ;;  %v4811_v51 = vunpack.c.l.b16 %v4692_v8  ;;  %5874 = vmatmul.msk.bf16.vlgmr.msrb.gmra.mxu0 %vm224_vm1, %v4692_v8 }
0x2418   :  { %v4812_v34 = vpack.c.b16 %v4811_v51, %v4811_v51  ;;  %5875 = vmatmul.msk.bf16.vlgmr.msra.gmra.mxu1 %vm224_vm1, %v4693_v62  ;;  %v4837_v49 = vunpack.c.l.b16 %v4693_v62 }
0x2419   :  { %v4655_v15 = vpop.f32.mrf.mxu2 }
0x241a   :  { %4813 = vrot.lane.b32.xlu0 %v4812_v34, %s8241_s4  ;;  %v4838_v59 = vpack.c.b16 %v4837_v49, %v4837_v49 }
0x2422   :  { %4928 = vrot.lane.b32.xlu0 %v7967_v50, %s8234_s28 }
0x242a   :  { %4949 = vrot.lane.b32.xlu0 %v4838_v59, %s8234_s28 }
0x2432   :  { %5036 = vrot.lane.b32.xlu0 %v4812_v34, %s8243_s21 }
0x248c   :  { %v4814_v13 = vpop.permute.xlu0 %4813 }
0x2493   :  { %v4718_v56 = vpop.f32.mrf.mxu0 }
0x2494   :  { %v4746_v1 = vmul.f32 0.35355338, %v4718_v56  ;;  %v4929_v46 = vpop.permute.xlu0 %4928 }
0x2495   :  { %v4742_v11 = vpop.f32.mrf.mxu1  ;;  %v4934_v36 = vsel %vm224_vm1, %v4929_v46, 0 }
0x2496   :  { %v4748_v55 = vsel %vm3233_vm6, %v4746_v1, -inf  ;;  %v4747_v54 = vmul.f32 0.35355338, %v4742_v11 }
0x2497   :  { %4749 = vmax.xlane.f32.xlu2 %v4748_v55 }
0x2498   :  { %v4751_v40 = vsel %vm3233_vm6, %v4747_v54, -inf }
0x249b   :  { %v4720_v61 = vpop.f32.mrf.mxu0 }
0x249c   :  { %v4950_v23 = vpop.permute.xlu0 %4949 }
0x249d   :  { %v4744_v57 = vpop.f32.mrf.mxu1 }
0x24a4   :  { %v5037_v19 = vpop.permute.xlu0 %5036 }
0x24af   :  { %4815 = vrot.lane.b32.xlu2 %v7967_v50, %s8241_s4 }
0x24b7   :  { %4839 = vrot.lane.b32.xlu2 %v4838_v59, %s8241_s4 }
0x24bf   :  { %4926 = vrot.lane.b32.xlu2 %v4812_v34, %s8234_s28 }
0x24c7   :  { %5061 = vrot.lane.b32.xlu2 %v7971_v0, %s8243_s21 }
0x24f0   :  { %4752 = vmax.xlane.f32.xlu2 %v4751_v40 }
0x250a   :  { %v4750_v28 = vpop.xlane.xlu2 %4749 }
0x250b   :  { %v4754_v25 = vsub.f32 %v4746_v1, %v4750_v28 }
0x250d   :  { %v4756_v20 = vmul.f32 1.442695, %v4754_v25 }
0x250f   :  { %6353 = vpow2.f32 %v4756_v20 }
0x2512   :  { %v4816_v14 = vpop.permute.xlu2 %4815 }
0x2513   :  { %v4821_v16 = vsel %vm224_vm1, %v4816_v14, 0 }
0x2514   :  { %4830 = vmatpush.bf16.xpose.msrb.mxu1 %v4821_v16 }
0x2515   :  { %v6354_v32 = vpop.eup %6353 }
0x2516   :  { %v4760_v58 = vsel %vm3233_vm6, %v6354_v32, 0.0 }
0x2517   :  { %4761 = vadd.xlane.f32.xlu1 %v4760_v58 }
0x251a   :  { %v4840_v18 = vpop.permute.xlu2 %4839 }
0x251b   :  { %5878 = vmatmul.msk.bf16.vlgmr.msrb.gmra.mxu1 %vm224_vm1, %v4814_v13 }
0x251c   :  { %4943 = vmatpush.bf16.xpose.msra.mxu1 %v4934_v36 }
0x2522   :  { %v4927_v17 = vpop.permute.xlu2 %4926 }
0x252a   :  { %v5062_v63 = vpop.permute.xlu2 %5061 }
0x252b   :  { %5882 = vmatmul.msk.bf16.vlgmr.msra.gmra.mxu1 %vm224_vm1, %v4927_v17  ;;  %v5067_v5 = vsel %vm224_vm1, %v5062_v63, 0 }
0x2530   :  { %4951 = vrot.lane.b32.xlu1 %v7971_v0, %s8234_s28 }
0x2538   :  { %5038 = vrot.lane.b32.xlu1 %v7967_v50, %s8243_s21 }
0x2540   :  { %5059 = vrot.lane.b32.xlu1 %v4838_v59, %s8243_s21 }
0x2563   :  { %v4753_v43 = vpop.xlane.xlu2 %4752 }
0x2564   :  { %v4755_v41 = vsub.f32 %v4747_v54, %v4753_v43 }
0x2566   :  { %v4758_v38 = vmul.f32 1.442695, %v4755_v41 }
0x258a   :  { %v4762_v12 = vpop.xlane.xlu1 %4761 }
0x258b   :  { %6355 = vrcp.f32 %v4762_v12 }
0x258c   :  { %6357 = vpow2.f32 %v4758_v38 }
0x2591   :  { %v6356_v48 = vpop.eup %6355 }
0x2592   :  { %v4768_v33 = vmul.f32 %v6356_v48, %v6354_v32  ;;  %v8046_v22 = vpop.eup %6357 }
0x2593   :  { %v4763_v27 = vsel %vm3233_vm6, %v8046_v22, 0.0 }
0x2594   :  { %v4770_v52 = vpack.c.bf16 %v4768_v33, %v4768_v33 }
0x2596   :  { %5876 = vmatmul.msk.bf16.vlgmr.msra.gmra.mxu2 %vm276_vm2, %v4770_v52 }
0x2598   :  { %v4832_v44 = vpop.f32.mrf.mxu1 }
0x2599   :  { %v4862_v31 = vmul.f32 0.35355338, %v4832_v44 }
0x259b   :  { %v4864_v7 = vsel %vm3233_vm6, %v4862_v31, -inf }
0x259c   :  { %4865 = vmax.xlane.f32.xlu0 %v4864_v7 }
0x25a0   :  { %v4834_v42 = vpop.f32.mrf.mxu1 }
0x25a2   :  { %v4952_v9 = vpop.permute.xlu1 %4951 }
0x25a3   :  { %v4957_v37 = vsel %vm224_vm1, %v4952_v9, 0 }
0x25a4   :  { %4764 = vadd.xlane.f32.xlu0 %v4763_v27  ;;  %4966 = vmatpush.bf16.xpose.msra.mxu2 %v4957_v37 }
0x25a6   :  { %5879 = vmatmul.msk.bf16.vlgmr.msrb.gmra.mxu2 %vm224_vm1, %v4840_v18 }
0x25a8   :  { %v4945_v60 = vpop.f32.mrf.mxu1 }
0x25a9   :  { %v4972_v53 = vmul.f32 0.35355338, %v4945_v60 }
0x25aa   :  { %v5039_v24 = vpop.permute.xlu1 %5038 }
0x25ab   :  { %v5044_v6 = vsel %vm224_vm1, %v5039_v24, 0  ;;  %v4974_v39 = vsel %vm3233_vm6, %v4972_v53, -inf }
0x25ac   :  { %5076 = vmatpush.bf16.xpose.msrb.mxu2 %v5067_v5  ;;  %4975 = vmax.xlane.f32.xlu2 %v4974_v39 }
0x25ad   :  { %5053 = vmatpush.bf16.xpose.msrb.mxu1 %v5044_v6 }
0x25b0   :  { %v4947_v3 = vpop.f32.mrf.mxu1 }
0x25b2   :  { %v5060_v29 = vpop.permute.xlu1 %5059 }
0x25b4   :  { %5886 = vmatmul.msk.bf16.vlgmr.msrb.gmra.mxu1 %vm224_vm1, %v5037_v19 }
0x25b6   :  { %5883 = vmatmul.msk.bf16.vlgmr.msra.gmra.mxu2 %vm224_vm1, %v4950_v23 }
0x25c6   :  { %5887 = vmatmul.msk.bf16.vlgmr.msrb.gmra.mxu2 %vm224_vm1, %v5060_v29 }
0x260f   :  { %v4866_v10 = vpop.xlane.xlu0 %4865 }
0x2610   :  { %v4870_v21 = vsub.f32 %v4862_v31, %v4866_v10 }
0x2612   :  { %v4872_v45 = vmul.f32 1.442695, %v4870_v21 }
0x2614   :  { %6359 = vpow2.f32 %v4872_v45 }
0x2617   :  { %v4765_v33 = vpop.xlane.xlu0 %4764 }
0x2619   :  { %v8058_v8 = vpop.f32.mrf.mxu2 }
0x261a   :  { %v6360_v62 = vpop.eup %6359 }
0x261b   :  { %v4876_v51 = vsel %vm3233_vm6, %v6360_v62, 0.0 }
0x261c   :  { %4877 = vadd.xlane.f32.xlu2 %v4876_v51 }
0x261f   :  { %v4976_v14 = vpop.xlane.xlu2 %4975 }
0x2620   :  { %v4980_v16 = vsub.f32 %v4972_v53, %v4976_v14 }
0x2621   :  { %v4789_v34 = vpop.f32.mrf.mxu2 }
0x2622   :  { %v4982_v36 = vmul.f32 1.442695, %v4980_v16 }
0x2624   :  { %6361 = vpow2.f32 %v4982_v36 }
0x2629   :  { %v4858_v15 = vpop.f32.mrf.mxu2 }
0x262a   :  { %v4863_v11 = vmul.f32 0.35355338, %v4858_v15  ;;  %v6362_v32 = vpop.eup %6361 }
0x262b   :  { %v4986_v58 = vsel %vm3233_vm6, %v6362_v32, 0.0 }
0x262c   :  { %v4867_v54 = vsel %vm3233_vm6, %v4863_v11, -inf }
0x2631   :  { %v5055_v49 = vpop.f32.mrf.mxu1  ;;  %v4860_v56 = vpop.f32.mrf.mxu2 }
0x2632   :  { %v5082_v59 = vmul.f32 0.35355338, %v5055_v49 }
0x2634   :  { %v5084_v1 = vsel %vm3233_vm6, %v5082_v59, -inf  ;;  %4888 = vrot.lane.b32.xlu2 %v7967_v50, %s8246_s6 }
0x2635   :  { %5085 = vmax.xlane.f32.xlu1 %v5084_v1 }
0x2639   :  { %v5057_v55 = vpop.f32.mrf.mxu1  ;;  %v4968_v61 = vpop.f32.mrf.mxu2 }
0x263a   :  { %v4973_v57 = vmul.f32 0.35355338, %v4968_v61 }
0x263c   :  { %4998 = vrot.lane.b32.xlu2 %v7967_v50, %s8247_s1  ;;  %v4977_v40 = vsel %vm3233_vm6, %v4973_v57, -inf }
0x263d   :  { %4868 = vmax.xlane.f32.xlu1 %v4867_v54  ;;  %4978 = vmax.xlane.f32.xlu0 %v4977_v40 }
0x2641   :  { %v4970_v13 = vpop.f32.mrf.mxu2 }
0x2649   :  { %v5078_v28 = vpop.f32.mrf.mxu2 }
0x264a   :  { %v5083_v20 = vmul.f32 0.35355338, %v5078_v28 }
0x264c   :  { %v5087_v46 = vsel %vm3233_vm6, %v5083_v20, -inf }
0x2651   :  { %4907 = vrot.lane.b32.xlu0 %v7971_v0, %s8246_s6  ;;  %v5080_v25 = vpop.f32.mrf.mxu2 }
0x2656   :  { %4791 = vrot.lane.b32.xlu1 %v7971_v0, %s8245_s2 }
0x2665   :  { %5088 = vmax.xlane.f32.xlu2 %v5087_v46 }
0x267d   :  { %5017 = vrot.lane.b32.xlu2 %v7971_v0, %s8247_s1 }
0x2680   :  { %4987 = vadd.xlane.f32.xlu1 %v4986_v58 }
0x268f   :  { %v4878_v18 = vpop.xlane.xlu2 %4877 }
0x2690   :  { %6363 = vrcp.f32 %v4878_v18 }
0x2696   :  { %v6364_v17 = vpop.eup %6363 }
0x2697   :  { %v4884_v63 = vmul.f32 %v6364_v17, %v6360_v62  ;;  %v4889_v12 = vpop.permute.xlu2 %4888 }
0x2698   :  { %4901 = vmatpush.bf16.msrb.mxu3 %v4889_v12 }
0x2699   :  { %v4886_v43 = vpack.c.bf16 %v4884_v63, %v4884_v63 }
0x269b   :  { %5880 = vmatmul.msk.bf16.vlgmr.msrb.gmra.mxu3 %vm276_vm2, %v4886_v43 }
0x269f   :  { %v4999_v48 = vpop.permute.xlu2 %4998 }
0x26a0   :  { %5011 = vmatpush.bf16.msra.mxu3 %v4999_v48 }
0x26a8   :  { %v5086_v41 = vpop.xlane.xlu1 %5085 }
0x26a9   :  { %v5090_v52 = vsub.f32 %v5082_v59, %v5086_v41 }
0x26ab   :  { %v5092_v38 = vmul.f32 1.442695, %v5090_v52 }
0x26ad   :  { %6365 = vpow2.f32 %v5092_v38 }
0x26b0   :  { %v4869_v44 = vpop.xlane.xlu1 %4868  ;;  %v4979_v7 = vpop.xlane.xlu0 %4978 }
0x26b1   :  { %v4871_v31 = vsub.f32 %v4863_v11, %v4869_v44  ;;  %v4981_v37 = vsub.f32 %v4973_v57, %v4979_v7 }
0x26b3   :  { %v6366_v42 = vpop.eup %6365  ;;  %v4874_v9 = vmul.f32 1.442695, %v4871_v31  ;;  %v4984_v5 = vmul.f32 1.442695, %v4981_v37 }
0x26b4   :  { %v5096_v27 = vsel %vm3233_vm6, %v6366_v42, 0.0 }
0x26b5   :  { %6367 = vpow2.f32 %v4874_v9  ;;  %5097 = vadd.xlane.f32.xlu2 %v5096_v27 }
0x26b6   :  { %6369 = vpow2.f32 %v4984_v5 }
0x26b7   :  { %6371 = vrcp.f32 %v4765_v33 }
0x26bb   :  { %v6368_v23 = vpop.eup %6367 }
0x26bc   :  { %v4879_v60 = vsel %vm3233_vm6, %v6368_v23, 0.0  ;;  %v6370_v53 = vpop.eup %6369 }
0x26bd   :  { %4880 = vadd.xlane.f32.xlu0 %v4879_v60  ;;  %v6372_v24 = vpop.eup %6371  ;;  %v4989_v6 = vsel %vm3233_vm6, %v6370_v53, 0.0  ;;  %v5993_v60 = vld [vmem:[%s8194_s12 + $0x10] sm:$0xff] }
0x26be   :  { %v4769_v39 = vmul.f32 %v6372_v24, %v8046_v22 }
0x26c0   :  { %v4771_v29 = vpack.c.bf16 %v4769_v39, %v4769_v39 }
0x26c3   :  { %v4908_v19 = vpop.permute.xlu0 %4907 }
0x26c5   :  { %4990 = vadd.xlane.f32.xlu0 %v4989_v6 }
0x26c8   :  { %v4792_v3 = vpop.permute.xlu1 %4791 }
0x26c9   :  { %4804 = vmatpush.bf16.msra.mxu0 %v4792_v3 }
0x26cc   :  { %5877 = vmatmul.msk.bf16.vlgmr.msra.gmra.mxu0 %vm276_vm2, %v4771_v29 }
0x26cd   :  { %4920 = vmatpush.bf16.msrb.mxu0 %v4908_v19 }
0x26d8   :  { %v5089_v10 = vpop.xlane.xlu2 %5088 }
0x26d9   :  { %5108 = vrot.lane.b32.xlu0 %v7967_v50, %s8242_s18  ;;  %v5091_v21 = vsub.f32 %v5083_v20, %v5089_v10  ;;  %v8115_v10 = vld [vmem:[%s8190_s15 + $0x10] sm:$0xff] }
0x26db   :  { %v5094_v45 = vmul.f32 1.442695, %v5091_v21  ;;  %v5184_v21 = vperm.slane %v8115_v10, 4 }
0x26dd   :  { %6373 = vpow2.f32 %v5094_v45 }
0x26e0   :  { %v5018_v62 = vpop.permute.xlu2 %5017 }
0x26e1   :  { %5030 = vmatpush.bf16.msra.mxu0 %v5018_v62 }
0x26e3   :  { %v6374_v51 = vpop.eup %6373 }
0x26e4   :  { %v5099_v34 = vsel %vm3233_vm6, %v6374_v51, 0.0 }
0x26e5   :  { %5100 = vadd.xlane.f32.xlu1 %v5099_v34 }
0x26f3   :  { %v4988_v22 = vpop.xlane.xlu1 %4987 }
0x26f4   :  { %6375 = vrcp.f32 %v4988_v22 }
0x26fa   :  { %v6376_v15 = vpop.eup %6375 }
0x26fb   :  { %v4994_v49 = vmul.f32 %v6376_v15, %v6362_v32 }
0x26fd   :  { %v4996_v59 = vpack.c.bf16 %v4994_v49, %v4994_v49 }
0x26fe   :  { %5127 = vrot.lane.b32.xlu1 %v7971_v0, %s8242_s18 }
0x26ff   :  { %5884 = vmatmul.msk.bf16.vlgmr.msra.gmra.mxu3 %vm276_vm2, %v4996_v59 }
0x271e   :  { %v4903_v50 = vpop.f32.mrf.mxu3 }
0x271f   :  { %5148 = vrot.lane.b32.xlu2 %v4903_v50, %s8238_s20 }
0x2726   :  { %v4905_v56 = vpop.f32.mrf.mxu3 }
0x2728   :  { %v5098_v54 = vpop.xlane.xlu2 %5097 }
0x2730   :  { %v4881_v1 = vpop.xlane.xlu0 %4880 }
0x2731   :  { %6377 = vrcp.f32 %v4881_v1 }
0x2737   :  { %v6378_v11 = vpop.eup %6377 }
0x2738   :  { %v4885_v55 = vmul.f32 %v6378_v11, %v6368_v23  ;;  %v4991_v57 = vpop.xlane.xlu0 %4990  ;;  %v5994_v23 = vld [vmem:[%s8194_s12 + $0x18] sm:$0xff] }
0x2739   :  { %6379 = vrcp.f32 %v4991_v57  ;;  %5206 = vmatpush.bf16.msra.mxu1 %v5994_v23  ;;  %v5313_v23 = vperm.slane %v8115_v10, 5 }
0x273a   :  { %v4887_v61 = vpack.c.bf16 %v4885_v55, %v4885_v55  ;;  %6381 = vrcp.f32 %v5098_v54 }
0x273c   :  { %5881 = vmatmul.msk.bf16.vlgmr.msrb.gmra.mxu0 %vm276_vm2, %v4887_v61 }
0x273d   :  { %5207 = vmatpush.bf16.msra.mxu1 %v5993_v60 }
0x273f   :  { %v6380_v40 = vpop.eup %6379 }
0x2740   :  { %v6382_v13 = vpop.eup %6381  ;;  %v4995_v0 = vmul.f32 %v6380_v40, %v6370_v53 }
0x2741   :  { %v5104_v28 = vmul.f32 %v6382_v13, %v6366_v42  ;;  %v5996_v13 = vld [vmem:[%s8195_s13 + $0x18] sm:$0xff] }
0x2742   :  { %v4997_v20 = vpack.c.bf16 %v4995_v0, %v4995_v0  ;;  %5335 = vmatpush.bf16.msra.mxu2 %v5996_v13  ;;  %v5464_v13 = vld [vmem:[%s8197_s16 + $0x8] sm:$0xff] }
0x2743   :  { %v5106_v14 = vpack.c.bf16 %v5104_v28, %v5104_v28  ;;  %v5995_v28 = vld [vmem:[%s8195_s13 + $0x10] sm:$0xff] }
0x2746   :  { %5336 = vmatpush.bf16.msra.mxu2 %v5995_v28 }
0x2749   :  { %v4806_v25 = vpop.f32.mrf.mxu0 }
0x274b   :  { %v5109_v46 = vpop.permute.xlu0 %5108 }
0x274c   :  { %5885 = vmatmul.msk.bf16.vlgmr.msra.gmra.mxu0 %vm276_vm2, %v4997_v20  ;;  %5121 = vmatpush.bf16.msrb.mxu3 %v5109_v46  ;;  %v6000_v20 = vld [vmem:[%s8196_s14 + $0x38] sm:$0xff] }
0x274f   :  { %5888 = vmatmul.msk.bf16.vlgmr.msrb.gmra.mxu3 %vm276_vm2, %v5106_v14 }
0x2750   :  { %5376 = vmatpush.bf16.msra.mxu3 %v6000_v20 }
0x2751   :  { %v4808_v16 = vpop.f32.mrf.mxu0 }
0x2752   :  { %v5999_v16 = vld [vmem:[%s8196_s14 + $0x30] sm:$0xff] }
0x2754   :  { %5377 = vmatpush.bf16.msra.mxu3 %v5999_v16 }
0x2758   :  { %v5101_v36 = vpop.xlane.xlu1 %5100 }
0x2759   :  { %6383 = vrcp.f32 %v5101_v36 }
0x275f   :  { %v6384_v32 = vpop.eup %6383 }
0x2760   :  { %v5105_v58 = vmul.f32 %v6384_v32, %v6374_v51 }
0x2762   :  { %v5107_v17 = vpack.c.bf16 %v5105_v58, %v5105_v58 }
0x2770   :  { %v5128_v18 = vpop.permute.xlu1 %5127 }
0x2771   :  { %5140 = vmatpush.bf16.msrb.mxu0 %v5128_v18  ;;  %v5279_v18 = vperm.slane %v8004_v2, 1 }
0x2774   :  { %5889 = vmatmul.msk.bf16.vlgmr.msrb.gmra.mxu0 %vm276_vm2, %v5107_v17 }
0x2779   :  { %v5149_v42 = vpop.permute.xlu2 %5148 }
0x277a   :  { %v5170_v9 = vsel %vm224_vm1, %v8058_v8, %v5149_v42 }
0x2782   :  { %v5013_v63 = vpop.f32.mrf.mxu3 }
0x2783   :  { %5156 = vrot.lane.b32.xlu1 %v5013_v63, %s8239_s24  ;;  %v5285_v63 = vperm.slane %v8004_v2, 2 }
0x278a   :  { %v5015_v12 = vpop.f32.mrf.mxu3 }
0x27b9   :  { %v4922_v43 = vpop.f32.mrf.mxu0 }
0x27ba   :  { %5150 = vrot.lane.b32.xlu0 %v4922_v43, %s8238_s20  ;;  %v5281_v43 = vrot.slane %v5279_v18, 4 }
0x27c1   :  { %v4924_v48 = vpop.f32.mrf.mxu0 }
0x27c9   :  { %v5032_v41 = vpop.f32.mrf.mxu0 }
0x27ca   :  { %5158 = vrot.lane.b32.xlu0 %v5032_v41, %s8239_s24 }
0x27d1   :  { %v5034_v33 = vpop.f32.mrf.mxu0 }
0x27d2   :  { %v5123_v52 = vpop.f32.mrf.mxu3  ;;  %v5287_v33 = vrot.slane %v5285_v63, 4 }
0x27d3   :  { %5164 = vrot.lane.b32.xlu1 %v5123_v52, %s8240_s26 }
0x27da   :  { %v5125_v38 = vpop.f32.mrf.mxu3 }
0x27f1   :  { %v5142_v44 = vpop.f32.mrf.mxu0 }
0x27f2   :  { %5166 = vrot.lane.b32.xlu0 %v5142_v44, %s8240_s26 }
0x27f5   :  { %v5157_v7 = vpop.permute.xlu1 %5156 }
0x27f6   :  { %v5172_v37 = vsel %vm276_vm2, %v5170_v9, %v5157_v7 }
0x27f9   :  { %v5144_v31 = vpop.f32.mrf.mxu0 }
0x282c   :  { %v5151_v53 = vpop.permute.xlu0 %5150 }
0x282d   :  { %v5171_v8 = vsel %vm224_vm1, %v4806_v25, %v5151_v53 }
0x283c   :  { %v5159_v24 = vpop.permute.xlu0 %5158 }
0x283d   :  { %v5173_v6 = vsel %vm276_vm2, %v5171_v8, %v5159_v24 }
0x2845   :  { %v5165_v27 = vpop.permute.xlu1 %5164 }
0x2846   :  { %v5174_v5 = vsel %vm881_vm3, %v5172_v37, %v5165_v27  ;;  %v5998_v27 = vld [vmem:[%s8196_s14 + $0x28] sm:$0xff] }
0x2847   :  { %5178 = vst [vmem:[#allocation1] ss:$2 sm:$0xff] %v5174_v5  ;;  %5378 = vmatpush.bf16.msra.mxu3 %v5998_v27  ;;  %v5997_v5 = vld [vmem:[%s8196_s14 + $0x20] sm:$0xff] }
0x284b   :  { %5379 = vmatpush.bf16.msra.mxu3 %v5997_v5 }
0x2864   :  { %v5167_v39 = vpop.permute.xlu0 %5166 }
0x2865   :  { %v5175_v3 = vsel %vm881_vm3, %v5173_v6, %v5167_v39  ;;  %v5344_v39 = vperm.slane %v8115_v10, 6 }
0x2866   :  { %5180 = vst [vmem:[#allocation1 + $0x1] ss:$2 sm:$0xff] %v5175_v3 }
0x286d   :  { %v5181_v19 = vld.sshfl [vmem:[#allocation1] sm:$0xff pattern:$0x75316420] }
0x286e   :  { %v5183_v29 = vpack.c.bf16 %v5181_v19, %v5181_v19 }
0x2870   :  { %5898 = vmatmul.msk.bf16.vlgmr.msra.gmra.mxu1 %vm187_vm0, %v5183_v29 }
0x28ed   :  { %v5209_v45 = vpop.f32.mrf.mxu1 }
0x28ee   :  { %v5210_v62 = vadd.f32 %v5209_v45, %v5184_v21 }
0x28f0   :  { %v5214_v51 = vrot.slane %v5210_v62, 4  ;;  %v5216_v34 = vadd.f32 %v5210_v62, %v8010_v4 }
0x28f2   :  { %v5217_v22 = vadd.f32 %v5214_v51, %v8012_v47  ;;  %5220 = vst [vmem:[#allocation1] ss:$2 sm:$0xff] %v5216_v34 }
0x28f4   :  { %5222 = vst [vmem:[#allocation1 + $0x1] ss:$2 sm:$0xff] %v5217_v22 }
0x28f5   :  { %v5211_v15 = vpop.f32.mrf.mxu1 }
0x28fb   :  { %v5223_v49 = vld.sshfl [vmem:[#allocation1] sm:$0xff pattern:$0x75316420] }
0x28fc   :  { %v5225_v59 = vsel %vm187_vm0, %v5223_v49, 0.0 }
0x28fd   :  { %5226 = vadd.xlane.f32.xlu2 %v5225_v59 }
0x2970   :  { %v5227_v50 = vpop.xlane.xlu2 %5226 }
0x2971   :  { %v5228_v56 = vmul.f32 %v5227_v50, %v6787_v35 }
0x2973   :  { %v5233_v1 = vperm.slane %v5228_v56, %v7489_v26  ;;  %v5237_v11 = vperm.slane %v5228_v56, %v7491_v30 }
0x2975   :  { %v5240_v55 = vsub.f32 %v5216_v34, %v5233_v1  ;;  %v5241_v61 = vsub.f32 %v5217_v22, %v5237_v11 }
0x2977   :  { %v5242_v57 = vmul.f32 %v5240_v55, %v5240_v55  ;;  %v5243_v4 = vmul.f32 %v5241_v61, %v5241_v61 }
0x2979   :  { %5246 = vst [vmem:[#allocation1] ss:$2 sm:$0xff] %v5242_v57  ;;  %v5465_v57 = vld [vmem:[%s8197_s16 + $0x10] sm:$0xff] }
0x297a   :  { %5248 = vst [vmem:[#allocation1 + $0x1] ss:$2 sm:$0xff] %v5243_v4  ;;  %v5466_v4 = vld [vmem:[%s8197_s16 + $0x18] sm:$0xff] }
0x2981   :  { %v5249_v47 = vld.sshfl [vmem:[#allocation1] sm:$0xff pattern:$0x75316420] }
0x2982   :  { %v5251_v54 = vsel %vm187_vm0, %v5249_v47, 0.0  ;;  %v5463_v47 = vld [vmem:[%s8197_s16] sm:$0xff] }
0x2983   :  { %5252 = vadd.xlane.f32.xlu1 %v5251_v54  ;;  %v5476_v28 = vpack.c.bf16 %v5464_v13, %v5463_v47 }
0x29f6   :  { %v5253_v40 = vpop.xlane.xlu1 %5252 }
0x29f7   :  { %v5254_v0 = vmul.f32 %v5253_v40, %v6787_v35  ;;  %v5477_v40 = vpack.c.bf16 %v5466_v4, %v5465_v57 }
0x29f9   :  { %v5255_v25 = vadd.f32 1e-05, %v5254_v0  ;;  %5488 = vmatpush.bf16.msra.mxu0 %v5477_v40 }
0x29fb   :  { %6385 = vrsqrt.f32 %v5255_v25  ;;  %vm5262_vm2 = vweird.f32 %v5255_v25 }
0x29fd   :  { %5489 = vmatpush.bf16.msra.mxu0 %v5476_v28 }
0x2a01   :  { %v6386_v46 = vpop.eup %6385 }
0x2a02   :  { %v5257_v14 = vmul.f32 %v6386_v46, %v5255_v25  ;;  %vm5263_vm1 = vweird.f32 %v6386_v46 }
0x2a03   :  { %vm5264_vm3 = vmor %vm5262_vm2, %vm5263_vm1 }
0x2a04   :  { %v5258_v36 = vmul.f32 %v6386_v46, %v5257_v14 }
0x2a06   :  { %v5259_v32 = vmul.f32 0.5, %v5258_v36  ;;  %v5451_v36 = vperm.slane %v8004_v2, 3 }
0x2a08   :  { %v5260_v58 = vsub.f32 1.5, %v5259_v32 }
0x2a0a   :  { %v5261_v17 = vmul.f32 %v6386_v46, %v5260_v58 }
0x2a0c   :  { %v5265_v12 = vsel %vm5264_vm3, %v6386_v46, %v5261_v17 }
0x2a0d   :  { %v5270_v48 = vperm.slane %v5265_v12, %v7489_v26  ;;  %v5274_v41 = vperm.slane %v5265_v12, %v7491_v30 }
0x2a0f   :  { %v5277_v52 = vmul.f32 %v5270_v48, %v5240_v55  ;;  %v5278_v38 = vmul.f32 %v5274_v41, %v5241_v61 }
0x2a11   :  { %v5283_v44 = vmul.f32 %v5279_v18, %v5277_v52  ;;  %v5284_v31 = vmul.f32 %v5281_v43, %v5278_v38  ;;  %v5453_v18 = vrot.slane %v5451_v36, 4 }
0x2a13   :  { %v5289_v7 = vadd.f32 %v5285_v63, %v5283_v44  ;;  %v5290_v42 = vadd.f32 %v5287_v33, %v5284_v31 }
0x2a15   :  { %5307 = vst [vmem:[#allocation1] ss:$2 sm:$0xff] %v5289_v7 }
0x2a16   :  { %5309 = vst [vmem:[#allocation1 + $0x1] ss:$2 sm:$0xff] %v5290_v42 }
0x2a1d   :  { %v5310_v9 = vld.sshfl [vmem:[#allocation1] sm:$0xff pattern:$0x75316420] }
0x2a1e   :  { %v5312_v37 = vpack.c.bf16 %v5310_v9, %v5310_v9 }
0x2a20   :  { %5919 = vmatmul.msk.bf16.vlgmr.msra.gmra.mxu2 %vm187_vm0, %v5312_v37 }
0x2aa3   :  { %v5338_v60 = vpop.f32.mrf.mxu2 }
0x2aa4   :  { %v5339_v53 = vadd.f32 %v5338_v60, %v5313_v23 }
0x2aa6   :  { %v5342_v24 = vmax.f32 %v5339_v53, 0.0 }
0x2aa8   :  { %v5343_v8 = vpack.c.bf16 %v5342_v24, %v5342_v24 }
0x2aaa   :  { %5936 = vmatmul.msk.bf16.vlgmr.msra.gmra.mxu3 %vm1118_vm5, %v5343_v8 }
0x2aab   :  { %v5340_v6 = vpop.f32.mrf.mxu2 }
0x2b2d   :  { %v5381_v3 = vpop.f32.mrf.mxu3 }
0x2b2e   :  { %v5382_v19 = vadd.f32 %v5381_v3, %v5344_v39 }
0x2b30   :  { %v5386_v29 = vrot.slane %v5382_v19, 4  ;;  %v5388_v21 = vadd.f32 %v5382_v19, %v5289_v7 }
0x2b32   :  { %v5389_v45 = vadd.f32 %v5386_v29, %v5290_v42  ;;  %5392 = vst [vmem:[#allocation1] ss:$2 sm:$0xff] %v5388_v21 }
0x2b34   :  { %5394 = vst [vmem:[#allocation1 + $0x1] ss:$2 sm:$0xff] %v5389_v45 }
0x2b35   :  { %v5383_v62 = vpop.f32.mrf.mxu3 }
0x2b3b   :  { %v5395_v51 = vld.sshfl [vmem:[#allocation1] sm:$0xff pattern:$0x75316420] }
0x2b3c   :  { %v5397_v34 = vsel %vm187_vm0, %v5395_v51, 0.0 }
0x2b3d   :  { %5398 = vadd.xlane.f32.xlu0 %v5397_v34 }
0x2bb0   :  { %v5399_v22 = vpop.xlane.xlu0 %5398 }
0x2bb1   :  { %v5400_v15 = vmul.f32 %v5399_v22, %v6787_v35 }
0x2bb3   :  { %v5405_v49 = vperm.slane %v5400_v15, %v7489_v26  ;;  %v5409_v59 = vperm.slane %v5400_v15, %v7491_v30 }
0x2bb5   :  { %v5412_v10 = vsub.f32 %v5388_v21, %v5405_v49  ;;  %v5413_v50 = vsub.f32 %v5389_v45, %v5409_v59 }
0x2bb7   :  { %v5414_v56 = vmul.f32 %v5412_v10, %v5412_v10  ;;  %v5415_v1 = vmul.f32 %v5413_v50, %v5413_v50 }
0x2bb9   :  { %5418 = vst [vmem:[#allocation1] ss:$2 sm:$0xff] %v5414_v56 }
0x2bba   :  { %5420 = vst [vmem:[#allocation1 + $0x1] ss:$2 sm:$0xff] %v5415_v1 }
0x2bc1   :  { %v5421_v11 = vld.sshfl [vmem:[#allocation1] sm:$0xff pattern:$0x75316420] }
0x2bc2   :  { %v5423_v55 = vsel %vm187_vm0, %v5421_v11, 0.0 }
0x2bc3   :  { %5424 = vadd.xlane.f32.xlu2 %v5423_v55 }
0x2c36   :  { %v5425_v61 = vpop.xlane.xlu2 %5424 }
0x2c37   :  { %v5426_v54 = vmul.f32 %v5425_v61, %v6787_v35  ;;  %v5457_v35 = vperm.slane %v8004_v2, 4  ;;  %v6078_v2 = vld [vmem:[%s8197_s16 + $0x20] ss:$0 sm:$0xff] }
0x2c39   :  { %v5427_v0 = vadd.f32 1e-05, %v5426_v54  ;;  %v5459_v12 = vrot.slane %v5457_v35, 4 }
0x2c3b   :  { %6387 = vrsqrt.f32 %v5427_v0  ;;  %vm5434_vm6 = vweird.f32 %v5427_v0 }
0x2c41   :  { %v6388_v25 = vpop.eup %6387 }
0x2c42   :  { %v5429_v20 = vmul.f32 %v6388_v25, %v5427_v0  ;;  %vm5435_vm5 = vweird.f32 %v6388_v25 }
0x2c43   :  { %vm5436_vm15 = vmor %vm5434_vm6, %vm5435_vm5 }
0x2c44   :  { %v5430_v46 = vmul.f32 %v6388_v25, %v5429_v20 }
0x2c46   :  { %v5431_v14 = vmul.f32 0.5, %v5430_v46 }
0x2c48   :  { %v5432_v16 = vsub.f32 1.5, %v5431_v14 }
0x2c4a   :  { %v5433_v32 = vmul.f32 %v6388_v25, %v5432_v16 }
0x2c4c   :  { %v5437_v58 = vsel %vm5436_vm15, %v6388_v25, %v5433_v32 }
0x2c4d   :  { %v5442_v17 = vperm.slane %v5437_v58, %v7489_v26  ;;  %v5446_v63 = vperm.slane %v5437_v58, %v7491_v30 }
0x2c4f   :  { %v5449_v43 = vmul.f32 %v5442_v17, %v5412_v10  ;;  %v5450_v48 = vmul.f32 %v5446_v63, %v5413_v50 }
0x2c51   :  { %v5455_v41 = vmul.f32 %v5451_v36, %v5449_v43  ;;  %v5456_v33 = vmul.f32 %v5453_v18, %v5450_v48 }
0x2c53   :  { %v5461_v52 = vadd.f32 %v5457_v35, %v5455_v41  ;;  %v5462_v38 = vadd.f32 %v5459_v12, %v5456_v33 }
0x2c55   :  { %5470 = vst [vmem:[#allocation1] ss:$2 sm:$0xff] %v5461_v52 }
0x2c56   :  { %5472 = vst [vmem:[#allocation1 + $0x1] ss:$2 sm:$0xff] %v5462_v38 }
0x2c5d   :  { %v5473_v44 = vld.sshfl [vmem:[#allocation1] sm:$0xff pattern:$0x75316420] }
0x2c5e   :  { %v5475_v31 = vpack.c.bf16 %v5473_v44, %v5473_v44 }
0x2c60   :  { %5937 = vmatmul.msk.bf16.vlgmr.msra.gmra.mxu0 %vm187_vm0, %v5475_v31 }
0x2cdd   :  { %v5491_v26 = vpop.f32.mrf.mxu0 }
0x2cde   :  { %v5492_v7 = vadd.f32 %v6078_v2, %v5491_v26 }
0x2ce0   :  { %5938 = vst.sshfl [vmem:[%s8248_s10] sm:$0xff pattern:$0x75316420] %v5492_v7 }
0x2ce5   :  { %v5493_v30 = vpop.f32.mrf.mxu0 }

</bundles_post_ra>
